<compile_context>
chip_gen: v5e
topology: v5e:2x2
jax: 0.10.0
libtpu: 0.0.40
codegen_flags: <defaults>
</compile_context>

<pallas_src>
import functools

import jax
import jax.numpy as jnp
from jax.experimental import pallas as pl
from jax.experimental.pallas import tpu as pltpu

BN_EPS = 1e-5
K = 5     # conv kernel size
S = 2     # conv stride


def _out_size(size):
    return (size - (K - 1) - 1) // S + 1


# ----------------------------- Pallas kernel -------------------------------

def _fused_dueling_cnn_kernel(*refs, dims, dueling_type):
    (x_ref,
     g1_ref, p1_ref, gm1_ref, bt1_ref, r1_ref, rt1_ref,
     g2_ref, p2_ref, gm2_ref, bt2_ref, r2_ref, rt2_ref,
     g3_ref, p3_ref, gm3_ref, bt3_ref, r3_ref, rt3_ref,
     wfc_ref, bfc_ref, sh_ref,
     q_ref,
     act1_ref, act2_ref, act3_ref) = refs

    n_batch = dims['N']

    def conv_bn_relu(in_ref, g_ref, p_ref, gm_ref, bt_ref, r_ref, rt_ref,
                     out_ref, rows_out, cols_out, cnt):
        """One stride-2 5x5 conv + training-mode BatchNorm + ReLU, in VMEM."""
        x = in_ref[...]                                   # (N*H, W*Cin) bf16
        acc = jnp.zeros((rows_out, cols_out), jnp.float32)
        for kh in range(K):
            # Row selection (input rows h = kh + 2*oh, block-diag over batch)
            # expressed as a 0/1 matmul: only contiguous loads + 2-D dots.
            sel = jnp.dot(p_ref[kh], x,
                          preferred_element_type=jnp.float32)
            sel = sel.astype(jnp.bfloat16)                # exact (0/1 select)
            # Banded weight matmul: kw taps + width stride folded into G_kh.
            acc = acc + jnp.dot(sel, g_ref[kh],
                                preferred_element_type=jnp.float32)

        # BatchNorm2d (training mode): per-channel batch stats over N*OH*OW,
        # biased variance (as PyTorch uses for normalisation).  One pass
        # (sum / sum-of-squares), pooled over the OW column groups with the
        # 0/1 matrix R.  Conv bias omitted (cancelled by mean subtraction).
        colsum = jnp.sum(acc, axis=0, keepdims=True)              # (1, OW*C)
        colsq = jnp.sum(acc * acc, axis=0, keepdims=True)
        ch_sum = jnp.dot(colsum, r_ref[...],
                         preferred_element_type=jnp.float32)      # (1, Cout)
        ch_sq = jnp.dot(colsq, r_ref[...],
                        preferred_element_type=jnp.float32)
        mean = ch_sum / cnt
        var = ch_sq / cnt - mean * mean
        inv = jax.lax.rsqrt(var + BN_EPS)
        scale_c = gm_ref[...] * inv                                # gamma/std
        shift_c = bt_ref[...] - mean * scale_c
        # broadcast per-channel scale/shift back to the (ow, cout) columns
        scale_row = jnp.dot(scale_c, rt_ref[...],
                            preferred_element_type=jnp.float32)
        shift_row = jnp.dot(shift_c, rt_ref[...],
                            preferred_element_type=jnp.float32)
        y = jnp.maximum(acc * scale_row + shift_row, 0.0)
        out_ref[...] = y.astype(out_ref.dtype)

    conv_bn_relu(x_ref, g1_ref, p1_ref, gm1_ref, bt1_ref, r1_ref, rt1_ref,
                 act1_ref, n_batch * dims['H1'], dims['W1'] * dims['C1'],
                 float(n_batch * dims['H1'] * dims['W1']))
    conv_bn_relu(act1_ref, g2_ref, p2_ref, gm2_ref, bt2_ref, r2_ref, rt2_ref,
                 act2_ref, n_batch * dims['H2'], dims['W2'] * dims['C2'],
                 float(n_batch * dims['H2'] * dims['W2']))
    conv_bn_relu(act2_ref, g3_ref, p3_ref, gm3_ref, bt3_ref, r3_ref, rt3_ref,
                 act3_ref, n_batch * dims['H3'], dims['W3'] * dims['C3'],
                 float(n_batch * dims['H3'] * dims['W3']))

    # Dueling head: single concatenated (value | advantage) weight, rows
    # pre-permuted to the PyTorch NCHW flatten order and split over the OH3
    # feature-map row groups, so no activation reshuffle is needed.
    feats = act3_ref[...]                                 # (N*OH3, OW3*C3)
    n_act = dims['A']
    qpre = jnp.zeros((n_batch, 1 + n_act), jnp.float32) + bfc_ref[...]
    for oh in range(dims['H3']):
        rows = jnp.dot(sh_ref[oh], feats,
                       preferred_element_type=jnp.float32).astype(jnp.bfloat16)
        qpre = qpre + jnp.dot(rows, wfc_ref[oh],
                              preferred_element_type=jnp.float32)
    v = qpre[:, 0:1]
    a = qpre[:, 1:1 + n_act]
    if dueling_type == 'max':
        red = jnp.max(a)      # global max over batch AND actions (torch a.max())
    else:
        red = jnp.mean(a)     # global mean (torch a.mean())
    q_ref[...] = v + a - red


# ---------------------- trace-time weight repacking -------------------------

def _conv_banded_weights(wt, w_in):
    """wt: (Cout, Cin, 5, 5) PyTorch conv weight.  Returns G of shape
    (5, W_in*Cin, OW*Cout) with G[kh, (w,ci), (ow,co)] = wt[co, ci, kh, w-2*ow]
    inside the 5-tap band (0 outside): kw taps + width stride folded into a
    banded matmul operand."""
    cout, cin, kh_, kw_ = wt.shape
    ow = (w_in - kw_) // S + 1
    sel = (jnp.arange(w_in)[None, :, None] ==
           (S * jnp.arange(ow)[None, None, :]
            + jnp.arange(kw_)[:, None, None])).astype(jnp.float32)  # (KW,W,OW)
    g = jnp.einsum('kwo,dchk->hwcod', sel, wt.astype(jnp.float32))
    return g.reshape(kh_, w_in * cin, ow * cout).astype(jnp.bfloat16)


def _row_select(h_in, n):
    """(5, N*OH, N*H) 0/1 matrices: P[kh] picks input rows h = kh + 2*oh,
    block-diagonal over the batch."""
    oh = (h_in - K) // S + 1
    p = (jnp.arange(h_in)[None, None, :] ==
         (jnp.arange(K)[:, None, None]
          + S * jnp.arange(oh)[None, :, None])).astype(jnp.float32)  # (5,OH,H)
    eye = jnp.eye(n, dtype=jnp.float32)
    pall = jnp.einsum('nm,kih->knimh', eye, p).reshape(K, n * oh, n * h_in)
    return pall.astype(jnp.bfloat16)


def _channel_pool(ow, cout):
    """R: (OW*Cout, Cout) 0/1 pooling matrix (sum over ow per channel) and its
    transpose (broadcast per-channel values back to the (ow, cout) columns)."""
    r = jnp.tile(jnp.eye(cout, dtype=jnp.float32), (ow, 1))
    return r, r.T


def _head_weights(wv, bv, wa, ba, oh3, ow3, c3):
    """Concatenate value/advantage weights into (L, 1+A), permute rows from
    the PyTorch NCHW flatten order (c, h, w) to the kernel's (h, w, c) feature
    order, and split by feature-map row h."""
    n_act = wa.shape[0]
    wfc = jnp.concatenate([wv, wa], axis=0).T             # (L, 1+A), (c,h,w)
    perm = (jnp.arange(c3 * oh3 * ow3)
            .reshape(c3, oh3, ow3).transpose(1, 2, 0).reshape(-1))
    wfc = wfc[perm, :]                                     # rows now (h, w, c)
    wfc = wfc.reshape(oh3, ow3 * c3, 1 + n_act).astype(jnp.bfloat16)
    bfc = jnp.concatenate([bv, ba]).reshape(1, 1 + n_act).astype(jnp.float32)
    return wfc, bfc


def _head_select(n, oh3):
    """(OH3, N, N*OH3) 0/1 matrices: S[oh] picks feature row oh of each sample."""
    s = (jnp.arange(n * oh3)[None, None, :] ==
         (oh3 * jnp.arange(n)[None, :, None]
          + jnp.arange(oh3)[:, None, None]))
    return s.astype(jnp.bfloat16)


# ------------------------------- forward ------------------------------------

@functools.partial(jax.jit, static_argnames=('dueling_type',))
def dueling_cnn_forward(params, x, dueling_type='mean'):
    n, c0, h0, w0 = x.shape
    h1, w1 = _out_size(h0), _out_size(w0)
    h2, w2 = _out_size(h1), _out_size(w1)
    h3, w3 = _out_size(h2), _out_size(w2)
    c1 = params['w1'].shape[0]
    c2 = params['w2'].shape[0]
    c3 = params['w3'].shape[0]
    n_act = params['wa'].shape[0]

    # One NCHW -> NHWC transform at the boundary; activations then stay in the
    # NHWC-flattened (N*H, W*C) layout end to end (no per-layer transposes).
    x2d = (jnp.transpose(x, (0, 2, 3, 1))
           .reshape(n * h0, w0 * c0).astype(jnp.bfloat16))

    g1 = _conv_banded_weights(params['w1'], w0)
    g2 = _conv_banded_weights(params['w2'], w1)
    g3 = _conv_banded_weights(params['w3'], w2)
    p1 = _row_select(h0, n)
    p2 = _row_select(h1, n)
    p3 = _row_select(h2, n)
    r1, rt1 = _channel_pool(w1, c1)
    r2, rt2 = _channel_pool(w2, c2)
    r3, rt3 = _channel_pool(w3, c3)
    wfc, bfc = _head_weights(params['wv'], params['bv'],
                             params['wa'], params['ba'], h3, w3, c3)
    sh = _head_select(n, h3)

    def bn_vec(v):
        return v.reshape(1, -1).astype(jnp.float32)

    args = (x2d,
            g1, p1, bn_vec(params['g1']), bn_vec(params['be1']), r1, rt1,
            g2, p2, bn_vec(params['g2']), bn_vec(params['be2']), r2, rt2,
            g3, p3, bn_vec(params['g3']), bn_vec(params['be3']), r3, rt3,
            wfc, bfc, sh)

    dims = dict(N=n, H1=h1, W1=w1, C1=c1, H2=h2, W2=w2, C2=c2,
                H3=h3, W3=w3, C3=c3, A=n_act)
    kernel = functools.partial(_fused_dueling_cnn_kernel,
                               dims=dims, dueling_type=dueling_type)

    return pl.pallas_call(
        kernel,
        out_shape=jax.ShapeDtypeStruct((n, n_act), jnp.float32),
        in_specs=[pl.BlockSpec(memory_space=pltpu.MemorySpace.VMEM)
                  for _ in args],
        out_specs=pl.BlockSpec(memory_space=pltpu.MemorySpace.VMEM),
        scratch_shapes=[
            pltpu.VMEM((n * h1, w1 * c1), jnp.bfloat16),   # layer-1 activations
            pltpu.VMEM((n * h2, w2 * c2), jnp.bfloat16),   # layer-2 activations
            pltpu.VMEM((n * h3, w3 * c3), jnp.bfloat16),   # layer-3 activations
        ],
    )(*args)


# ---------------------------- parameter init --------------------------------

def init_params(key, img_dim, output_dim, linear_input_size):
    ks = jax.random.split(key, 10)

    def u(k, shape, fan_in):
        bound = 1.0 / jnp.sqrt(jnp.float32(fan_in))
        return jax.random.uniform(k, shape, jnp.float32, -bound, bound)

    p = {}
    # conv1 / bn1   (conv biases kept for checkpoint parity, but they are
    # exactly cancelled by training-mode BatchNorm so the kernel omits them)
    p['w1'] = u(ks[0], (16, img_dim, 5, 5), img_dim * 25)
    p['b1'] = u(ks[1], (16,), img_dim * 25)
    p['g1'] = jnp.ones((16,), jnp.float32)
    p['be1'] = jnp.zeros((16,), jnp.float32)
    # conv2 / bn2
    p['w2'] = u(ks[2], (32, 16, 5, 5), 16 * 25)
    p['b2'] = u(ks[3], (32,), 16 * 25)
    p['g2'] = jnp.ones((32,), jnp.float32)
    p['be2'] = jnp.zeros((32,), jnp.float32)
    # conv3 / bn3
    p['w3'] = u(ks[4], (32, 32, 5, 5), 32 * 25)
    p['b3'] = u(ks[5], (32,), 32 * 25)
    p['g3'] = jnp.ones((32,), jnp.float32)
    p['be3'] = jnp.zeros((32,), jnp.float32)
    # fc_value (1, L), fc_action_adv (output_dim, L) -- PyTorch Linear layout
    p['wv'] = u(ks[6], (1, linear_input_size), linear_input_size)
    p['bv'] = u(ks[7], (1,), linear_input_size)
    p['wa'] = u(ks[8], (output_dim, linear_input_size), linear_input_size)
    p['ba'] = u(ks[9], (output_dim,), linear_input_size)
    return p


# --------------------------------- main --------------------------------------

if __name__ == "__main__":
    key = jax.random.PRNGKey(0)
    kx, kp = jax.random.split(key)

    # Three stride-2 k=5 convs need spatial >= 29; 40x40 gives a 2x2x32 = 128
    # dimensional flattened feature (matches the reference module's math).
    N, img_dim, w, h, output_dim = 2, 4, 40, 40, 8

    convw = _out_size(_out_size(_out_size(w)))
    convh = _out_size(_out_size(_out_size(h)))
    linear_input_size = convw * convh * 32   # = 128

    params = init_params(kp, img_dim, output_dim, linear_input_size)
    x = jax.random.normal(kx, (N, img_dim, h, w), dtype=jnp.float32)

    q = dueling_cnn_forward(params, x, dueling_type='mean')
    jax.block_until_ready(q)
    assert q.shape == (N, output_dim), q.shape
    print("KERNEL_OK")
</pallas_src>

<mosaic_0001>
module attributes {stable_mosaic.version = 11 : i64} {
  func.func @_fused_dueling_cnn_kernel(%arg0: memref<80x160xbf16, #tpu.memory_space<vmem>>, %arg1: memref<5x160x288xbf16, #tpu.memory_space<vmem>>, %arg2: memref<5x36x80xbf16, #tpu.memory_space<vmem>>, %arg3: memref<1x16xf32, #tpu.memory_space<vmem>>, %arg4: memref<1x16xf32, #tpu.memory_space<vmem>>, %arg5: memref<288x16xf32, #tpu.memory_space<vmem>>, %arg6: memref<16x288xf32, #tpu.memory_space<vmem>>, %arg7: memref<5x288x224xbf16, #tpu.memory_space<vmem>>, %arg8: memref<5x14x36xbf16, #tpu.memory_space<vmem>>, %arg9: memref<1x32xf32, #tpu.memory_space<vmem>>, %arg10: memref<1x32xf32, #tpu.memory_space<vmem>>, %arg11: memref<224x32xf32, #tpu.memory_space<vmem>>, %arg12: memref<32x224xf32, #tpu.memory_space<vmem>>, %arg13: memref<5x224x64xbf16, #tpu.memory_space<vmem>>, %arg14: memref<5x4x14xbf16, #tpu.memory_space<vmem>>, %arg15: memref<1x32xf32, #tpu.memory_space<vmem>>, %arg16: memref<1x32xf32, #tpu.memory_space<vmem>>, %arg17: memref<64x32xf32, #tpu.memory_space<vmem>>, %arg18: memref<32x64xf32, #tpu.memory_space<vmem>>, %arg19: memref<2x64x9xbf16, #tpu.memory_space<vmem>>, %arg20: memref<1x9xf32, #tpu.memory_space<vmem>>, %arg21: memref<2x2x4xbf16, #tpu.memory_space<vmem>>, %arg22: memref<2x8xf32, #tpu.memory_space<vmem>>, %arg23: memref<36x288xbf16, #tpu.memory_space<vmem>>, %arg24: memref<14x224xbf16, #tpu.memory_space<vmem>>, %arg25: memref<4x64xbf16, #tpu.memory_space<vmem>>) attributes {dimension_semantics = [], scalar_prefetch = 0 : i64, scratch_operands = 3 : i64, tpu.core_type = #tpu.core_type<tc>} {
    %c0 = arith.constant 0 : index
    %c0_0 = arith.constant 0 : index
    %0 = vector.load %arg0[%c0, %c0_0] : memref<80x160xbf16, #tpu.memory_space<vmem>>, vector<80x160xbf16>
    %cst = arith.constant 0.000000e+00 : f32
    %1 = vector.broadcast %cst : f32 to vector<36x288xf32>
    %c0_1 = arith.constant 0 : index
    %c0_2 = arith.constant 0 : index
    %c0_3 = arith.constant 0 : index
    %2 = vector.load %arg2[%c0_1, %c0_2, %c0_3] : memref<5x36x80xbf16, #tpu.memory_space<vmem>>, vector<1x36x80xbf16>
    %3 = vector.shape_cast %2 : vector<1x36x80xbf16> to vector<36x80xbf16>
    %cst_4 = arith.constant dense<0.000000e+00> : vector<36x160xf32>
    %4 = tpu.matmul %3, %0, %cst_4 {dimension_numbers = #tpu.dot_dimension_numbers<[1], [0], [0], [1], [0, 0, 1, 1], [], []>} : vector<36x80xbf16>, vector<80x160xbf16>, vector<36x160xf32> -> vector<36x160xf32>
    %5 = arith.truncf %4 : vector<36x160xf32> to vector<36x160xbf16>
    %c0_5 = arith.constant 0 : index
    %c0_6 = arith.constant 0 : index
    %c0_7 = arith.constant 0 : index
    %6 = vector.load %arg1[%c0_5, %c0_6, %c0_7] : memref<5x160x288xbf16, #tpu.memory_space<vmem>>, vector<1x160x288xbf16>
    %7 = vector.shape_cast %6 : vector<1x160x288xbf16> to vector<160x288xbf16>
    %cst_8 = arith.constant dense<0.000000e+00> : vector<36x288xf32>
    %8 = tpu.matmul %5, %7, %cst_8 {dimension_numbers = #tpu.dot_dimension_numbers<[1], [0], [0], [1], [0, 0, 1, 1], [], []>} : vector<36x160xbf16>, vector<160x288xbf16>, vector<36x288xf32> -> vector<36x288xf32>
    %9 = arith.addf %1, %8 : vector<36x288xf32>
    %c1 = arith.constant 1 : index
    %c0_9 = arith.constant 0 : index
    %c0_10 = arith.constant 0 : index
    %10 = vector.load %arg2[%c1, %c0_9, %c0_10] : memref<5x36x80xbf16, #tpu.memory_space<vmem>>, vector<1x36x80xbf16>
    %11 = vector.shape_cast %10 : vector<1x36x80xbf16> to vector<36x80xbf16>
    %cst_11 = arith.constant dense<0.000000e+00> : vector<36x160xf32>
    %12 = tpu.matmul %11, %0, %cst_11 {dimension_numbers = #tpu.dot_dimension_numbers<[1], [0], [0], [1], [0, 0, 1, 1], [], []>} : vector<36x80xbf16>, vector<80x160xbf16>, vector<36x160xf32> -> vector<36x160xf32>
    %13 = arith.truncf %12 : vector<36x160xf32> to vector<36x160xbf16>
    %c1_12 = arith.constant 1 : index
    %c0_13 = arith.constant 0 : index
    %c0_14 = arith.constant 0 : index
    %14 = vector.load %arg1[%c1_12, %c0_13, %c0_14] : memref<5x160x288xbf16, #tpu.memory_space<vmem>>, vector<1x160x288xbf16>
    %15 = vector.shape_cast %14 : vector<1x160x288xbf16> to vector<160x288xbf16>
    %cst_15 = arith.constant dense<0.000000e+00> : vector<36x288xf32>
    %16 = tpu.matmul %13, %15, %cst_15 {dimension_numbers = #tpu.dot_dimension_numbers<[1], [0], [0], [1], [0, 0, 1, 1], [], []>} : vector<36x160xbf16>, vector<160x288xbf16>, vector<36x288xf32> -> vector<36x288xf32>
    %17 = arith.addf %9, %16 : vector<36x288xf32>
    %c2 = arith.constant 2 : index
    %c0_16 = arith.constant 0 : index
    %c0_17 = arith.constant 0 : index
    %18 = vector.load %arg2[%c2, %c0_16, %c0_17] : memref<5x36x80xbf16, #tpu.memory_space<vmem>>, vector<1x36x80xbf16>
    %19 = vector.shape_cast %18 : vector<1x36x80xbf16> to vector<36x80xbf16>
    %cst_18 = arith.constant dense<0.000000e+00> : vector<36x160xf32>
    %20 = tpu.matmul %19, %0, %cst_18 {dimension_numbers = #tpu.dot_dimension_numbers<[1], [0], [0], [1], [0, 0, 1, 1], [], []>} : vector<36x80xbf16>, vector<80x160xbf16>, vector<36x160xf32> -> vector<36x160xf32>
    %21 = arith.truncf %20 : vector<36x160xf32> to vector<36x160xbf16>
    %c2_19 = arith.constant 2 : index
    %c0_20 = arith.constant 0 : index
    %c0_21 = arith.constant 0 : index
    %22 = vector.load %arg1[%c2_19, %c0_20, %c0_21] : memref<5x160x288xbf16, #tpu.memory_space<vmem>>, vector<1x160x288xbf16>
    %23 = vector.shape_cast %22 : vector<1x160x288xbf16> to vector<160x288xbf16>
    %cst_22 = arith.constant dense<0.000000e+00> : vector<36x288xf32>
    %24 = tpu.matmul %21, %23, %cst_22 {dimension_numbers = #tpu.dot_dimension_numbers<[1], [0], [0], [1], [0, 0, 1, 1], [], []>} : vector<36x160xbf16>, vector<160x288xbf16>, vector<36x288xf32> -> vector<36x288xf32>
    %25 = arith.addf %17, %24 : vector<36x288xf32>
    %c3 = arith.constant 3 : index
    %c0_23 = arith.constant 0 : index
    %c0_24 = arith.constant 0 : index
    %26 = vector.load %arg2[%c3, %c0_23, %c0_24] : memref<5x36x80xbf16, #tpu.memory_space<vmem>>, vector<1x36x80xbf16>
    %27 = vector.shape_cast %26 : vector<1x36x80xbf16> to vector<36x80xbf16>
    %cst_25 = arith.constant dense<0.000000e+00> : vector<36x160xf32>
    %28 = tpu.matmul %27, %0, %cst_25 {dimension_numbers = #tpu.dot_dimension_numbers<[1], [0], [0], [1], [0, 0, 1, 1], [], []>} : vector<36x80xbf16>, vector<80x160xbf16>, vector<36x160xf32> -> vector<36x160xf32>
    %29 = arith.truncf %28 : vector<36x160xf32> to vector<36x160xbf16>
    %c3_26 = arith.constant 3 : index
    %c0_27 = arith.constant 0 : index
    %c0_28 = arith.constant 0 : index
    %30 = vector.load %arg1[%c3_26, %c0_27, %c0_28] : memref<5x160x288xbf16, #tpu.memory_space<vmem>>, vector<1x160x288xbf16>
    %31 = vector.shape_cast %30 : vector<1x160x288xbf16> to vector<160x288xbf16>
    %cst_29 = arith.constant dense<0.000000e+00> : vector<36x288xf32>
    %32 = tpu.matmul %29, %31, %cst_29 {dimension_numbers = #tpu.dot_dimension_numbers<[1], [0], [0], [1], [0, 0, 1, 1], [], []>} : vector<36x160xbf16>, vector<160x288xbf16>, vector<36x288xf32> -> vector<36x288xf32>
    %33 = arith.addf %25, %32 : vector<36x288xf32>
    %c4 = arith.constant 4 : index
    %c0_30 = arith.constant 0 : index
    %c0_31 = arith.constant 0 : index
    %34 = vector.load %arg2[%c4, %c0_30, %c0_31] : memref<5x36x80xbf16, #tpu.memory_space<vmem>>, vector<1x36x80xbf16>
    %35 = vector.shape_cast %34 : vector<1x36x80xbf16> to vector<36x80xbf16>
    %cst_32 = arith.constant dense<0.000000e+00> : vector<36x160xf32>
    %36 = tpu.matmul %35, %0, %cst_32 {dimension_numbers = #tpu.dot_dimension_numbers<[1], [0], [0], [1], [0, 0, 1, 1], [], []>} : vector<36x80xbf16>, vector<80x160xbf16>, vector<36x160xf32> -> vector<36x160xf32>
    %37 = arith.truncf %36 : vector<36x160xf32> to vector<36x160xbf16>
    %c4_33 = arith.constant 4 : index
    %c0_34 = arith.constant 0 : index
    %c0_35 = arith.constant 0 : index
    %38 = vector.load %arg1[%c4_33, %c0_34, %c0_35] : memref<5x160x288xbf16, #tpu.memory_space<vmem>>, vector<1x160x288xbf16>
    %39 = vector.shape_cast %38 : vector<1x160x288xbf16> to vector<160x288xbf16>
    %cst_36 = arith.constant dense<0.000000e+00> : vector<36x288xf32>
    %40 = tpu.matmul %37, %39, %cst_36 {dimension_numbers = #tpu.dot_dimension_numbers<[1], [0], [0], [1], [0, 0, 1, 1], [], []>} : vector<36x160xbf16>, vector<160x288xbf16>, vector<36x288xf32> -> vector<36x288xf32>
    %41 = arith.addf %33, %40 : vector<36x288xf32>
    %cst_37 = arith.constant dense<0.000000e+00> : vector<288xf32>
    %42 = vector.multi_reduction <add>, %41, %cst_37 [0] : vector<36x288xf32> to vector<288xf32>
    %43 = vector.shape_cast %42 : vector<288xf32> to vector<1x288xf32>
    %44 = arith.mulf %41, %41 : vector<36x288xf32>
    %cst_38 = arith.constant dense<0.000000e+00> : vector<288xf32>
    %45 = vector.multi_reduction <add>, %44, %cst_38 [0] : vector<36x288xf32> to vector<288xf32>
    %46 = vector.shape_cast %45 : vector<288xf32> to vector<1x288xf32>
    %c0_39 = arith.constant 0 : index
    %c0_40 = arith.constant 0 : index
    %47 = vector.load %arg5[%c0_39, %c0_40] : memref<288x16xf32, #tpu.memory_space<vmem>>, vector<288x16xf32>
    %cst_41 = arith.constant dense<0.000000e+00> : vector<1x16xf32>
    %48 = tpu.matmul %43, %47, %cst_41 {dimension_numbers = #tpu.dot_dimension_numbers<[1], [0], [0], [1], [0, 0, 1, 1], [], []>} : vector<1x288xf32>, vector<288x16xf32>, vector<1x16xf32> -> vector<1x16xf32>
    %c0_42 = arith.constant 0 : index
    %c0_43 = arith.constant 0 : index
    %49 = vector.load %arg5[%c0_42, %c0_43] : memref<288x16xf32, #tpu.memory_space<vmem>>, vector<288x16xf32>
    %cst_44 = arith.constant dense<0.000000e+00> : vector<1x16xf32>
    %50 = tpu.matmul %46, %49, %cst_44 {dimension_numbers = #tpu.dot_dimension_numbers<[1], [0], [0], [1], [0, 0, 1, 1], [], []>} : vector<1x288xf32>, vector<288x16xf32>, vector<1x16xf32> -> vector<1x16xf32>
    %cst_45 = arith.constant 6.480000e+02 : f32
    %51 = vector.broadcast %cst_45 : f32 to vector<1x16xf32>
    %52 = arith.divf %48, %51 : vector<1x16xf32>
    %cst_46 = arith.constant 6.480000e+02 : f32
    %53 = vector.broadcast %cst_46 : f32 to vector<1x16xf32>
    %54 = arith.divf %50, %53 : vector<1x16xf32>
    %55 = arith.mulf %52, %52 : vector<1x16xf32>
    %56 = arith.subf %54, %55 : vector<1x16xf32>
    %cst_47 = arith.constant 9.99999974E-6 : f32
    %57 = vector.broadcast %cst_47 : f32 to vector<1x16xf32>
    %58 = arith.addf %56, %57 : vector<1x16xf32>
    %59 = math.rsqrt %58 : vector<1x16xf32>
    %c0_48 = arith.constant 0 : index
    %c0_49 = arith.constant 0 : index
    %60 = vector.load %arg3[%c0_48, %c0_49] : memref<1x16xf32, #tpu.memory_space<vmem>>, vector<1x16xf32>
    %61 = arith.mulf %60, %59 : vector<1x16xf32>
    %c0_50 = arith.constant 0 : index
    %c0_51 = arith.constant 0 : index
    %62 = vector.load %arg4[%c0_50, %c0_51] : memref<1x16xf32, #tpu.memory_space<vmem>>, vector<1x16xf32>
    %63 = arith.mulf %52, %61 : vector<1x16xf32>
    %64 = arith.subf %62, %63 : vector<1x16xf32>
    %c0_52 = arith.constant 0 : index
    %c0_53 = arith.constant 0 : index
    %65 = vector.load %arg6[%c0_52, %c0_53] : memref<16x288xf32, #tpu.memory_space<vmem>>, vector<16x288xf32>
    %cst_54 = arith.constant dense<0.000000e+00> : vector<1x288xf32>
    %66 = tpu.matmul %61, %65, %cst_54 {dimension_numbers = #tpu.dot_dimension_numbers<[1], [0], [0], [1], [0, 0, 1, 1], [], []>} : vector<1x16xf32>, vector<16x288xf32>, vector<1x288xf32> -> vector<1x288xf32>
    %c0_55 = arith.constant 0 : index
    %c0_56 = arith.constant 0 : index
    %67 = vector.load %arg6[%c0_55, %c0_56] : memref<16x288xf32, #tpu.memory_space<vmem>>, vector<16x288xf32>
    %cst_57 = arith.constant dense<0.000000e+00> : vector<1x288xf32>
    %68 = tpu.matmul %64, %67, %cst_57 {dimension_numbers = #tpu.dot_dimension_numbers<[1], [0], [0], [1], [0, 0, 1, 1], [], []>} : vector<1x16xf32>, vector<16x288xf32>, vector<1x288xf32> -> vector<1x288xf32>
    %69 = vector.broadcast %66 : vector<1x288xf32> to vector<36x288xf32>
    %70 = arith.mulf %41, %69 : vector<36x288xf32>
    %71 = vector.broadcast %68 : vector<1x288xf32> to vector<36x288xf32>
    %72 = arith.addf %70, %71 : vector<36x288xf32>
    %cst_58 = arith.constant 0.000000e+00 : f32
    %73 = vector.broadcast %cst_58 : f32 to vector<36x288xf32>
    %74 = arith.maximumf %72, %73 : vector<36x288xf32>
    %75 = arith.truncf %74 : vector<36x288xf32> to vector<36x288xbf16>
    %c0_59 = arith.constant 0 : index
    %c0_60 = arith.constant 0 : index
    %76 = vector.load %arg23[%c0_59, %c0_60] : memref<36x288xbf16, #tpu.memory_space<vmem>>, vector<36x288xbf16>
    tpu.vector_store %arg23[%c0_59, %c0_60], %75 {strides = array<i32>} : memref<36x288xbf16, #tpu.memory_space<vmem>>, vector<36x288xbf16>,
    %c0_61 = arith.constant 0 : index
    %c0_62 = arith.constant 0 : index
    %77 = vector.load %arg23[%c0_61, %c0_62] : memref<36x288xbf16, #tpu.memory_space<vmem>>, vector<36x288xbf16>
    %cst_63 = arith.constant 0.000000e+00 : f32
    %78 = vector.broadcast %cst_63 : f32 to vector<14x224xf32>
    %c0_64 = arith.constant 0 : index
    %c0_65 = arith.constant 0 : index
    %c0_66 = arith.constant 0 : index
    %79 = vector.load %arg8[%c0_64, %c0_65, %c0_66] : memref<5x14x36xbf16, #tpu.memory_space<vmem>>, vector<1x14x36xbf16>
    %80 = vector.shape_cast %79 : vector<1x14x36xbf16> to vector<14x36xbf16>
    %cst_67 = arith.constant dense<0.000000e+00> : vector<14x288xf32>
    %81 = tpu.matmul %80, %77, %cst_67 {dimension_numbers = #tpu.dot_dimension_numbers<[1], [0], [0], [1], [0, 0, 1, 1], [], []>} : vector<14x36xbf16>, vector<36x288xbf16>, vector<14x288xf32> -> vector<14x288xf32>
    %82 = arith.truncf %81 : vector<14x288xf32> to vector<14x288xbf16>
    %c0_68 = arith.constant 0 : index
    %c0_69 = arith.constant 0 : index
    %c0_70 = arith.constant 0 : index
    %83 = vector.load %arg7[%c0_68, %c0_69, %c0_70] : memref<5x288x224xbf16, #tpu.memory_space<vmem>>, vector<1x288x224xbf16>
    %84 = vector.shape_cast %83 : vector<1x288x224xbf16> to vector<288x224xbf16>
    %cst_71 = arith.constant dense<0.000000e+00> : vector<14x224xf32>
    %85 = tpu.matmul %82, %84, %cst_71 {dimension_numbers = #tpu.dot_dimension_numbers<[1], [0], [0], [1], [0, 0, 1, 1], [], []>} : vector<14x288xbf16>, vector<288x224xbf16>, vector<14x224xf32> -> vector<14x224xf32>
    %86 = arith.addf %78, %85 : vector<14x224xf32>
    %c1_72 = arith.constant 1 : index
    %c0_73 = arith.constant 0 : index
    %c0_74 = arith.constant 0 : index
    %87 = vector.load %arg8[%c1_72, %c0_73, %c0_74] : memref<5x14x36xbf16, #tpu.memory_space<vmem>>, vector<1x14x36xbf16>
    %88 = vector.shape_cast %87 : vector<1x14x36xbf16> to vector<14x36xbf16>
    %cst_75 = arith.constant dense<0.000000e+00> : vector<14x288xf32>
    %89 = tpu.matmul %88, %77, %cst_75 {dimension_numbers = #tpu.dot_dimension_numbers<[1], [0], [0], [1], [0, 0, 1, 1], [], []>} : vector<14x36xbf16>, vector<36x288xbf16>, vector<14x288xf32> -> vector<14x288xf32>
    %90 = arith.truncf %89 : vector<14x288xf32> to vector<14x288xbf16>
    %c1_76 = arith.constant 1 : index
    %c0_77 = arith.constant 0 : index
    %c0_78 = arith.constant 0 : index
    %91 = vector.load %arg7[%c1_76, %c0_77, %c0_78] : memref<5x288x224xbf16, #tpu.memory_space<vmem>>, vector<1x288x224xbf16>
    %92 = vector.shape_cast %91 : vector<1x288x224xbf16> to vector<288x224xbf16>
    %cst_79 = arith.constant dense<0.000000e+00> : vector<14x224xf32>
    %93 = tpu.matmul %90, %92, %cst_79 {dimension_numbers = #tpu.dot_dimension_numbers<[1], [0], [0], [1], [0, 0, 1, 1], [], []>} : vector<14x288xbf16>, vector<288x224xbf16>, vector<14x224xf32> -> vector<14x224xf32>
    %94 = arith.addf %86, %93 : vector<14x224xf32>
    %c2_80 = arith.constant 2 : index
    %c0_81 = arith.constant 0 : index
    %c0_82 = arith.constant 0 : index
    %95 = vector.load %arg8[%c2_80, %c0_81, %c0_82] : memref<5x14x36xbf16, #tpu.memory_space<vmem>>, vector<1x14x36xbf16>
    %96 = vector.shape_cast %95 : vector<1x14x36xbf16> to vector<14x36xbf16>
    %cst_83 = arith.constant dense<0.000000e+00> : vector<14x288xf32>
    %97 = tpu.matmul %96, %77, %cst_83 {dimension_numbers = #tpu.dot_dimension_numbers<[1], [0], [0], [1], [0, 0, 1, 1], [], []>} : vector<14x36xbf16>, vector<36x288xbf16>, vector<14x288xf32> -> vector<14x288xf32>
    %98 = arith.truncf %97 : vector<14x288xf32> to vector<14x288xbf16>
    %c2_84 = arith.constant 2 : index
    %c0_85 = arith.constant 0 : index
    %c0_86 = arith.constant 0 : index
    %99 = vector.load %arg7[%c2_84, %c0_85, %c0_86] : memref<5x288x224xbf16, #tpu.memory_space<vmem>>, vector<1x288x224xbf16>
    %100 = vector.shape_cast %99 : vector<1x288x224xbf16> to vector<288x224xbf16>
    %cst_87 = arith.constant dense<0.000000e+00> : vector<14x224xf32>
    %101 = tpu.matmul %98, %100, %cst_87 {dimension_numbers = #tpu.dot_dimension_numbers<[1], [0], [0], [1], [0, 0, 1, 1], [], []>} : vector<14x288xbf16>, vector<288x224xbf16>, vector<14x224xf32> -> vector<14x224xf32>
    %102 = arith.addf %94, %101 : vector<14x224xf32>
    %c3_88 = arith.constant 3 : index
    %c0_89 = arith.constant 0 : index
    %c0_90 = arith.constant 0 : index
    %103 = vector.load %arg8[%c3_88, %c0_89, %c0_90] : memref<5x14x36xbf16, #tpu.memory_space<vmem>>, vector<1x14x36xbf16>
    %104 = vector.shape_cast %103 : vector<1x14x36xbf16> to vector<14x36xbf16>
    %cst_91 = arith.constant dense<0.000000e+00> : vector<14x288xf32>
    %105 = tpu.matmul %104, %77, %cst_91 {dimension_numbers = #tpu.dot_dimension_numbers<[1], [0], [0], [1], [0, 0, 1, 1], [], []>} : vector<14x36xbf16>, vector<36x288xbf16>, vector<14x288xf32> -> vector<14x288xf32>
    %106 = arith.truncf %105 : vector<14x288xf32> to vector<14x288xbf16>
    %c3_92 = arith.constant 3 : index
    %c0_93 = arith.constant 0 : index
    %c0_94 = arith.constant 0 : index
    %107 = vector.load %arg7[%c3_92, %c0_93, %c0_94] : memref<5x288x224xbf16, #tpu.memory_space<vmem>>, vector<1x288x224xbf16>
    %108 = vector.shape_cast %107 : vector<1x288x224xbf16> to vector<288x224xbf16>
    %cst_95 = arith.constant dense<0.000000e+00> : vector<14x224xf32>
    %109 = tpu.matmul %106, %108, %cst_95 {dimension_numbers = #tpu.dot_dimension_numbers<[1], [0], [0], [1], [0, 0, 1, 1], [], []>} : vector<14x288xbf16>, vector<288x224xbf16>, vector<14x224xf32> -> vector<14x224xf32>
    %110 = arith.addf %102, %109 : vector<14x224xf32>
    %c4_96 = arith.constant 4 : index
    %c0_97 = arith.constant 0 : index
    %c0_98 = arith.constant 0 : index
    %111 = vector.load %arg8[%c4_96, %c0_97, %c0_98] : memref<5x14x36xbf16, #tpu.memory_space<vmem>>, vector<1x14x36xbf16>
    %112 = vector.shape_cast %111 : vector<1x14x36xbf16> to vector<14x36xbf16>
    %cst_99 = arith.constant dense<0.000000e+00> : vector<14x288xf32>
    %113 = tpu.matmul %112, %77, %cst_99 {dimension_numbers = #tpu.dot_dimension_numbers<[1], [0], [0], [1], [0, 0, 1, 1], [], []>} : vector<14x36xbf16>, vector<36x288xbf16>, vector<14x288xf32> -> vector<14x288xf32>
    %114 = arith.truncf %113 : vector<14x288xf32> to vector<14x288xbf16>
    %c4_100 = arith.constant 4 : index
    %c0_101 = arith.constant 0 : index
    %c0_102 = arith.constant 0 : index
    %115 = vector.load %arg7[%c4_100, %c0_101, %c0_102] : memref<5x288x224xbf16, #tpu.memory_space<vmem>>, vector<1x288x224xbf16>
    %116 = vector.shape_cast %115 : vector<1x288x224xbf16> to vector<288x224xbf16>
    %cst_103 = arith.constant dense<0.000000e+00> : vector<14x224xf32>
    %117 = tpu.matmul %114, %116, %cst_103 {dimension_numbers = #tpu.dot_dimension_numbers<[1], [0], [0], [1], [0, 0, 1, 1], [], []>} : vector<14x288xbf16>, vector<288x224xbf16>, vector<14x224xf32> -> vector<14x224xf32>
    %118 = arith.addf %110, %117 : vector<14x224xf32>
    %cst_104 = arith.constant dense<0.000000e+00> : vector<224xf32>
    %119 = vector.multi_reduction <add>, %118, %cst_104 [0] : vector<14x224xf32> to vector<224xf32>
    %120 = vector.shape_cast %119 : vector<224xf32> to vector<1x224xf32>
    %121 = arith.mulf %118, %118 : vector<14x224xf32>
    %cst_105 = arith.constant dense<0.000000e+00> : vector<224xf32>
    %122 = vector.multi_reduction <add>, %121, %cst_105 [0] : vector<14x224xf32> to vector<224xf32>
    %123 = vector.shape_cast %122 : vector<224xf32> to vector<1x224xf32>
    %c0_106 = arith.constant 0 : index
    %c0_107 = arith.constant 0 : index
    %124 = vector.load %arg11[%c0_106, %c0_107] : memref<224x32xf32, #tpu.memory_space<vmem>>, vector<224x32xf32>
    %cst_108 = arith.constant dense<0.000000e+00> : vector<1x32xf32>
    %125 = tpu.matmul %120, %124, %cst_108 {dimension_numbers = #tpu.dot_dimension_numbers<[1], [0], [0], [1], [0, 0, 1, 1], [], []>} : vector<1x224xf32>, vector<224x32xf32>, vector<1x32xf32> -> vector<1x32xf32>
    %c0_109 = arith.constant 0 : index
    %c0_110 = arith.constant 0 : index
    %126 = vector.load %arg11[%c0_109, %c0_110] : memref<224x32xf32, #tpu.memory_space<vmem>>, vector<224x32xf32>
    %cst_111 = arith.constant dense<0.000000e+00> : vector<1x32xf32>
    %127 = tpu.matmul %123, %126, %cst_111 {dimension_numbers = #tpu.dot_dimension_numbers<[1], [0], [0], [1], [0, 0, 1, 1], [], []>} : vector<1x224xf32>, vector<224x32xf32>, vector<1x32xf32> -> vector<1x32xf32>
    %cst_112 = arith.constant 9.800000e+01 : f32
    %128 = vector.broadcast %cst_112 : f32 to vector<1x32xf32>
    %129 = arith.divf %125, %128 : vector<1x32xf32>
    %cst_113 = arith.constant 9.800000e+01 : f32
    %130 = vector.broadcast %cst_113 : f32 to vector<1x32xf32>
    %131 = arith.divf %127, %130 : vector<1x32xf32>
    %132 = arith.mulf %129, %129 : vector<1x32xf32>
    %133 = arith.subf %131, %132 : vector<1x32xf32>
    %cst_114 = arith.constant 9.99999974E-6 : f32
    %134 = vector.broadcast %cst_114 : f32 to vector<1x32xf32>
    %135 = arith.addf %133, %134 : vector<1x32xf32>
    %136 = math.rsqrt %135 : vector<1x32xf32>
    %c0_115 = arith.constant 0 : index
    %c0_116 = arith.constant 0 : index
    %137 = vector.load %arg9[%c0_115, %c0_116] : memref<1x32xf32, #tpu.memory_space<vmem>>, vector<1x32xf32>
    %138 = arith.mulf %137, %136 : vector<1x32xf32>
    %c0_117 = arith.constant 0 : index
    %c0_118 = arith.constant 0 : index
    %139 = vector.load %arg10[%c0_117, %c0_118] : memref<1x32xf32, #tpu.memory_space<vmem>>, vector<1x32xf32>
    %140 = arith.mulf %129, %138 : vector<1x32xf32>
    %141 = arith.subf %139, %140 : vector<1x32xf32>
    %c0_119 = arith.constant 0 : index
    %c0_120 = arith.constant 0 : index
    %142 = vector.load %arg12[%c0_119, %c0_120] : memref<32x224xf32, #tpu.memory_space<vmem>>, vector<32x224xf32>
    %cst_121 = arith.constant dense<0.000000e+00> : vector<1x224xf32>
    %143 = tpu.matmul %138, %142, %cst_121 {dimension_numbers = #tpu.dot_dimension_numbers<[1], [0], [0], [1], [0, 0, 1, 1], [], []>} : vector<1x32xf32>, vector<32x224xf32>, vector<1x224xf32> -> vector<1x224xf32>
    %c0_122 = arith.constant 0 : index
    %c0_123 = arith.constant 0 : index
    %144 = vector.load %arg12[%c0_122, %c0_123] : memref<32x224xf32, #tpu.memory_space<vmem>>, vector<32x224xf32>
    %cst_124 = arith.constant dense<0.000000e+00> : vector<1x224xf32>
    %145 = tpu.matmul %141, %144, %cst_124 {dimension_numbers = #tpu.dot_dimension_numbers<[1], [0], [0], [1], [0, 0, 1, 1], [], []>} : vector<1x32xf32>, vector<32x224xf32>, vector<1x224xf32> -> vector<1x224xf32>
    %146 = vector.broadcast %143 : vector<1x224xf32> to vector<14x224xf32>
    %147 = arith.mulf %118, %146 : vector<14x224xf32>
    %148 = vector.broadcast %145 : vector<1x224xf32> to vector<14x224xf32>
    %149 = arith.addf %147, %148 : vector<14x224xf32>
    %cst_125 = arith.constant 0.000000e+00 : f32
    %150 = vector.broadcast %cst_125 : f32 to vector<14x224xf32>
    %151 = arith.maximumf %149, %150 : vector<14x224xf32>
    %152 = arith.truncf %151 : vector<14x224xf32> to vector<14x224xbf16>
    %c0_126 = arith.constant 0 : index
    %c0_127 = arith.constant 0 : index
    %153 = vector.load %arg24[%c0_126, %c0_127] : memref<14x224xbf16, #tpu.memory_space<vmem>>, vector<14x224xbf16>
    tpu.vector_store %arg24[%c0_126, %c0_127], %152 {strides = array<i32>} : memref<14x224xbf16, #tpu.memory_space<vmem>>, vector<14x224xbf16>,
    %c0_128 = arith.constant 0 : index
    %c0_129 = arith.constant 0 : index
    %154 = vector.load %arg24[%c0_128, %c0_129] : memref<14x224xbf16, #tpu.memory_space<vmem>>, vector<14x224xbf16>
    %cst_130 = arith.constant 0.000000e+00 : f32
    %155 = vector.broadcast %cst_130 : f32 to vector<4x64xf32>
    %c0_131 = arith.constant 0 : index
    %c0_132 = arith.constant 0 : index
    %c0_133 = arith.constant 0 : index
    %156 = vector.load %arg14[%c0_131, %c0_132, %c0_133] : memref<5x4x14xbf16, #tpu.memory_space<vmem>>, vector<1x4x14xbf16>
    %157 = vector.shape_cast %156 : vector<1x4x14xbf16> to vector<4x14xbf16>
    %cst_134 = arith.constant dense<0.000000e+00> : vector<4x224xf32>
    %158 = tpu.matmul %157, %154, %cst_134 {dimension_numbers = #tpu.dot_dimension_numbers<[1], [0], [0], [1], [0, 0, 1, 1], [], []>} : vector<4x14xbf16>, vector<14x224xbf16>, vector<4x224xf32> -> vector<4x224xf32>
    %159 = arith.truncf %158 : vector<4x224xf32> to vector<4x224xbf16>
    %c0_135 = arith.constant 0 : index
    %c0_136 = arith.constant 0 : index
    %c0_137 = arith.constant 0 : index
    %160 = vector.load %arg13[%c0_135, %c0_136, %c0_137] : memref<5x224x64xbf16, #tpu.memory_space<vmem>>, vector<1x224x64xbf16>
    %161 = vector.shape_cast %160 : vector<1x224x64xbf16> to vector<224x64xbf16>
    %cst_138 = arith.constant dense<0.000000e+00> : vector<4x64xf32>
    %162 = tpu.matmul %159, %161, %cst_138 {dimension_numbers = #tpu.dot_dimension_numbers<[1], [0], [0], [1], [0, 0, 1, 1], [], []>} : vector<4x224xbf16>, vector<224x64xbf16>, vector<4x64xf32> -> vector<4x64xf32>
    %163 = arith.addf %155, %162 : vector<4x64xf32>
    %c1_139 = arith.constant 1 : index
    %c0_140 = arith.constant 0 : index
    %c0_141 = arith.constant 0 : index
    %164 = vector.load %arg14[%c1_139, %c0_140, %c0_141] : memref<5x4x14xbf16, #tpu.memory_space<vmem>>, vector<1x4x14xbf16>
    %165 = vector.shape_cast %164 : vector<1x4x14xbf16> to vector<4x14xbf16>
    %cst_142 = arith.constant dense<0.000000e+00> : vector<4x224xf32>
    %166 = tpu.matmul %165, %154, %cst_142 {dimension_numbers = #tpu.dot_dimension_numbers<[1], [0], [0], [1], [0, 0, 1, 1], [], []>} : vector<4x14xbf16>, vector<14x224xbf16>, vector<4x224xf32> -> vector<4x224xf32>
    %167 = arith.truncf %166 : vector<4x224xf32> to vector<4x224xbf16>
    %c1_143 = arith.constant 1 : index
    %c0_144 = arith.constant 0 : index
    %c0_145 = arith.constant 0 : index
    %168 = vector.load %arg13[%c1_143, %c0_144, %c0_145] : memref<5x224x64xbf16, #tpu.memory_space<vmem>>, vector<1x224x64xbf16>
    %169 = vector.shape_cast %168 : vector<1x224x64xbf16> to vector<224x64xbf16>
    %cst_146 = arith.constant dense<0.000000e+00> : vector<4x64xf32>
    %170 = tpu.matmul %167, %169, %cst_146 {dimension_numbers = #tpu.dot_dimension_numbers<[1], [0], [0], [1], [0, 0, 1, 1], [], []>} : vector<4x224xbf16>, vector<224x64xbf16>, vector<4x64xf32> -> vector<4x64xf32>
    %171 = arith.addf %163, %170 : vector<4x64xf32>
    %c2_147 = arith.constant 2 : index
    %c0_148 = arith.constant 0 : index
    %c0_149 = arith.constant 0 : index
    %172 = vector.load %arg14[%c2_147, %c0_148, %c0_149] : memref<5x4x14xbf16, #tpu.memory_space<vmem>>, vector<1x4x14xbf16>
    %173 = vector.shape_cast %172 : vector<1x4x14xbf16> to vector<4x14xbf16>
    %cst_150 = arith.constant dense<0.000000e+00> : vector<4x224xf32>
    %174 = tpu.matmul %173, %154, %cst_150 {dimension_numbers = #tpu.dot_dimension_numbers<[1], [0], [0], [1], [0, 0, 1, 1], [], []>} : vector<4x14xbf16>, vector<14x224xbf16>, vector<4x224xf32> -> vector<4x224xf32>
    %175 = arith.truncf %174 : vector<4x224xf32> to vector<4x224xbf16>
    %c2_151 = arith.constant 2 : index
    %c0_152 = arith.constant 0 : index
    %c0_153 = arith.constant 0 : index
    %176 = vector.load %arg13[%c2_151, %c0_152, %c0_153] : memref<5x224x64xbf16, #tpu.memory_space<vmem>>, vector<1x224x64xbf16>
    %177 = vector.shape_cast %176 : vector<1x224x64xbf16> to vector<224x64xbf16>
    %cst_154 = arith.constant dense<0.000000e+00> : vector<4x64xf32>
    %178 = tpu.matmul %175, %177, %cst_154 {dimension_numbers = #tpu.dot_dimension_numbers<[1], [0], [0], [1], [0, 0, 1, 1], [], []>} : vector<4x224xbf16>, vector<224x64xbf16>, vector<4x64xf32> -> vector<4x64xf32>
    %179 = arith.addf %171, %178 : vector<4x64xf32>
    %c3_155 = arith.constant 3 : index
    %c0_156 = arith.constant 0 : index
    %c0_157 = arith.constant 0 : index
    %180 = vector.load %arg14[%c3_155, %c0_156, %c0_157] : memref<5x4x14xbf16, #tpu.memory_space<vmem>>, vector<1x4x14xbf16>
    %181 = vector.shape_cast %180 : vector<1x4x14xbf16> to vector<4x14xbf16>
    %cst_158 = arith.constant dense<0.000000e+00> : vector<4x224xf32>
    %182 = tpu.matmul %181, %154, %cst_158 {dimension_numbers = #tpu.dot_dimension_numbers<[1], [0], [0], [1], [0, 0, 1, 1], [], []>} : vector<4x14xbf16>, vector<14x224xbf16>, vector<4x224xf32> -> vector<4x224xf32>
    %183 = arith.truncf %182 : vector<4x224xf32> to vector<4x224xbf16>
    %c3_159 = arith.constant 3 : index
    %c0_160 = arith.constant 0 : index
    %c0_161 = arith.constant 0 : index
    %184 = vector.load %arg13[%c3_159, %c0_160, %c0_161] : memref<5x224x64xbf16, #tpu.memory_space<vmem>>, vector<1x224x64xbf16>
    %185 = vector.shape_cast %184 : vector<1x224x64xbf16> to vector<224x64xbf16>
    %cst_162 = arith.constant dense<0.000000e+00> : vector<4x64xf32>
    %186 = tpu.matmul %183, %185, %cst_162 {dimension_numbers = #tpu.dot_dimension_numbers<[1], [0], [0], [1], [0, 0, 1, 1], [], []>} : vector<4x224xbf16>, vector<224x64xbf16>, vector<4x64xf32> -> vector<4x64xf32>
    %187 = arith.addf %179, %186 : vector<4x64xf32>
    %c4_163 = arith.constant 4 : index
    %c0_164 = arith.constant 0 : index
    %c0_165 = arith.constant 0 : index
    %188 = vector.load %arg14[%c4_163, %c0_164, %c0_165] : memref<5x4x14xbf16, #tpu.memory_space<vmem>>, vector<1x4x14xbf16>
    %189 = vector.shape_cast %188 : vector<1x4x14xbf16> to vector<4x14xbf16>
    %cst_166 = arith.constant dense<0.000000e+00> : vector<4x224xf32>
    %190 = tpu.matmul %189, %154, %cst_166 {dimension_numbers = #tpu.dot_dimension_numbers<[1], [0], [0], [1], [0, 0, 1, 1], [], []>} : vector<4x14xbf16>, vector<14x224xbf16>, vector<4x224xf32> -> vector<4x224xf32>
    %191 = arith.truncf %190 : vector<4x224xf32> to vector<4x224xbf16>
    %c4_167 = arith.constant 4 : index
    %c0_168 = arith.constant 0 : index
    %c0_169 = arith.constant 0 : index
    %192 = vector.load %arg13[%c4_167, %c0_168, %c0_169] : memref<5x224x64xbf16, #tpu.memory_space<vmem>>, vector<1x224x64xbf16>
    %193 = vector.shape_cast %192 : vector<1x224x64xbf16> to vector<224x64xbf16>
    %cst_170 = arith.constant dense<0.000000e+00> : vector<4x64xf32>
    %194 = tpu.matmul %191, %193, %cst_170 {dimension_numbers = #tpu.dot_dimension_numbers<[1], [0], [0], [1], [0, 0, 1, 1], [], []>} : vector<4x224xbf16>, vector<224x64xbf16>, vector<4x64xf32> -> vector<4x64xf32>
    %195 = arith.addf %187, %194 : vector<4x64xf32>
    %cst_171 = arith.constant dense<0.000000e+00> : vector<64xf32>
    %196 = vector.multi_reduction <add>, %195, %cst_171 [0] : vector<4x64xf32> to vector<64xf32>
    %197 = vector.shape_cast %196 : vector<64xf32> to vector<1x64xf32>
    %198 = arith.mulf %195, %195 : vector<4x64xf32>
    %cst_172 = arith.constant dense<0.000000e+00> : vector<64xf32>
    %199 = vector.multi_reduction <add>, %198, %cst_172 [0] : vector<4x64xf32> to vector<64xf32>
    %200 = vector.shape_cast %199 : vector<64xf32> to vector<1x64xf32>
    %c0_173 = arith.constant 0 : index
    %c0_174 = arith.constant 0 : index
    %201 = vector.load %arg17[%c0_173, %c0_174] : memref<64x32xf32, #tpu.memory_space<vmem>>, vector<64x32xf32>
    %cst_175 = arith.constant dense<0.000000e+00> : vector<1x32xf32>
    %202 = tpu.matmul %197, %201, %cst_175 {dimension_numbers = #tpu.dot_dimension_numbers<[1], [0], [0], [1], [0, 0, 1, 1], [], []>} : vector<1x64xf32>, vector<64x32xf32>, vector<1x32xf32> -> vector<1x32xf32>
    %c0_176 = arith.constant 0 : index
    %c0_177 = arith.constant 0 : index
    %203 = vector.load %arg17[%c0_176, %c0_177] : memref<64x32xf32, #tpu.memory_space<vmem>>, vector<64x32xf32>
    %cst_178 = arith.constant dense<0.000000e+00> : vector<1x32xf32>
    %204 = tpu.matmul %200, %203, %cst_178 {dimension_numbers = #tpu.dot_dimension_numbers<[1], [0], [0], [1], [0, 0, 1, 1], [], []>} : vector<1x64xf32>, vector<64x32xf32>, vector<1x32xf32> -> vector<1x32xf32>
    %cst_179 = arith.constant 8.000000e+00 : f32
    %205 = vector.broadcast %cst_179 : f32 to vector<1x32xf32>
    %206 = arith.divf %202, %205 : vector<1x32xf32>
    %cst_180 = arith.constant 8.000000e+00 : f32
    %207 = vector.broadcast %cst_180 : f32 to vector<1x32xf32>
    %208 = arith.divf %204, %207 : vector<1x32xf32>
    %209 = arith.mulf %206, %206 : vector<1x32xf32>
    %210 = arith.subf %208, %209 : vector<1x32xf32>
    %cst_181 = arith.constant 9.99999974E-6 : f32
    %211 = vector.broadcast %cst_181 : f32 to vector<1x32xf32>
    %212 = arith.addf %210, %211 : vector<1x32xf32>
    %213 = math.rsqrt %212 : vector<1x32xf32>
    %c0_182 = arith.constant 0 : index
    %c0_183 = arith.constant 0 : index
    %214 = vector.load %arg15[%c0_182, %c0_183] : memref<1x32xf32, #tpu.memory_space<vmem>>, vector<1x32xf32>
    %215 = arith.mulf %214, %213 : vector<1x32xf32>
    %c0_184 = arith.constant 0 : index
    %c0_185 = arith.constant 0 : index
    %216 = vector.load %arg16[%c0_184, %c0_185] : memref<1x32xf32, #tpu.memory_space<vmem>>, vector<1x32xf32>
    %217 = arith.mulf %206, %215 : vector<1x32xf32>
    %218 = arith.subf %216, %217 : vector<1x32xf32>
    %c0_186 = arith.constant 0 : index
    %c0_187 = arith.constant 0 : index
    %219 = vector.load %arg18[%c0_186, %c0_187] : memref<32x64xf32, #tpu.memory_space<vmem>>, vector<32x64xf32>
    %cst_188 = arith.constant dense<0.000000e+00> : vector<1x64xf32>
    %220 = tpu.matmul %215, %219, %cst_188 {dimension_numbers = #tpu.dot_dimension_numbers<[1], [0], [0], [1], [0, 0, 1, 1], [], []>} : vector<1x32xf32>, vector<32x64xf32>, vector<1x64xf32> -> vector<1x64xf32>
    %c0_189 = arith.constant 0 : index
    %c0_190 = arith.constant 0 : index
    %221 = vector.load %arg18[%c0_189, %c0_190] : memref<32x64xf32, #tpu.memory_space<vmem>>, vector<32x64xf32>
    %cst_191 = arith.constant dense<0.000000e+00> : vector<1x64xf32>
    %222 = tpu.matmul %218, %221, %cst_191 {dimension_numbers = #tpu.dot_dimension_numbers<[1], [0], [0], [1], [0, 0, 1, 1], [], []>} : vector<1x32xf32>, vector<32x64xf32>, vector<1x64xf32> -> vector<1x64xf32>
    %223 = vector.broadcast %220 : vector<1x64xf32> to vector<4x64xf32>
    %224 = arith.mulf %195, %223 : vector<4x64xf32>
    %225 = vector.broadcast %222 : vector<1x64xf32> to vector<4x64xf32>
    %226 = arith.addf %224, %225 : vector<4x64xf32>
    %cst_192 = arith.constant 0.000000e+00 : f32
    %227 = vector.broadcast %cst_192 : f32 to vector<4x64xf32>
    %228 = arith.maximumf %226, %227 : vector<4x64xf32>
    %229 = arith.truncf %228 : vector<4x64xf32> to vector<4x64xbf16>
    %c0_193 = arith.constant 0 : index
    %c0_194 = arith.constant 0 : index
    %230 = vector.load %arg25[%c0_193, %c0_194] : memref<4x64xbf16, #tpu.memory_space<vmem>>, vector<4x64xbf16>
    tpu.vector_store %arg25[%c0_193, %c0_194], %229 {strides = array<i32>} : memref<4x64xbf16, #tpu.memory_space<vmem>>, vector<4x64xbf16>,
    %c0_195 = arith.constant 0 : index
    %c0_196 = arith.constant 0 : index
    %231 = vector.load %arg25[%c0_195, %c0_196] : memref<4x64xbf16, #tpu.memory_space<vmem>>, vector<4x64xbf16>
    %cst_197 = arith.constant 0.000000e+00 : f32
    %232 = vector.broadcast %cst_197 : f32 to vector<2x9xf32>
    %c0_198 = arith.constant 0 : index
    %c0_199 = arith.constant 0 : index
    %233 = vector.load %arg20[%c0_198, %c0_199] : memref<1x9xf32, #tpu.memory_space<vmem>>, vector<1x9xf32>
    %234 = vector.broadcast %233 : vector<1x9xf32> to vector<2x9xf32>
    %235 = arith.addf %232, %234 : vector<2x9xf32>
    %c0_200 = arith.constant 0 : index
    %c0_201 = arith.constant 0 : index
    %c0_202 = arith.constant 0 : index
    %236 = vector.load %arg21[%c0_200, %c0_201, %c0_202] : memref<2x2x4xbf16, #tpu.memory_space<vmem>>, vector<1x2x4xbf16>
    %237 = vector.shape_cast %236 : vector<1x2x4xbf16> to vector<2x4xbf16>
    %cst_203 = arith.constant dense<0.000000e+00> : vector<2x64xf32>
    %238 = tpu.matmul %237, %231, %cst_203 {dimension_numbers = #tpu.dot_dimension_numbers<[1], [0], [0], [1], [0, 0, 1, 1], [], []>} : vector<2x4xbf16>, vector<4x64xbf16>, vector<2x64xf32> -> vector<2x64xf32>
    %239 = arith.truncf %238 : vector<2x64xf32> to vector<2x64xbf16>
    %c0_204 = arith.constant 0 : index
    %c0_205 = arith.constant 0 : index
    %c0_206 = arith.constant 0 : index
    %240 = vector.load %arg19[%c0_204, %c0_205, %c0_206] : memref<2x64x9xbf16, #tpu.memory_space<vmem>>, vector<1x64x9xbf16>
    %241 = vector.shape_cast %240 : vector<1x64x9xbf16> to vector<64x9xbf16>
    %cst_207 = arith.constant dense<0.000000e+00> : vector<2x9xf32>
    %242 = tpu.matmul %239, %241, %cst_207 {dimension_numbers = #tpu.dot_dimension_numbers<[1], [0], [0], [1], [0, 0, 1, 1], [], []>} : vector<2x64xbf16>, vector<64x9xbf16>, vector<2x9xf32> -> vector<2x9xf32>
    %243 = arith.addf %235, %242 : vector<2x9xf32>
    %c1_208 = arith.constant 1 : index
    %c0_209 = arith.constant 0 : index
    %c0_210 = arith.constant 0 : index
    %244 = vector.load %arg21[%c1_208, %c0_209, %c0_210] : memref<2x2x4xbf16, #tpu.memory_space<vmem>>, vector<1x2x4xbf16>
    %245 = vector.shape_cast %244 : vector<1x2x4xbf16> to vector<2x4xbf16>
    %cst_211 = arith.constant dense<0.000000e+00> : vector<2x64xf32>
    %246 = tpu.matmul %245, %231, %cst_211 {dimension_numbers = #tpu.dot_dimension_numbers<[1], [0], [0], [1], [0, 0, 1, 1], [], []>} : vector<2x4xbf16>, vector<4x64xbf16>, vector<2x64xf32> -> vector<2x64xf32>
    %247 = arith.truncf %246 : vector<2x64xf32> to vector<2x64xbf16>
    %c1_212 = arith.constant 1 : index
    %c0_213 = arith.constant 0 : index
    %c0_214 = arith.constant 0 : index
    %248 = vector.load %arg19[%c1_212, %c0_213, %c0_214] : memref<2x64x9xbf16, #tpu.memory_space<vmem>>, vector<1x64x9xbf16>
    %249 = vector.shape_cast %248 : vector<1x64x9xbf16> to vector<64x9xbf16>
    %cst_215 = arith.constant dense<0.000000e+00> : vector<2x9xf32>
    %250 = tpu.matmul %247, %249, %cst_215 {dimension_numbers = #tpu.dot_dimension_numbers<[1], [0], [0], [1], [0, 0, 1, 1], [], []>} : vector<2x64xbf16>, vector<64x9xbf16>, vector<2x9xf32> -> vector<2x9xf32>
    %251 = arith.addf %243, %250 : vector<2x9xf32>
    %252 = vector.extract_strided_slice %251 {offsets = [0, 0], sizes = [2, 1], strides = [1, 1]} : vector<2x9xf32> to vector<2x1xf32>
    %253 = vector.extract_strided_slice %251 {offsets = [0, 1], sizes = [2, 8], strides = [1, 1]} : vector<2x9xf32> to vector<2x8xf32>
    %254 = vector.shape_cast %253 : vector<2x8xf32> to vector<1x2x8xf32>
    %cst_216 = arith.constant dense<0.000000e+00> : vector<1xf32>
    %255 = vector.multi_reduction <add>, %254, %cst_216 [1, 2] : vector<1x2x8xf32> to vector<1xf32>
    %256 = vector.shape_cast %255 : vector<1xf32> to vector<1x1x1xf32>
    %257 = vector.extract %256[0, 0, 0] : f32 from vector<1x1x1xf32>
    %cst_217 = arith.constant 1.600000e+01 : f32
    %258 = arith.divf %257, %cst_217 : f32
    %259 = vector.broadcast %252 : vector<2x1xf32> to vector<2x8xf32>
    %260 = arith.addf %259, %253 : vector<2x8xf32>
    %261 = vector.broadcast %258 : f32 to vector<2x8xf32>
    %262 = arith.subf %260, %261 : vector<2x8xf32>
    %c0_218 = arith.constant 0 : index
    %c0_219 = arith.constant 0 : index
    %263 = vector.load %arg22[%c0_218, %c0_219] : memref<2x8xf32, #tpu.memory_space<vmem>>, vector<2x8xf32>
    tpu.vector_store %arg22[%c0_218, %c0_219], %262 {strides = array<i32>} : memref<2x8xf32, #tpu.memory_space<vmem>>, vector<2x8xf32>,
    return
  }
}

</mosaic_0001>

<bundles_post_ra>
// kernel: tile.19
= control target key start
LH: loop header
LB: loop body
LE: loop exit
PB: predicated region body
PF: predicated region fallthrough
CT: control target
= control target key end

     0   :  { %vm4_vm0 = vcmask 1047556   ;;  %s523_s14 = smov 112   ;;  %s524_s27 = smov 96   ;;  %vm6_vm1 = vcmask 130048   ;;  %vm89_vm2 = vcmask 1048448   ;;  %vm132_vm3 = vcmask 917248   ;;  %s982_s0 = inlined_call_operand.vmem [shape: f32[18,16,16], index: 0, kind: input, shape index: {}]   ;;  %s983_s1 = inlined_call_operand.vmem [shape: f32[288,16], index: 1, kind: output, shape index: {}]  }
   0x1   :  { %v438_v0 = vld [vmem:[%s982_s0 + $0xf] ss:$24 sm:$0xf]   ;;  %v444_v10 = vld [vmem:[%s982_s0 + $0x6] ss:$24 sm:$0xf]  }
   0x2   :  { %v439_v1 = vld [vmem:[%s982_s0 + $0xf] ss:$24 sm:$0xf0]   ;;  %v445_v11 = vld [vmem:[%s982_s0 + $0x6] ss:$24 sm:$0xf0]  }
   0x3   :  { %v107_v2 = vsel %vm4_vm0, %v439_v1, %v438_v0  ;;  %v433_v3 = vld [vmem:[%s982_s0 + $0x7] ss:$24 sm:$0xf]   ;;  %v129_v13 = vsel %vm4_vm0, %v445_v11, %v444_v10  ;;  %v446_v15 = vld [vmem:[%s982_s0 + $0xce] ss:$24 sm:$0xf]  }
   0x4   :  { %v434_v4 = vld [vmem:[%s982_s0 + $0x7] ss:$24 sm:$0xf0]   ;;  %108 = vrot.lane.b32.xlu1 %v107_v2, %s523_s14  ;;  %130 = vrot.lane.b32.xlu2 %v129_v13, %s524_s27  ;;  %v447_v16 = vld [vmem:[%s982_s0 + $0xce] ss:$24 sm:$0xf0]  }
   0x5   :  { %v86_v5 = vsel %vm4_vm0, %v434_v4, %v433_v3  ;;  %v441_v6 = vld [vmem:[%s982_s0 + $0xc7] ss:$24 sm:$0xf]   ;;  %v452_v17 = vld [vmem:[%s982_s0 + $0xc6] ss:$24 sm:$0xf]   ;;  %v139_v21 = vsel %vm4_vm0, %v447_v16, %v446_v15 }
   0x6   :  { %87 = vrot.lane.b32.xlu0 %v86_v5, %s523_s14  ;;  %v442_v7 = vld [vmem:[%s982_s0 + $0xc7] ss:$24 sm:$0xf0]   ;;  %v453_v18 = vld [vmem:[%s982_s0 + $0xc6] ss:$24 sm:$0xf0]  }
   0x7   :  { %v435_v8 = vld [vmem:[%s982_s0 + $0xcf] ss:$24 sm:$0xf]   ;;  %v118_v12 = vsel %vm4_vm0, %v442_v7, %v441_v6  ;;  %v449_v19 = vld [vmem:[%s982_s0 + $0xe] ss:$24 sm:$0xf]   ;;  %v161_v22 = vsel %vm4_vm0, %v453_v18, %v452_v17 }
   0x8   :  { %v436_v9 = vld [vmem:[%s982_s0 + $0xcf] ss:$24 sm:$0xf0]   ;;  %v450_v20 = vld [vmem:[%s982_s0 + $0xe] ss:$24 sm:$0xf0]  }
   0x9   :  { %v96_v14 = vsel %vm4_vm0, %v436_v9, %v435_v8  ;;  %v150_v23 = vsel %vm4_vm0, %v450_v20, %v449_v19  ;;  %v455_v24 = vld [vmem:[%s982_s0 + $0x5] ss:$24 sm:$0xf]   ;;  %s525_s23 = smov 80   ;;  %s526_s7 = smov 64   ;;  %vm175_vm4 = vcmask 786048  }
   0xa   :  { %v456_v25 = vld [vmem:[%s982_s0 + $0x5] ss:$24 sm:$0xf0]   ;;  %v468_v35 = vld [vmem:[%s982_s0 + $0xcc] ss:$24 sm:$0xf]  }
   0xb   :  { %v460_v26 = vld [vmem:[%s982_s0 + $0xd] ss:$24 sm:$0xf]   ;;  %v172_v30 = vsel %vm4_vm0, %v456_v25, %v455_v24  ;;  %v469_v36 = vld [vmem:[%s982_s0 + $0xcc] ss:$24 sm:$0xf0]  }
   0xc   :  { %119 = vrot.lane.b32.xlu1 %v118_v12, %s523_s14  ;;  %140 = vrot.lane.b32.xlu2 %v139_v21, %s524_s27  ;;  %v461_v27 = vld [vmem:[%s982_s0 + $0xd] ss:$24 sm:$0xf0]   ;;  %v466_v37 = vld [vmem:[%s982_s0 + $0x4] ss:$24 sm:$0xf]   ;;  %v225_v40 = vsel %vm4_vm0, %v469_v36, %v468_v35 }
   0xd   :  { %v457_v28 = vld [vmem:[%s982_s0 + $0xcd] ss:$24 sm:$0xf]   ;;  %v193_v31 = vsel %vm4_vm0, %v461_v27, %v460_v26  ;;  %v467_v38 = vld [vmem:[%s982_s0 + $0x4] ss:$24 sm:$0xf0]  }
   0xe   :  { %97 = vrot.lane.b32.xlu0 %v96_v14, %s523_s14  ;;  %v458_v29 = vld [vmem:[%s982_s0 + $0xcd] ss:$24 sm:$0xf0]   ;;  %v215_v41 = vsel %vm4_vm0, %v467_v38, %v466_v37  ;;  %v471_v42 = vld [vmem:[%s982_s0 + $0xc] ss:$24 sm:$0xf]  }
   0xf   :  { %v182_v32 = vsel %vm4_vm0, %v458_v29, %v457_v28  ;;  %v463_v33 = vld [vmem:[%s982_s0 + $0xc5] ss:$24 sm:$0xf]   ;;  %v472_v43 = vld [vmem:[%s982_s0 + $0xc] ss:$24 sm:$0xf0]  }
  0x10   :  { %v464_v34 = vld [vmem:[%s982_s0 + $0xc5] ss:$24 sm:$0xf0]   ;;  %v477_v44 = vld [vmem:[%s982_s0 + $0x3] ss:$24 sm:$0xf]   ;;  %v236_v48 = vsel %vm4_vm0, %v472_v43, %v471_v42 }
  0x11   :  { %v204_v39 = vsel %vm4_vm0, %v464_v34, %v463_v33  ;;  %v478_v45 = vld [vmem:[%s982_s0 + $0x3] ss:$24 sm:$0xf0]   ;;  %v474_v46 = vld [vmem:[%s982_s0 + $0xc4] ss:$24 sm:$0xf]  }
  0x12   :  { %v475_v47 = vld [vmem:[%s982_s0 + $0xc4] ss:$24 sm:$0xf0]   ;;  %v258_v49 = vsel %vm4_vm0, %v478_v45, %v477_v44  ;;  %s527_s20 = smov 48   ;;  %s528_s16 = smov 32   ;;  %vm218_vm5 = vcmask 654848  }
  0x13   :  { %v247_v50 = vsel %vm4_vm0, %v475_v47, %v474_v46  ;;  %v479_v51 = vld [vmem:[%s982_s0 + $0xcb] ss:$24 sm:$0xf]   ;;  %v488_v60 = vld [vmem:[%s982_s0 + $0x2] ss:$24 sm:$0xf]  }
  0x14   :  { %162 = vrot.lane.b32.xlu1 %v161_v22, %s524_s27  ;;  %173 = vrot.lane.b32.xlu2 %v172_v30, %s525_s23  ;;  %v480_v52 = vld [vmem:[%s982_s0 + $0xcb] ss:$24 sm:$0xf0]   ;;  %v489_v61 = vld [vmem:[%s982_s0 + $0x2] ss:$24 sm:$0xf0]  }
  0x15   :  { %v485_v53 = vld [vmem:[%s982_s0 + $0xc3] ss:$24 sm:$0xf]   ;;  %v268_v57 = vsel %vm4_vm0, %v480_v52, %v479_v51  ;;  %v493_v62 = vld [vmem:[%s982_s0 + $0xa] ss:$24 sm:$0xf]   ;;  %v301_v2 = vsel %vm4_vm0, %v489_v61, %v488_v60 }
  0x16   :  { %151 = vrot.lane.b32.xlu0 %v150_v23, %s524_s27  ;;  %v486_v54 = vld [vmem:[%s982_s0 + $0xc3] ss:$24 sm:$0xf0]   ;;  %v494_v63 = vld [vmem:[%s982_s0 + $0xa] ss:$24 sm:$0xf0]  }
  0x17   :  { %v482_v55 = vld [vmem:[%s982_s0 + $0xb] ss:$24 sm:$0xf]   ;;  %v290_v58 = vsel %vm4_vm0, %v486_v54, %v485_v53  ;;  %v490_v0 = vld [vmem:[%s982_s0 + $0xca] ss:$24 sm:$0xf]   ;;  %v322_v3 = vsel %vm4_vm0, %v494_v63, %v493_v62 }
  0x18   :  { %v483_v56 = vld [vmem:[%s982_s0 + $0xb] ss:$24 sm:$0xf0]   ;;  %v491_v1 = vld [vmem:[%s982_s0 + $0xca] ss:$24 sm:$0xf0]  }
  0x19   :  { %v279_v59 = vsel %vm4_vm0, %v483_v56, %v482_v55  ;;  %v311_v4 = vsel %vm4_vm0, %v491_v1, %v490_v0  ;;  %v496_v5 = vld [vmem:[%s982_s0 + $0xc2] ss:$24 sm:$0xf]   ;;  %v501_v7 = vld [vmem:[%s982_s0 + $0xc9] ss:$24 sm:$0xf]  }
  0x1a   :  { %v497_v6 = vld [vmem:[%s982_s0 + $0xc2] ss:$24 sm:$0xf0]   ;;  %v502_v8 = vld [vmem:[%s982_s0 + $0xc9] ss:$24 sm:$0xf0]  }
  0x1b   :  { %v499_v9 = vld [vmem:[%s982_s0 + $0x1] ss:$24 sm:$0xf]   ;;  %v333_v11 = vsel %vm4_vm0, %v497_v6, %v496_v5  ;;  %v354_v12 = vsel %vm4_vm0, %v502_v8, %v501_v7  ;;  %s529_s4 = smov 16   ;;  %vm261_vm6 = vcmask 523648   ;;  %vm304_vm7 = vcmask 392448  }
  0x1c   :  { %194 = vrot.lane.b32.xlu1 %v193_v31, %s525_s23  ;;  %205 = vrot.lane.b32.xlu2 %v204_v39, %s525_s23  ;;  %v500_v10 = vld [vmem:[%s982_s0 + $0x1] ss:$24 sm:$0xf0]   ;;  %v406_v16 = vld [vmem:[%s982_s0 + $0x40] ss:$8 sm:$0xf]  }
  0x1d   :  { %v344_v13 = vsel %vm4_vm0, %v500_v10, %v499_v9  ;;  %v504_v14 = vld [vmem:[%s982_s0 + $0x9] ss:$24 sm:$0xf]   ;;  %v407_v17 = vld [vmem:[%s982_s0 + $0x40] ss:$8 sm:$0xf0]  }
  0x1e   :  { %183 = vrot.lane.b32.xlu0 %v182_v32, %s525_s23  ;;  %v505_v15 = vld [vmem:[%s982_s0 + $0x9] ss:$24 sm:$0xf0]   ;;  %v17_v20 = vsel %vm4_vm0, %v407_v17, %v406_v16  ;;  %v422_v29 = vld [vmem:[%s982_s0 + $0x100] ss:$8 sm:$0xf]  }
  0x1f   :  { %v510_v18 = vld [vmem:[%s982_s0 + $0x11] ss:$24 sm:$0xf]   ;;  %408 = vst.msk [vmem:[%s983_s1 + $0x12] ss:$-15 sm:$0x3] %vm6_vm1, %v17_v20   ;;  %v365_v23 = vsel %vm4_vm0, %v505_v15, %v504_v14 }
  0x20   :  { %v511_v19 = vld [vmem:[%s982_s0 + $0x11] ss:$24 sm:$0xf0]   ;;  %411 = vst.msk [vmem:[%s983_s1 - $0x2] sm:$0x80] %vm6_vm1, %v17_v20   ;;  %vm347_vm8 = vcmask 261248  }
  0x21   :  { %v507_v21 = vld [vmem:[%s982_s0 + $0xd1] ss:$24 sm:$0xf]   ;;  %409 = vst.msk [vmem:[%s983_s1 - $0x5] ss:$8 sm:$0xc] %vm6_vm1, %v17_v20   ;;  %v387_v24 = vsel %vm4_vm0, %v511_v19, %v510_v18 }
  0x22   :  { %v508_v22 = vld [vmem:[%s982_s0 + $0xd1] ss:$24 sm:$0xf0]   ;;  %410 = vst.msk [vmem:[%s983_s1 - $0x1c] ss:$8 sm:$0x70] %vm6_vm1, %v17_v20  }
  0x23   :  { %v376_v25 = vsel %vm4_vm0, %v508_v22, %v507_v21  ;;  %v513_v26 = vld [vmem:[%s982_s0 + $0xc1] ss:$24 sm:$0xf]   ;;  %v423_v30 = vld [vmem:[%s982_s0 + $0x100] ss:$8 sm:$0xf0]  }
  0x24   :  { %226 = vrot.lane.b32.xlu1 %v225_v40, %s526_s7  ;;  %237 = vrot.lane.b32.xlu2 %v236_v48, %s526_s7  ;;  %v514_v27 = vld [vmem:[%s982_s0 + $0xc1] ss:$24 sm:$0xf0]   ;;  %v58_v31 = vsel %vm4_vm0, %v423_v30, %v422_v29  ;;  %v428_v32 = vld [vmem:[%s982_s0 + $0x140] ss:$8 sm:$0xf]  }
  0x25   :  { %v398_v28 = vsel %vm4_vm0, %v514_v27, %v513_v26  ;;  %v429_v33 = vld [vmem:[%s982_s0 + $0x140] ss:$8 sm:$0xf0]   ;;  %425 = vst.msk [vmem:[%s983_s1 + $0x13] ss:$8 sm:$0xc] %vm6_vm1, %v58_v31  }
  0x26   :  { %216 = vrot.lane.b32.xlu0 %v215_v41, %s526_s7  ;;  %v73_v34 = vsel %vm4_vm0, %v429_v33, %v428_v32  ;;  %v2_v35 = vld [vmem:[%s982_s0] ss:$8 sm:$0xf]   ;;  %424 = vst.msk [vmem:[%s983_s1 + $0x2a] ss:$-15 sm:$0x3] %vm6_vm1, %v58_v31  }
  0x27   :  { %430 = vst.msk [vmem:[%s983_s1 + $0x25] ss:$8 sm:$0x3] %vm6_vm1, %v73_v34   ;;  %v3_v36 = vld [vmem:[%s982_s0] ss:$8 sm:$0xf0]  }
  0x28   :  { %426 = vst.msk [vmem:[%s983_s1 - $0x4] ss:$8 sm:$0x70] %vm6_vm1, %v58_v31   ;;  %v412_v37 = vld [vmem:[%s982_s0 + $0x80] ss:$8 sm:$0xf]   ;;  %v5_v38 = vsel %vm4_vm0, %v3_v36, %v2_v35 }
  0x29   :  { %427 = vst.msk [vmem:[%s983_s1 + $0x16] sm:$0x80] %vm6_vm1, %v58_v31   ;;  %v413_v39 = vld [vmem:[%s982_s0 + $0x80] ss:$8 sm:$0xf0]  }
  0x2a   :  { %431 = vst.msk [vmem:[%s983_s1 + $0xe] ss:$8 sm:$0x1c] %vm6_vm1, %v73_v34   ;;  %v417_v40 = vld [vmem:[%s982_s0 + $0xc0] ss:$8 sm:$0xf]   ;;  %v32_v41 = vsel %vm4_vm0, %v413_v39, %v412_v37 }
  0x2b   :  { %432 = vst.msk [vmem:[%s983_s1 - $0x9] ss:$8 sm:$0xe0] %vm6_vm1, %v73_v34   ;;  %v418_v42 = vld [vmem:[%s982_s0 + $0xc0] ss:$8 sm:$0xf0]  }
  0x2c   :  { %259 = vrot.lane.b32.xlu1 %v258_v49, %s527_s20  ;;  %269 = vrot.lane.b32.xlu2 %v268_v57, %s527_s20  ;;  %7 = vst.msk [vmem:[%s983_s1] ss:$8 sm:$0x7] %vm6_vm1, %v5_v38   ;;  %v45_v43 = vsel %vm4_vm0, %v418_v42, %v417_v40 }
  0x2d   :  { %404 = vst.msk [vmem:[%s983_s1 - $0x17] ss:$8 sm:$0x38] %vm6_vm1, %v5_v38  }
  0x2e   :  { %248 = vrot.lane.b32.xlu0 %v247_v50, %s526_s7  ;;  %405 = vst.msk [vmem:[%s983_s1 - $0x2e] ss:$8 sm:$0xc0] %vm6_vm1, %v5_v38  }
  0x2f   :  { %415 = vst.msk [vmem:[%s983_s1 - $0xa] ss:$8 sm:$0x1c] %vm6_vm1, %v32_v41  }
  0x30   :  { %416 = vst.msk [vmem:[%s983_s1 - $0x21] ss:$8 sm:$0xe0] %vm6_vm1, %v32_v41  }
  0x31   :  { %414 = vst.msk [vmem:[%s983_s1 + $0xd] ss:$8 sm:$0x3] %vm6_vm1, %v32_v41  }
  0x32   :  { %419 = vst.msk [vmem:[%s983_s1 + $0x18] ss:$8 sm:$0x7] %vm6_vm1, %v45_v43  }
  0x33   :  { %420 = vst.msk [vmem:[%s983_s1 + $0x1] ss:$8 sm:$0x38] %vm6_vm1, %v45_v43  }
  0x34   :  { %291 = vrot.lane.b32.xlu1 %v290_v58, %s527_s20  ;;  %302 = vrot.lane.b32.xlu2 %v301_v2, %s528_s16  ;;  %421 = vst.msk [vmem:[%s983_s1 - $0x16] ss:$8 sm:$0xc0] %vm6_vm1, %v45_v43  }
  0x36   :  { %280 = vrot.lane.b32.xlu0 %v279_v59, %s527_s20 }
  0x3c   :  { %323 = vrot.lane.b32.xlu1 %v322_v3, %s528_s16  ;;  %334 = vrot.lane.b32.xlu2 %v333_v11, %s528_s16 }
  0x3e   :  { %312 = vrot.lane.b32.xlu0 %v311_v4, %s528_s16 }
  0x44   :  { %355 = vrot.lane.b32.xlu1 %v354_v12, %s529_s4  ;;  %366 = vrot.lane.b32.xlu2 %v365_v23, %s529_s4 }
  0x46   :  { %345 = vrot.lane.b32.xlu0 %v344_v13, %s529_s4 }
  0x4c   :  { %388 = vrot.lane.b32.xlu1 %v387_v24, %s529_s4  ;;  %399 = vrot.lane.b32.xlu2 %v398_v28, %s529_s4 }
  0x4e   :  { %377 = vrot.lane.b32.xlu0 %v376_v25, %s529_s4 }
  0x5e   :  { %v131_v44 = vpop.permute.xlu2 %130  }
  0x66   :  { %v141_v45 = vpop.permute.xlu2 %140  }
  0x6e   :  { %v174_v46 = vpop.permute.xlu2 %173  }
  0x76   :  { %v109_v47 = vpop.permute.xlu1 %108   ;;  %v206_v49 = vpop.permute.xlu2 %205  }
  0x77   :  { %440 = vst.msk [vmem:[%s983_s1 + $0x8] sm:$0xff] %vm89_vm2, %v109_v47  }
  0x78   :  { %v88_v48 = vpop.permute.xlu0 %87  }
  0x79   :  { %90 = vst.msk [vmem:[%s983_s1] sm:$0xff] %vm89_vm2, %v88_v48  }
  0x7a   :  { %133 = vst.msk [vmem:[%s983_s1] sm:$0xff] %vm132_vm3, %v131_v44  }
  0x7b   :  { %176 = vst.msk [vmem:[%s983_s1] sm:$0xff] %vm175_vm4, %v174_v46  }
  0x7e   :  { %v120_v50 = vpop.permute.xlu1 %119   ;;  %v238_v52 = vpop.permute.xlu2 %237  }
  0x7f   :  { %443 = vst.msk [vmem:[%s983_s1 + $0x18] sm:$0xff] %vm89_vm2, %v120_v50  }
  0x80   :  { %v98_v51 = vpop.permute.xlu0 %97  }
  0x81   :  { %437 = vst.msk [vmem:[%s983_s1 + $0x20] sm:$0xff] %vm89_vm2, %v98_v51  }
  0x82   :  { %448 = vst.msk [vmem:[%s983_s1 + $0x20] sm:$0xff] %vm132_vm3, %v141_v45  }
  0x86   :  { %v163_v53 = vpop.permute.xlu1 %162   ;;  %v270_v55 = vpop.permute.xlu2 %269  }
  0x87   :  { %454 = vst.msk [vmem:[%s983_s1 + $0x18] sm:$0xff] %vm132_vm3, %v163_v53  }
  0x88   :  { %v152_v54 = vpop.permute.xlu0 %151   ;;  %465 = vst.msk [vmem:[%s983_s1 + $0x18] sm:$0xff] %vm175_vm4, %v206_v49  }
  0x89   :  { %451 = vst.msk [vmem:[%s983_s1 + $0x8] sm:$0xff] %vm132_vm3, %v152_v54  }
  0x8e   :  { %v195_v56 = vpop.permute.xlu1 %194   ;;  %v303_v58 = vpop.permute.xlu2 %302  }
  0x8f   :  { %462 = vst.msk [vmem:[%s983_s1 + $0x8] sm:$0xff] %vm175_vm4, %v195_v56  }
  0x90   :  { %v184_v57 = vpop.permute.xlu0 %183   ;;  %473 = vst.msk [vmem:[%s983_s1 + $0x8] sm:$0xff] %vm218_vm5, %v238_v52  }
  0x91   :  { %459 = vst.msk [vmem:[%s983_s1 + $0x20] sm:$0xff] %vm175_vm4, %v184_v57  }
  0x96   :  { %v227_v59 = vpop.permute.xlu1 %226   ;;  %v335_v61 = vpop.permute.xlu2 %334  }
  0x97   :  { %470 = vst.msk [vmem:[%s983_s1 + $0x20] sm:$0xff] %vm218_vm5, %v227_v59  }
  0x98   :  { %v217_v60 = vpop.permute.xlu0 %216   ;;  %481 = vst.msk [vmem:[%s983_s1 + $0x20] sm:$0xff] %vm261_vm6, %v270_v55  }
  0x99   :  { %219 = vst.msk [vmem:[%s983_s1] sm:$0xff] %vm218_vm5, %v217_v60  }
  0x9e   :  { %v260_v62 = vpop.permute.xlu1 %259   ;;  %v367_v0 = vpop.permute.xlu2 %366  }
  0x9f   :  { %262 = vst.msk [vmem:[%s983_s1] sm:$0xff] %vm261_vm6, %v260_v62  }
  0xa0   :  { %v249_v63 = vpop.permute.xlu0 %248   ;;  %305 = vst.msk [vmem:[%s983_s1] sm:$0xff] %vm304_vm7, %v303_v58  }
  0xa1   :  { %476 = vst.msk [vmem:[%s983_s1 + $0x18] sm:$0xff] %vm218_vm5, %v249_v63  }
  0xa6   :  { %v292_v1 = vpop.permute.xlu1 %291   ;;  %v400_v3 = vpop.permute.xlu2 %399  }
  0xa7   :  { %487 = vst.msk [vmem:[%s983_s1 + $0x18] sm:$0xff] %vm261_vm6, %v292_v1  }
  0xa8   :  { %v281_v2 = vpop.permute.xlu0 %280   ;;  %498 = vst.msk [vmem:[%s983_s1 + $0x18] sm:$0xff] %vm304_vm7, %v335_v61  }
  0xa9   :  { %484 = vst.msk [vmem:[%s983_s1 + $0x8] sm:$0xff] %vm261_vm6, %v281_v2  }
  0xaa   :  { %515 = vst.msk [vmem:[%s983_s1 + $0x18] sm:$0xff] %vm347_vm8, %v400_v3  }
  0xae   :  { %v324_v4 = vpop.permute.xlu1 %323  }
  0xaf   :  { %495 = vst.msk [vmem:[%s983_s1 + $0x8] sm:$0xff] %vm304_vm7, %v324_v4  }
  0xb0   :  { %v313_v5 = vpop.permute.xlu0 %312   ;;  %506 = vst.msk [vmem:[%s983_s1 + $0x8] sm:$0xff] %vm347_vm8, %v367_v0  }
  0xb1   :  { %492 = vst.msk [vmem:[%s983_s1 + $0x20] sm:$0xff] %vm304_vm7, %v313_v5  }
  0xb6   :  { %v356_v6 = vpop.permute.xlu1 %355  }
  0xb7   :  { %503 = vst.msk [vmem:[%s983_s1 + $0x20] sm:$0xff] %vm347_vm8, %v356_v6  }
  0xb8   :  { %v346_v7 = vpop.permute.xlu0 %345  }
  0xb9   :  { %348 = vst.msk [vmem:[%s983_s1] sm:$0xff] %vm347_vm8, %v346_v7  }
  0xbe   :  { %v389_v8 = vpop.permute.xlu1 %388  }
  0xbf   :  { %512 = vst.msk [vmem:[%s983_s1 + $0x10] sm:$0xff] %vm347_vm8, %v389_v8  }
  0xc0   :  { %v378_v9 = vpop.permute.xlu0 %377  }
  0xc1   :  { %509 = vst.msk [vmem:[%s983_s1 + $0x28] sm:$0xff] %vm347_vm8, %v378_v9  }

// kernel: tile.24
= control target key start
LH: loop header
LB: loop body
LE: loop exit
PB: predicated region body
PF: predicated region fallthrough
CT: control target
= control target key end

     0   :  { %vm92_vm0 = vcmask 1047556   ;;  %s403_s14 = smov 96   ;;  %s404_s27 = smov 64   ;;  %vm3_vm1 = vcmask 261120   ;;  %vm96_vm2 = vcmask 1048320   ;;  %vm139_vm3 = vcmask 785920   ;;  %s796_s0 = inlined_call_operand.vmem [shape: f32[7,32,32], index: 0, kind: input, shape index: {}]   ;;  %s797_s1 = inlined_call_operand.vmem [shape: f32[224,32], index: 1, kind: output, shape index: {}]  }
   0x1   :  { %v348_v0 = vld [vmem:[%s796_s0 + $0x43] ss:$8 sm:$0xf]   ;;  %v354_v12 = vld [vmem:[%s796_s0 + $0x2] ss:$8 sm:$0xf]  }
   0x2   :  { %v349_v1 = vld [vmem:[%s796_s0 + $0x43] ss:$8 sm:$0xf0]   ;;  %v355_v13 = vld [vmem:[%s796_s0 + $0x2] ss:$8 sm:$0xf0]  }
   0x3   :  { %v114_v2 = vsel %vm92_vm0, %v349_v1, %v348_v0  ;;  %v343_v3 = vld [vmem:[%s796_s0 + $0x3] ss:$8 sm:$0xf]   ;;  %v136_v14 = vsel %vm92_vm0, %v355_v13, %v354_v12  ;;  %v362_v15 = vld [vmem:[%s796_s0 + $0x86] ss:$8 sm:$0xf]  }
   0x4   :  { %v344_v4 = vld [vmem:[%s796_s0 + $0x3] ss:$8 sm:$0xf0]   ;;  %115 = vrot.lane.b32.xlu1 %v114_v2, %s403_s14  ;;  %137 = vrot.lane.b32.xlu2 %v136_v14, %s404_s27  ;;  %v363_v16 = vld [vmem:[%s796_s0 + $0x86] ss:$8 sm:$0xf0]  }
   0x5   :  { %v93_v5 = vsel %vm92_vm0, %v344_v4, %v343_v3  ;;  %v351_v6 = vld [vmem:[%s796_s0 + $0xc3] ss:$8 sm:$0xf]   ;;  %v356_v17 = vld [vmem:[%s796_s0 + $0x82] ss:$8 sm:$0xf]   ;;  %v168_v21 = vsel %vm92_vm0, %v363_v16, %v362_v15 }
   0x6   :  { %94 = vrot.lane.b32.xlu0 %v93_v5, %s403_s14  ;;  %v352_v7 = vld [vmem:[%s796_s0 + $0xc3] ss:$8 sm:$0xf0]   ;;  %v357_v18 = vld [vmem:[%s796_s0 + $0x82] ss:$8 sm:$0xf0]  }
   0x7   :  { %v345_v8 = vld [vmem:[%s796_s0 + $0x83] ss:$8 sm:$0xf]   ;;  %v125_v10 = vsel %vm92_vm0, %v352_v7, %v351_v6  ;;  %v359_v19 = vld [vmem:[%s796_s0 + $0x6] ss:$8 sm:$0xf]   ;;  %v146_v22 = vsel %vm92_vm0, %v357_v18, %v356_v17 }
   0x8   :  { %v346_v9 = vld [vmem:[%s796_s0 + $0x83] ss:$8 sm:$0xf0]   ;;  %v360_v20 = vld [vmem:[%s796_s0 + $0x6] ss:$8 sm:$0xf0]  }
   0x9   :  { %v103_v11 = vsel %vm92_vm0, %v346_v9, %v345_v8  ;;  %v157_v23 = vsel %vm92_vm0, %v360_v20, %v359_v19  ;;  %v371_v24 = vld [vmem:[%s796_s0 + $0x46] ss:$8 sm:$0xf]   ;;  %v365_v26 = vld [vmem:[%s796_s0 + $0x42] ss:$8 sm:$0xf]  }
   0xa   :  { %v372_v25 = vld [vmem:[%s796_s0 + $0x46] ss:$8 sm:$0xf0]   ;;  %v366_v27 = vld [vmem:[%s796_s0 + $0x42] ss:$8 sm:$0xf0]  }
   0xb   :  { %v368_v28 = vld [vmem:[%s796_s0 + $0xc2] ss:$8 sm:$0xf]   ;;  %v201_v30 = vsel %vm92_vm0, %v372_v25, %v371_v24  ;;  %v179_v31 = vsel %vm92_vm0, %v366_v27, %v365_v26  ;;  %v379_v33 = vld [vmem:[%s796_s0 + $0x81] ss:$8 sm:$0xf]  }
   0xc   :  { %126 = vrot.lane.b32.xlu1 %v125_v10, %s403_s14  ;;  %147 = vrot.lane.b32.xlu2 %v146_v22, %s404_s27  ;;  %v369_v29 = vld [vmem:[%s796_s0 + $0xc2] ss:$8 sm:$0xf0]   ;;  %v380_v34 = vld [vmem:[%s796_s0 + $0x81] ss:$8 sm:$0xf0]  }
   0xd   :  { %v190_v32 = vsel %vm92_vm0, %v369_v29, %v368_v28  ;;  %v374_v35 = vld [vmem:[%s796_s0 + $0xc6] ss:$8 sm:$0xf]   ;;  %v377_v37 = vld [vmem:[%s796_s0 + $0x1] ss:$8 sm:$0xf]   ;;  %v233_v39 = vsel %vm92_vm0, %v380_v34, %v379_v33 }
   0xe   :  { %104 = vrot.lane.b32.xlu0 %v103_v11, %s403_s14  ;;  %v375_v36 = vld [vmem:[%s796_s0 + $0xc6] ss:$8 sm:$0xf0]   ;;  %v378_v38 = vld [vmem:[%s796_s0 + $0x1] ss:$8 sm:$0xf0]  }
   0xf   :  { %v212_v40 = vsel %vm92_vm0, %v375_v36, %v374_v35  ;;  %v223_v41 = vsel %vm92_vm0, %v378_v38, %v377_v37  ;;  %s405_s7 = smov 32   ;;  %v388_v42 = vld [vmem:[%s796_s0 + $0x41] ss:$8 sm:$0xf]   ;;  %v2_v60 = vld [vmem:[%s796_s0] ss:$4 sm:$0xff]  }
  0x10   :  { %v389_v43 = vld [vmem:[%s796_s0 + $0x41] ss:$8 sm:$0xf0]   ;;  %v382_v44 = vld [vmem:[%s796_s0 + $0x5] ss:$8 sm:$0xf]  }
  0x11   :  { %v383_v45 = vld [vmem:[%s796_s0 + $0x5] ss:$8 sm:$0xf0]   ;;  %v266_v48 = vsel %vm92_vm0, %v389_v43, %v388_v42  ;;  %v391_v53 = vld [vmem:[%s796_s0 + $0xc1] ss:$8 sm:$0xf]  }
  0x12   :  { %v385_v46 = vld [vmem:[%s796_s0 + $0x85] ss:$8 sm:$0xf]   ;;  %v244_v49 = vsel %vm92_vm0, %v383_v45, %v382_v44  ;;  %v392_v54 = vld [vmem:[%s796_s0 + $0xc1] ss:$8 sm:$0xf0]  }
  0x13   :  { %v386_v47 = vld [vmem:[%s796_s0 + $0x85] ss:$8 sm:$0xf0]   ;;  %v277_v58 = vsel %vm92_vm0, %v392_v54, %v391_v53  ;;  %4 = vst.msk [vmem:[%s797_s1] ss:$8 sm:$0x3] %vm3_vm1, %v2_v60  }
  0x14   :  { %169 = vrot.lane.b32.xlu1 %v168_v21, %s404_s27  ;;  %180 = vrot.lane.b32.xlu2 %v179_v31, %s404_s27  ;;  %v255_v50 = vsel %vm92_vm0, %v386_v47, %v385_v46  ;;  %v397_v51 = vld [vmem:[%s796_s0 + $0xc5] ss:$8 sm:$0xf]   ;;  %305 = vst.msk [vmem:[%s797_s1 - $0xf] ss:$8 sm:$0xc] %vm3_vm1, %v2_v60  }
  0x15   :  { %v398_v52 = vld [vmem:[%s796_s0 + $0xc5] ss:$8 sm:$0xf0]   ;;  %v308_v61 = vld [vmem:[%s796_s0 + $0x20] ss:$4 sm:$0xff]   ;;  %vm226_vm4 = vcmask 523520  }
  0x16   :  { %158 = vrot.lane.b32.xlu0 %v157_v23, %s404_s27  ;;  %v394_v55 = vld [vmem:[%s796_s0 + $0x45] ss:$8 sm:$0xf]   ;;  %v299_v57 = vsel %vm92_vm0, %v398_v52, %v397_v51  ;;  %306 = vst.msk [vmem:[%s797_s1 - $0x1e] ss:$8 sm:$0x30] %vm3_vm1, %v2_v60  }
  0x17   :  { %v395_v56 = vld [vmem:[%s796_s0 + $0x45] ss:$8 sm:$0xf0]   ;;  %307 = vst.msk [vmem:[%s797_s1 - $0x2d] ss:$8 sm:$0xc0] %vm3_vm1, %v2_v60  }
  0x18   :  { %v288_v59 = vsel %vm92_vm0, %v395_v56, %v394_v55  ;;  %309 = vst.msk [vmem:[%s797_s1 + $0x4] ss:$8 sm:$0x3] %vm3_vm1, %v308_v61   ;;  %v323_v62 = vld [vmem:[%s796_s0 + $0x80] ss:$4 sm:$0xff]  }
  0x19   :  { %310 = vst.msk [vmem:[%s797_s1 - $0xb] ss:$8 sm:$0xc] %vm3_vm1, %v308_v61   ;;  %v328_v63 = vld [vmem:[%s796_s0 + $0xa0] ss:$4 sm:$0xff]  }
  0x1a   :  { %311 = vst.msk [vmem:[%s797_s1 - $0x1a] ss:$8 sm:$0x30] %vm3_vm1, %v308_v61   ;;  %v313_v0 = vld [vmem:[%s796_s0 + $0x40] ss:$4 sm:$0xff]  }
  0x1b   :  { %312 = vst.msk [vmem:[%s797_s1 - $0x29] ss:$8 sm:$0xc0] %vm3_vm1, %v308_v61   ;;  %v318_v2 = vld [vmem:[%s796_s0 + $0x60] ss:$4 sm:$0xff]  }
  0x1c   :  { %202 = vrot.lane.b32.xlu1 %v201_v30, %s404_s27  ;;  %213 = vrot.lane.b32.xlu2 %v212_v40, %s404_s27  ;;  %324 = vst.msk [vmem:[%s797_s1 + $0x20] ss:$8 sm:$0x3] %vm3_vm1, %v323_v62   ;;  %v333_v3 = vld [vmem:[%s796_s0 + $0xc0] ss:$4 sm:$0xff]  }
  0x1d   :  { %325 = vst.msk [vmem:[%s797_s1 + $0x11] ss:$8 sm:$0xc] %vm3_vm1, %v323_v62   ;;  %v338_v5 = vld [vmem:[%s796_s0 + $0xe0] ss:$4 sm:$0xff]  }
  0x1e   :  { %191 = vrot.lane.b32.xlu0 %v190_v32, %s404_s27  ;;  %326 = vst.msk [vmem:[%s797_s1 + $0x2] ss:$8 sm:$0x30] %vm3_vm1, %v323_v62  }
  0x1f   :  { %327 = vst.msk [vmem:[%s797_s1 - $0xd] ss:$8 sm:$0xc0] %vm3_vm1, %v323_v62  }
  0x20   :  { %329 = vst.msk [vmem:[%s797_s1 + $0x24] ss:$8 sm:$0x3] %vm3_vm1, %v328_v63  }
  0x21   :  { %330 = vst.msk [vmem:[%s797_s1 + $0x15] ss:$8 sm:$0xc] %vm3_vm1, %v328_v63  }
  0x22   :  { %331 = vst.msk [vmem:[%s797_s1 + $0x6] ss:$8 sm:$0x30] %vm3_vm1, %v328_v63  }
  0x23   :  { %332 = vst.msk [vmem:[%s797_s1 - $0x9] ss:$8 sm:$0xc0] %vm3_vm1, %v328_v63  }
  0x24   :  { %234 = vrot.lane.b32.xlu1 %v233_v39, %s405_s7  ;;  %245 = vrot.lane.b32.xlu2 %v244_v49, %s405_s7  ;;  %314 = vst.msk [vmem:[%s797_s1 + $0x10] ss:$8 sm:$0x3] %vm3_vm1, %v313_v0  }
  0x25   :  { %315 = vst.msk [vmem:[%s797_s1 + $0x1] ss:$8 sm:$0xc] %vm3_vm1, %v313_v0  }
  0x26   :  { %224 = vrot.lane.b32.xlu0 %v223_v41, %s405_s7  ;;  %316 = vst.msk [vmem:[%s797_s1 - $0xe] ss:$8 sm:$0x30] %vm3_vm1, %v313_v0  }
  0x27   :  { %317 = vst.msk [vmem:[%s797_s1 - $0x1d] ss:$8 sm:$0xc0] %vm3_vm1, %v313_v0  }
  0x28   :  { %319 = vst.msk [vmem:[%s797_s1 + $0x14] ss:$8 sm:$0x3] %vm3_vm1, %v318_v2  }
  0x29   :  { %320 = vst.msk [vmem:[%s797_s1 + $0x5] ss:$8 sm:$0xc] %vm3_vm1, %v318_v2  }
  0x2a   :  { %321 = vst.msk [vmem:[%s797_s1 - $0xa] ss:$8 sm:$0x30] %vm3_vm1, %v318_v2  }
  0x2b   :  { %322 = vst.msk [vmem:[%s797_s1 - $0x19] ss:$8 sm:$0xc0] %vm3_vm1, %v318_v2  }
  0x2c   :  { %267 = vrot.lane.b32.xlu1 %v266_v48, %s405_s7  ;;  %278 = vrot.lane.b32.xlu2 %v277_v58, %s405_s7  ;;  %334 = vst.msk [vmem:[%s797_s1 + $0x30] ss:$8 sm:$0x3] %vm3_vm1, %v333_v3  }
  0x2d   :  { %335 = vst.msk [vmem:[%s797_s1 + $0x21] ss:$8 sm:$0xc] %vm3_vm1, %v333_v3  }
  0x2e   :  { %256 = vrot.lane.b32.xlu0 %v255_v50, %s405_s7  ;;  %336 = vst.msk [vmem:[%s797_s1 + $0x12] ss:$8 sm:$0x30] %vm3_vm1, %v333_v3  }
  0x2f   :  { %337 = vst.msk [vmem:[%s797_s1 + $0x3] ss:$8 sm:$0xc0] %vm3_vm1, %v333_v3  }
  0x30   :  { %339 = vst.msk [vmem:[%s797_s1 + $0x34] ss:$8 sm:$0x3] %vm3_vm1, %v338_v5  }
  0x31   :  { %340 = vst.msk [vmem:[%s797_s1 + $0x25] ss:$8 sm:$0xc] %vm3_vm1, %v338_v5  }
  0x32   :  { %341 = vst.msk [vmem:[%s797_s1 + $0x16] ss:$8 sm:$0x30] %vm3_vm1, %v338_v5  }
  0x33   :  { %342 = vst.msk [vmem:[%s797_s1 + $0x7] ss:$8 sm:$0xc0] %vm3_vm1, %v338_v5  }
  0x34   :  { %300 = vrot.lane.b32.xlu1 %v299_v57, %s405_s7 }
  0x36   :  { %289 = vrot.lane.b32.xlu0 %v288_v59, %s405_s7 }
  0x5e   :  { %v138_v1 = vpop.permute.xlu2 %137  }
  0x66   :  { %v148_v4 = vpop.permute.xlu2 %147  }
  0x6e   :  { %v181_v7 = vpop.permute.xlu2 %180  }
  0x76   :  { %v116_v6 = vpop.permute.xlu1 %115   ;;  %v214_v10 = vpop.permute.xlu2 %213  }
  0x77   :  { %350 = vst.msk [vmem:[%s797_s1 + $0x10] sm:$0xff] %vm96_vm2, %v116_v6  }
  0x78   :  { %v95_v8 = vpop.permute.xlu0 %94   ;;  %367 = vst.msk [vmem:[%s797_s1 + $0x10] sm:$0xff] %vm139_vm3, %v181_v7  }
  0x79   :  { %97 = vst.msk [vmem:[%s797_s1] sm:$0xff] %vm96_vm2, %v95_v8  }
  0x7a   :  { %140 = vst.msk [vmem:[%s797_s1] sm:$0xff] %vm139_vm3, %v138_v1  }
  0x7b   :  { %376 = vst.msk [vmem:[%s797_s1 + $0x38] sm:$0xff] %vm139_vm3, %v214_v10  }
  0x7e   :  { %v127_v9 = vpop.permute.xlu1 %126   ;;  %v246_v13 = vpop.permute.xlu2 %245  }
  0x7f   :  { %353 = vst.msk [vmem:[%s797_s1 + $0x30] sm:$0xff] %vm96_vm2, %v127_v9  }
  0x80   :  { %v105_v11 = vpop.permute.xlu0 %104  }
  0x81   :  { %347 = vst.msk [vmem:[%s797_s1 + $0x20] sm:$0xff] %vm96_vm2, %v105_v11  }
  0x82   :  { %358 = vst.msk [vmem:[%s797_s1 + $0x20] sm:$0xff] %vm139_vm3, %v148_v4  }
  0x86   :  { %v170_v12 = vpop.permute.xlu1 %169   ;;  %v279_v16 = vpop.permute.xlu2 %278  }
  0x87   :  { %364 = vst.msk [vmem:[%s797_s1 + $0x28] sm:$0xff] %vm139_vm3, %v170_v12  }
  0x88   :  { %v159_v14 = vpop.permute.xlu0 %158  }
  0x89   :  { %361 = vst.msk [vmem:[%s797_s1 + $0x8] sm:$0xff] %vm139_vm3, %v159_v14  }
  0x8a   :  { %384 = vst.msk [vmem:[%s797_s1 + $0x8] sm:$0xff] %vm226_vm4, %v246_v13  }
  0x8e   :  { %v203_v15 = vpop.permute.xlu1 %202  }
  0x8f   :  { %373 = vst.msk [vmem:[%s797_s1 + $0x18] sm:$0xff] %vm139_vm3, %v203_v15  }
  0x90   :  { %v192_v17 = vpop.permute.xlu0 %191  }
  0x91   :  { %370 = vst.msk [vmem:[%s797_s1 + $0x30] sm:$0xff] %vm139_vm3, %v192_v17  }
  0x92   :  { %393 = vst.msk [vmem:[%s797_s1 + $0x30] sm:$0xff] %vm226_vm4, %v279_v16  }
  0x96   :  { %v235_v18 = vpop.permute.xlu1 %234  }
  0x97   :  { %381 = vst.msk [vmem:[%s797_s1 + $0x20] sm:$0xff] %vm226_vm4, %v235_v18  }
  0x98   :  { %v225_v19 = vpop.permute.xlu0 %224  }
  0x99   :  { %227 = vst.msk [vmem:[%s797_s1] sm:$0xff] %vm226_vm4, %v225_v19  }
  0x9e   :  { %v268_v20 = vpop.permute.xlu1 %267  }
  0x9f   :  { %390 = vst.msk [vmem:[%s797_s1 + $0x10] sm:$0xff] %vm226_vm4, %v268_v20  }
  0xa0   :  { %v257_v21 = vpop.permute.xlu0 %256  }
  0xa1   :  { %387 = vst.msk [vmem:[%s797_s1 + $0x28] sm:$0xff] %vm226_vm4, %v257_v21  }
  0xa6   :  { %v301_v22 = vpop.permute.xlu1 %300  }
  0xa7   :  { %399 = vst.msk [vmem:[%s797_s1 + $0x38] sm:$0xff] %vm226_vm4, %v301_v22  }
  0xa8   :  { %v290_v23 = vpop.permute.xlu0 %289  }
  0xa9   :  { %396 = vst.msk [vmem:[%s797_s1 + $0x18] sm:$0xff] %vm226_vm4, %v290_v23  }

// kernel: tile.29
= control target key start
LH: loop header
LB: loop body
LE: loop exit
PB: predicated region body
PF: predicated region fallthrough
CT: control target
= control target key end

     0   :  { %vm132_vm0 = vcmask 1047556   ;;  %s244_s15 = smov 32   ;;  %vm134_vm1 = vcmask 261120   ;;  %vm171_vm2 = vcmask 523520   ;;  %s387_s0 = inlined_call_operand.vmem [shape: f32[2,32,32], index: 0, kind: input, shape index: {}]   ;;  %s388_s1 = inlined_call_operand.vmem [shape: f32[64,32], index: 1, kind: output, shape index: {}]  }
   0x1   :  { %v230_v0 = vld [vmem:[%s387_s0 + $0xe] sm:$0x3]  ;;  %v231_v1 = vld [vmem:[%s387_s0 + $0xc] sm:$0x3]  ;;  %v232_v2 = vld [vmem:[%s387_s0 + $0xa] sm:$0x3] }
   0x2   :  { %103 = vst [vmem:[#allocation0 + $0x38] sm:$0x3] %v230_v0  ;;  %v233_v3 = vld [vmem:[%s387_s0 + $0x8] sm:$0x3]  ;;  %v234_v4 = vld [vmem:[%s387_s0 + $0x6] sm:$0x3] }
   0x3   :  { %107 = vst [vmem:[#allocation0 + $0x30] sm:$0x3] %v231_v1  ;;  %v235_v5 = vld [vmem:[%s387_s0 + $0x4] sm:$0x3]  ;;  %v236_v6 = vld [vmem:[%s387_s0 + $0x2] sm:$0x3] }
   0x4   :  { %111 = vst [vmem:[#allocation0 + $0x28] sm:$0x3] %v232_v2  ;;  %v128_v7 = vld [vmem:[%s387_s0] sm:$0x3]  ;;  %v214_v8 = vld [vmem:[%s387_s0 + $0x2e] sm:$0x3] }
   0x5   :  { %115 = vst [vmem:[#allocation0 + $0x20] sm:$0x3] %v233_v3  ;;  %v215_v9 = vld [vmem:[%s387_s0 + $0x2c] sm:$0x3]  ;;  %v216_v10 = vld [vmem:[%s387_s0 + $0x2a] sm:$0x3] }
   0x6   :  { %119 = vst [vmem:[#allocation0 + $0x18] sm:$0x3] %v234_v4  ;;  %v217_v11 = vld [vmem:[%s387_s0 + $0x28] sm:$0x3]  ;;  %v218_v12 = vld [vmem:[%s387_s0 + $0x26] sm:$0x3] }
   0x7   :  { %123 = vst [vmem:[#allocation0 + $0x10] sm:$0x3] %v235_v5  ;;  %v219_v13 = vld [vmem:[%s387_s0 + $0x24] sm:$0x3]  ;;  %v220_v14 = vld [vmem:[%s387_s0 + $0x22] sm:$0x3] }
   0x8   :  { %127 = vst [vmem:[#allocation0 + $0x8] sm:$0x3] %v236_v6  ;;  %v221_v15 = vld [vmem:[%s387_s0 + $0x20] sm:$0x3]  ;;  %v222_v17 = vld [vmem:[%s387_s0 + $0x1e] sm:$0x3] }
   0x9   :  { %129 = vst [vmem:[#allocation0] sm:$0x3] %v128_v7  ;;  %v223_v18 = vld [vmem:[%s387_s0 + $0x1c] sm:$0x3]  ;;  %v224_v21 = vld [vmem:[%s387_s0 + $0x1a] sm:$0x3] }
   0xa   :  { %39 = vst [vmem:[#allocation0 + $0xb8] sm:$0x3] %v214_v8  ;;  %v225_v22 = vld [vmem:[%s387_s0 + $0x18] sm:$0x3]  ;;  %v226_v23 = vld [vmem:[%s387_s0 + $0x16] sm:$0x3] }
   0xb   :  { %43 = vst [vmem:[#allocation0 + $0xb0] sm:$0x3] %v215_v9  ;;  %v227_v24 = vld [vmem:[%s387_s0 + $0x14] sm:$0x3]  ;;  %v228_v25 = vld [vmem:[%s387_s0 + $0x12] sm:$0x3] }
   0xc   :  { %47 = vst [vmem:[#allocation0 + $0xa8] sm:$0x3] %v216_v10  ;;  %v166_v16 = vld [vmem:[#allocation0 + $0x1] ss:$8 sm:$0xf0]  }
   0xd   :  { %51 = vst [vmem:[#allocation0 + $0xa0] sm:$0x3] %v217_v11  ;;  %v229_v26 = vld [vmem:[%s387_s0 + $0x10] sm:$0x3]  ;;  %v206_v28 = vld [vmem:[%s387_s0 + $0x3e] sm:$0x3] }
   0xe   :  { %55 = vst [vmem:[#allocation0 + $0x98] sm:$0x3] %v218_v12  ;;  %v207_v29 = vld [vmem:[%s387_s0 + $0x3c] sm:$0x3]  ;;  %v208_v32 = vld [vmem:[%s387_s0 + $0x3a] sm:$0x3] }
   0xf   :  { %59 = vst [vmem:[#allocation0 + $0x90] sm:$0x3] %v219_v13  ;;  %v209_v33 = vld [vmem:[%s387_s0 + $0x38] sm:$0x3]  ;;  %v210_v34 = vld [vmem:[%s387_s0 + $0x36] sm:$0x3] }
  0x10   :  { %v164_v19 = vld [vmem:[#allocation0 + $0x1] ss:$8 sm:$0xf]   ;;  %63 = vst [vmem:[#allocation0 + $0x88] sm:$0x3] %v220_v14 }
  0x11   :  { %v168_v20 = vsel %vm132_vm0, %v166_v16, %v164_v19  ;;  %67 = vst [vmem:[#allocation0 + $0x80] sm:$0x3] %v221_v15  ;;  %v211_v35 = vld [vmem:[%s387_s0 + $0x34] sm:$0x3]  ;;  %v212_v36 = vld [vmem:[%s387_s0 + $0x32] sm:$0x3] }
  0x12   :  { %169 = vrot.lane.b32.xlu0 %v168_v20, %s244_s15  ;;  %71 = vst [vmem:[#allocation0 + $0x78] sm:$0x3] %v222_v17  ;;  %v213_v37 = vld [vmem:[%s387_s0 + $0x30] sm:$0x3] }
  0x13   :  { %75 = vst [vmem:[#allocation0 + $0x70] sm:$0x3] %v223_v18  ;;  %v130_v44 = vld [vmem:[#allocation0] ss:$8 sm:$0xf]  }
  0x14   :  { %79 = vst [vmem:[#allocation0 + $0x68] sm:$0x3] %v224_v21  ;;  %v187_v27 = vld [vmem:[#allocation0 + $0x81] ss:$8 sm:$0xf0]  }
  0x15   :  { %83 = vst [vmem:[#allocation0 + $0x60] sm:$0x3] %v225_v22  ;;  %v131_v45 = vld [vmem:[#allocation0] ss:$8 sm:$0xf0]  }
  0x16   :  { %87 = vst [vmem:[#allocation0 + $0x58] sm:$0x3] %v226_v23  ;;  %v133_v46 = vsel %vm132_vm0, %v131_v45, %v130_v44  ;;  %v148_v48 = vld [vmem:[#allocation0 + $0x80] ss:$8 sm:$0xf0]  }
  0x17   :  { %91 = vst [vmem:[#allocation0 + $0x50] sm:$0x3] %v227_v24 }
  0x18   :  { %v185_v30 = vld [vmem:[#allocation0 + $0x81] ss:$8 sm:$0xf]   ;;  %95 = vst [vmem:[#allocation0 + $0x48] sm:$0x3] %v228_v25 }
  0x19   :  { %v189_v31 = vsel %vm132_vm0, %v187_v27, %v185_v30  ;;  %99 = vst [vmem:[#allocation0 + $0x40] sm:$0x3] %v229_v26  ;;  %v146_v47 = vld [vmem:[#allocation0 + $0x80] ss:$8 sm:$0xf]  }
  0x1a   :  { %190 = vrot.lane.b32.xlu1 %v189_v31, %s244_s15  ;;  %7 = vst [vmem:[#allocation0 + $0xf8] sm:$0x3] %v206_v28  ;;  %v150_v49 = vsel %vm132_vm0, %v148_v48, %v146_v47 }
  0x1b   :  { %11 = vst [vmem:[#allocation0 + $0xf0] sm:$0x3] %v207_v29 }
  0x1c   :  { %15 = vst [vmem:[#allocation0 + $0xe8] sm:$0x3] %v208_v32  ;;  %v176_v38 = vld [vmem:[#allocation0 + $0x41] ss:$8 sm:$0xf0]  }
  0x1d   :  { %19 = vst [vmem:[#allocation0 + $0xe0] sm:$0x3] %v209_v33  ;;  %v139_v51 = vld [vmem:[#allocation0 + $0x40] ss:$8 sm:$0xf0]  }
  0x1e   :  { %23 = vst [vmem:[#allocation0 + $0xd8] sm:$0x3] %v210_v34 }
  0x1f   :  { %27 = vst [vmem:[#allocation0 + $0xd0] sm:$0x3] %v211_v35 }
  0x20   :  { %v174_v39 = vld [vmem:[#allocation0 + $0x41] ss:$8 sm:$0xf]   ;;  %31 = vst [vmem:[#allocation0 + $0xc8] sm:$0x3] %v212_v36 }
  0x21   :  { %v178_v40 = vsel %vm132_vm0, %v176_v38, %v174_v39  ;;  %35 = vst [vmem:[#allocation0 + $0xc0] sm:$0x3] %v213_v37  ;;  %v137_v50 = vld [vmem:[#allocation0 + $0x40] ss:$8 sm:$0xf]  }
  0x22   :  { %179 = vrot.lane.b32.xlu0 %v178_v40, %s244_s15  ;;  %135 = vst.msk [vmem:[%s388_s1] sm:$0xff] %vm134_vm1, %v133_v46   ;;  %v141_v52 = vsel %vm132_vm0, %v139_v51, %v137_v50 }
  0x23   :  { %238 = vst.msk [vmem:[%s388_s1 + $0x10] sm:$0xff] %vm134_vm1, %v150_v49  }
  0x24   :  { %v198_v41 = vld [vmem:[#allocation0 + $0xc1] ss:$8 sm:$0xf0]   ;;  %237 = vst.msk [vmem:[%s388_s1 + $0x8] sm:$0xff] %vm134_vm1, %v141_v52  }
  0x25   :  { %v157_v54 = vld [vmem:[#allocation0 + $0xc0] ss:$8 sm:$0xf0]  }
  0x28   :  { %v196_v42 = vld [vmem:[#allocation0 + $0xc1] ss:$8 sm:$0xf]   ;;  %v155_v53 = vld [vmem:[#allocation0 + $0xc0] ss:$8 sm:$0xf]  }
  0x29   :  { %v200_v43 = vsel %vm132_vm0, %v198_v41, %v196_v42  ;;  %v159_v55 = vsel %vm132_vm0, %v157_v54, %v155_v53 }
  0x2a   :  { %201 = vrot.lane.b32.xlu1 %v200_v43, %s244_s15  ;;  %239 = vst.msk [vmem:[%s388_s1 + $0x18] sm:$0xff] %vm134_vm1, %v159_v55  }
  0x84   :  { %v170_v56 = vpop.permute.xlu0 %169  }
  0x85   :  { %172 = vst.msk [vmem:[%s388_s1] sm:$0xff] %vm171_vm2, %v170_v56  }
  0x8c   :  { %v191_v57 = vpop.permute.xlu1 %190  }
  0x8d   :  { %241 = vst.msk [vmem:[%s388_s1 + $0x10] sm:$0xff] %vm171_vm2, %v191_v57  }
  0x94   :  { %v180_v58 = vpop.permute.xlu0 %179  }
  0x95   :  { %240 = vst.msk [vmem:[%s388_s1 + $0x8] sm:$0xff] %vm171_vm2, %v180_v58  }
  0x9c   :  { %v202_v59 = vpop.permute.xlu1 %201  }
  0x9d   :  { %242 = vst.msk [vmem:[%s388_s1 + $0x18] sm:$0xff] %vm171_vm2, %v202_v59  }

// kernel: dueling_cnn_forward.1
= control target key start
LH: loop header
LB: loop body
LE: loop exit
PB: predicated region body
PF: predicated region fallthrough
CT: control target
= control target key end

     0   :  { %s12744_s0 = inlined_call_operand.vmem [shape: bf16[80,160], index: 0, kind: input, shape index: {}]   ;;  %s12745_s1 = inlined_call_operand.vmem [shape: bf16[5,160,288], index: 1, kind: input, shape index: {}]   ;;  %s12746_s2 = inlined_call_operand.vmem [shape: bf16[5,36,80], index: 2, kind: input, shape index: {}]   ;;  %s12747_s3 = inlined_call_operand.vmem [shape: f32[1,16], index: 3, kind: input, shape index: {}]   ;;  %s12748_s4 = inlined_call_operand.vmem [shape: f32[1,16], index: 4, kind: input, shape index: {}]   ;;  %s12749_s5 = inlined_call_operand.vmem [shape: f32[288,16], index: 5, kind: input, shape index: {}]   ;;  %s12750_s6 = inlined_call_operand.vmem [shape: f32[16,288], index: 6, kind: input, shape index: {}]   ;;  %s12751_s7 = inlined_call_operand.vmem [shape: bf16[5,288,224], index: 7, kind: input, shape index: {}]   ;;  %s12752_s8 = inlined_call_operand.vmem [shape: bf16[5,14,36], index: 8, kind: input, shape index: {}]   ;;  %s12753_s9 = inlined_call_operand.vmem [shape: f32[1,32], index: 9, kind: input, shape index: {}]   ;;  %s12754_s10 = inlined_call_operand.vmem [shape: f32[1,32], index: 10, kind: input, shape index: {}]   ;;  %s12755_s11 = inlined_call_operand.vmem [shape: f32[224,32], index: 11, kind: input, shape index: {}]   ;;  %s12756_s12 = inlined_call_operand.vmem [shape: f32[32,224], index: 12, kind: input, shape index: {}]   ;;  %s12757_s13 = inlined_call_operand.vmem [shape: bf16[5,224,64], index: 13, kind: input, shape index: {}]   ;;  %s12758_s14 = inlined_call_operand.vmem [shape: bf16[5,4,14], index: 14, kind: input, shape index: {}]   ;;  %s12759_s15 = inlined_call_operand.vmem [shape: f32[1,32], index: 15, kind: input, shape index: {}]   ;;  %s12760_s16 = inlined_call_operand.vmem [shape: f32[1,32], index: 16, kind: input, shape index: {}]   ;;  %s12761_s17 = inlined_call_operand.vmem [shape: f32[64,32], index: 17, kind: input, shape index: {}]   ;;  %s12762_s18 = inlined_call_operand.vmem [shape: f32[32,64], index: 18, kind: input, shape index: {}]   ;;  %s12763_s19 = inlined_call_operand.vmem [shape: bf16[2,64,9], index: 19, kind: input, shape index: {}]   ;;  %s12764_s20 = inlined_call_operand.vmem [shape: f32[1,9], index: 20, kind: input, shape index: {}]   ;;  %s12765_s21 = inlined_call_operand.vmem [shape: bf16[2,2,4], index: 21, kind: input, shape index: {}]   ;;  %s12766_s22 = inlined_call_operand.hbm [shape: f32[2,8], index: 22, kind: output, shape index: {}]  }
   0x1   :  { %12772 = sst [smem:[#allocation32_spill]] %s12744_s0 }
   0x2   :  { %12773 = sst [smem:[#allocation33_spill]] %s12745_s1 }
   0x3   :  { %12774 = sst [smem:[#allocation34_spill]] %s12746_s2 }
   0x4   :  { %12775 = sst [smem:[#allocation35_spill]] %s12747_s3 }
   0x5   :  { %12776 = sst [smem:[#allocation36_spill]] %s12748_s4 }
   0x6   :  { %12777 = sst [smem:[#allocation37_spill]] %s12749_s5 }
   0x7   :  { %12778 = sst [smem:[#allocation38_spill]] %s12750_s6 }
   0x8   :  { %s12779_s29 = sld [smem:[#allocation32_spill]] }
   0xe   :  { %v6265_v0 = vld [vmem:[%s12779_s29 + $0x40] sm:$0xf]  ;;  %v8590_v1 = vld [vmem:[%s12779_s29 + $0x44] sm:$0xf0]  ;;  %v8589_v2 = vld [vmem:[%s12779_s29 + $0x44] sm:$0xf] }
   0xf   :  { %v9207_v3 = vor.u32 %v8590_v1, %v6265_v0  ;;  %v6267_v4 = vld [vmem:[%s12779_s29 + $0x48] sm:$0xf0]  ;;  %v6257_v5 = vld [vmem:[%s12779_s29 + $0x30] sm:$0xf]  ;;  %v8588_v6 = vld [vmem:[%s12779_s29 + $0x34] sm:$0xf0] }
  0x10   :  { %v9218_v7 = vor.u32 %v8589_v2, %v6267_v4  ;;  %v8587_v8 = vld [vmem:[%s12779_s29 + $0x34] sm:$0xf]  ;;  %v6259_v9 = vld [vmem:[%s12779_s29 + $0x38] sm:$0xf0]  ;;  %v9227_v10 = vor.u32 %v8588_v6, %v6257_v5  ;;  %v6249_v12 = vld [vmem:[%s12779_s29 + $0x20] sm:$0xf] }
  0x11   :  { %284 = vmatpush.bf16.msra.mxu2 %v9207_v3  ;;  %164 = vmatpush.bf16.msra.mxu0 %v9207_v3  ;;  %v9231_v11 = vor.u32 %v8587_v8, %v6259_v9  ;;  %v8586_v13 = vld [vmem:[%s12779_s29 + $0x24] sm:$0xf0]  ;;  %v8585_v14 = vld [vmem:[%s12779_s29 + $0x24] sm:$0xf]  ;;  %v6251_v15 = vld [vmem:[%s12779_s29 + $0x28] sm:$0xf0] }
  0x12   :  { %307 = vmatpush.bf16.msra.mxu3 %v9218_v7  ;;  %187 = vmatpush.bf16.msra.mxu1 %v9218_v7  ;;  %v9247_v16 = vor.u32 %v8586_v13, %v6249_v12  ;;  %v9251_v17 = vor.u32 %v8585_v14, %v6251_v15  ;;  %v6241_v18 = vld [vmem:[%s12779_s29 + $0x10] sm:$0xf]  ;;  %v8584_v19 = vld [vmem:[%s12779_s29 + $0x14] sm:$0xf0] }
  0x15   :  { %285 = vmatpush.bf16.msra.mxu2 %v9227_v10  ;;  %165 = vmatpush.bf16.msra.mxu0 %v9227_v10 }
  0x16   :  { %308 = vmatpush.bf16.msra.mxu3 %v9231_v11  ;;  %188 = vmatpush.bf16.msra.mxu1 %v9231_v11 }
  0x17   :  { %27 = vsyncpa [#allocation6], 0  ;;  %v8583_v20 = vld [vmem:[%s12779_s29 + $0x14] sm:$0xf]  ;;  %v6243_v21 = vld [vmem:[%s12779_s29 + $0x18] sm:$0xf0]  ;;  %v9267_v22 = vor.u32 %v8584_v19, %v6241_v18 }
  0x18   :  { %v9271_v23 = vor.u32 %v8583_v20, %v6243_v21  ;;  %v6233_v24 = vld [vmem:[%s12779_s29] sm:$0xf]  ;;  %v8582_v25 = vld [vmem:[%s12779_s29 + $0x4] sm:$0xf0]  ;;  %v8581_v26 = vld [vmem:[%s12779_s29 + $0x4] sm:$0xf] }
  0x19   :  { %286 = vmatpush.bf16.msra.mxu2 %v9247_v16  ;;  %166 = vmatpush.bf16.msra.mxu0 %v9247_v16  ;;  %v6235_v27 = vld [vmem:[%s12779_s29 + $0x8] sm:$0xf0]  ;;  %v9287_v28 = vor.u32 %v8582_v25, %v6233_v24  ;;  %s12780_s3 = sld [smem:[#allocation34_spill]]  ;;  %vm151_vm0 = vcmask 654336   ;;  %vm534_vm1 = vcmask 261120   ;;  %vm2321_vm2 = vcmask 1043456  }
  0x1a   :  { %309 = vmatpush.bf16.msra.mxu3 %v9251_v17  ;;  %189 = vmatpush.bf16.msra.mxu1 %v9251_v17  ;;  %v9291_v29 = vor.u32 %v8581_v26, %v6235_v27  ;;  %s12781_s0 = sld [smem:[#allocation33_spill]]  ;;  %vm2348_vm3 = vcmask 257024   ;;  %vm2604_vm8 = vcmask 130048   ;;  %vm2801_vm9 = vcmask 254976   ;;  %s6214_s29 = sshll.u32 %s12766_s22, 4  ;;  %s6215_s29 = int_to_ptr.hbm [resolvable:$true] %s6214_s29 }
  0x1b   :  { %s12806_s25 = sld [smem:[#allocation37_spill]]  ;;  %vm2864_vm10 = vcmask 1041408   ;;  %vm2860_vm11 = vcmask 293888   ;;  %vm4674_vm12 = vcmask 1045504   ;;  %vm4683_vm13 = vcmask 785408  }
  0x1c   :  { %s12831_s2 = sld [smem:[#allocation38_spill]]  ;;  %vm4685_vm14 = vcmask 783360  }
  0x1d   :  { %287 = vmatpush.bf16.msra.mxu2 %v9267_v22  ;;  %167 = vmatpush.bf16.msra.mxu0 %v9267_v22  ;;  %s12833_s27 = sld [smem:[#allocation36_spill]] }
  0x1e   :  { %310 = vmatpush.bf16.msra.mxu3 %v9271_v23  ;;  %190 = vmatpush.bf16.msra.mxu1 %v9271_v23 }
  0x1f   :  { %v8623_v30 = vld [vmem:[%s12780_s3 + $0x14] sm:$0xff]  ;;  %v8591_v31 = vld [vmem:[%s12780_s3] sm:$0xff]  ;;  %v8592_v62 = vld [vmem:[%s12780_s3 + $0x8] sm:$0xff] }
  0x20   :  { %v6422_v32 = vld [vmem:[%s12781_s0 + $0x198] sm:$0xf]  ;;  %v8647_v33 = vld [vmem:[%s12781_s0 + $0x1a0] sm:$0xf0]  ;;  %v6446_v34 = vld [vmem:[%s12781_s0 + $0x1c8] sm:$0xf] }
  0x21   :  { %288 = vmatpush.bf16.msra.mxu2 %v9287_v28  ;;  %168 = vmatpush.bf16.msra.mxu0 %v9287_v28  ;;  %v6423_v35 = vor.u32 %v8647_v33, %v6422_v32  ;;  %v8653_v36 = vld [vmem:[%s12781_s0 + $0x1d0] sm:$0xf0]  ;;  %v6410_v37 = vld [vmem:[%s12781_s0 + $0x180] sm:$0xf]  ;;  %v8644_v38 = vld [vmem:[%s12781_s0 + $0x188] sm:$0xf0] }
  0x22   :  { %311 = vmatpush.bf16.msra.mxu3 %v9291_v29  ;;  %191 = vmatpush.bf16.msra.mxu1 %v9291_v29  ;;  %v6447_v39 = vor.u32 %v8653_v36, %v6446_v34  ;;  %v8646_v40 = vld [vmem:[%s12781_s0 + $0x19c] sm:$0xf]  ;;  %v6411_v41 = vor.u32 %v8644_v38, %v6410_v37  ;;  %v6424_v42 = vld [vmem:[%s12781_s0 + $0x1a4] sm:$0xf0]  ;;  %v8643_v43 = vld [vmem:[%s12781_s0 + $0x184] sm:$0xf] }
  0x23   :  { %v6412_v44 = vld [vmem:[%s12781_s0 + $0x18c] sm:$0xf0]  ;;  %v6398_v45 = vld [vmem:[%s12781_s0 + $0x168] sm:$0xf]  ;;  %v8641_v46 = vld [vmem:[%s12781_s0 + $0x170] sm:$0xf0]  ;;  %v6427_v47 = vor.u32 %v8646_v40, %v6424_v42 }
  0x24   :  { %6290 = vmatmul.msk.bf16.vlgmr.msra.gmra.mxu2 %vm151_vm0, %v8623_v30  ;;  %6271 = vmatmul.msk.bf16.vlgmr.msra.gmra.mxu0 %vm151_vm0, %v8591_v31  ;;  %v6415_v48 = vor.u32 %v8643_v43, %v6412_v44  ;;  %v6434_v49 = vld [vmem:[%s12781_s0 + $0x1b0] sm:$0xf]  ;;  %v8650_v50 = vld [vmem:[%s12781_s0 + $0x1b8] sm:$0xf0]  ;;  %v6399_v51 = vor.u32 %v8641_v46, %v6398_v45  ;;  %v8640_v52 = vld [vmem:[%s12781_s0 + $0x16c] sm:$0xf] }
  0x25   :  { %6293 = vmatmul.msk.bf16.vlgmr.msra.gmra.mxu3 %vm151_vm0, %v8623_v30  ;;  %6274 = vmatmul.msk.bf16.vlgmr.msra.gmra.mxu1 %vm151_vm0, %v8591_v31  ;;  %v6400_v53 = vld [vmem:[%s12781_s0 + $0x174] sm:$0xf0]  ;;  %v6435_v54 = vor.u32 %v8650_v50, %v6434_v49  ;;  %v6386_v55 = vld [vmem:[%s12781_s0 + $0x150] sm:$0xf]  ;;  %v8638_v56 = vld [vmem:[%s12781_s0 + $0x158] sm:$0xf0] }
  0x26   :  { %544 = vmatpush.bf16.msrb.mxu0 %v6423_v35  ;;  %573 = vmatpush.bf16.msrb.mxu1 %v6447_v39  ;;  %v8624_v57 = vld [vmem:[%s12780_s3 + $0x1c] sm:$0xff]  ;;  %v6403_v58 = vor.u32 %v8640_v52, %v6400_v53  ;;  %v6387_v59 = vor.u32 %v8638_v56, %v6386_v55  ;;  %v8637_v60 = vld [vmem:[%s12781_s0 + $0x154] sm:$0xf]  ;;  %v6374_v63 = vld [vmem:[%s12781_s0 + $0x138] sm:$0xf] }
  0x27   :  { %590 = vmatpush.bf16.msrb.mxu2 %v6427_v47  ;;  %v6388_v61 = vld [vmem:[%s12781_s0 + $0x15c] sm:$0xf0]  ;;  %v8635_v0 = vld [vmem:[%s12781_s0 + $0x140] sm:$0xf0]  ;;  %v8634_v4 = vld [vmem:[%s12781_s0 + $0x13c] sm:$0xf] }
  0x28   :  { %v6391_v1 = vor.u32 %v8637_v60, %v6388_v61  ;;  %v6375_v2 = vor.u32 %v8635_v0, %v6374_v63  ;;  %v6376_v5 = vld [vmem:[%s12781_s0 + $0x144] sm:$0xf0]  ;;  %v6362_v6 = vld [vmem:[%s12781_s0 + $0x120] sm:$0xf]  ;;  %v8632_v8 = vld [vmem:[%s12781_s0 + $0x128] sm:$0xf0] }
  0x29   :  { %v6281_v9 = vld [vmem:[%s12780_s3 + $0x24] sm:$0x3]  ;;  %v6379_v12 = vor.u32 %v8634_v4, %v6376_v5  ;;  %v6363_v13 = vor.u32 %v8632_v8, %v6362_v6  ;;  %v87_v15 = vld [vmem:[%s12780_s3 + $0x10] sm:$0x3]  ;;  %v6350_v26 = vld [vmem:[%s12781_s0 + $0x108] sm:$0xf] }
  0x2a   :  { %545 = vmatpush.bf16.msrb.mxu0 %v6411_v41  ;;  %574 = vmatpush.bf16.msrb.mxu1 %v6435_v54  ;;  %v268_v14 = vunpack.c.l.b16 %v6281_v9  ;;  %v97_v18 = vunpack.c.l.b16 %v87_v15  ;;  %v8631_v21 = vld [vmem:[%s12781_s0 + $0x124] sm:$0xf]  ;;  %v6364_v24 = vld [vmem:[%s12781_s0 + $0x12c] sm:$0xf0]  ;;  %v8629_v27 = vld [vmem:[%s12781_s0 + $0x110] sm:$0xf0] }
  0x2b   :  { %591 = vmatpush.bf16.msrb.mxu2 %v6415_v48  ;;  %v6367_v25 = vor.u32 %v8631_v21, %v6364_v24  ;;  %v8628_v30 = vld [vmem:[%s12781_s0 + $0x10c] sm:$0xf]  ;;  %v6351_v31 = vor.u32 %v8629_v27, %v6350_v26  ;;  %v6352_v32 = vld [vmem:[%s12781_s0 + $0x114] sm:$0xf0]  ;;  %v6338_v37 = vld [vmem:[%s12781_s0 + $0xf0] sm:$0xf] }
  0x2c   :  { %v271_v19 = vpack.c.b16 %v268_v14, %v268_v14  ;;  %v100_v20 = vpack.c.b16 %v97_v18, %v97_v18  ;;  %v8652_v33 = vld [vmem:[%s12781_s0 + $0x1cc] sm:$0xf]  ;;  %v6448_v34 = vld [vmem:[%s12781_s0 + $0x1d4] sm:$0xf0]  ;;  %v6355_v35 = vor.u32 %v8628_v30, %v6352_v32  ;;  %v8626_v38 = vld [vmem:[%s12781_s0 + $0xf8] sm:$0xf0] }
  0x2d   :  { %v6451_v36 = vor.u32 %v8652_v33, %v6448_v34  ;;  %v8625_v39 = vld [vmem:[%s12781_s0 + $0xf4] sm:$0xf]  ;;  %v6339_v40 = vor.u32 %v8626_v38, %v6338_v37  ;;  %v6340_v41 = vld [vmem:[%s12781_s0 + $0xfc] sm:$0xf0]  ;;  %v8648_v47 = vld [vmem:[%s12781_s0 + $0x1a8] sm:$0xf0] }
  0x2e   :  { %546 = vmatpush.bf16.msrb.mxu0 %v6399_v51  ;;  %v8649_v42 = vld [vmem:[%s12781_s0 + $0x1b4] sm:$0xf]  ;;  %v6436_v43 = vld [vmem:[%s12781_s0 + $0x1bc] sm:$0xf0]  ;;  %v6343_v44 = vor.u32 %v8625_v39, %v6340_v41  ;;  %v6454_v48 = vld [vmem:[%s12781_s0 + $0x1d0] sm:$0xf] }
  0x2f   :  { %592 = vmatpush.bf16.msrb.mxu2 %v6403_v58  ;;  %619 = vmatpush.bf16.msrb.mxu3 %v6451_v36  ;;  %v6439_v45 = vor.u32 %v8649_v42, %v6436_v43  ;;  %v6430_v46 = vld [vmem:[%s12781_s0 + $0x1a0] sm:$0xf]  ;;  %v8654_v50 = vld [vmem:[%s12781_s0 + $0x1d8] sm:$0xf0]  ;;  %v6418_v51 = vld [vmem:[%s12781_s0 + $0x188] sm:$0xf] }
  0x30   :  { %v6431_v49 = vor.u32 %v8648_v47, %v6430_v46  ;;  %v8645_v52 = vld [vmem:[%s12781_s0 + $0x190] sm:$0xf0]  ;;  %v6455_v53 = vor.u32 %v8654_v50, %v6454_v48  ;;  %v6551_v55 = vld [vmem:[%s12781_s0 + $0xa8] sm:$0xf]  ;;  %v6406_v58 = vld [vmem:[%s12781_s0 + $0x170] sm:$0xf] }
  0x31   :  { %v6419_v54 = vor.u32 %v8645_v52, %v6418_v51  ;;  %v8615_v56 = vld [vmem:[%s12781_s0 + $0xb0] sm:$0xf0]  ;;  %v6539_v61 = vld [vmem:[%s12781_s0 + $0x90] sm:$0xf]  ;;  %v8639_v4 = vld [vmem:[%s12781_s0 + $0x160] sm:$0xf0] }
  0x32   :  { %547 = vmatpush.bf16.msrb.mxu0 %v6387_v59  ;;  %665 = vmatpush.bf16.msra.mxu1 %v6455_v53  ;;  %v8642_v59 = vld [vmem:[%s12781_s0 + $0x178] sm:$0xf0]  ;;  %v6527_v5 = vld [vmem:[%s12781_s0 + $0x78] sm:$0xf]  ;;  %v8609_v8 = vld [vmem:[%s12781_s0 + $0x80] sm:$0xf0] }
  0x33   :  { %593 = vmatpush.bf16.msrb.mxu2 %v6391_v1  ;;  %620 = vmatpush.bf16.msrb.mxu3 %v6439_v45  ;;  %v6407_v60 = vor.u32 %v8642_v59, %v6406_v58  ;;  %v6528_v9 = vor.u32 %v8609_v8, %v6527_v5  ;;  %v8636_v21 = vld [vmem:[%s12781_s0 + $0x148] sm:$0xf0]  ;;  %v6442_v24 = vld [vmem:[%s12781_s0 + $0x1b8] sm:$0xf]  ;;  %v8651_v27 = vld [vmem:[%s12781_s0 + $0x1c0] sm:$0xf0] }
  0x34   :  { %6291 = vmatmul.msk.bf16.gmra.mxu2 %vm151_vm0, %v8624_v57  ;;  %6272 = vmatmul.msk.bf16.gmra.mxu0 %vm151_vm0, %v8592_v62  ;;  %v6503_v30 = vld [vmem:[%s12781_s0 + $0x48] sm:$0xf]  ;;  %v6443_v32 = vor.u32 %v8651_v27, %v6442_v24  ;;  %v6491_v38 = vld [vmem:[%s12781_s0 + $0x30] sm:$0xf]  ;;  %v8630_v43 = vld [vmem:[%s12781_s0 + $0x118] sm:$0xf0] }
  0x35   :  { %6294 = vmatmul.msk.bf16.gmra.mxu3 %vm151_vm0, %v8624_v57  ;;  %6275 = vmatmul.msk.bf16.gmra.mxu1 %vm151_vm0, %v8592_v62  ;;  %v6552_v57 = vor.u32 %v8615_v56, %v6551_v55  ;;  %v8612_v62 = vld [vmem:[%s12781_s0 + $0x98] sm:$0xf0]  ;;  %v6370_v34 = vld [vmem:[%s12781_s0 + $0x128] sm:$0xf]  ;;  %v6358_v42 = vld [vmem:[%s12781_s0 + $0x110] sm:$0xf] }
  0x36   :  { %548 = vmatpush.bf16.msrb.mxu0 %v6375_v2  ;;  %v6540_v63 = vor.u32 %v8612_v62, %v6539_v61  ;;  %v6394_v2 = vld [vmem:[%s12781_s0 + $0x158] sm:$0xf]  ;;  %666 = vmatpush.bf16.msra.mxu1 %v6443_v32  ;;  %v8597_v46 = vld [vmem:[%s12781_s0 + $0x20] sm:$0xf0]  ;;  %v6563_v50 = vld [vmem:[%s12781_s0 + $0xc0] sm:$0xf]  ;;  %v6359_v52 = vor.u32 %v8630_v43, %v6358_v42 }
  0x37   :  { %594 = vmatpush.bf16.msrb.mxu2 %v6379_v12  ;;  %v6395_v6 = vor.u32 %v8639_v4, %v6394_v2  ;;  %v6515_v12 = vld [vmem:[%s12781_s0 + $0x60] sm:$0xf]  ;;  %v6479_v45 = vld [vmem:[%s12781_s0 + $0x18] sm:$0xf]  ;;  %v8621_v47 = vld [vmem:[%s12781_s0 + $0xe0] sm:$0xf0] }
  0x38   :  { %v8618_v53 = vld [vmem:[%s12781_s0 + $0xc8] sm:$0xf0]  ;;  %v6346_v55 = vld [vmem:[%s12781_s0 + $0xf8] sm:$0xf]  ;;  %v8627_v56 = vld [vmem:[%s12781_s0 + $0x100] sm:$0xf0] }
  0x39   :  { %v6467_v58 = vld [vmem:[%s12781_s0] sm:$0xf]  ;;  %v8594_v59 = vld [vmem:[%s12781_s0 + $0x8] sm:$0xf0]  ;;  %v6347_v62 = vor.u32 %v8627_v56, %v6346_v55  ;;  %v6547_v42 = vld [vmem:[%s12781_s0 + $0x98] sm:$0xf] }
  0x3a   :  { %549 = vmatpush.bf16.msrb.mxu0 %v6363_v13  ;;  %v8606_v13 = vld [vmem:[%s12781_s0 + $0x68] sm:$0xf0]  ;;  %v6505_v56 = vld [vmem:[%s12781_s0 + $0x54] sm:$0xf0] }
  0x3b   :  { %595 = vmatpush.bf16.msrb.mxu2 %v6367_v25  ;;  %v6516_v14 = vor.u32 %v8606_v13, %v6515_v12  ;;  %v8614_v8 = vld [vmem:[%s12781_s0 + $0xac] sm:$0xf]  ;;  %v8620_v12 = vld [vmem:[%s12781_s0 + $0xdc] sm:$0xf] }
  0x3c   :  { %v8602_v55 = vld [vmem:[%s12781_s0 + $0x4c] sm:$0xf] }
  0x3e   :  { %550 = vmatpush.bf16.msrb.mxu0 %v6351_v31  ;;  %v8603_v31 = vld [vmem:[%s12781_s0 + $0x50] sm:$0xf0] }
  0x3f   :  { %596 = vmatpush.bf16.msrb.mxu2 %v6355_v35  ;;  %v6504_v33 = vor.u32 %v8603_v31, %v6503_v30  ;;  %v8633_v35 = vld [vmem:[%s12781_s0 + $0x130] sm:$0xf0] }
  0x40   :  { %v6371_v39 = vor.u32 %v8633_v35, %v6370_v34  ;;  %v6559_v35 = vld [vmem:[%s12781_s0 + $0xb0] sm:$0xf] }
  0x42   :  { %551 = vmatpush.bf16.msrb.mxu0 %v6339_v40  ;;  %v8600_v40 = vld [vmem:[%s12781_s0 + $0x38] sm:$0xf0] }
  0x43   :  { %597 = vmatpush.bf16.msrb.mxu2 %v6343_v44  ;;  %v6492_v41 = vor.u32 %v8600_v40, %v6491_v38  ;;  %v6575_v44 = vld [vmem:[%s12781_s0 + $0xd8] sm:$0xf]  ;;  %v8616_v38 = vld [vmem:[%s12781_s0 + $0xb8] sm:$0xf0] }
  0x44   :  { %6292 = vmatmul.msk.bf16.gmra.mxu2 %vm151_vm0, %v271_v19  ;;  %6273 = vmatmul.msk.bf16.gmra.mxu0 %vm151_vm0, %v100_v20  ;;  %v8608_v40 = vld [vmem:[%s12781_s0 + $0x7c] sm:$0xf] }
  0x45   :  { %6295 = vmatmul.msk.bf16.gmra.mxu3 %vm151_vm0, %v271_v19  ;;  %6276 = vmatmul.msk.bf16.gmra.mxu1 %vm151_vm0, %v100_v20  ;;  %v6382_v20 = vld [vmem:[%s12781_s0 + $0x140] sm:$0xf] }
  0x46   :  { %636 = vmatpush.bf16.msra.mxu0 %v6431_v49  ;;  %v6383_v26 = vor.u32 %v8636_v21, %v6382_v20  ;;  %v6576_v49 = vor.u32 %v8621_v47, %v6575_v44  ;;  %v8605_v47 = vld [vmem:[%s12781_s0 + $0x64] sm:$0xf] }
  0x47   :  { %851 = vmatpush.bf16.msra.mxu2 %v6552_v57  ;;  %v6564_v57 = vor.u32 %v8618_v53, %v6563_v50  ;;  %v6535_v50 = vld [vmem:[%s12781_s0 + $0x80] sm:$0xf]  ;;  %v8617_v53 = vld [vmem:[%s12781_s0 + $0xc4] sm:$0xf] }
  0x48   :  { %880 = vmatpush.bf16.msra.mxu3 %v6576_v49 }
  0x4a   :  { %637 = vmatpush.bf16.msra.mxu0 %v6419_v54  ;;  %v6480_v54 = vor.u32 %v8597_v46, %v6479_v45  ;;  %v8613_v46 = vld [vmem:[%s12781_s0 + $0xa0] sm:$0xf0] }
  0x4b   :  { %852 = vmatpush.bf16.msra.mxu2 %v6540_v63  ;;  %v6468_v63 = vor.u32 %v8594_v59, %v6467_v58  ;;  %v6548_v49 = vor.u32 %v8613_v46, %v6547_v42  ;;  %v6523_v59 = vld [vmem:[%s12781_s0 + $0x68] sm:$0xf]  ;;  %v8619_v42 = vld [vmem:[%s12781_s0 + $0xd0] sm:$0xf0] }
  0x4c   :  { %881 = vmatpush.bf16.msra.mxu3 %v6564_v57  ;;  %v8595_v46 = vld [vmem:[%s12781_s0 + $0x10] sm:$0xf0] }
  0x4e   :  { %638 = vmatpush.bf16.msra.mxu0 %v6407_v60 }
  0x4f   :  { %853 = vmatpush.bf16.msra.mxu2 %v6528_v9  ;;  %v6553_v9 = vld [vmem:[%s12781_s0 + $0xb4] sm:$0xf0] }
  0x50   :  { %v6556_v13 = vor.u32 %v8614_v8, %v6553_v9 }
  0x52   :  { %639 = vmatpush.bf16.msra.mxu0 %v6395_v6 }
  0x53   :  { %854 = vmatpush.bf16.msra.mxu2 %v6516_v14  ;;  %v6577_v14 = vld [vmem:[%s12781_s0 + $0xe4] sm:$0xf0] }
  0x54   :  { %v6580_v20 = vor.u32 %v8620_v12, %v6577_v14  ;;  %v8604_v14 = vld [vmem:[%s12781_s0 + $0x58] sm:$0xf0] }
  0x56   :  { %640 = vmatpush.bf16.msra.mxu0 %v6383_v26 }
  0x57   :  { %855 = vmatpush.bf16.msra.mxu2 %v6504_v33 }
  0x5a   :  { %641 = vmatpush.bf16.msra.mxu0 %v6371_v39  ;;  %v6560_v39 = vor.u32 %v8616_v38, %v6559_v35  ;;  %v8593_v38 = vld [vmem:[%s12781_s0 + $0x4] sm:$0xf] }
  0x5b   :  { %856 = vmatpush.bf16.msra.mxu2 %v6492_v41  ;;  %v6529_v41 = vld [vmem:[%s12781_s0 + $0x84] sm:$0xf0] }
  0x5c   :  { %v6532_v45 = vor.u32 %v8608_v40, %v6529_v41  ;;  %v6571_v40 = vld [vmem:[%s12781_s0 + $0xc8] sm:$0xf] }
  0x5e   :  { %642 = vmatpush.bf16.msra.mxu0 %v6359_v52 }
  0x5f   :  { %857 = vmatpush.bf16.msra.mxu2 %v6480_v54  ;;  %v6565_v54 = vld [vmem:[%s12781_s0 + $0xcc] sm:$0xf0] }
  0x60   :  { %v6568_v57 = vor.u32 %v8617_v53, %v6565_v54  ;;  %v8655_v54 = vld [vmem:[%s12780_s3 + $0x28] sm:$0xff] }
  0x62   :  { %643 = vmatpush.bf16.msra.mxu0 %v6347_v62  ;;  %v8607_v62 = vld [vmem:[%s12781_s0 + $0x70] sm:$0xf0] }
  0x63   :  { %858 = vmatpush.bf16.msra.mxu2 %v6468_v63  ;;  %v6508_v63 = vor.u32 %v8602_v55, %v6505_v56  ;;  %v6524_v8 = vor.u32 %v8607_v62, %v6523_v59 }
  0xa1   :  { %v9536_v36 = vpop.f32.mrf.mxu0 }
  0xa2   :  { %v9538_v37 = vpop.f32.mrf.mxu1 }
  0xa7   :  { %v290_v0 = vpop.f32.mrf.mxu2 }
  0xa8   :  { %v313_v1 = vpop.f32.mrf.mxu3 }
  0xa9   :  { %v9582_v60 = vpop.f32.mrf.mxu0 }
  0xaa   :  { %v9584_v61 = vpop.f32.mrf.mxu1  ;;  %v9686_v9 = vpack.c.bf16 %v9582_v60, %v9536_v36  ;;  %v6493_v60 = vld [vmem:[%s12781_s0 + $0x3c] sm:$0xf0] }
  0xab   :  { %v9690_v12 = vpack.c.bf16 %v9584_v61, %v9538_v37  ;;  %v8599_v37 = vld [vmem:[%s12781_s0 + $0x34] sm:$0xf] }
  0xac   :  { %v6496_v61 = vor.u32 %v8599_v37, %v6493_v60 }
  0xaf   :  { %v292_v15 = vpop.f32.mrf.mxu2 }
  0xb0   :  { %v9502_v18 = vpack.c.bf16 %v292_v15, %v290_v0  ;;  %v315_v19 = vpop.f32.mrf.mxu3  ;;  %v8611_v15 = vld [vmem:[%s12781_s0 + $0x94] sm:$0xf] }
  0xb1   :  { %v9513_v25 = vpack.c.bf16 %v315_v19, %v313_v1  ;;  %v9596_v5 = vpop.f32.mrf.mxu0  ;;  %v6541_v19 = vld [vmem:[%s12781_s0 + $0x9c] sm:$0xf0] }
  0xb2   :  { %552 = vmatmul.bf16.vlgmr.msrb.gmra.mxu0 %v9502_v18  ;;  %598 = vmatmul.bf16.vlgmr.msrb.gmra.mxu2 %v9502_v18  ;;  %v9598_v6 = vpop.f32.mrf.mxu1  ;;  %v6544_v21 = vor.u32 %v8611_v15, %v6541_v19  ;;  %v8596_v15 = vld [vmem:[%s12781_s0 + $0x1c] sm:$0xf]  ;;  %v6481_v19 = vld [vmem:[%s12781_s0 + $0x24] sm:$0xf0] }
  0xb3   :  { %6456 = vmatmul.msk.bf16.vlgmr.msrb.gmra.mxu1 %vm534_vm1, %v9513_v25  ;;  %6459 = vmatmul.msk.bf16.vlgmr.msrb.gmra.mxu3 %vm534_vm1, %v9513_v25 }
  0xb4   :  { %897 = vmatpush.bf16.msrb.mxu0 %v6556_v13  ;;  %926 = vmatpush.bf16.msrb.mxu1 %v6580_v20  ;;  %v6511_v13 = vld [vmem:[%s12781_s0 + $0x50] sm:$0xf] }
  0xb5   :  { %943 = vmatpush.bf16.msrb.mxu2 %v6560_v39  ;;  %v6512_v36 = vor.u32 %v8604_v14, %v6511_v13  ;;  %v6469_v39 = vld [vmem:[%s12781_s0 + $0xc] sm:$0xf0] }
  0xb7   :  { %v295_v48 = vpop.f32.mrf.mxu2 }
  0xb8   :  { %v318_v51 = vpop.f32.mrf.mxu3  ;;  %898 = vmatpush.bf16.msrb.mxu0 %v6544_v21  ;;  %927 = vmatpush.bf16.msrb.mxu1 %v6568_v57  ;;  %v6487_v21 = vld [vmem:[%s12781_s0 + $0x20] sm:$0xf] }
  0xb9   :  { %v9618_v27 = vpop.f32.mrf.mxu0  ;;  %944 = vmatpush.bf16.msrb.mxu2 %v6548_v49 }
  0xba   :  { %v9620_v30 = vpop.f32.mrf.mxu1 }
  0xbc   :  { %899 = vmatpush.bf16.msrb.mxu0 %v6532_v45  ;;  %v6475_v45 = vld [vmem:[%s12781_s0 + $0x8] sm:$0xf] }
  0xbd   :  { %v6476_v49 = vor.u32 %v8595_v46, %v6475_v45 }
  0xbf   :  { %v297_v0 = vpop.f32.mrf.mxu2 }
  0xc0   :  { %v9586_v1 = vpack.c.bf16 %v297_v0, %v295_v48  ;;  %v320_v2 = vpop.f32.mrf.mxu3  ;;  %v6517_v48 = vld [vmem:[%s12781_s0 + $0x6c] sm:$0xf0] }
  0xc1   :  { %v9588_v4 = vpack.c.bf16 %v320_v2, %v318_v51  ;;  %v9647_v43 = vpop.f32.mrf.mxu0  ;;  %v8610_v51 = vld [vmem:[%s12781_s0 + $0x88] sm:$0xf0]  ;;  %v6520_v52 = vor.u32 %v8605_v47, %v6517_v48  ;;  %v6572_v47 = vor.u32 %v8619_v42, %v6571_v40  ;;  %v6472_v48 = vor.u32 %v8593_v38, %v6469_v39 }
  0xc2   :  { %557 = vmatmul.bf16.gmra.mxu0 %v9586_v1  ;;  %603 = vmatmul.bf16.gmra.mxu2 %v9586_v1  ;;  %v9649_v44 = vpop.f32.mrf.mxu1  ;;  %v6536_v58 = vor.u32 %v8610_v51, %v6535_v50  ;;  %v209_v50 = vpack.c.bf16 %v9618_v27, %v9596_v5  ;;  %v210_v51 = vpack.c.bf16 %v9620_v30, %v9598_v6 }
  0xc3   :  { %6457 = vmatmul.msk.bf16.gmra.mxu1 %vm534_vm1, %v9588_v4  ;;  %6460 = vmatmul.msk.bf16.gmra.mxu3 %vm534_vm1, %v9588_v4  ;;  %v211_v5 = vpack.c.bf16 %v9647_v43, %v9647_v43 }
  0xc4   :  { %900 = vmatpush.bf16.msrb.mxu0 %v6520_v52  ;;  %945 = vmatpush.bf16.msrb.mxu2 %v6536_v58 }
  0xc7   :  { %v300_v24 = vpop.f32.mrf.mxu2 }
  0xc8   :  { %v323_v26 = vpop.f32.mrf.mxu3  ;;  %v9622_v31 = vpack.c.bf16 %v300_v24, %v300_v24  ;;  %901 = vmatpush.bf16.msrb.mxu0 %v6508_v63  ;;  %946 = vmatpush.bf16.msrb.mxu2 %v6524_v8  ;;  %v8598_v24 = vld [vmem:[%s12781_s0 + $0x28] sm:$0xf0] }
  0xc9   :  { %v9624_v32 = vpack.c.bf16 %v323_v26, %v323_v26  ;;  %v182_v0 = vpop.f32.mrf.mxu0  ;;  %v6583_v26 = vld [vmem:[%s12781_s0 + $0xe0] sm:$0xf]  ;;  %v6488_v41 = vor.u32 %v8598_v24, %v6487_v21 }
  0xca   :  { %v205_v2 = vpop.f32.mrf.mxu1 }
  0xcc   :  { %947 = vmatpush.bf16.msrb.mxu2 %v6512_v36  ;;  %902 = vmatpush.bf16.msrb.mxu0 %v6496_v61  ;;  %v6598_v61 = vld [vmem:[%s12780_s3 + $0x38] sm:$0x3] }
  0xcf   :  { %v302_v33 = vpop.f32.mrf.mxu2 }
  0xd0   :  { %v325_v34 = vpop.f32.mrf.mxu3  ;;  %v6484_v33 = vor.u32 %v8596_v15, %v6481_v19  ;;  %v1004_v15 = vunpack.c.l.b16 %v6598_v61 }
  0xd1   :  { %v8622_v34 = vld [vmem:[%s12781_s0 + $0xe8] sm:$0xf0] }
  0xd2   :  { %562 = vmatmul.bf16.gmra.mxu0 %v9622_v31  ;;  %608 = vmatmul.bf16.gmra.mxu2 %v9622_v31  ;;  %v6584_v35 = vor.u32 %v8622_v34, %v6583_v26  ;;  %v1007_v21 = vpack.c.b16 %v1004_v15, %v1004_v15  ;;  %v6729_v15 = vld [vmem:[%s12781_s0 + $0x27c] sm:$0xf0] }
  0xd3   :  { %6458 = vmatmul.msk.bf16.gmra.mxu1 %vm534_vm1, %v9624_v32  ;;  %6461 = vmatmul.msk.bf16.gmra.mxu3 %vm534_vm1, %v9624_v32 }
  0xd4   :  { %972 = vmatpush.bf16.msrb.mxu3 %v6584_v35  ;;  %903 = vmatpush.bf16.msrb.mxu0 %v6484_v33 }
  0xd8   :  { %973 = vmatpush.bf16.msrb.mxu3 %v6572_v47  ;;  %904 = vmatpush.bf16.msrb.mxu0 %v6472_v48 }
  0xe2   :  { %644 = vmatmul.bf16.vlgmr.msra.gmra.mxu0 %v9502_v18  ;;  %859 = vmatmul.bf16.vlgmr.msra.gmra.mxu2 %v9686_v9  ;;  %v6499_v18 = vld [vmem:[%s12781_s0 + $0x38] sm:$0xf] }
  0xe3   :  { %6462 = vmatmul.msk.bf16.vlgmr.msra.gmra.mxu1 %vm534_vm1, %v9513_v25  ;;  %6585 = vmatmul.msk.bf16.vlgmr.msra.gmra.mxu3 %vm534_vm1, %v9690_v12  ;;  %v8601_v25 = vld [vmem:[%s12781_s0 + $0x40] sm:$0xf0] }
  0xe4   :  { %1043 = vmatpush.bf16.msra.mxu1 %v9218_v7  ;;  %v6500_v20 = vor.u32 %v8601_v25, %v6499_v18  ;;  %1020 = vmatpush.bf16.msra.mxu0 %v9207_v3 }
  0xe6   :  { %948 = vmatpush.bf16.msrb.mxu2 %v6500_v20 }
  0xe8   :  { %1044 = vmatpush.bf16.msra.mxu1 %v9231_v11  ;;  %1021 = vmatpush.bf16.msra.mxu0 %v9227_v10 }
  0xea   :  { %949 = vmatpush.bf16.msrb.mxu2 %v6488_v41 }
  0xec   :  { %1045 = vmatpush.bf16.msra.mxu1 %v9251_v17  ;;  %1022 = vmatpush.bf16.msra.mxu0 %v9247_v16 }
  0xee   :  { %950 = vmatpush.bf16.msrb.mxu2 %v6476_v49 }
  0xf0   :  { %1046 = vmatpush.bf16.msra.mxu1 %v9271_v23  ;;  %1023 = vmatpush.bf16.msra.mxu0 %v9267_v22 }
  0xf2   :  { %649 = vmatmul.bf16.gmra.mxu0 %v9586_v1  ;;  %864 = vmatmul.bf16.gmra.mxu2 %v209_v50  ;;  %v212_v1 = vpack.c.bf16 %v9649_v44, %v9649_v44 }
  0xf3   :  { %6463 = vmatmul.msk.bf16.gmra.mxu1 %vm534_vm1, %v9588_v4  ;;  %6586 = vmatmul.msk.bf16.gmra.mxu3 %vm534_vm1, %v210_v51 }
  0xf4   :  { %1047 = vmatpush.bf16.msra.mxu1 %v9291_v29  ;;  %1024 = vmatpush.bf16.msra.mxu0 %v9287_v28 }
 0x102   :  { %654 = vmatmul.bf16.gmra.mxu0 %v9622_v31  ;;  %869 = vmatmul.bf16.gmra.mxu2 %v211_v5 }
 0x103   :  { %6464 = vmatmul.msk.bf16.gmra.mxu1 %vm534_vm1, %v9624_v32  ;;  %6587 = vmatmul.msk.bf16.gmra.mxu3 %vm534_vm1, %v212_v1 }
 0x112   :  { %905 = vmatmul.bf16.vlgmr.msrb.gmra.mxu0 %v9686_v9  ;;  %951 = vmatmul.bf16.vlgmr.msrb.gmra.mxu2 %v9686_v9  ;;  %v8656_v9 = vld [vmem:[%s12780_s3 + $0x30] sm:$0xff] }
 0x113   :  { %6588 = vmatmul.msk.bf16.vlgmr.msrb.gmra.mxu1 %vm534_vm1, %v9690_v12  ;;  %6591 = vmatmul.msk.bf16.vlgmr.msrb.gmra.mxu3 %vm534_vm1, %v9690_v12 }
 0x122   :  { %910 = vmatmul.bf16.gmra.mxu0 %v209_v50  ;;  %956 = vmatmul.bf16.gmra.mxu2 %v209_v50 }
 0x123   :  { %6589 = vmatmul.msk.bf16.gmra.mxu1 %vm534_vm1, %v210_v51  ;;  %6592 = vmatmul.msk.bf16.gmra.mxu3 %vm534_vm1, %v210_v51 }
 0x12f   :  { %v553_v4 = vpop.f32.mrf.mxu0 }
 0x130   :  { %v576_v6 = vpop.f32.mrf.mxu1 }
 0x131   :  { %v577_v27 = vadd.f32 %v576_v6, %v553_v4 }
 0x132   :  { %915 = vmatmul.bf16.gmra.mxu0 %v211_v5  ;;  %961 = vmatmul.bf16.gmra.mxu2 %v211_v5 }
 0x133   :  { %6590 = vmatmul.msk.bf16.gmra.mxu1 %vm534_vm1, %v212_v1  ;;  %6593 = vmatmul.msk.bf16.gmra.mxu3 %vm534_vm1, %v212_v1 }
 0x135   :  { %v599_v30 = vpop.f32.mrf.mxu2 }
 0x136   :  { %v622_v31 = vpop.f32.mrf.mxu3 }
 0x137   :  { %v9788_v32 = vadd.f32 %v622_v31, %v599_v30  ;;  %v9790_v43 = vpop.f32.mrf.mxu0 }
 0x138   :  { %v9792_v44 = vpop.f32.mrf.mxu1 }
 0x13d   :  { %v9794_v52 = vpop.f32.mrf.mxu2 }
 0x13e   :  { %v9796_v53 = vpop.f32.mrf.mxu3 }
 0x13f   :  { %v558_v55 = vpop.f32.mrf.mxu0 }
 0x140   :  { %v581_v56 = vpop.f32.mrf.mxu1 }
 0x141   :  { %v582_v57 = vadd.f32 %v581_v56, %v558_v55  ;;  %v8678_v55 = vld [vmem:[%s12781_s0 + $0x28c] sm:$0xf]  ;;  %v6741_v56 = vld [vmem:[%s12781_s0 + $0x294] sm:$0xf0] }
 0x142   :  { %6607 = vmatmul.msk.bf16.vlgmr.msra.gmra.mxu0 %vm151_vm0, %v8655_v54 }
 0x143   :  { %6610 = vmatmul.msk.bf16.vlgmr.msra.gmra.mxu1 %vm151_vm0, %v8655_v54 }
 0x145   :  { %v604_v58 = vpop.f32.mrf.mxu2 }
 0x146   :  { %v627_v59 = vpop.f32.mrf.mxu3 }
 0x147   :  { %v9803_v62 = vadd.f32 %v627_v59, %v604_v58  ;;  %v9805_v63 = vpop.f32.mrf.mxu0  ;;  %v6744_v58 = vor.u32 %v8678_v55, %v6741_v56  ;;  %v6765_v59 = vld [vmem:[%s12781_s0 + $0x2c4] sm:$0xf0]  ;;  %v8673_v55 = vld [vmem:[%s12781_s0 + $0x260] sm:$0xf0] }
 0x148   :  { %v9807_v0 = vpop.f32.mrf.mxu1 }
 0x149   :  { %1325 = vmatpush.bf16.msrb.mxu0 %v6744_v58 }
 0x14d   :  { %v9809_v2 = vpop.f32.mrf.mxu2 }
 0x14e   :  { %v9811_v8 = vpop.f32.mrf.mxu3 }
 0x14f   :  { %v563_v12 = vpop.f32.mrf.mxu0 }
 0x150   :  { %v586_v13 = vpop.f32.mrf.mxu1 }
 0x151   :  { %v587_v14 = vadd.f32 %v586_v13, %v563_v12 }
 0x152   :  { %6608 = vmatmul.msk.bf16.gmra.mxu0 %vm151_vm0, %v8656_v9 }
 0x153   :  { %6611 = vmatmul.msk.bf16.gmra.mxu1 %vm151_vm0, %v8656_v9 }
 0x155   :  { %v609_v36 = vpop.f32.mrf.mxu2 }
 0x156   :  { %v632_v37 = vpop.f32.mrf.mxu3 }
 0x157   :  { %v9818_v60 = vadd.f32 %v632_v37, %v609_v36  ;;  %v565_v18 = vpop.f32.mrf.mxu0 }
 0x158   :  { %v588_v25 = vpop.f32.mrf.mxu1 }
 0x159   :  { %v8675_v25 = vld [vmem:[%s12781_s0 + $0x274] sm:$0xf] }
 0x15d   :  { %v611_v19 = vpop.f32.mrf.mxu2 }
 0x15e   :  { %v634_v20 = vpop.f32.mrf.mxu3  ;;  %v6732_v19 = vor.u32 %v8675_v25, %v6729_v15 }
 0x15f   :  { %v645_v24 = vpop.f32.mrf.mxu0  ;;  %v6739_v20 = vld [vmem:[%s12781_s0 + $0x288] sm:$0xf] }
 0x160   :  { %v668_v26 = vpop.f32.mrf.mxu1  ;;  %1326 = vmatpush.bf16.msrb.mxu0 %v6732_v19 }
 0x161   :  { %v9823_v33 = vadd.f32 %v668_v26, %v645_v24  ;;  %v8672_v24 = vld [vmem:[%s12781_s0 + $0x25c] sm:$0xf]  ;;  %v6717_v26 = vld [vmem:[%s12781_s0 + $0x264] sm:$0xf0] }
 0x162   :  { %6609 = vmatmul.msk.bf16.gmra.mxu0 %vm151_vm0, %v1007_v21 }
 0x163   :  { %6612 = vmatmul.msk.bf16.gmra.mxu1 %vm151_vm0, %v1007_v21 }
 0x165   :  { %v860_v34 = vpop.f32.mrf.mxu2 }
 0x166   :  { %v861_v35 = vadd.f32 %v860_v34, %v577_v27  ;;  %v883_v38 = vpop.f32.mrf.mxu3  ;;  %v6720_v34 = vor.u32 %v8672_v24, %v6717_v26  ;;  %v6753_v24 = vld [vmem:[%s12781_s0 + $0x2ac] sm:$0xf0]  ;;  %v6691_v26 = vld [vmem:[%s12781_s0 + $0x228] sm:$0xf] }
 0x167   :  { %v9827_v39 = vpop.f32.mrf.mxu0 }
 0x168   :  { %12782 = vst [vmem:[#allocation8_spill] sm:$0xff] %v9827_v39  ;;  %v9829_v40 = vadd.f32 %v883_v38, %v861_v35  ;;  %v9831_v41 = vpop.f32.mrf.mxu1  ;;  %v6727_v38 = vld [vmem:[%s12781_s0 + $0x270] sm:$0xf]  ;;  %1327 = vmatpush.bf16.msrb.mxu0 %v6720_v34  ;;  %v8667_v34 = vld [vmem:[%s12781_s0 + $0x230] sm:$0xf0] }
 0x169   :  { %12783 = vst [vmem:[#allocation9_spill] sm:$0xff] %v9831_v41 }
 0x16d   :  { %v9833_v42 = vpop.f32.mrf.mxu2 }
 0x16e   :  { %v9835_v45 = vpop.f32.mrf.mxu3 }
 0x16f   :  { %v650_v46 = vpop.f32.mrf.mxu0 }
 0x170   :  { %v673_v47 = vpop.f32.mrf.mxu1 }
 0x171   :  { %v9837_v48 = vadd.f32 %v673_v47, %v650_v46  ;;  %v8676_v46 = vld [vmem:[%s12781_s0 + $0x278] sm:$0xf0] }
 0x175   :  { %v865_v49 = vpop.f32.mrf.mxu2 }
 0x176   :  { %v866_v50 = vadd.f32 %v865_v49, %v582_v57  ;;  %v888_v51 = vpop.f32.mrf.mxu3  ;;  %v8684_v57 = vld [vmem:[%s12781_s0 + $0x2bc] sm:$0xf]  ;;  %v6728_v49 = vor.u32 %v8676_v46, %v6727_v38  ;;  %v6692_v38 = vor.u32 %v8667_v34, %v6691_v26  ;;  %v6751_v26 = vld [vmem:[%s12781_s0 + $0x2a0] sm:$0xf] }
 0x177   :  { %v9839_v5 = vpop.f32.mrf.mxu0  ;;  %v6768_v9 = vor.u32 %v8684_v57, %v6765_v59  ;;  %v8669_v57 = vld [vmem:[%s12781_s0 + $0x244] sm:$0xf] }
 0x178   :  { %12784 = vst [vmem:[#allocation10_spill] sm:$0xff] %v9839_v5  ;;  %v9841_v1 = vadd.f32 %v888_v51, %v866_v50  ;;  %v9843_v4 = vpop.f32.mrf.mxu1 }
 0x179   :  { %12785 = vst [vmem:[#allocation11_spill] sm:$0xff] %v9843_v4  ;;  %1354 = vmatpush.bf16.msrb.mxu1 %v6768_v9 }
 0x17d   :  { %v9845_v6 = vpop.f32.mrf.mxu2 }
 0x17e   :  { %v9847_v27 = vpop.f32.mrf.mxu3 }
 0x17f   :  { %v655_v30 = vpop.f32.mrf.mxu0 }
 0x180   :  { %v678_v31 = vpop.f32.mrf.mxu1 }
 0x181   :  { %v9849_v54 = vadd.f32 %v678_v31, %v655_v30  ;;  %v6715_v31 = vld [vmem:[%s12781_s0 + $0x258] sm:$0xf] }
 0x182   :  { %v6716_v58 = vor.u32 %v8673_v55, %v6715_v31  ;;  %v8664_v31 = vld [vmem:[%s12781_s0 + $0x218] sm:$0xf0] }
 0x185   :  { %v870_v12 = vpop.f32.mrf.mxu2 }
 0x186   :  { %v871_v13 = vadd.f32 %v870_v12, %v587_v14  ;;  %v893_v36 = vpop.f32.mrf.mxu3  ;;  %v8679_v14 = vld [vmem:[%s12781_s0 + $0x290] sm:$0xf0]  ;;  %v6703_v12 = vld [vmem:[%s12781_s0 + $0x240] sm:$0xf] }
 0x187   :  { %v657_v37 = vpop.f32.mrf.mxu0  ;;  %v6740_v21 = vor.u32 %v8679_v14, %v6739_v20  ;;  %v8666_v20 = vld [vmem:[%s12781_s0 + $0x22c] sm:$0xf]  ;;  %v6693_v14 = vld [vmem:[%s12781_s0 + $0x234] sm:$0xf0] }
 0x188   :  { %v9863_v18 = vadd.f32 %v893_v36, %v871_v13  ;;  %v680_v61 = vpop.f32.mrf.mxu1  ;;  %v8670_v13 = vld [vmem:[%s12781_s0 + $0x248] sm:$0xf0] }
 0x189   :  { %1279 = vmatpush.bf16.msra.mxu2 %v6740_v21  ;;  %v6704_v61 = vor.u32 %v8670_v13, %v6703_v12  ;;  %v6696_v21 = vor.u32 %v8666_v20, %v6693_v14  ;;  %v6763_v12 = vld [vmem:[%s12781_s0 + $0x2b8] sm:$0xf] }
 0x18d   :  { %v872_v35 = vpop.f32.mrf.mxu2  ;;  %1280 = vmatpush.bf16.msra.mxu2 %v6728_v49  ;;  %v6681_v49 = vld [vmem:[%s12781_s0 + $0x21c] sm:$0xf0] }
 0x18e   :  { %v895_v47 = vpop.f32.mrf.mxu3 }
 0x18f   :  { %v906_v50 = vpop.f32.mrf.mxu0  ;;  %v8663_v47 = vld [vmem:[%s12781_s0 + $0x214] sm:$0xf] }
 0x190   :  { %v907_v51 = vadd.f32 %v906_v50, %v9788_v32  ;;  %v929_v30 = vpop.f32.mrf.mxu1  ;;  %v6705_v32 = vld [vmem:[%s12781_s0 + $0x24c] sm:$0xf0] }
 0x191   :  { %v6708_v59 = vor.u32 %v8669_v57, %v6705_v32  ;;  %1281 = vmatpush.bf16.msra.mxu2 %v6716_v58  ;;  %v6679_v50 = vld [vmem:[%s12781_s0 + $0x210] sm:$0xf] }
 0x192   :  { %v9896_v56 = vadd.f32 %v929_v30, %v907_v51  ;;  %v6684_v30 = vor.u32 %v8663_v47, %v6681_v49  ;;  %v6680_v57 = vor.u32 %v8664_v31, %v6679_v50  ;;  %v8682_v47 = vld [vmem:[%s12781_s0 + $0x2a8] sm:$0xf0]  ;;  %v8657_v49 = vld [vmem:[%s12781_s0 + $0x1e4] sm:$0xf]  ;;  %v6657_v50 = vld [vmem:[%s12781_s0 + $0x1ec] sm:$0xf0] }
 0x193   :  { %1328 = vmatpush.bf16.msrb.mxu0 %v6708_v59  ;;  %v6667_v59 = vld [vmem:[%s12781_s0 + $0x1f8] sm:$0xf]  ;;  %v6752_v31 = vor.u32 %v8682_v47, %v6751_v26 }
 0x194   :  { %v6735_v26 = vld [vmem:[%s12781_s0 + $0x278] sm:$0xf] }
 0x195   :  { %v952_v9 = vpop.f32.mrf.mxu2  ;;  %1282 = vmatpush.bf16.msra.mxu2 %v6704_v61 }
 0x196   :  { %v953_v36 = vadd.f32 %v952_v9, %v9823_v33  ;;  %v975_v37 = vpop.f32.mrf.mxu3  ;;  %v8681_v33 = vld [vmem:[%s12781_s0 + $0x2a4] sm:$0xf] }
 0x197   :  { %v9911_v25 = vpop.f32.mrf.mxu0  ;;  %v6756_v35 = vor.u32 %v8681_v33, %v6753_v24  ;;  %1329 = vmatpush.bf16.msrb.mxu0 %v6696_v21  ;;  %v8661_v9 = vld [vmem:[%s12781_s0 + $0x200] sm:$0xf0]  ;;  %v6655_v21 = vld [vmem:[%s12781_s0 + $0x1e0] sm:$0xf]  ;;  %v8658_v24 = vld [vmem:[%s12781_s0 + $0x1e8] sm:$0xf0] }
 0x198   :  { %v9913_v15 = vadd.f32 %v975_v37, %v953_v36  ;;  %v9915_v19 = vpop.f32.mrf.mxu1  ;;  %v6668_v13 = vor.u32 %v8661_v9, %v6667_v59  ;;  %v8660_v36 = vld [vmem:[%s12781_s0 + $0x1fc] sm:$0xf]  ;;  %v6669_v37 = vld [vmem:[%s12781_s0 + $0x204] sm:$0xf0] }
 0x199   :  { %1355 = vmatpush.bf16.msrb.mxu1 %v6756_v35  ;;  %1283 = vmatpush.bf16.msra.mxu2 %v6692_v38  ;;  %v6672_v14 = vor.u32 %v8660_v36, %v6669_v37  ;;  %v6656_v38 = vor.u32 %v8658_v24, %v6655_v21  ;;  %v6747_v21 = vld [vmem:[%s12781_s0 + $0x290] sm:$0xf] }
 0x19b   :  { %1330 = vmatpush.bf16.msrb.mxu0 %v6684_v30 }
 0x19d   :  { %v9935_v46 = vpop.f32.mrf.mxu2  ;;  %1486 = vmatpush.bf16.msra.mxu1 %v9218_v7  ;;  %1284 = vmatpush.bf16.msra.mxu2 %v6680_v57 }
 0x19e   :  { %12786 = vst [vmem:[#allocation12_spill] sm:$0xff] %v9935_v46  ;;  %v9947_v51 = vpop.f32.mrf.mxu3 }
 0x19f   :  { %12787 = vst [vmem:[#allocation13_spill] sm:$0xff] %v9947_v51  ;;  %v911_v55 = vpop.f32.mrf.mxu0  ;;  %1331 = vmatpush.bf16.msrb.mxu0 %v6672_v14  ;;  %v7039_v51 = vld [vmem:[%s12781_s0 + $0x3c8] sm:$0xf] }
 0x1a0   :  { %v912_v32 = vadd.f32 %v911_v55, %v9803_v62  ;;  %v934_v58 = vpop.f32.mrf.mxu1  ;;  %v8685_v62 = vld [vmem:[%s12781_s0 + $0x2c0] sm:$0xf0]  ;;  %v6660_v55 = vor.u32 %v8657_v49, %v6657_v50  ;;  %v6723_v50 = vld [vmem:[%s12781_s0 + $0x260] sm:$0xf] }
 0x1a1   :  { %1487 = vmatpush.bf16.msra.mxu1 %v9231_v11  ;;  %v6764_v20 = vor.u32 %v8685_v62, %v6763_v12  ;;  %1285 = vmatpush.bf16.msra.mxu2 %v6668_v13 }
 0x1a2   :  { %v9972_v61 = vadd.f32 %v934_v58, %v912_v32 }
 0x1a3   :  { %1308 = vmatpush.bf16.msra.mxu3 %v6764_v20  ;;  %1332 = vmatpush.bf16.msrb.mxu0 %v6660_v55 }
 0x1a5   :  { %v957_v33 = vpop.f32.mrf.mxu2  ;;  %1488 = vmatpush.bf16.msra.mxu1 %v9251_v17  ;;  %1286 = vmatpush.bf16.msra.mxu2 %v6656_v38 }
 0x1a6   :  { %v958_v34 = vadd.f32 %v957_v33, %v9837_v48  ;;  %v980_v35 = vpop.f32.mrf.mxu3 }
 0x1a7   :  { %v9994_v30 = vpop.f32.mrf.mxu0  ;;  %1309 = vmatpush.bf16.msra.mxu3 %v6752_v31  ;;  %1463 = vmatpush.bf16.msra.mxu0 %v9207_v3  ;;  %v8674_v31 = vld [vmem:[%s12781_s0 + $0x268] sm:$0xf0] }
 0x1a8   :  { %v9996_v57 = vadd.f32 %v980_v35, %v958_v34  ;;  %v9998_v48 = vpop.f32.mrf.mxu1  ;;  %v8677_v34 = vld [vmem:[%s12781_s0 + $0x280] sm:$0xf0]  ;;  %v6724_v55 = vor.u32 %v8674_v31, %v6723_v50  ;;  %v6759_v50 = vld [vmem:[%s12781_s0 + $0x2a8] sm:$0xf]  ;;  %v8683_v31 = vld [vmem:[%s12781_s0 + $0x2b0] sm:$0xf0] }
 0x1a9   :  { %1489 = vmatpush.bf16.msra.mxu1 %v9271_v23  ;;  %v6736_v38 = vor.u32 %v8677_v34, %v6735_v26  ;;  %v6771_v34 = vld [vmem:[%s12781_s0 + $0x2c0] sm:$0xf] }
 0x1ab   :  { %1464 = vmatpush.bf16.msra.mxu0 %v9227_v10 }
 0x1ad   :  { %v10002_v32 = vpop.f32.mrf.mxu2  ;;  %1490 = vmatpush.bf16.msra.mxu1 %v9291_v29 }
 0x1ae   :  { %12788 = vst [vmem:[#allocation14_spill] sm:$0xff] %v10002_v32  ;;  %v10004_v58 = vpop.f32.mrf.mxu3 }
 0x1af   :  { %12789 = vst [vmem:[#allocation15_spill] sm:$0xff] %v10004_v58  ;;  %v916_v59 = vpop.f32.mrf.mxu0  ;;  %1465 = vmatpush.bf16.msra.mxu0 %v9247_v16 }
 0x1b0   :  { %v917_v9 = vadd.f32 %v916_v59, %v9818_v60  ;;  %v939_v12 = vpop.f32.mrf.mxu1  ;;  %v8680_v60 = vld [vmem:[%s12781_s0 + $0x298] sm:$0xf0]  ;;  %v6711_v59 = vld [vmem:[%s12781_s0 + $0x248] sm:$0xf] }
 0x1b1   :  { %v6748_v24 = vor.u32 %v8680_v60, %v6747_v21  ;;  %v8668_v21 = vld [vmem:[%s12781_s0 + $0x238] sm:$0xf0] }
 0x1b2   :  { %v10009_v13 = vadd.f32 %v939_v12, %v917_v9  ;;  %v8671_v9 = vld [vmem:[%s12781_s0 + $0x250] sm:$0xf0] }
 0x1b3   :  { %1466 = vmatpush.bf16.msra.mxu0 %v9267_v22  ;;  %1371 = vmatpush.bf16.msrb.mxu2 %v6748_v24  ;;  %v6712_v12 = vor.u32 %v8671_v9, %v6711_v59  ;;  %v6687_v24 = vld [vmem:[%s12781_s0 + $0x218] sm:$0xf]  ;;  %v6760_v59 = vor.u32 %v8683_v31, %v6759_v50  ;;  %v8687_v50 = vld [vmem:[%s12780_s3 + $0x3c] sm:$0xff]  ;;  %v8688_v31 = vld [vmem:[%s12780_s3 + $0x44] sm:$0xff] }
 0x1b5   :  { %v962_v62 = vpop.f32.mrf.mxu2 }
 0x1b6   :  { %v963_v36 = vadd.f32 %v962_v62, %v9849_v54  ;;  %v985_v37 = vpop.f32.mrf.mxu3 }
 0x1b7   :  { %v918_v20 = vpop.f32.mrf.mxu0  ;;  %1467 = vmatpush.bf16.msra.mxu0 %v9287_v28  ;;  %1372 = vmatpush.bf16.msrb.mxu2 %v6736_v38  ;;  %v6675_v38 = vld [vmem:[%s12781_s0 + $0x200] sm:$0xf] }
 0x1b8   :  { %v10014_v14 = vadd.f32 %v985_v37, %v963_v36  ;;  %v941_v33 = vpop.f32.mrf.mxu1 }
 0x1b9   :  { %v6699_v33 = vld [vmem:[%s12781_s0 + $0x230] sm:$0xf] }
 0x1ba   :  { %v6700_v60 = vor.u32 %v8668_v21, %v6699_v33 }
 0x1bb   :  { %1373 = vmatpush.bf16.msrb.mxu2 %v6724_v55 }
 0x1bd   :  { %v964_v54 = vpop.f32.mrf.mxu2 }
 0x1be   :  { %v987_v35 = vpop.f32.mrf.mxu3  ;;  %v8665_v54 = vld [vmem:[%s12781_s0 + $0x220] sm:$0xf0] }
 0x1bf   :  { %v1026_v47 = vpop.f32.mrf.mxu0  ;;  %1374 = vmatpush.bf16.msrb.mxu2 %v6712_v12  ;;  %v6688_v26 = vor.u32 %v8665_v54, %v6687_v24  ;;  %v8686_v35 = vld [vmem:[%s12781_s0 + $0x2c8] sm:$0xf0] }
 0x1c0   :  { %v1049_v49 = vpop.f32.mrf.mxu1 }
 0x1c3   :  { %1375 = vmatpush.bf16.msrb.mxu2 %v6700_v60 }
 0x1c7   :  { %v1028_v62 = vpop.f32.mrf.mxu0  ;;  %1376 = vmatpush.bf16.msrb.mxu2 %v6688_v26 }
 0x1c8   :  { %v1063_v36 = vpack.c.bf16 %v1028_v62, %v1026_v47  ;;  %v1051_v37 = vpop.f32.mrf.mxu1  ;;  %v8662_v47 = vld [vmem:[%s12781_s0 + $0x208] sm:$0xf0]  ;;  %v6663_v62 = vld [vmem:[%s12781_s0 + $0x1e8] sm:$0xf] }
 0x1c9   :  { %v1064_v20 = vpack.c.bf16 %v1051_v37, %v1049_v49  ;;  %v6772_v49 = vor.u32 %v8686_v35, %v6771_v34  ;;  %v6676_v12 = vor.u32 %v8662_v47, %v6675_v38  ;;  %v8659_v37 = vld [vmem:[%s12781_s0 + $0x1f0] sm:$0xf0] }
 0x1ca   :  { %1287 = vmatmul.bf16.vlgmr.msra.gmra.mxu2 %v1063_v36  ;;  %1333 = vmatmul.bf16.vlgmr.msrb.gmra.mxu0 %v1063_v36  ;;  %v6664_v33 = vor.u32 %v8659_v37, %v6663_v62  ;;  %v6953_v37 = vld [vmem:[%s12781_s0 + $0x3b4] sm:$0xf0] }
 0x1cb   :  { %6773 = vmatmul.msk.bf16.vlgmr.msra.gmra.mxu3 %vm534_vm1, %v1064_v20  ;;  %6776 = vmatmul.msk.bf16.vlgmr.msrb.gmra.mxu1 %vm534_vm1, %v1064_v20 }
 0x1cc   :  { %1400 = vmatpush.bf16.msrb.mxu3 %v6772_v49  ;;  %1377 = vmatpush.bf16.msrb.mxu2 %v6676_v12  ;;  %v8716_v12 = vld [vmem:[%s12781_s0 + $0x3ac] sm:$0xf] }
 0x1cf   :  { %v1031_v55 = vpop.f32.mrf.mxu0 }
 0x1d0   :  { %v1054_v9 = vpop.f32.mrf.mxu1  ;;  %1401 = vmatpush.bf16.msrb.mxu3 %v6760_v59  ;;  %1378 = vmatpush.bf16.msrb.mxu2 %v6664_v33  ;;  %v6956_v33 = vor.u32 %v8716_v12, %v6953_v37  ;;  %v8701_v37 = vld [vmem:[%s12781_s0 + $0x334] sm:$0xf] }
 0x1d2   :  { %1797 = vmatpush.bf16.msrb.mxu1 %v6956_v33  ;;  %v6893_v33 = vld [vmem:[%s12781_s0 + $0x33c] sm:$0xf0] }
 0x1d7   :  { %v1033_v21 = vpop.f32.mrf.mxu0 }
 0x1d8   :  { %v1065_v60 = vpack.c.bf16 %v1033_v21, %v1031_v55  ;;  %v1056_v24 = vpop.f32.mrf.mxu1  ;;  %v8707_v21 = vld [vmem:[%s12781_s0 + $0x364] sm:$0xf] }
 0x1d9   :  { %v1066_v54 = vpack.c.bf16 %v1056_v24, %v1054_v9  ;;  %v6929_v9 = vld [vmem:[%s12781_s0 + $0x384] sm:$0xf0]  ;;  %v6927_v24 = vld [vmem:[%s12781_s0 + $0x378] sm:$0xf] }
 0x1da   :  { %1292 = vmatmul.bf16.gmra.mxu2 %v1065_v60  ;;  %1338 = vmatmul.bf16.gmra.mxu0 %v1065_v60 }
 0x1db   :  { %6774 = vmatmul.msk.bf16.gmra.mxu3 %vm534_vm1, %v1066_v54  ;;  %6777 = vmatmul.msk.bf16.gmra.mxu1 %vm534_vm1, %v1066_v54 }
 0x1df   :  { %v1036_v26 = vpop.f32.mrf.mxu0 }
 0x1e0   :  { %v1059_v34 = vpop.f32.mrf.mxu1  ;;  %v1067_v35 = vpack.c.bf16 %v1036_v26, %v1036_v26  ;;  %v8711_v26 = vld [vmem:[%s12781_s0 + $0x380] sm:$0xf0] }
 0x1e1   :  { %v1068_v38 = vpack.c.bf16 %v1059_v34, %v1059_v34  ;;  %v6928_v34 = vor.u32 %v8711_v26, %v6927_v24  ;;  %v6891_v24 = vld [vmem:[%s12781_s0 + $0x330] sm:$0xf] }
 0x1e3   :  { %1722 = vmatpush.bf16.msra.mxu2 %v6928_v34 }
 0x1e7   :  { %v1038_v47 = vpop.f32.mrf.mxu0 }
 0x1e8   :  { %v1061_v49 = vpop.f32.mrf.mxu1 }
 0x1e9   :  { %v6915_v49 = vld [vmem:[%s12781_s0 + $0x360] sm:$0xf] }
 0x1ea   :  { %1297 = vmatmul.bf16.gmra.mxu2 %v1067_v35  ;;  %1343 = vmatmul.bf16.gmra.mxu0 %v1067_v35 }
 0x1eb   :  { %6775 = vmatmul.msk.bf16.gmra.mxu3 %vm534_vm1, %v1068_v38  ;;  %6778 = vmatmul.msk.bf16.gmra.mxu1 %vm534_vm1, %v1068_v38 }
 0x1fa   :  { %1379 = vmatmul.bf16.vlgmr.msrb.gmra.mxu2 %v1063_v36  ;;  %6795 = vmatmul.msk.bf16.vlgmr.msra.gmra.mxu0 %vm151_vm0, %v8687_v50  ;;  %v6786_v36 = vld [vmem:[%s12780_s3 + $0x4c] sm:$0x3] }
 0x1fb   :  { %6779 = vmatmul.msk.bf16.vlgmr.msrb.gmra.mxu3 %vm534_vm1, %v1064_v20  ;;  %6798 = vmatmul.msk.bf16.vlgmr.msra.gmra.mxu1 %vm151_vm0, %v8687_v50  ;;  %v1447_v55 = vunpack.c.l.b16 %v6786_v36  ;;  %v8710_v20 = vld [vmem:[%s12781_s0 + $0x37c] sm:$0xf]  ;;  %v8708_v50 = vld [vmem:[%s12781_s0 + $0x368] sm:$0xf0] }
 0x1fc   :  { %v6932_v62 = vor.u32 %v8710_v20, %v6929_v9  ;;  %v6903_v20 = vld [vmem:[%s12781_s0 + $0x348] sm:$0xf]  ;;  %v8705_v9 = vld [vmem:[%s12781_s0 + $0x350] sm:$0xf0] }
 0x1fd   :  { %v1450_v59 = vpack.c.b16 %v1447_v55, %v1447_v55  ;;  %v6904_v12 = vor.u32 %v8705_v9, %v6903_v20 }
 0x1fe   :  { %1768 = vmatpush.bf16.msrb.mxu0 %v6932_v62 }
 0x20a   :  { %1384 = vmatmul.bf16.gmra.mxu2 %v1065_v60  ;;  %6796 = vmatmul.msk.bf16.gmra.mxu0 %vm151_vm0, %v8688_v31  ;;  %v6917_v60 = vld [vmem:[%s12781_s0 + $0x36c] sm:$0xf0] }
 0x20b   :  { %6780 = vmatmul.msk.bf16.gmra.mxu3 %vm534_vm1, %v1066_v54  ;;  %6799 = vmatmul.msk.bf16.gmra.mxu1 %vm151_vm0, %v8688_v31  ;;  %v6920_v54 = vor.u32 %v8707_v21, %v6917_v60  ;;  %v6916_v31 = vor.u32 %v8708_v50, %v6915_v49  ;;  %v6896_v21 = vor.u32 %v8701_v37, %v6893_v33  ;;  %v8698_v49 = vld [vmem:[%s12781_s0 + $0x31c] sm:$0xf]  ;;  %v6881_v50 = vld [vmem:[%s12781_s0 + $0x324] sm:$0xf0]  ;;  %v8695_v37 = vld [vmem:[%s12781_s0 + $0x304] sm:$0xf] }
 0x20c   :  { %v6869_v33 = vld [vmem:[%s12781_s0 + $0x30c] sm:$0xf0] }
 0x20d   :  { %1769 = vmatpush.bf16.msrb.mxu0 %v6920_v54  ;;  %1723 = vmatpush.bf16.msra.mxu2 %v6916_v31  ;;  %v8713_v31 = vld [vmem:[%s12781_s0 + $0x394] sm:$0xf] }
 0x211   :  { %1724 = vmatpush.bf16.msra.mxu2 %v6904_v12 }
 0x21a   :  { %1389 = vmatmul.bf16.gmra.mxu2 %v1067_v35  ;;  %6797 = vmatmul.msk.bf16.gmra.mxu0 %vm151_vm0, %v1450_v59  ;;  %v8704_v35 = vld [vmem:[%s12781_s0 + $0x34c] sm:$0xf] }
 0x21b   :  { %6781 = vmatmul.msk.bf16.gmra.mxu3 %vm534_vm1, %v1068_v38  ;;  %6800 = vmatmul.msk.bf16.gmra.mxu1 %vm151_vm0, %v1450_v59  ;;  %v6905_v38 = vld [vmem:[%s12781_s0 + $0x354] sm:$0xf0] }
 0x21c   :  { %v6908_v47 = vor.u32 %v8704_v35, %v6905_v38 }
 0x21e   :  { %1770 = vmatpush.bf16.msrb.mxu0 %v6908_v47 }
 0x222   :  { %1771 = vmatpush.bf16.msrb.mxu0 %v6896_v21  ;;  %v6867_v21 = vld [vmem:[%s12781_s0 + $0x300] sm:$0xf] }
 0x247   :  { %v1334_v36 = vpop.f32.mrf.mxu0 }
 0x248   :  { %v1357_v55 = vpop.f32.mrf.mxu1 }
 0x249   :  { %v1358_v59 = vadd.f32 %v1357_v55, %v1334_v36  ;;  %v6884_v36 = vor.u32 %v8698_v49, %v6881_v50  ;;  %v6941_v55 = vld [vmem:[%s12781_s0 + $0x39c] sm:$0xf0]  ;;  %v6855_v49 = vld [vmem:[%s12781_s0 + $0x2e8] sm:$0xf]  ;;  %v8693_v50 = vld [vmem:[%s12781_s0 + $0x2f0] sm:$0xf0] }
 0x24a   :  { %v6944_v20 = vor.u32 %v8713_v31, %v6941_v55  ;;  %v6951_v31 = vld [vmem:[%s12781_s0 + $0x3a8] sm:$0xf]  ;;  %v6856_v55 = vor.u32 %v8693_v50, %v6855_v49 }
 0x24b   :  { %v10144_v62 = vadd.f32 %v1358_v59, %v9896_v56  ;;  %v8702_v56 = vld [vmem:[%s12781_s0 + $0x338] sm:$0xf0]  ;;  %v8699_v59 = vld [vmem:[%s12781_s0 + $0x320] sm:$0xf0]  ;;  %1772 = vmatpush.bf16.msrb.mxu0 %v6884_v36 }
 0x24c   :  { %v6892_v26 = vor.u32 %v8702_v56, %v6891_v24  ;;  %1798 = vmatpush.bf16.msrb.mxu1 %v6944_v20  ;;  %v6872_v24 = vor.u32 %v8695_v37, %v6869_v33  ;;  %v8696_v56 = vld [vmem:[%s12781_s0 + $0x308] sm:$0xf0] }
 0x24d   :  { %v1288_v60 = vpop.f32.mrf.mxu2 }
 0x24e   :  { %v1311_v54 = vpop.f32.mrf.mxu3  ;;  %1725 = vmatpush.bf16.msra.mxu2 %v6892_v26  ;;  %v6868_v26 = vor.u32 %v8696_v56, %v6867_v21  ;;  %v6843_v21 = vld [vmem:[%s12781_s0 + $0x2d0] sm:$0xf] }
 0x24f   :  { %v1312_v34 = vadd.f32 %v1311_v54, %v1288_v60  ;;  %v10158_v35 = vpop.f32.mrf.mxu0  ;;  %1773 = vmatpush.bf16.msrb.mxu0 %v6872_v24  ;;  %v8690_v24 = vld [vmem:[%s12781_s0 + $0x2d8] sm:$0xf0]  ;;  %v6939_v56 = vld [vmem:[%s12781_s0 + $0x390] sm:$0xf] }
 0x250   :  { %v10160_v38 = vpop.f32.mrf.mxu1  ;;  %1929 = vmatpush.bf16.msra.mxu1 %v9218_v7  ;;  %v8717_v7 = vld [vmem:[%s12781_s0 + $0x3b0] sm:$0xf0] }
 0x251   :  { %v10163_v47 = vadd.f32 %v1312_v34, %v9829_v40  ;;  %v6879_v40 = vld [vmem:[%s12781_s0 + $0x318] sm:$0xf]  ;;  %v6952_v20 = vor.u32 %v8717_v7, %v6951_v31 }
 0x252   :  { %v6880_v9 = vor.u32 %v8699_v59, %v6879_v40  ;;  %v8692_v40 = vld [vmem:[%s12781_s0 + $0x2ec] sm:$0xf]  ;;  %v6857_v59 = vld [vmem:[%s12781_s0 + $0x2f4] sm:$0xf0] }
 0x253   :  { %1751 = vmatpush.bf16.msra.mxu3 %v6952_v20 }
 0x254   :  { %1726 = vmatpush.bf16.msra.mxu2 %v6880_v9  ;;  %v6860_v9 = vor.u32 %v8692_v40, %v6857_v59  ;;  %1930 = vmatpush.bf16.msra.mxu1 %v9231_v11 }
 0x255   :  { %v10183_v12 = vpop.f32.mrf.mxu2 }
 0x256   :  { %v10194_v60 = vpop.f32.mrf.mxu3  ;;  %1774 = vmatpush.bf16.msrb.mxu0 %v6860_v9 }
 0x257   :  { %v1339_v54 = vpop.f32.mrf.mxu0 }
 0x258   :  { %v1362_v34 = vpop.f32.mrf.mxu1  ;;  %1727 = vmatpush.bf16.msra.mxu2 %v6868_v26  ;;  %v8689_v26 = vld [vmem:[%s12781_s0 + $0x2d4] sm:$0xf]  ;;  %1931 = vmatpush.bf16.msra.mxu1 %v9251_v17 }
 0x259   :  { %v1363_v36 = vadd.f32 %v1362_v34, %v1339_v54  ;;  %v6844_v54 = vor.u32 %v8690_v24, %v6843_v21  ;;  %v6845_v34 = vld [vmem:[%s12781_s0 + $0x2dc] sm:$0xf0] }
 0x25b   :  { %v10220_v37 = vadd.f32 %v1363_v36, %v9972_v61  ;;  %v8714_v61 = vld [vmem:[%s12781_s0 + $0x398] sm:$0xf0]  ;;  %v6848_v36 = vor.u32 %v8689_v26, %v6845_v34  ;;  %v6911_v34 = vld [vmem:[%s12781_s0 + $0x350] sm:$0xf] }
 0x25c   :  { %1728 = vmatpush.bf16.msra.mxu2 %v6856_v55  ;;  %v6940_v31 = vor.u32 %v8714_v61, %v6939_v56  ;;  %1932 = vmatpush.bf16.msra.mxu1 %v9271_v23 }
 0x25d   :  { %v1293_v33 = vpop.f32.mrf.mxu2  ;;  %1775 = vmatpush.bf16.msrb.mxu0 %v6848_v36  ;;  %v6899_v36 = vld [vmem:[%s12781_s0 + $0x338] sm:$0xf] }
 0x25e   :  { %v1316_v11 = vpop.f32.mrf.mxu3  ;;  %1752 = vmatpush.bf16.msra.mxu3 %v6940_v31 }
 0x25f   :  { %v1317_v49 = vadd.f32 %v1316_v11, %v1293_v33  ;;  %v10241_v50 = vpop.f32.mrf.mxu0 }
 0x260   :  { %v10243_v55 = vpop.f32.mrf.mxu1  ;;  %1729 = vmatpush.bf16.msra.mxu2 %v6844_v54  ;;  %1933 = vmatpush.bf16.msra.mxu1 %v9291_v29  ;;  %v8712_v29 = vld [vmem:[%s12781_s0 + $0x388] sm:$0xf0] }
 0x261   :  { %v10246_v7 = vadd.f32 %v1317_v49, %v9841_v1  ;;  %1906 = vmatpush.bf16.msra.mxu0 %v9207_v3 }
 0x265   :  { %v10250_v40 = vpop.f32.mrf.mxu2  ;;  %1907 = vmatpush.bf16.msra.mxu0 %v9227_v10  ;;  %v6935_v10 = vld [vmem:[%s12781_s0 + $0x380] sm:$0xf] }
 0x266   :  { %v10252_v17 = vpop.f32.mrf.mxu3 }
 0x267   :  { %v1344_v59 = vpop.f32.mrf.mxu0 }
 0x268   :  { %v1367_v20 = vpop.f32.mrf.mxu1 }
 0x269   :  { %v1368_v9 = vadd.f32 %v1367_v20, %v1344_v59  ;;  %1908 = vmatpush.bf16.msra.mxu0 %v9247_v16  ;;  %v8703_v59 = vld [vmem:[%s12781_s0 + $0x340] sm:$0xf0] }
 0x26b   :  { %v10257_v1 = vadd.f32 %v1368_v9, %v10009_v13  ;;  %v6936_v13 = vor.u32 %v8712_v29, %v6935_v10  ;;  %v6900_v9 = vor.u32 %v8703_v59, %v6899_v36  ;;  %v6887_v29 = vld [vmem:[%s12781_s0 + $0x320] sm:$0xf] }
 0x26d   :  { %v1298_v33 = vpop.f32.mrf.mxu2  ;;  %1909 = vmatpush.bf16.msra.mxu0 %v9267_v22  ;;  %1814 = vmatpush.bf16.msrb.mxu2 %v6936_v13  ;;  %v6923_v22 = vld [vmem:[%s12781_s0 + $0x368] sm:$0xf]  ;;  %v8700_v13 = vld [vmem:[%s12781_s0 + $0x328] sm:$0xf0] }
 0x26e   :  { %v1321_v23 = vpop.f32.mrf.mxu3 }
 0x26f   :  { %v1322_v21 = vadd.f32 %v1321_v23, %v1298_v33  ;;  %v1346_v3 = vpop.f32.mrf.mxu0 }
 0x270   :  { %v1369_v24 = vpop.f32.mrf.mxu1 }
 0x271   :  { %v10262_v56 = vadd.f32 %v1322_v21, %v9863_v18  ;;  %1910 = vmatpush.bf16.msra.mxu0 %v9287_v28  ;;  %v8709_v18 = vld [vmem:[%s12781_s0 + $0x370] sm:$0xf0]  ;;  %v8706_v28 = vld [vmem:[%s12781_s0 + $0x358] sm:$0xf0] }
 0x272   :  { %v6924_v54 = vor.u32 %v8709_v18, %v6923_v22  ;;  %v6912_v49 = vor.u32 %v8706_v28, %v6911_v34  ;;  %v6875_v22 = vld [vmem:[%s12781_s0 + $0x308] sm:$0xf]  ;;  %v8697_v18 = vld [vmem:[%s12781_s0 + $0x310] sm:$0xf0]  ;;  %v6959_v34 = vld [vmem:[%s12781_s0 + $0x3b0] sm:$0xf] }
 0x273   :  { %12790 = vst [vmem:[#allocation16_spill] sm:$0xff] %v10262_v56  ;;  %v2426_v56 = vld [vmem:[%s12806_s25 + $0x88] sm:$0xff] }
 0x274   :  { %1815 = vmatpush.bf16.msrb.mxu2 %v6924_v54  ;;  %v6876_v54 = vor.u32 %v8697_v18, %v6875_v22 }
 0x275   :  { %v1300_v16 = vpop.f32.mrf.mxu2 }
 0x276   :  { %v1323_v11 = vpop.f32.mrf.mxu3  ;;  %v6888_v16 = vor.u32 %v8700_v13, %v6887_v29 }
 0x277   :  { %v1469_v61 = vpop.f32.mrf.mxu0 }
 0x278   :  { %v1492_v26 = vpop.f32.mrf.mxu1  ;;  %1816 = vmatpush.bf16.msrb.mxu2 %v6912_v49  ;;  %v8718_v49 = vld [vmem:[%s12781_s0 + $0x3b8] sm:$0xf0] }
 0x279   :  { %v6960_v59 = vor.u32 %v8718_v49, %v6959_v34 }
 0x27b   :  { %1843 = vmatpush.bf16.msrb.mxu3 %v6960_v59 }
 0x27c   :  { %1817 = vmatpush.bf16.msrb.mxu2 %v6900_v9  ;;  %v8715_v9 = vld [vmem:[%s12781_s0 + $0x3a0] sm:$0xf0] }
 0x27d   :  { %v1380_v31 = vpop.f32.mrf.mxu2 }
 0x27e   :  { %v1403_v20 = vpop.f32.mrf.mxu3 }
 0x27f   :  { %v1404_v33 = vadd.f32 %v1403_v20, %v1380_v31  ;;  %v1471_v23 = vpop.f32.mrf.mxu0  ;;  %v6947_v20 = vld [vmem:[%s12781_s0 + $0x398] sm:$0xf] }
 0x280   :  { %v10289_v21 = vpack.c.bf16 %v1471_v23, %v1469_v61  ;;  %v1494_v3 = vpop.f32.mrf.mxu1  ;;  %1818 = vmatpush.bf16.msrb.mxu2 %v6888_v16  ;;  %v6863_v61 = vld [vmem:[%s12781_s0 + $0x2f0] sm:$0xf]  ;;  %v8691_v23 = vld [vmem:[%s12781_s0 + $0x2e0] sm:$0xf0] }
 0x281   :  { %v10292_v24 = vadd.f32 %v1404_v33, %v9913_v15  ;;  %v10294_v10 = vpack.c.bf16 %v1494_v3, %v1492_v26  ;;  %v8694_v26 = vld [vmem:[%s12781_s0 + $0x2f8] sm:$0xf0]  ;;  %v6851_v33 = vld [vmem:[%s12781_s0 + $0x2d8] sm:$0xf]  ;;  %v6948_v3 = vor.u32 %v8715_v9, %v6947_v20 }
 0x282   :  { %1730 = vmatmul.bf16.vlgmr.msra.gmra.mxu2 %v10289_v21  ;;  %1776 = vmatmul.bf16.vlgmr.msrb.gmra.mxu0 %v10289_v21  ;;  %v6864_v36 = vor.u32 %v8694_v26, %v6863_v61  ;;  %v6852_v29 = vor.u32 %v8691_v23, %v6851_v33 }
 0x283   :  { %12791 = vst [vmem:[#allocation17_spill] sm:$0xff] %v10292_v24  ;;  %6961 = vmatmul.msk.bf16.vlgmr.msra.gmra.mxu3 %vm534_vm1, %v10294_v10  ;;  %6964 = vmatmul.msk.bf16.vlgmr.msrb.gmra.mxu1 %vm534_vm1, %v10294_v10 }
 0x284   :  { %1819 = vmatpush.bf16.msrb.mxu2 %v6876_v54  ;;  %1844 = vmatpush.bf16.msrb.mxu3 %v6948_v3 }
 0x285   :  { %v10308_v15 = vpop.f32.mrf.mxu2 }
 0x286   :  { %12792 = vst [vmem:[#allocation18_spill] sm:$0xff] %v10308_v15  ;;  %v10316_v11 = vpop.f32.mrf.mxu3 }
 0x287   :  { %12793 = vst [vmem:[#allocation19_spill] sm:$0xff] %v10316_v11  ;;  %v1474_v28 = vpop.f32.mrf.mxu0 }
 0x288   :  { %v1497_v31 = vpop.f32.mrf.mxu1  ;;  %1820 = vmatpush.bf16.msrb.mxu2 %v6864_v36 }
 0x28c   :  { %1821 = vmatpush.bf16.msrb.mxu2 %v6852_v29 }
 0x28d   :  { %v1385_v13 = vpop.f32.mrf.mxu2 }
 0x28e   :  { %v1408_v16 = vpop.f32.mrf.mxu3 }
 0x28f   :  { %v1409_v22 = vadd.f32 %v1408_v16, %v1385_v13  ;;  %v1476_v18 = vpop.f32.mrf.mxu0 }
 0x290   :  { %v1508_v54 = vpack.c.bf16 %v1476_v18, %v1474_v28  ;;  %v1499_v61 = vpop.f32.mrf.mxu1 }
 0x291   :  { %v10343_v26 = vadd.f32 %v1409_v22, %v9996_v57  ;;  %v1509_v34 = vpack.c.bf16 %v1499_v61, %v1497_v31  ;;  %v8719_v22 = vld [vmem:[%s12780_s3 + $0x50] sm:$0xff] }
 0x292   :  { %1735 = vmatmul.bf16.gmra.mxu2 %v1508_v54  ;;  %1781 = vmatmul.bf16.gmra.mxu0 %v1508_v54 }
 0x293   :  { %12794 = vst [vmem:[#allocation20_spill] sm:$0xff] %v10343_v26  ;;  %6962 = vmatmul.msk.bf16.gmra.mxu3 %vm534_vm1, %v1509_v34  ;;  %6965 = vmatmul.msk.bf16.gmra.mxu1 %vm534_vm1, %v1509_v34 }
 0x295   :  { %v10347_v49 = vpop.f32.mrf.mxu2 }
 0x296   :  { %12795 = vst [vmem:[#allocation21_spill] sm:$0xff] %v10347_v49  ;;  %v10349_v36 = vpop.f32.mrf.mxu3 }
 0x297   :  { %12796 = vst [vmem:[#allocation22_spill] sm:$0xff] %v10349_v36  ;;  %v1479_v59 = vpop.f32.mrf.mxu0  ;;  %v7123_v36 = vld [vmem:[%s12781_s0 + $0x470] sm:$0xf] }
 0x298   :  { %v1502_v20 = vpop.f32.mrf.mxu1  ;;  %v1510_v28 = vpack.c.bf16 %v1479_v59, %v1479_v59 }
 0x299   :  { %v1511_v23 = vpack.c.bf16 %v1502_v20, %v1502_v20  ;;  %v8749_v20 = vld [vmem:[%s12781_s0 + $0x4a0] sm:$0xf0] }
 0x29d   :  { %v1390_v9 = vpop.f32.mrf.mxu2 }
 0x29e   :  { %v1413_v33 = vpop.f32.mrf.mxu3 }
 0x29f   :  { %v1414_v3 = vadd.f32 %v1413_v33, %v1390_v9  ;;  %v1481_v57 = vpop.f32.mrf.mxu0  ;;  %v8740_v33 = vld [vmem:[%s12781_s0 + $0x458] sm:$0xf0] }
 0x2a0   :  { %v1504_v29 = vpop.f32.mrf.mxu1  ;;  %v7117_v57 = vld [vmem:[%s12781_s0 + $0x474] sm:$0xf0] }
 0x2a1   :  { %v10352_v31 = vadd.f32 %v1414_v3, %v10014_v14  ;;  %v8720_v14 = vld [vmem:[%s12780_s3 + $0x58] sm:$0xff] }
 0x2a2   :  { %1740 = vmatmul.bf16.gmra.mxu2 %v1510_v28  ;;  %1786 = vmatmul.bf16.gmra.mxu0 %v1510_v28  ;;  %v7091_v29 = vld [vmem:[%s12781_s0 + $0x438] sm:$0xf] }
 0x2a3   :  { %12797 = vst [vmem:[#allocation23_spill] sm:$0xff] %v10352_v31  ;;  %6963 = vmatmul.msk.bf16.gmra.mxu3 %vm534_vm1, %v1511_v23  ;;  %6966 = vmatmul.msk.bf16.gmra.mxu1 %vm534_vm1, %v1511_v23 }
 0x2a5   :  { %v1392_v13 = vpop.f32.mrf.mxu2 }
 0x2a6   :  { %v1415_v16 = vpop.f32.mrf.mxu3  ;;  %v8737_v13 = vld [vmem:[%s12781_s0 + $0x440] sm:$0xf0] }
 0x2b2   :  { %1822 = vmatmul.bf16.vlgmr.msrb.gmra.mxu2 %v10289_v21  ;;  %6983 = vmatmul.msk.bf16.vlgmr.msra.gmra.mxu0 %vm151_vm0, %v8719_v22  ;;  %v6974_v21 = vld [vmem:[%s12780_s3 + $0x60] sm:$0x3] }
 0x2b3   :  { %6967 = vmatmul.msk.bf16.vlgmr.msrb.gmra.mxu3 %vm534_vm1, %v10294_v10  ;;  %6986 = vmatmul.msk.bf16.vlgmr.msra.gmra.mxu1 %vm151_vm0, %v8719_v22  ;;  %v1890_v18 = vunpack.c.l.b16 %v6974_v21  ;;  %v7115_v10 = vld [vmem:[%s12781_s0 + $0x468] sm:$0xf]  ;;  %v7092_v22 = vor.u32 %v8737_v13, %v7091_v29  ;;  %v7105_v21 = vld [vmem:[%s12781_s0 + $0x45c] sm:$0xf0] }
 0x2b5   :  { %v1893_v61 = vpack.c.b16 %v1890_v18, %v1890_v18 }
 0x2c2   :  { %1827 = vmatmul.bf16.gmra.mxu2 %v1508_v54  ;;  %6984 = vmatmul.msk.bf16.gmra.mxu0 %vm151_vm0, %v8720_v14  ;;  %v8743_v54 = vld [vmem:[%s12781_s0 + $0x470] sm:$0xf0] }
 0x2c3   :  { %6968 = vmatmul.msk.bf16.gmra.mxu3 %vm534_vm1, %v1509_v34  ;;  %6987 = vmatmul.msk.bf16.gmra.mxu1 %vm151_vm0, %v8720_v14  ;;  %v7139_v34 = vld [vmem:[%s12781_s0 + $0x498] sm:$0xf]  ;;  %v7116_v59 = vor.u32 %v8743_v54, %v7115_v10  ;;  %v8739_v14 = vld [vmem:[%s12781_s0 + $0x454] sm:$0xf] }
 0x2c4   :  { %v7140_v9 = vor.u32 %v8749_v20, %v7139_v34  ;;  %v7108_v18 = vor.u32 %v8739_v14, %v7105_v21  ;;  %v8736_v34 = vld [vmem:[%s12781_s0 + $0x43c] sm:$0xf]  ;;  %v7067_v14 = vld [vmem:[%s12781_s0 + $0x408] sm:$0xf]  ;;  %v8731_v21 = vld [vmem:[%s12781_s0 + $0x410] sm:$0xf0] }
 0x2c5   :  { %2165 = vmatpush.bf16.msra.mxu2 %v7116_v59  ;;  %v7093_v59 = vld [vmem:[%s12781_s0 + $0x444] sm:$0xf0] }
 0x2c6   :  { %2194 = vmatpush.bf16.msra.mxu3 %v7140_v9  ;;  %v7096_v20 = vor.u32 %v8736_v34, %v7093_v59  ;;  %v7069_v34 = vld [vmem:[%s12781_s0 + $0x414] sm:$0xf0] }
 0x2d2   :  { %1832 = vmatmul.bf16.gmra.mxu2 %v1510_v28  ;;  %6985 = vmatmul.msk.bf16.gmra.mxu0 %vm151_vm0, %v1893_v61  ;;  %v7103_v28 = vld [vmem:[%s12781_s0 + $0x450] sm:$0xf] }
 0x2d3   :  { %6969 = vmatmul.msk.bf16.gmra.mxu3 %vm534_vm1, %v1511_v23  ;;  %6988 = vmatmul.msk.bf16.gmra.mxu1 %vm151_vm0, %v1893_v61  ;;  %v8742_v23 = vld [vmem:[%s12781_s0 + $0x46c] sm:$0xf]  ;;  %v7104_v3 = vor.u32 %v8740_v33, %v7103_v28  ;;  %v7079_v28 = vld [vmem:[%s12781_s0 + $0x420] sm:$0xf] }
 0x2d4   :  { %v7120_v16 = vor.u32 %v8742_v23, %v7117_v57  ;;  %v8734_v33 = vld [vmem:[%s12781_s0 + $0x428] sm:$0xf0]  ;;  %v8733_v57 = vld [vmem:[%s12781_s0 + $0x424] sm:$0xf] }
 0x2d5   :  { %2166 = vmatpush.bf16.msra.mxu2 %v7104_v3  ;;  %v7080_v23 = vor.u32 %v8734_v33, %v7079_v28  ;;  %v7055_v33 = vld [vmem:[%s12781_s0 + $0x3f0] sm:$0xf] }
 0x2d6   :  { %2211 = vmatpush.bf16.msrb.mxu0 %v7120_v16 }
 0x2d9   :  { %2167 = vmatpush.bf16.msra.mxu2 %v7092_v22 }
 0x2da   :  { %2212 = vmatpush.bf16.msrb.mxu0 %v7108_v18  ;;  %v7127_v18 = vld [vmem:[%s12781_s0 + $0x480] sm:$0xf] }
 0x2dd   :  { %2168 = vmatpush.bf16.msra.mxu2 %v7080_v23  ;;  %v8728_v23 = vld [vmem:[%s12781_s0 + $0x3f8] sm:$0xf0] }
 0x2de   :  { %2213 = vmatpush.bf16.msrb.mxu0 %v7096_v20 }
 0x2ff   :  { %v1777_v61 = vpop.f32.mrf.mxu0 }
 0x300   :  { %v1800_v10 = vpop.f32.mrf.mxu1 }
 0x301   :  { %v1801_v54 = vadd.f32 %v1800_v10, %v1777_v61  ;;  %v7068_v61 = vor.u32 %v8731_v21, %v7067_v14  ;;  %v8746_v10 = vld [vmem:[%s12781_s0 + $0x488] sm:$0xf0]  ;;  %v7057_v14 = vld [vmem:[%s12781_s0 + $0x3fc] sm:$0xf0] }
 0x302   :  { %v7128_v59 = vor.u32 %v8746_v10, %v7127_v18  ;;  %v7043_v10 = vld [vmem:[%s12781_s0 + $0x3d8] sm:$0xf] }
 0x303   :  { %v10419_v9 = vadd.f32 %v1801_v54, %v10144_v62  ;;  %v7081_v62 = vld [vmem:[%s12781_s0 + $0x42c] sm:$0xf0]  ;;  %v8730_v54 = vld [vmem:[%s12781_s0 + $0x40c] sm:$0xf]  ;;  %2169 = vmatpush.bf16.msra.mxu2 %v7068_v61 }
 0x304   :  { %v7084_v13 = vor.u32 %v8733_v57, %v7081_v62  ;;  %v7072_v20 = vor.u32 %v8730_v54, %v7069_v34  ;;  %2195 = vmatpush.bf16.msra.mxu3 %v7128_v59  ;;  %v8727_v57 = vld [vmem:[%s12781_s0 + $0x3f4] sm:$0xf]  ;;  %v8725_v54 = vld [vmem:[%s12781_s0 + $0x3e0] sm:$0xf0]  ;;  %v8724_v34 = vld [vmem:[%s12781_s0 + $0x3dc] sm:$0xf] }
 0x305   :  { %v10427_v3 = vpop.f32.mrf.mxu2  ;;  %v7060_v18 = vor.u32 %v8727_v57, %v7057_v14  ;;  %v7141_v57 = vld [vmem:[%s12781_s0 + $0x4a4] sm:$0xf0] }
 0x306   :  { %v10435_v29 = vpop.f32.mrf.mxu3  ;;  %2214 = vmatpush.bf16.msrb.mxu0 %v7084_v13  ;;  %v7056_v13 = vor.u32 %v8728_v23, %v7055_v33  ;;  %v7045_v33 = vld [vmem:[%s12781_s0 + $0x3e4] sm:$0xf0]  ;;  %v8748_v23 = vld [vmem:[%s12781_s0 + $0x49c] sm:$0xf] }
 0x307   :  { %v10437_v16 = vpop.f32.mrf.mxu0  ;;  %v7144_v14 = vor.u32 %v8748_v23, %v7141_v57 }
 0x308   :  { %v10439_v22 = vpop.f32.mrf.mxu1  ;;  %2170 = vmatpush.bf16.msra.mxu2 %v7056_v13  ;;  %v7048_v13 = vor.u32 %v8724_v34, %v7045_v33  ;;  %v7033_v34 = vld [vmem:[%s12781_s0 + $0x3cc] sm:$0xf0] }
 0x309   :  { %2240 = vmatpush.bf16.msrb.mxu1 %v7144_v14 }
 0x30a   :  { %2215 = vmatpush.bf16.msrb.mxu0 %v7072_v20  ;;  %v7044_v20 = vor.u32 %v8725_v54, %v7043_v10  ;;  %v8721_v10 = vld [vmem:[%s12781_s0 + $0x3c4] sm:$0xf] }
 0x30b   :  { %v7036_v23 = vor.u32 %v8721_v10, %v7033_v34  ;;  %v8744_v10 = vld [vmem:[%s12781_s0 + $0x478] sm:$0xf0] }
 0x30c   :  { %2171 = vmatpush.bf16.msra.mxu2 %v7044_v20  ;;  %v7129_v20 = vld [vmem:[%s12781_s0 + $0x48c] sm:$0xf0]  ;;  %v7124_v34 = vor.u32 %v8744_v10, %v7123_v36  ;;  %v7111_v36 = vld [vmem:[%s12781_s0 + $0x458] sm:$0xf] }
 0x30d   :  { %v10459_v28 = vpop.f32.mrf.mxu2 }
 0x30e   :  { %v10470_v62 = vpop.f32.mrf.mxu3  ;;  %2216 = vmatpush.bf16.msrb.mxu0 %v7060_v18  ;;  %v7031_v18 = vld [vmem:[%s12781_s0 + $0x3c0] sm:$0xf] }
 0x30f   :  { %v1782_v21 = vpop.f32.mrf.mxu0 }
 0x310   :  { %v1805_v61 = vpop.f32.mrf.mxu1 }
 0x311   :  { %v1806_v59 = vadd.f32 %v1805_v61, %v1782_v21  ;;  %v8722_v61 = vld [vmem:[%s12781_s0 + $0x3c8] sm:$0xf0] }
 0x312   :  { %2217 = vmatpush.bf16.msrb.mxu0 %v7048_v13 }
 0x313   :  { %v10494_v31 = vadd.f32 %v1806_v59, %v10220_v37  ;;  %v7032_v37 = vor.u32 %v8722_v61, %v7031_v18  ;;  %v8745_v59 = vld [vmem:[%s12781_s0 + $0x484] sm:$0xf] }
 0x314   :  { %v7132_v57 = vor.u32 %v8745_v59, %v7129_v20  ;;  %v8750_v59 = vld [vmem:[%s12781_s0 + $0x4a8] sm:$0xf0] }
 0x315   :  { %v10496_v21 = vpop.f32.mrf.mxu2  ;;  %2172 = vmatpush.bf16.msra.mxu2 %v7032_v37  ;;  %v7147_v37 = vld [vmem:[%s12781_s0 + $0x4a0] sm:$0xf] }
 0x316   :  { %v10507_v54 = vpop.f32.mrf.mxu3  ;;  %2218 = vmatpush.bf16.msrb.mxu0 %v7036_v23  ;;  %2241 = vmatpush.bf16.msrb.mxu1 %v7132_v57 }
 0x317   :  { %v10518_v33 = vpop.f32.mrf.mxu0 }
 0x318   :  { %v10520_v13 = vpop.f32.mrf.mxu1 }
 0x319   :  { %2257 = vmatpush.bf16.msrb.mxu2 %v7124_v34 }
 0x31d   :  { %v1738_v14 = vpop.f32.mrf.mxu2 }
 0x31e   :  { %v1761_v18 = vpop.f32.mrf.mxu3 }
 0x31f   :  { %v10522_v61 = vadd.f32 %v1761_v18, %v1738_v14  ;;  %v1787_v26 = vpop.f32.mrf.mxu0  ;;  %v8741_v18 = vld [vmem:[%s12781_s0 + $0x460] sm:$0xf0] }
 0x320   :  { %v1810_v24 = vpop.f32.mrf.mxu1  ;;  %v7112_v10 = vor.u32 %v8741_v18, %v7111_v36  ;;  %v8735_v36 = vld [vmem:[%s12781_s0 + $0x430] sm:$0xf0] }
 0x321   :  { %v1811_v58 = vadd.f32 %v1810_v24, %v1787_v26  ;;  %v7148_v24 = vor.u32 %v8750_v59, %v7147_v37 }
 0x322   :  { %2258 = vmatpush.bf16.msrb.mxu2 %v7112_v10 }
 0x323   :  { %v10537_v20 = vadd.f32 %v1811_v58, %v10257_v1  ;;  %2286 = vmatpush.bf16.msrb.mxu3 %v7148_v24  ;;  %v7099_v58 = vld [vmem:[%s12781_s0 + $0x440] sm:$0xf]  ;;  %v8738_v1 = vld [vmem:[%s12781_s0 + $0x448] sm:$0xf0] }
 0x324   :  { %v7100_v37 = vor.u32 %v8738_v1, %v7099_v58 }
 0x325   :  { %v10539_v26 = vpop.f32.mrf.mxu2 }
 0x326   :  { %v10541_v23 = vpop.f32.mrf.mxu3  ;;  %2259 = vmatpush.bf16.msrb.mxu2 %v7100_v37  ;;  %v7075_v37 = vld [vmem:[%s12781_s0 + $0x410] sm:$0xf] }
 0x327   :  { %v1789_v57 = vpop.f32.mrf.mxu0 }
 0x328   :  { %v1812_v14 = vpop.f32.mrf.mxu1 }
 0x329   :  { %v7087_v14 = vld [vmem:[%s12781_s0 + $0x428] sm:$0xf] }
 0x32a   :  { %v7088_v18 = vor.u32 %v8735_v36, %v7087_v14  ;;  %v7135_v14 = vld [vmem:[%s12781_s0 + $0x488] sm:$0xf] }
 0x32c   :  { %2260 = vmatpush.bf16.msrb.mxu2 %v7088_v18 }
 0x32d   :  { %v1743_v34 = vpop.f32.mrf.mxu2 }
 0x32e   :  { %v1766_v59 = vpop.f32.mrf.mxu3 }
 0x32f   :  { %v1912_v24 = vpop.f32.mrf.mxu0  ;;  %v8732_v59 = vld [vmem:[%s12781_s0 + $0x418] sm:$0xf0] }
 0x330   :  { %v1935_v57 = vpop.f32.mrf.mxu1  ;;  %v7076_v36 = vor.u32 %v8732_v59, %v7075_v37 }
 0x332   :  { %2261 = vmatpush.bf16.msrb.mxu2 %v7076_v36 }
 0x335   :  { %v10561_v49 = vpop.f32.mrf.mxu2 }
 0x336   :  { %12798 = vst [vmem:[#allocation24_spill] sm:$0xff] %v10561_v49  ;;  %v10563_v32 = vpop.f32.mrf.mxu3 }
 0x337   :  { %12799 = vst [vmem:[#allocation25_spill] sm:$0xff] %v10563_v32  ;;  %v1914_v10 = vpop.f32.mrf.mxu0  ;;  %v7051_v32 = vld [vmem:[%s12781_s0 + $0x3e0] sm:$0xf] }
 0x338   :  { %v1949_v58 = vpack.c.bf16 %v1914_v10, %v1912_v24  ;;  %v1937_v1 = vpop.f32.mrf.mxu1  ;;  %v8747_v24 = vld [vmem:[%s12781_s0 + $0x490] sm:$0xf0]  ;;  %v7063_v10 = vld [vmem:[%s12781_s0 + $0x3f8] sm:$0xf] }
 0x339   :  { %v1950_v34 = vpack.c.bf16 %v1937_v1, %v1935_v57  ;;  %v7136_v57 = vor.u32 %v8747_v24, %v7135_v14  ;;  %v8729_v1 = vld [vmem:[%s12781_s0 + $0x400] sm:$0xf0]  ;;  %v8726_v14 = vld [vmem:[%s12781_s0 + $0x3e8] sm:$0xf0] }
 0x33a   :  { %2173 = vmatmul.bf16.vlgmr.msra.gmra.mxu2 %v1949_v58  ;;  %2219 = vmatmul.bf16.vlgmr.msrb.gmra.mxu0 %v1949_v58  ;;  %v7064_v59 = vor.u32 %v8729_v1, %v7063_v10  ;;  %v7052_v49 = vor.u32 %v8726_v14, %v7051_v32  ;;  %v8723_v10 = vld [vmem:[%s12781_s0 + $0x3d0] sm:$0xf0] }
 0x33b   :  { %7149 = vmatmul.msk.bf16.vlgmr.msra.gmra.mxu3 %vm534_vm1, %v1950_v34  ;;  %7152 = vmatmul.msk.bf16.vlgmr.msrb.gmra.mxu1 %vm534_vm1, %v1950_v34  ;;  %v7040_v1 = vor.u32 %v8723_v10, %v7039_v51 }
 0x33c   :  { %2287 = vmatpush.bf16.msrb.mxu3 %v7136_v57  ;;  %2262 = vmatpush.bf16.msrb.mxu2 %v7064_v59 }
 0x33d   :  { %v1825_v18 = vpop.f32.mrf.mxu2 }
 0x33e   :  { %v1848_v37 = vpop.f32.mrf.mxu3 }
 0x33f   :  { %v10591_v36 = vadd.f32 %v1848_v37, %v1825_v18  ;;  %v1917_v24 = vpop.f32.mrf.mxu0 }
 0x340   :  { %v1940_v57 = vpop.f32.mrf.mxu1  ;;  %2263 = vmatpush.bf16.msrb.mxu2 %v7052_v49 }
 0x341   :  { %12800 = vst [vmem:[#allocation26_spill] sm:$0xff] %v10591_v36 }
 0x344   :  { %2264 = vmatpush.bf16.msrb.mxu2 %v7040_v1 }
 0x345   :  { %v10599_v4 = vpop.f32.mrf.mxu2 }
 0x346   :  { %12801 = vst [vmem:[#allocation27_spill] sm:$0xff] %v10599_v4  ;;  %v10601_v5 = vpop.f32.mrf.mxu3 }
 0x347   :  { %12802 = vst [vmem:[#allocation28_spill] sm:$0xff] %v10601_v5  ;;  %v1919_v18 = vpop.f32.mrf.mxu0 }
 0x348   :  { %v1951_v37 = vpack.c.bf16 %v1919_v18, %v1917_v24  ;;  %v1942_v36 = vpop.f32.mrf.mxu1 }
 0x349   :  { %v1952_v59 = vpack.c.bf16 %v1942_v36, %v1940_v57 }
 0x34a   :  { %2178 = vmatmul.bf16.gmra.mxu2 %v1951_v37  ;;  %2224 = vmatmul.bf16.gmra.mxu0 %v1951_v37 }
 0x34b   :  { %7150 = vmatmul.msk.bf16.gmra.mxu3 %vm534_vm1, %v1952_v59  ;;  %7153 = vmatmul.msk.bf16.gmra.mxu1 %vm534_vm1, %v1952_v59 }
 0x34d   :  { %v1830_v32 = vpop.f32.mrf.mxu2 }
 0x34e   :  { %v1853_v14 = vpop.f32.mrf.mxu3 }
 0x34f   :  { %v10605_v11 = vadd.f32 %v1853_v14, %v1830_v32  ;;  %v1922_v51 = vpop.f32.mrf.mxu0  ;;  %v2424_v32 = vld [vmem:[%s12806_s25 + $0x78] sm:$0xff]  ;;  %v2423_v14 = vld [vmem:[%s12806_s25 + $0x70] sm:$0xff] }
 0x350   :  { %v1945_v49 = vpop.f32.mrf.mxu1  ;;  %v1953_v5 = vpack.c.bf16 %v1922_v51, %v1922_v51  ;;  %2448 = vmatpush.msra.mxu0 %v2424_v32  ;;  %2511 = vmatpush.msra.mxu3 %v2424_v32  ;;  %v2417_v51 = vld [vmem:[%s12806_s25 + $0x40] sm:$0xff] }
 0x351   :  { %12803 = vst [vmem:[#allocation29_spill] sm:$0xff] %v10605_v11  ;;  %v1954_v24 = vpack.c.bf16 %v1945_v49, %v1945_v49  ;;  %v2416_v49 = vld [vmem:[%s12806_s25 + $0x38] sm:$0xff]  ;;  %v2413_v32 = vld [vmem:[%s12806_s25 + $0x20] sm:$0xff] }
 0x352   :  { %2449 = vmatpush.msra.mxu0 %v2423_v14  ;;  %2512 = vmatpush.msra.mxu3 %v2423_v14  ;;  %v2437_v14 = vld [vmem:[%s12806_s25 + $0xe0] sm:$0xff]  ;;  %v2428_v11 = vld [vmem:[%s12806_s25 + $0x98] sm:$0xff] }
 0x355   :  { %v10607_v10 = vpop.f32.mrf.mxu2 }
 0x356   :  { %12804 = vst [vmem:[#allocation30_spill] sm:$0xff] %v10607_v10  ;;  %v10609_v4 = vpop.f32.mrf.mxu3 }
 0x357   :  { %12805 = vst [vmem:[#allocation31_spill] sm:$0xff] %v10609_v4  ;;  %v1924_v1 = vpop.f32.mrf.mxu0  ;;  %v2431_v4 = vld [vmem:[%s12806_s25 + $0xb0] sm:$0xff] }
 0x358   :  { %v1947_v36 = vpop.f32.mrf.mxu1  ;;  %v2415_v1 = vld [vmem:[%s12806_s25 + $0x30] sm:$0xff] }
 0x359   :  { %v2439_v36 = vld [vmem:[%s12806_s25 + $0xf0] sm:$0xff] }
 0x35a   :  { %2183 = vmatmul.bf16.gmra.mxu2 %v1953_v5  ;;  %2229 = vmatmul.bf16.gmra.mxu0 %v1953_v5 }
 0x35b   :  { %7151 = vmatmul.msk.bf16.gmra.mxu3 %vm534_vm1, %v1954_v24  ;;  %7154 = vmatmul.msk.bf16.gmra.mxu1 %vm534_vm1, %v1954_v24 }
 0x35d   :  { %v1835_v57 = vpop.f32.mrf.mxu2 }
 0x35e   :  { %v1858_v18 = vpop.f32.mrf.mxu3  ;;  %v2414_v57 = vld [vmem:[%s12806_s25 + $0x28] sm:$0xff] }
 0x35f   :  { %v2438_v18 = vld [vmem:[%s12806_s25 + $0xe8] sm:$0xff] }
 0x36a   :  { %2265 = vmatmul.bf16.vlgmr.msrb.gmra.mxu2 %v1949_v58  ;;  %v2422_v58 = vld [vmem:[%s12806_s25 + $0x68] sm:$0xff] }
 0x36b   :  { %7155 = vmatmul.msk.bf16.vlgmr.msrb.gmra.mxu3 %vm534_vm1, %v1950_v34  ;;  %2450 = vmatpush.msra.mxu0 %v2422_v58  ;;  %v2420_v34 = vld [vmem:[%s12806_s25 + $0x58] sm:$0xff] }
 0x36c   :  { %2513 = vmatpush.msra.mxu3 %v2422_v58  ;;  %v2412_v58 = vld [vmem:[%s12806_s25 + $0x18] sm:$0xff] }
 0x37a   :  { %2270 = vmatmul.bf16.gmra.mxu2 %v1951_v37  ;;  %v2419_v37 = vld [vmem:[%s12806_s25 + $0x50] sm:$0xff] }
 0x37b   :  { %7156 = vmatmul.msk.bf16.gmra.mxu3 %vm534_vm1, %v1952_v59  ;;  %v2418_v59 = vld [vmem:[%s12806_s25 + $0x48] sm:$0xff] }
 0x38a   :  { %2275 = vmatmul.bf16.gmra.mxu2 %v1953_v5  ;;  %v2421_v5 = vld [vmem:[%s12806_s25 + $0x60] sm:$0xff] }
 0x38b   :  { %7157 = vmatmul.msk.bf16.gmra.mxu3 %vm534_vm1, %v1954_v24  ;;  %2451 = vmatpush.msra.mxu0 %v2421_v5  ;;  %v2440_v24 = vld [vmem:[%s12806_s25 + $0xf8] sm:$0xff] }
 0x38c   :  { %2514 = vmatpush.msra.mxu3 %v2421_v5  ;;  %2468 = vmatpush.msra.mxu1 %v2440_v24  ;;  %v2436_v5 = vld [vmem:[%s12806_s25 + $0xd8] sm:$0xff] }
 0x38d   :  { %2452 = vmatpush.msra.mxu0 %v2420_v34 }
 0x38e   :  { %2515 = vmatpush.msra.mxu3 %v2420_v34  ;;  %2469 = vmatpush.msra.mxu1 %v2439_v36  ;;  %v2411_v34 = vld [vmem:[%s12806_s25 + $0x10] sm:$0xff] }
 0x38f   :  { %2453 = vmatpush.msra.mxu0 %v2419_v37 }
 0x390   :  { %2516 = vmatpush.msra.mxu3 %v2419_v37  ;;  %2470 = vmatpush.msra.mxu1 %v2438_v18  ;;  %v2435_v37 = vld [vmem:[%s12806_s25 + $0xd0] sm:$0xff] }
 0x391   :  { %2454 = vmatpush.msra.mxu0 %v2418_v59 }
 0x392   :  { %2517 = vmatpush.msra.mxu3 %v2418_v59  ;;  %2471 = vmatpush.msra.mxu1 %v2437_v14 }
 0x393   :  { %2455 = vmatpush.msra.mxu0 %v2417_v51 }
 0x394   :  { %2518 = vmatpush.msra.mxu3 %v2417_v51  ;;  %2472 = vmatpush.msra.mxu1 %v2436_v5  ;;  %v2410_v51 = vld [vmem:[%s12806_s25 + $0x8] sm:$0xff] }
 0x395   :  { %2456 = vmatpush.msra.mxu0 %v2416_v49 }
 0x396   :  { %2519 = vmatpush.msra.mxu3 %v2416_v49  ;;  %2473 = vmatpush.msra.mxu1 %v2435_v37 }
 0x397   :  { %2457 = vmatpush.msra.mxu0 %v2415_v1 }
 0x398   :  { %2520 = vmatpush.msra.mxu3 %v2415_v1  ;;  %v2434_v1 = vld [vmem:[%s12806_s25 + $0xc8] sm:$0xff] }
 0x399   :  { %2458 = vmatpush.msra.mxu0 %v2414_v57  ;;  %2474 = vmatpush.msra.mxu1 %v2434_v1 }
 0x39a   :  { %2521 = vmatpush.msra.mxu3 %v2414_v57  ;;  %v2409_v57 = vld [vmem:[%s12806_s25] sm:$0xff] }
 0x39b   :  { %2459 = vmatpush.msra.mxu0 %v2413_v32 }
 0x39c   :  { %2522 = vmatpush.msra.mxu3 %v2413_v32  ;;  %v2433_v32 = vld [vmem:[%s12806_s25 + $0xc0] sm:$0xff] }
 0x39d   :  { %2460 = vmatpush.msra.mxu0 %v2412_v58  ;;  %2475 = vmatpush.msra.mxu1 %v2433_v32 }
 0x39e   :  { %2523 = vmatpush.msra.mxu3 %v2412_v58  ;;  %v2432_v58 = vld [vmem:[%s12806_s25 + $0xb8] sm:$0xff] }
 0x39f   :  { %2461 = vmatpush.msra.mxu0 %v2411_v34  ;;  %2476 = vmatpush.msra.mxu1 %v2432_v58 }
 0x3a0   :  { %2524 = vmatpush.msra.mxu3 %v2411_v34 }
 0x3a1   :  { %2462 = vmatpush.msra.mxu0 %v2410_v51  ;;  %2477 = vmatpush.msra.mxu1 %v2431_v4 }
 0x3a2   :  { %2525 = vmatpush.msra.mxu3 %v2410_v51 }
 0x3a3   :  { %2463 = vmatpush.msra.mxu0 %v2409_v57 }
 0x3a4   :  { %2526 = vmatpush.msra.mxu3 %v2409_v57 }
 0x3a5   :  { %2531 = vmatpush.msrb.mxu0 %v2440_v24  ;;  %v2430_v24 = vld [vmem:[%s12806_s25 + $0xa8] sm:$0xff] }
 0x3a6   :  { %2478 = vmatpush.msra.mxu1 %v2430_v24 }
 0x3a7   :  { %2532 = vmatpush.msrb.mxu0 %v2439_v36  ;;  %v2429_v36 = vld [vmem:[%s12806_s25 + $0xa0] sm:$0xff] }
 0x3a8   :  { %2479 = vmatpush.msra.mxu1 %v2429_v36 }
 0x3a9   :  { %2533 = vmatpush.msrb.mxu0 %v2438_v18  ;;  %v625_v18 = vadd.f32 %v9796_v53, %v9794_v52  ;;  %v630_v52 = vadd.f32 %v9811_v8, %v9809_v2  ;;  %v1360_v53 = vadd.f32 %v10160_v38, %v10158_v35  ;;  %v1314_v35 = vadd.f32 %v10194_v60, %v10183_v12 }
 0x3aa   :  { %2480 = vmatpush.msra.mxu1 %v2428_v11  ;;  %v1365_v38 = vadd.f32 %v10243_v55, %v10241_v50 }
 0x3ab   :  { %2534 = vmatpush.msrb.mxu0 %v2437_v14  ;;  %v2427_v14 = vld [vmem:[%s12806_s25 + $0x90] sm:$0xff] }
 0x3ac   :  { %2481 = vmatpush.msra.mxu1 %v2427_v14 }
 0x3ad   :  { %2535 = vmatpush.msrb.mxu0 %v2436_v5  ;;  %v909_v5 = vadd.f32 %v9911_v25, %v625_v18  ;;  %v2425_v25 = vld [vmem:[%s12806_s25 + $0x80] sm:$0xff]  ;;  %v914_v18 = vadd.f32 %v9994_v30, %v630_v52  ;;  %v584_v30 = vadd.f32 %v9807_v0, %v9805_v63  ;;  %v1757_v63 = vadd.f32 %v10470_v62, %v10459_v28 }
 0x3ae   :  { %2482 = vmatpush.msra.mxu1 %v2426_v56  ;;  %v1765_v52 = vadd.f32 %v10541_v23, %v10539_v26 }
 0x3af   :  { %2536 = vmatpush.msrb.mxu0 %v2435_v37  ;;  %v579_v37 = vadd.f32 %v9792_v44, %v9790_v43  ;;  %v932_v43 = vadd.f32 %v9915_v19, %v909_v5  ;;  %v1803_v44 = vadd.f32 %v10439_v22, %v10437_v16  ;;  %v937_v19 = vadd.f32 %v9998_v48, %v914_v18 }
 0x3b0   :  { %2483 = vmatpush.msra.mxu1 %v2425_v25  ;;  %v868_v55 = vadd.f32 %v9845_v6, %v584_v30 }
 0x3b1   :  { %2537 = vmatpush.msrb.mxu0 %v2434_v1  ;;  %v863_v1 = vadd.f32 %v9833_v42, %v579_v37  ;;  %v1421_v8 = vadd.f32 %v1360_v53, %v932_v43 }
 0x3b3   :  { %2538 = vmatpush.msrb.mxu0 %v2433_v32  ;;  %v1864_v16 = vadd.f32 %v1803_v44, %v1421_v8 }
 0x3b5   :  { %2539 = vmatpush.msrb.mxu0 %v2432_v58  ;;  %v886_v58 = vadd.f32 %v9835_v45, %v863_v1  ;;  %v1427_v45 = vadd.f32 %v1365_v38, %v937_v19 }
 0x3b7   :  { %v10676_v59 = vpop.f32.mrf.mxu0  ;;  %2540 = vmatpush.msrb.mxu0 %v2431_v4  ;;  %v1808_v4 = vadd.f32 %v10520_v13, %v10518_v33  ;;  %v1420_v0 = vadd.f32 %v1314_v35, %v886_v58  ;;  %v1755_v33 = vadd.f32 %v10435_v29, %v10427_v3  ;;  %v891_v13 = vadd.f32 %v9847_v27, %v868_v55 }
 0x3b8   :  { %v10681_v49 = vpop.f32.mrf.mxu1 }
 0x3b9   :  { %2541 = vmatpush.msrb.mxu0 %v2430_v24  ;;  %v2244_v12 = vadd.f32 %v10681_v49, %v10676_v59  ;;  %v1870_v6 = vadd.f32 %v1808_v4, %v1427_v45  ;;  %v1863_v59 = vadd.f32 %v1757_v63, %v1420_v0  ;;  %v1860_v29 = vadd.f32 %v1755_v33, %v10163_v47 }
 0x3bb   :  { %2542 = vmatpush.msrb.mxu0 %v2429_v36  ;;  %v10758_v28 = vadd.f32 %v2244_v12, %v10419_v9 }
 0x3bd   :  { %v10695_v34 = vpop.f32.mrf.mxu2  ;;  %2543 = vmatpush.msrb.mxu0 %v2428_v11 }
 0x3be   :  { %v10697_v51 = vpop.f32.mrf.mxu3 }
 0x3bf   :  { %v2222_v10 = vpop.f32.mrf.mxu0  ;;  %2544 = vmatpush.msrb.mxu0 %v2427_v14 }
 0x3c0   :  { %v2245_v57 = vpop.f32.mrf.mxu1 }
 0x3c1   :  { %v2246_v32 = vadd.f32 %v2245_v57, %v2222_v10  ;;  %v1319_v10 = vadd.f32 %v10252_v17, %v10250_v40  ;;  %v2198_v40 = vadd.f32 %v10697_v51, %v10695_v34  ;;  %2545 = vmatpush.msrb.mxu0 %v2426_v56 }
 0x3c3   :  { %v10749_v48 = vadd.f32 %v2246_v32, %v1864_v16  ;;  %v1426_v9 = vadd.f32 %v1319_v10, %v891_v13  ;;  %v10781_v47 = vadd.f32 %v2198_v40, %v1860_v29  ;;  %2546 = vmatpush.msrb.mxu0 %v2425_v25  ;;  %v2444_v32 = vld [vmem:[%s12806_s25 + $0x118] sm:$0xff] }
 0x3c4   :  { %2500 = vmatpush.msra.mxu2 %v2444_v32  ;;  %2563 = vmatpush.msrb.mxu1 %v2444_v32 }
 0x3c5   :  { %v2176_v15 = vpop.f32.mrf.mxu2  ;;  %v2361_v3 = vmul.f32 %v10749_v48, %v10749_v48  ;;  %v2330_v49 = vadd.f32 %v10749_v48, %v10758_v28  ;;  %v1869_v24 = vadd.f32 %v10522_v61, %v1426_v9  ;;  %v2357_v43 = vmul.f32 %v10781_v47, %v10781_v47  ;;  %v2443_v9 = vld [vmem:[%s12806_s25 + $0x110] sm:$0xff] }
 0x3c6   :  { %v2199_v46 = vpop.f32.mrf.mxu3  ;;  %2501 = vmatpush.msra.mxu2 %v2443_v9  ;;  %2564 = vmatpush.msrb.mxu1 %v2443_v9 }
 0x3c7   :  { %v2225_v41 = vpop.f32.mrf.mxu0 }
 0x3c8   :  { %v2248_v39 = vpop.f32.mrf.mxu1 }
 0x3c9   :  { %v2249_v60 = vadd.f32 %v2248_v39, %v2225_v41  ;;  %v1760_v39 = vadd.f32 %v10507_v54, %v10496_v21  ;;  %v2200_v41 = vadd.f32 %v2199_v46, %v2176_v15  ;;  %v2358_v54 = vmul.f32 %v10758_v28, %v10758_v28 }
 0x3cb   :  { %v10761_v62 = vadd.f32 %v2249_v60, %v10494_v31  ;;  %v1866_v31 = vadd.f32 %v1760_v39, %v10246_v7  ;;  %v10772_v21 = vadd.f32 %v2200_v41, %v1863_v59  ;;  %v2383_v36 = vadd.f32 %v2361_v3, %v2358_v54 }
 0x3cd   :  { %v2179_v2 = vpop.f32.mrf.mxu2  ;;  %v2364_v34 = vmul.f32 %v10761_v62, %v10761_v62  ;;  %v2331_v56 = vadd.f32 %v2330_v49, %v10761_v62  ;;  %v2360_v53 = vmul.f32 %v10772_v21, %v10772_v21 }
 0x3ce   :  { %v2202_v42 = vpop.f32.mrf.mxu3 }
 0x3cf   :  { %v2227_v5 = vpop.f32.mrf.mxu0  ;;  %v2203_v46 = vadd.f32 %v2202_v42, %v2179_v2  ;;  %v2384_v1 = vadd.f32 %v2383_v36, %v2364_v34  ;;  %v2318_v2 = vadd.f32 %v10772_v21, %v10781_v47  ;;  %v12807_v42 = vld [vmem:[#allocation16_spill] sm:$0xff]  ;;  %v2372_v58 = vadd.f32 %v2360_v53, %v2357_v43 }
 0x3d0   :  { %v2250_v50 = vpop.f32.mrf.mxu1  ;;  %v1872_v30 = vadd.f32 %v1765_v52, %v12807_v42  ;;  %v12811_v42 = vld [vmem:[#allocation18_spill] sm:$0xff] }
 0x3d1   :  { %v2251_v22 = vadd.f32 %v2250_v50, %v2227_v5  ;;  %v10784_v14 = vadd.f32 %v2203_v46, %v1866_v31 }
 0x3d3   :  { %v10768_v15 = vadd.f32 %v2251_v22, %v1870_v6  ;;  %v2319_v4 = vadd.f32 %v2318_v2, %v10784_v14  ;;  %v12808_v2 = vld [vmem:[#allocation8_spill] sm:$0xff] }
 0x3d5   :  { %v2181_v17 = vpop.f32.mrf.mxu2  ;;  %v2367_v37 = vmul.f32 %v10768_v15, %v10768_v15  ;;  %v2332_v25 = vadd.f32 %v2331_v56, %v10768_v15 }
 0x3d6   :  { %v2204_v11 = vpop.f32.mrf.mxu3 }
 0x3d7   :  { %v2230_v27 = vpop.f32.mrf.mxu0  ;;  %v2205_v51 = vadd.f32 %v2204_v11, %v2181_v17  ;;  %v2385_v8 = vadd.f32 %v2384_v1, %v2367_v37 }
 0x3d8   :  { %v2253_v57 = vpop.f32.mrf.mxu1 }
 0x3d9   :  { %v2254_v7 = vadd.f32 %v2253_v57, %v2230_v27  ;;  %v10796_v18 = vadd.f32 %v2205_v51, %v1869_v24 }
 0x3db   :  { %v10793_v61 = vadd.f32 %v2254_v7, %v10537_v20  ;;  %v2363_v20 = vmul.f32 %v10784_v14, %v10784_v14  ;;  %v2366_v12 = vmul.f32 %v10796_v18, %v10796_v18  ;;  %v2320_v45 = vadd.f32 %v2319_v4, %v10796_v18 }
 0x3dd   :  { %v2333_v44 = vsel %vm2321_vm2, %v10793_v61, 0.0  ;;  %v2370_v26 = vmul.f32 %v10793_v61, %v10793_v61  ;;  %v2184_v23 = vpop.f32.mrf.mxu2  ;;  %v2373_v0 = vadd.f32 %v2372_v58, %v2363_v20  ;;  %v12809_v20 = vld [vmem:[#allocation9_spill] sm:$0xff] }
 0x3de   :  { %v2334_v35 = vadd.f32 %v2333_v44, %v2332_v25  ;;  %v2207_v38 = vpop.f32.mrf.mxu3 }
 0x3df   :  { %v2386_v19 = vsel %vm2321_vm2, %v2370_v26, 0.0  ;;  %v2208_v5 = vadd.f32 %v2207_v38, %v2184_v23  ;;  %v2232_v16 = vpop.f32.mrf.mxu0  ;;  %v2374_v39 = vadd.f32 %v2373_v0, %v2366_v12  ;;  %v12810_v38 = vld [vmem:[#allocation12_spill] sm:$0xff]  ;;  %v12815_v12 = vld [vmem:[#allocation13_spill] sm:$0xff]  ;;  %v12816_v0 = vld [vmem:[#allocation14_spill] sm:$0xff] }
 0x3e0   :  { %v2335_v60 = vrot.slane %v2334_v35, 4  ;;  %v2387_v50 = vadd.f32 %v2386_v19, %v2385_v8  ;;  %v2255_v55 = vpop.f32.mrf.mxu1  ;;  %v671_v8 = vadd.f32 %v12809_v20, %v12808_v2  ;;  %v12813_v19 = vld [vmem:[#allocation10_spill] sm:$0xff] }
 0x3e1   :  { %v10816_v63 = vadd.f32 %v2208_v5, %v1872_v30  ;;  %v12812_v30 = vld [vmem:[#allocation19_spill] sm:$0xff] }
 0x3e2   :  { %v2336_v22 = vadd.f32 %v2335_v60, %v2334_v35  ;;  %v2388_v6 = vrot.slane %v2387_v50, 4  ;;  %v955_v32 = vadd.f32 %v12810_v38, %v671_v8  ;;  %v1406_v58 = vadd.f32 %v12812_v30, %v12811_v42  ;;  %v12814_v5 = vld [vmem:[#allocation11_spill] sm:$0xff] }
 0x3e3   :  { %v2322_v10 = vsel %vm2321_vm2, %v10816_v63, 0.0  ;;  %v2369_v33 = vmul.f32 %v10816_v63, %v10816_v63  ;;  %v676_v16 = vadd.f32 %v12814_v5, %v12813_v19  ;;  %v2442_v55 = vld [vmem:[%s12806_s25 + $0x108] sm:$0xff] }
 0x3e4   :  { %v2337_v41 = vrot.slane %v2336_v22, 2  ;;  %v2323_v13 = vadd.f32 %v2322_v10, %v2320_v45  ;;  %v2389_v29 = vadd.f32 %v2388_v6, %v2387_v50  ;;  %v978_v60 = vadd.f32 %v12815_v12, %v955_v32  ;;  %2502 = vmatpush.msra.mxu2 %v2442_v55  ;;  %2565 = vmatpush.msrb.mxu1 %v2442_v55  ;;  %v12817_v10 = vld [vmem:[#allocation21_spill] sm:$0xff]  ;;  %v12819_v6 = vld [vmem:[#allocation24_spill] sm:$0xff]  ;;  %v12830_v19 = vld [vmem:[#allocation23_spill] sm:$0xff] }
 0x3e5   :  { %v2375_v59 = vsel %vm2321_vm2, %v2369_v33, 0.0  ;;  %v2186_v40 = vpop.f32.mrf.mxu2  ;;  %v960_v45 = vadd.f32 %v12816_v0, %v676_v16  ;;  %v12818_v33 = vld [vmem:[#allocation22_spill] sm:$0xff] }
 0x3e6   :  { %v2338_v17 = vadd.f32 %v2337_v41, %v2336_v22  ;;  %v2324_v3 = vrot.slane %v2323_v13, 4  ;;  %v2376_v46 = vadd.f32 %v2375_v59, %v2374_v39  ;;  %v2209_v11 = vpop.f32.mrf.mxu3  ;;  %v2390_v57 = vrot.slane %v2389_v29, 2  ;;  %v2441_v41 = vld [vmem:[%s12806_s25 + $0x100] sm:$0xff]  ;;  %v12821_v40 = vld [vmem:[#allocation27_spill] sm:$0xff]  ;;  %s12832_s25 = sld [smem:[#allocation35_spill]] }
 0x3e7   :  { %v1422_v22 = vadd.f32 %v1406_v58, %v978_v60  ;;  %v1411_v39 = vadd.f32 %v12818_v33, %v12817_v10  ;;  %2503 = vmatpush.msra.mxu2 %v2441_v41  ;;  %2566 = vmatpush.msrb.mxu1 %v2441_v41  ;;  %v12823_v11 = vld [vmem:[#allocation15_spill] sm:$0xff] }
 0x3e8   :  { %v2325_v31 = vadd.f32 %v2324_v3, %v2323_v13  ;;  %v2377_v27 = vrot.slane %v2376_v46, 4  ;;  %v2339_v54 = vrot.slane %v2338_v17, 1  ;;  %v2391_v25 = vadd.f32 %v2390_v57, %v2389_v29  ;;  %v12820_v13 = vld [vmem:[#allocation25_spill] sm:$0xff]  ;;  %v12824_v29 = vld [vmem:[#allocation26_spill] sm:$0xff]  ;;  %v12826_v57 = vld [vmem:[#allocation20_spill] sm:$0xff] }
 0x3e9   :  { %v1847_v59 = vadd.f32 %v12820_v13, %v12819_v6  ;;  %v983_v9 = vadd.f32 %v12823_v11, %v960_v45 }
 0x3ea   :  { %v2326_v49 = vrot.slane %v2325_v31, 2  ;;  %v2378_v34 = vadd.f32 %v2377_v27, %v2376_v46  ;;  %v2340_v51 = vadd.f32 %v2339_v54, %v2338_v17  ;;  %v2392_v44 = vrot.slane %v2391_v25, 1  ;;  %v12822_v17 = vld [vmem:[#allocation28_spill] sm:$0xff] }
 0x3eb   :  { %v1852_v3 = vadd.f32 %v12822_v17, %v12821_v40 }
 0x3ec   :  { %v2327_v24 = vadd.f32 %v2326_v49, %v2325_v31  ;;  %v2379_v7 = vrot.slane %v2378_v34, 2  ;;  %2484 = vmatmul.f32.vlgmr.msra.gmra.mxu1 %v2340_v51  ;;  %v2393_v35 = vadd.f32 %v2392_v44, %v2391_v25  ;;  %v1865_v31 = vadd.f32 %v12824_v29, %v1422_v22 }
 0x3ed   :  { %v2266_v36 = vpop.f32.mrf.mxu2  ;;  %v1428_v49 = vadd.f32 %v1411_v39, %v983_v9 }
 0x3ee   :  { %v2289_v56 = vpop.f32.mrf.mxu3  ;;  %v2328_v37 = vrot.slane %v2327_v24, 1  ;;  %v2380_v52 = vadd.f32 %v2379_v7, %v2378_v34  ;;  %v12825_v34 = vld [vmem:[#allocation17_spill] sm:$0xff] }
 0x3ef   :  { %v2290_v27 = vadd.f32 %v2289_v56, %v2266_v36  ;;  %v1862_v51 = vadd.f32 %v1847_v59, %v12825_v34 }
 0x3f0   :  { %v2329_v53 = vadd.f32 %v2328_v37, %v2327_v24  ;;  %v2381_v1 = vrot.slane %v2380_v52, 1  ;;  %v1868_v24 = vadd.f32 %v1852_v3, %v12826_v57 }
 0x3f1   :  { %v10855_v25 = vadd.f32 %v2290_v27, %v1862_v51 }
 0x3f2   :  { %2464 = vmatmul.f32.vlgmr.msra.gmra.mxu0 %v2329_v53  ;;  %v2382_v43 = vadd.f32 %v2381_v1, %v2380_v52  ;;  %v12827_v53 = vld [vmem:[#allocation29_spill] sm:$0xff] }
 0x3f3   :  { %v1871_v1 = vadd.f32 %v12827_v53, %v1428_v49  ;;  %v2359_v20 = vmul.f32 %v10855_v25, %v10855_v25  ;;  %v2341_v38 = vsel %vm534_vm1, %v10855_v25, 0.0 }
 0x3f4   :  { %2527 = vmatmul.f32.vlgmr.msra.gmra.mxu3 %v2382_v43 }
 0x3f5   :  { %v2268_v26 = vpop.f32.mrf.mxu2  ;;  %v2394_v12 = vsel %vm534_vm1, %v2359_v20, 0.0  ;;  %v2602_v20 = vld [vmem:[%s12831_s2 + $0x20] sm:$0xff] }
 0x3f6   :  { %v2291_v23 = vpop.f32.mrf.mxu3  ;;  %2642 = vmatpush.msrb.mxu3 %v2602_v20 }
 0x3f7   :  { %v2292_v46 = vadd.f32 %v2291_v23, %v2268_v26  ;;  %v12828_v26 = vld [vmem:[#allocation30_spill] sm:$0xff]  ;;  %v12829_v23 = vld [vmem:[#allocation31_spill] sm:$0xff] }
 0x3f8   :  { %v1857_v2 = vadd.f32 %v12829_v23, %v12828_v26 }
 0x3f9   :  { %v10852_v7 = vadd.f32 %v2292_v46, %v1865_v31 }
 0x3fa   :  { %2547 = vmatmul.f32.vlgmr.msrb.gmra.mxu0 %v2393_v35  ;;  %v1874_v5 = vadd.f32 %v1857_v2, %v12830_v19  ;;  %v2601_v2 = vld [vmem:[%s12831_s2 + $0x18] sm:$0xff]  ;;  %v2600_v19 = vld [vmem:[%s12831_s2 + $0x10] sm:$0xff] }
 0x3fb   :  { %v2362_v36 = vmul.f32 %v10852_v7, %v10852_v7  ;;  %v2342_v8 = vsel %vm534_vm1, %v10852_v7, 0.0  ;;  %2622 = vmatpush.msrb.mxu2 %v2601_v2 }
 0x3fc   :  { %v2343_v16 = vadd.f32 %v2342_v8, %v2341_v38  ;;  %v2603_v8 = vld [vmem:[%s12831_s2 + $0x28] sm:$0xff] }
 0x3fd   :  { %v2271_v4 = vpop.f32.mrf.mxu2  ;;  %v2395_v32 = vsel %vm534_vm1, %v2362_v36, 0.0  ;;  %2662 = vmatpush.msra.mxu1 %v2603_v8 }
 0x3fe   :  { %v2294_v50 = vpop.f32.mrf.mxu3  ;;  %v2396_v0 = vadd.f32 %v2395_v32, %v2394_v12  ;;  %v2598_v32 = vld [vmem:[%s12831_s2] sm:$0xff] }
 0x3ff   :  { %v2295_v54 = vadd.f32 %v2294_v50, %v2271_v4  ;;  %2623 = vmatpush.msrb.mxu2 %v2598_v32  ;;  %2663 = vmatpush.msra.mxu1 %v2600_v19 }
 0x401   :  { %v10857_v43 = vadd.f32 %v2295_v54, %v1868_v24 }
 0x403   :  { %v2365_v35 = vmul.f32 %v10857_v43, %v10857_v43  ;;  %v2344_v42 = vsel %vm534_vm1, %v10857_v43, 0.0 }
 0x404   :  { %v2345_v45 = vadd.f32 %v2344_v42, %v2343_v16  ;;  %v2599_v42 = vld [vmem:[%s12831_s2 + $0x8] sm:$0xff] }
 0x405   :  { %v2273_v37 = vpop.f32.mrf.mxu2  ;;  %v2397_v60 = vsel %vm534_vm1, %v2365_v35, 0.0  ;;  %2643 = vmatpush.msrb.mxu3 %v2599_v42 }
 0x406   :  { %v2296_v52 = vpop.f32.mrf.mxu3  ;;  %v2398_v33 = vadd.f32 %v2397_v60, %v2396_v0 }
 0x407   :  { %v2297_v44 = vadd.f32 %v2296_v52, %v2273_v37  ;;  %v9076_v52 = vmov 648.0   ;;  %2705 = vmatpush.msra.mxu3 %v2602_v20 }
 0x408   :  { %9036 = vrcp.f32 %v9076_v52 }
 0x409   :  { %v10861_v56 = vadd.f32 %v2297_v44, %v1871_v1  ;;  %2706 = vmatpush.msra.mxu3 %v2599_v42 }
 0x40b   :  { %v2368_v30 = vmul.f32 %v10861_v56, %v10861_v56  ;;  %v2346_v50 = vsel %vm534_vm1, %v10861_v56, 0.0 }
 0x40c   :  { %v2347_v39 = vadd.f32 %v2346_v50, %v2345_v45 }
 0x40d   :  { %v2276_v58 = vpop.f32.mrf.mxu2  ;;  %v2399_v22 = vsel %vm534_vm1, %v2368_v30, 0.0 }
 0x40e   :  { %v2299_v4 = vpop.f32.mrf.mxu3  ;;  %v2400_v13 = vadd.f32 %v2399_v22, %v2398_v33  ;;  %v9037_v53 = vpop.eup %9036 }
 0x40f   :  { %v2300_v55 = vadd.f32 %v2299_v4, %v2276_v58  ;;  %v2572_v44 = vmul.f32 648.0, %v9037_v53  ;;  %vm2576_vm4 = vweird.f32 %v9037_v53 }
 0x411   :  { %v10884_v10 = vadd.f32 %v2300_v55, %v1874_v5  ;;  %v2573_v26 = vsub.f32 1.0, %v2572_v44 }
 0x413   :  { %v2349_v41 = vsel %vm2348_vm3, %v10884_v10, 0.0  ;;  %v2371_v6 = vmul.f32 %v10884_v10, %v10884_v10  ;;  %v2574_v23 = vmul.f32 %v9037_v53, %v2573_v26 }
 0x414   :  { %v2350_v59 = vadd.f32 %v2349_v41, %v2347_v39 }
 0x415   :  { %v2401_v40 = vsel %vm2348_vm3, %v2371_v6, 0.0  ;;  %v2278_v17 = vpop.f32.mrf.mxu2  ;;  %v2575_v58 = vadd.f32 %v9037_v53, %v2574_v23 }
 0x416   :  { %v2351_v3 = vrot.slane %v2350_v59, 4  ;;  %v2402_v46 = vadd.f32 %v2401_v40, %v2400_v13  ;;  %v2301_v11 = vpop.f32.mrf.mxu3  ;;  %v2593_v17 = vld [vmem:[%s12832_s25] sm:$0x1] }
 0x417   :  { %v2577_v50 = vsel %vm2576_vm4, %v9037_v53, %v2575_v58 }
 0x418   :  { %v2352_v9 = vadd.f32 %v2351_v3, %v2350_v59  ;;  %v2403_v29 = vrot.slane %v2402_v46, 4 }
 0x41a   :  { %v2353_v31 = vrot.slane %v2352_v9, 2  ;;  %v2404_v27 = vadd.f32 %v2403_v29, %v2402_v46 }
 0x41c   :  { %v2354_v54 = vadd.f32 %v2353_v31, %v2352_v9  ;;  %v2405_v49 = vrot.slane %v2404_v27, 2  ;;  %v2595_v9 = vld [vmem:[%s12833_s27] sm:$0x1] }
 0x41e   :  { %v2355_v34 = vrot.slane %v2354_v54, 1  ;;  %v2406_v51 = vadd.f32 %v2405_v49, %v2404_v27 }
 0x420   :  { %v2356_v57 = vadd.f32 %v2355_v34, %v2354_v54  ;;  %v2407_v24 = vrot.slane %v2406_v51, 1 }
 0x422   :  { %v2408_v37 = vadd.f32 %v2407_v24, %v2406_v51  ;;  %7158 = vmatmul.msk.f32.vlgmr.msra.gmra.mxu2 %vm534_vm1, %v2356_v57 }
 0x423   :  { %2685 = vmatpush.msra.mxu2 %v2601_v2 }
 0x424   :  { %7159 = vmatmul.msk.f32.vlgmr.msrb.gmra.mxu1 %vm534_vm1, %v2408_v37 }
 0x425   :  { %2725 = vmatpush.msrb.mxu1 %v2603_v8  ;;  %2686 = vmatpush.msra.mxu2 %v2598_v32 }
 0x427   :  { %2726 = vmatpush.msrb.mxu1 %v2600_v19 }
 0x469   :  { %v2485_v36 = vpop.f32.mrf.mxu1 }
 0x46f   :  { %v2465_v1 = vpop.f32.mrf.mxu0 }
 0x470   :  { %v2486_v5 = vadd.f32 %v2485_v36, %v2465_v1 }
 0x477   :  { %v2528_v35 = vpop.f32.mrf.mxu3  ;;  %v2548_v38 = vpop.f32.mrf.mxu0 }
 0x478   :  { %v2549_v16 = vadd.f32 %v2548_v38, %v2528_v35 }
 0x4a1   :  { %v2568_v30 = vpop.f32.mrf.mxu1 }
 0x4a2   :  { %v2569_v12 = vadd.f32 %v2568_v30, %v2549_v16 }
 0x4a4   :  { %v2579_v0 = vmul.f32 %v2577_v50, %v2569_v12 }
 0x4a5   :  { %v2505_v4 = vpop.f32.mrf.mxu2 }
 0x4a6   :  { %v2506_v60 = vadd.f32 %v2505_v4, %v2486_v5 }
 0x4a8   :  { %v2578_v55 = vmul.f32 %v2577_v50, %v2506_v60 }
 0x4aa   :  { %v2580_v45 = vmul.f32 %v2578_v55, %v2578_v55 }
 0x4ac   :  { %v2581_v22 = vsub.f32 %v2579_v0, %v2580_v45 }
 0x4ae   :  { %v2582_v33 = vadd.f32 1e-05, %v2581_v22 }
 0x4b0   :  { %9038 = vrsqrt.f32 %v2582_v33  ;;  %vm2589_vm6 = vweird.f32 %v2582_v33 }
 0x4b6   :  { %v9039_v39 = vpop.eup %9038 }
 0x4b7   :  { %v2584_v41 = vmul.f32 %v9039_v39, %v2582_v33  ;;  %vm2590_vm5 = vweird.f32 %v9039_v39 }
 0x4b8   :  { %vm2591_vm7 = vmor %vm2589_vm6, %vm2590_vm5  ;;  %vm4968_vm5 = vcmask 785412   ;;  %vm4971_vm6 = vcmask 1042432  }
 0x4b9   :  { %v2585_v6 = vmul.f32 %v9039_v39, %v2584_v41 }
 0x4bb   :  { %v2586_v13 = vmul.f32 0.5, %v2585_v6 }
 0x4bd   :  { %v2587_v59 = vsub.f32 1.5, %v2586_v13 }
 0x4bf   :  { %v2588_v40 = vmul.f32 %v9039_v39, %v2587_v59 }
 0x4c1   :  { %v2592_v3 = vsel %vm2591_vm7, %v9039_v39, %v2588_v40  ;;  %vm4972_vm7 = vcmask 784388  }
 0x4c2   :  { %v2594_v46 = vmul.f32 %v2593_v17, %v2592_v3 }
 0x4c4   :  { %7160 = vmatmul.msk.f32.vlgmr.msrb.gmra.mxu2 %vm2604_vm8, %v2594_v46  ;;  %7161 = vmatmul.msk.f32.vlgmr.msrb.gmra.mxu3 %vm2604_vm8, %v2594_v46  ;;  %v2596_v11 = vmul.f32 %v2594_v46, %v2578_v55 }
 0x4c5   :  { %7162 = vmatmul.msk.f32.vlgmr.msra.gmra.mxu1 %vm2604_vm8, %v2594_v46 }
 0x4c6   :  { %v2597_v29 = vsub.f32 %v2595_v9, %v2596_v11 }
 0x4cc   :  { %7163 = vmatmul.msk.f32.vlgmr.msra.gmra.mxu2 %vm2604_vm8, %v2597_v29  ;;  %7164 = vmatmul.msk.f32.vlgmr.msra.gmra.mxu3 %vm2604_vm8, %v2597_v29 }
 0x4cd   :  { %7165 = vmatmul.msk.f32.vlgmr.msrb.gmra.mxu1 %vm2604_vm8, %v2597_v29  ;;  %vm4969_vm8 = vmor %vm4968_vm5, %vm2321_vm2  ;;  %vm4986_vm2 = vcmask 113664  }
 0x542   :  { %v2665_v31 = vpop.f32.mrf.mxu1 }
 0x543   :  { %v2733_v27 = vperm.slane %v2665_v31, 0 }
 0x545   :  { %v2736_v24 = vmul.f32 %v2733_v27, %v10855_v25  ;;  %v2739_v37 = vmul.f32 %v2733_v27, %v10852_v7  ;;  %v2742_v52 = vmul.f32 %v2733_v27, %v10857_v43  ;;  %v2745_v53 = vmul.f32 %v2733_v27, %v10861_v56 }
 0x546   :  { %v2748_v1 = vmul.f32 %v2733_v27, %v10884_v10 }
 0x547   :  { %v2625_v54 = vpop.f32.mrf.mxu2  ;;  %v2645_v49 = vpop.f32.mrf.mxu3 }
 0x548   :  { %v2731_v34 = vperm.slane %v2625_v54, 0  ;;  %v2732_v51 = vperm.slane %v2645_v49, 0 }
 0x54a   :  { %v2728_v57 = vpop.f32.mrf.mxu1  ;;  %v2734_v44 = vmul.f32 %v2731_v34, %v10781_v47  ;;  %v2737_v36 = vmul.f32 %v2731_v34, %v10772_v21  ;;  %v2740_v23 = vmul.f32 %v2731_v34, %v10784_v14  ;;  %v2743_v2 = vmul.f32 %v2731_v34, %v10796_v18 }
 0x54b   :  { %v2751_v26 = vperm.slane %v2728_v57, 0  ;;  %v2746_v20 = vmul.f32 %v2731_v34, %v10816_v63  ;;  %v2735_v25 = vmul.f32 %v2732_v51, %v10758_v28  ;;  %v2738_v10 = vmul.f32 %v2732_v51, %v10749_v48 }
 0x54c   :  { %v2741_v47 = vmul.f32 %v2732_v51, %v10761_v62  ;;  %v2744_v21 = vmul.f32 %v2732_v51, %v10768_v15  ;;  %v2747_v28 = vmul.f32 %v2732_v51, %v10793_v61 }
 0x54d   :  { %v2754_v7 = vadd.f32 %v2751_v26, %v2736_v24  ;;  %v2757_v43 = vadd.f32 %v2751_v26, %v2739_v37  ;;  %v2760_v8 = vadd.f32 %v2751_v26, %v2742_v52  ;;  %v2763_v56 = vadd.f32 %v2751_v26, %v2745_v53 }
 0x54e   :  { %v2766_v35 = vadd.f32 %v2751_v26, %v2748_v1 }
 0x54f   :  { %v2688_v38 = vpop.f32.mrf.mxu2  ;;  %v2708_v14 = vpop.f32.mrf.mxu3  ;;  %v2769_v32 = vmax.f32 %v2754_v7, 0.0  ;;  %v2772_v18 = vmax.f32 %v2757_v43, 0.0  ;;  %v2775_v42 = vmax.f32 %v2760_v8, 0.0  ;;  %v2778_v63 = vmax.f32 %v2763_v56, 0.0 }
 0x550   :  { %v2781_v30 = vmax.f32 %v2766_v35, 0.0  ;;  %v2749_v58 = vperm.slane %v2688_v38, 0  ;;  %v2750_v19 = vperm.slane %v2708_v14, 0 }
 0x551   :  { %v2783_v5 = vpack.c.bf16 %v2769_v32, %v2769_v32  ;;  %v2785_v16 = vpack.c.bf16 %v2772_v18, %v2772_v18  ;;  %v2787_v4 = vpack.c.bf16 %v2775_v42, %v2775_v42  ;;  %v2789_v48 = vpack.c.bf16 %v2778_v63, %v2778_v63 }
 0x552   :  { %v2791_v12 = vpack.c.bf16 %v2781_v30, %v2781_v30  ;;  %v2752_v62 = vadd.f32 %v2749_v58, %v2734_v44  ;;  %v2755_v60 = vadd.f32 %v2749_v58, %v2737_v36  ;;  %v2758_v15 = vadd.f32 %v2749_v58, %v2740_v23  ;;  %v8794_v30 = vld [vmem:[%s12752_s8 + $0x8] sm:$0x70] }
 0x553   :  { %2793 = vst.msk [vmem:[#allocation2 + $0x8] sm:$0xf] %vm2348_vm3, %v2783_v5  ;;  %v2761_v50 = vadd.f32 %v2749_v58, %v2743_v2  ;;  %v2764_v55 = vadd.f32 %v2749_v58, %v2746_v20  ;;  %v2753_v0 = vadd.f32 %v2750_v19, %v2735_v25  ;;  %v2756_v45 = vadd.f32 %v2750_v19, %v2738_v10 }
 0x554   :  { %2795 = vst.msk [vmem:[#allocation2 + $0x14] sm:$0xf] %vm2348_vm3, %v2785_v16  ;;  %v2767_v61 = vmax.f32 %v2752_v62, 0.0  ;;  %v2770_v22 = vmax.f32 %v2755_v60, 0.0  ;;  %v2773_v33 = vmax.f32 %v2758_v15, 0.0  ;;  %v2759_v39 = vadd.f32 %v2750_v19, %v2741_v47 }
 0x555   :  { %2797 = vst.msk [vmem:[#allocation2 + $0x20] sm:$0xf] %vm2348_vm3, %v2787_v4  ;;  %v2776_v41 = vmax.f32 %v2761_v50, 0.0  ;;  %v2762_v6 = vadd.f32 %v2750_v19, %v2744_v21  ;;  %v2765_v13 = vadd.f32 %v2750_v19, %v2747_v28  ;;  %v2779_v59 = vmax.f32 %v2764_v55, 0.0  ;;  %v7168_v47 = vld [vmem:[%s12752_s8] sm:$0xf] }
 0x556   :  { %2799 = vst.msk [vmem:[#allocation2 + $0x2c] sm:$0xf] %vm2348_vm3, %v2789_v48  ;;  %v2768_v40 = vmax.f32 %v2753_v0, 0.0  ;;  %v2771_v17 = vmax.f32 %v2756_v45, 0.0  ;;  %v2774_v3 = vmax.f32 %v2759_v39, 0.0 }
 0x557   :  { %2802 = vst.msk [vmem:[#allocation2 + $0x38] sm:$0x3] %vm2801_vm9, %v2791_v12  ;;  %v2777_v46 = vmax.f32 %v2762_v6, 0.0  ;;  %v2780_v11 = vmax.f32 %v2765_v13, 0.0  ;;  %v8757_v21 = vld [vmem:[%s12752_s8] sm:$0x70]  ;;  %vm4973_vm9 = vmor %vm4972_vm7, %vm4971_vm6 }
 0x558   :  { %v2782_v9 = vpack.c.bf16 %v2768_v40, %v2767_v61  ;;  %v2784_v29 = vpack.c.bf16 %v2771_v17, %v2770_v22  ;;  %v2786_v31 = vpack.c.bf16 %v2774_v3, %v2773_v33  ;;  %v7169_v63 = vor.u32 %v8757_v21, %v7168_v47  ;;  %v7201_v28 = vld [vmem:[%s12752_s8 + $0x8] sm:$0xf]  ;;  %v8809_v16 = vld [vmem:[%s12751_s7 + $0x194] sm:$0xf]  ;;  %v7302_v4 = vld [vmem:[%s12751_s7 + $0x198] sm:$0xf0] }
 0x559   :  { %v2788_v27 = vpack.c.bf16 %v2777_v46, %v2776_v41  ;;  %v2790_v54 = vpack.c.bf16 %v2780_v11, %v2779_v59  ;;  %v7202_v5 = vor.u32 %v8794_v30, %v7201_v28  ;;  %v7305_v48 = vor.u32 %v8809_v16, %v7302_v4  ;;  %v8807_v12 = vld [vmem:[%s12751_s7 + $0x184] sm:$0xf]  ;;  %v7294_v62 = vld [vmem:[%s12751_s7 + $0x188] sm:$0xf0]  ;;  %v7300_v60 = vld [vmem:[%s12751_s7 + $0x190] sm:$0xf] }
 0x55a   :  { %2792 = vst [vmem:[#allocation2] sm:$0xff] %v2782_v9  ;;  %v7180_v36 = vld [vmem:[#allocation2 + $0x8] sm:$0xf]  ;;  %v8810_v15 = vld [vmem:[%s12751_s7 + $0x194] sm:$0xf0]  ;;  %v7297_v45 = vor.u32 %v8807_v12, %v7294_v62 }
 0x55b   :  { %2794 = vst [vmem:[#allocation2 + $0xc] sm:$0xff] %v2784_v29  ;;  %v8753_v26 = vld [vmem:[#allocation2 + $0x10] sm:$0xf0]  ;;  %v7364_v50 = vld [vmem:[%s12751_s7 + $0x210] sm:$0xf]  ;;  %v7301_v55 = vor.u32 %v8810_v15, %v7300_v60 }
 0x55c   :  { %2796 = vst [vmem:[#allocation2 + $0x18] sm:$0xff] %v2786_v31  ;;  %v7192_v24 = vld [vmem:[#allocation2 + $0x20] sm:$0xf]  ;;  %v10950_v8 = vor.u32 %v8753_v26, %v7180_v36  ;;  %v8826_v0 = vld [vmem:[%s12751_s7 + $0x214] sm:$0xf0] }
 0x55d   :  { %2798 = vst [vmem:[#allocation2 + $0x24] sm:$0xff] %v2788_v27  ;;  %v8756_v37 = vld [vmem:[#allocation2 + $0x28] sm:$0xf0]  ;;  %v7365_v61 = vor.u32 %v8826_v0, %v7364_v50  ;;  %v8805_v22 = vld [vmem:[%s12751_s7 + $0x174] sm:$0xf] }
 0x55e   :  { %2800 = vst [vmem:[#allocation2 + $0x30] sm:$0x33] %v2790_v54  ;;  %v2812_v49 = vld [vmem:[#allocation2 + $0x38] sm:$0x3]  ;;  %v10941_v53 = vor.u32 %v8756_v37, %v7192_v24  ;;  %v7286_v33 = vld [vmem:[%s12751_s7 + $0x178] sm:$0xf0] }
 0x55f   :  { %v2844_v34 = vunpack.c.l.b16 %v2812_v49  ;;  %v7292_v39 = vld [vmem:[%s12751_s7 + $0x180] sm:$0xf]  ;;  %v8808_v41 = vld [vmem:[%s12751_s7 + $0x184] sm:$0xf0]  ;;  %v7289_v17 = vor.u32 %v8805_v22, %v7286_v33  ;;  %v8803_v3 = vld [vmem:[%s12751_s7 + $0x164] sm:$0xf] }
 0x560   :  { %v7356_v6 = vld [vmem:[%s12751_s7 + $0x200] sm:$0xf]  ;;  %v7293_v13 = vor.u32 %v8808_v41, %v7292_v39  ;;  %v8824_v59 = vld [vmem:[%s12751_s7 + $0x204] sm:$0xf0]  ;;  %v7278_v46 = vld [vmem:[%s12751_s7 + $0x168] sm:$0xf0] }
 0x561   :  { %v2853_v51 = vpack.c.b16 %v2844_v34, %v2844_v34  ;;  %v7172_v14 = vld [vmem:[#allocation2] sm:$0xf]  ;;  %v8751_v18 = vld [vmem:[#allocation2 + $0x4] sm:$0xf]  ;;  %v7357_v40 = vor.u32 %v8824_v59, %v7356_v6  ;;  %v7284_v11 = vld [vmem:[%s12751_s7 + $0x170] sm:$0xf]  ;;  %v7281_v49 = vor.u32 %v8803_v3, %v7278_v46 }
 0x562   :  { %v8752_v32 = vld [vmem:[#allocation2 + $0x8] sm:$0xf0]  ;;  %v7174_v42 = vld [vmem:[#allocation2 + $0xc] sm:$0xf0]  ;;  %v8806_v9 = vld [vmem:[%s12751_s7 + $0x174] sm:$0xf0] }
 0x563   :  { %v10938_v57 = vsel %vm2864_vm10, %v2853_v51, 0  ;;  %v7184_v20 = vld [vmem:[#allocation2 + $0x18] sm:$0xf]  ;;  %v8754_v25 = vld [vmem:[#allocation2 + $0x1c] sm:$0xf]  ;;  %v10976_v58 = vor.u32 %v8752_v32, %v7172_v14  ;;  %v10978_v19 = vor.u32 %v8751_v18, %v7174_v42  ;;  %v7285_v31 = vor.u32 %v8806_v9, %v7284_v11 }
 0x564   :  { %2907 = vmatpush.bf16.msra.mxu1 %v10938_v57  ;;  %v8755_v56 = vld [vmem:[#allocation2 + $0x20] sm:$0xf0]  ;;  %v7186_v10 = vld [vmem:[#allocation2 + $0x24] sm:$0xf0]  ;;  %v7348_v29 = vld [vmem:[%s12751_s7 + $0x1f0] sm:$0xf] }
 0x565   :  { %v2811_v52 = vld [vmem:[#allocation2 + $0x30] sm:$0x33]  ;;  %v10962_v35 = vor.u32 %v8755_v56, %v7184_v20  ;;  %v10964_v38 = vor.u32 %v8754_v25, %v7186_v10  ;;  %v8822_v27 = vld [vmem:[%s12751_s7 + $0x1f4] sm:$0xf0]  ;;  %v7270_v51 = vld [vmem:[%s12751_s7 + $0x158] sm:$0xf0] }
 0x566   :  { %v2842_v1 = vunpack.c.l.b16 %v2811_v52  ;;  %v2843_v44 = vunpack.c.h.b16 %v2811_v52  ;;  %v7349_v54 = vor.u32 %v8822_v27, %v7348_v29  ;;  %v8801_v34 = vld [vmem:[%s12751_s7 + $0x154] sm:$0xf]  ;;  %v7276_v24 = vld [vmem:[%s12751_s7 + $0x160] sm:$0xf]  ;;  %v8804_v37 = vld [vmem:[%s12751_s7 + $0x164] sm:$0xf0] }
 0x567   :  { %v7340_v52 = vld [vmem:[%s12751_s7 + $0x1e0] sm:$0xf]  ;;  %v7273_v26 = vor.u32 %v8801_v34, %v7270_v51  ;;  %v7380_v20 = vld [vmem:[%s12751_s7 + $0x230] sm:$0xf]  ;;  %v8830_v25 = vld [vmem:[%s12751_s7 + $0x234] sm:$0xf0] }
 0x568   :  { %2908 = vmatpush.bf16.msra.mxu1 %v10941_v53  ;;  %v2851_v23 = vpack.c.b16 %v2842_v1, %v2842_v1  ;;  %v2852_v2 = vpack.c.b16 %v2843_v44, %v2843_v44  ;;  %v7277_v1 = vor.u32 %v8804_v37, %v7276_v24  ;;  %v8820_v44 = vld [vmem:[%s12751_s7 + $0x1e4] sm:$0xf0]  ;;  %v7381_v56 = vor.u32 %v8830_v25, %v7380_v20  ;;  %v8797_v47 = vld [vmem:[%s12751_s7 + $0x134] sm:$0xf]  ;;  %v7254_v21 = vld [vmem:[%s12751_s7 + $0x138] sm:$0xf0] }
 0x569   :  { %v7341_v36 = vor.u32 %v8820_v44, %v7340_v52  ;;  %v7257_v14 = vor.u32 %v8797_v47, %v7254_v21  ;;  %v8795_v32 = vld [vmem:[%s12751_s7 + $0x124] sm:$0xf]  ;;  %v7246_v18 = vld [vmem:[%s12751_s7 + $0x128] sm:$0xf0]  ;;  %v7510_v42 = vld [vmem:[%s12751_s7 + $0xf0] sm:$0xf] }
 0x56a   :  { %v10945_v7 = vsel %vm2864_vm10, %v2851_v23, 0  ;;  %v10948_v43 = vsel %vm2864_vm10, %v2852_v2, 0  ;;  %v8799_v23 = vld [vmem:[%s12751_s7 + $0x144] sm:$0xf]  ;;  %v7262_v2 = vld [vmem:[%s12751_s7 + $0x148] sm:$0xf0]  ;;  %v7249_v28 = vor.u32 %v8795_v32, %v7246_v18 }
 0x56b   :  { %2879 = vmatpush.bf16.msrb.mxu2 %v10945_v7  ;;  %2893 = vmatpush.bf16.msrb.mxu3 %v10948_v43  ;;  %v7265_v10 = vor.u32 %v8799_v23, %v7262_v2  ;;  %v8787_v16 = vld [vmem:[%s12751_s7 + $0xe4] sm:$0xf0]  ;;  %v8785_v12 = vld [vmem:[%s12751_s7 + $0xd4] sm:$0xf0]  ;;  %v7486_v60 = vld [vmem:[%s12751_s7 + $0xc0] sm:$0xf] }
 0x56c   :  { %2971 = vmatpush.bf16.msra.mxu0 %v10945_v7  ;;  %2909 = vmatpush.bf16.msra.mxu1 %v10950_v8  ;;  %v8783_v15 = vld [vmem:[%s12751_s7 + $0xc4] sm:$0xf0]  ;;  %v8781_v0 = vld [vmem:[%s12751_s7 + $0xb4] sm:$0xf0]  ;;  %v7332_v33 = vld [vmem:[%s12751_s7 + $0x1d0] sm:$0xf] }
 0x56d   :  { %v7487_v50 = vor.u32 %v8783_v15, %v7486_v60  ;;  %v8802_v22 = vld [vmem:[%s12751_s7 + $0x154] sm:$0xf0]  ;;  %v7470_v6 = vld [vmem:[%s12751_s7 + $0xa0] sm:$0xf]  ;;  %v8828_v3 = vld [vmem:[%s12751_s7 + $0x224] sm:$0xf0] }
 0x56e   :  { %v8818_v41 = vld [vmem:[%s12751_s7 + $0x1d4] sm:$0xf0]  ;;  %v8825_v46 = vld [vmem:[%s12751_s7 + $0x214] sm:$0xf]  ;;  %v7366_v9 = vld [vmem:[%s12751_s7 + $0x218] sm:$0xf0] }
 0x56f   :  { %2880 = vmatpush.bf16.msrb.mxu2 %v10962_v35  ;;  %2894 = vmatpush.bf16.msrb.mxu3 %v10964_v38  ;;  %v7333_v59 = vor.u32 %v8818_v41, %v7332_v33  ;;  %v7369_v29 = vor.u32 %v8825_v46, %v7366_v9  ;;  %v8800_v27 = vld [vmem:[%s12751_s7 + $0x144] sm:$0xf0]  ;;  %v7462_v51 = vld [vmem:[%s12751_s7 + $0x90] sm:$0xf]  ;;  %v8777_v24 = vld [vmem:[%s12751_s7 + $0x94] sm:$0xf0] }
 0x570   :  { %2972 = vmatpush.bf16.msra.mxu0 %v10962_v35  ;;  %7196 = vmatmul.msk.bf16.vlgmr.msra.gmra.mxu1 %vm2860_vm11, %v7169_v63  ;;  %v8816_v34 = vld [vmem:[%s12751_s7 + $0x1c4] sm:$0xf0]  ;;  %v7463_v52 = vor.u32 %v8777_v24, %v7462_v51  ;;  %v7358_v44 = vld [vmem:[%s12751_s7 + $0x208] sm:$0xf0]  ;;  %v8798_v23 = vld [vmem:[%s12751_s7 + $0x134] sm:$0xf0] }
 0x571   :  { %3231 = vmatpush.bf16.msrb.mxu1 %v7301_v55  ;;  %v7478_v55 = vld [vmem:[%s12751_s7 + $0xb0] sm:$0xf]  ;;  %v8814_v25 = vld [vmem:[%s12751_s7 + $0x1b4] sm:$0xf0]  ;;  %v7350_v32 = vld [vmem:[%s12751_s7 + $0x1f8] sm:$0xf0] }
 0x572   :  { %v7316_v2 = vld [vmem:[%s12751_s7 + $0x1b0] sm:$0xf]  ;;  %v7342_v60 = vld [vmem:[%s12751_s7 + $0x1e8] sm:$0xf0]  ;;  %v8829_v33 = vld [vmem:[%s12751_s7 + $0x234] sm:$0xf] }
 0x573   :  { %2881 = vmatpush.bf16.msrb.mxu2 %v10976_v58  ;;  %2895 = vmatpush.bf16.msrb.mxu3 %v10978_v19  ;;  %v7317_v47 = vor.u32 %v8814_v25, %v7316_v2  ;;  %v7430_v41 = vld [vmem:[%s12751_s7 + $0x50] sm:$0xf]  ;;  %v8827_v46 = vld [vmem:[%s12751_s7 + $0x224] sm:$0xf]  ;;  %v7422_v9 = vld [vmem:[%s12751_s7 + $0x40] sm:$0xf] }
 0x574   :  { %2973 = vmatpush.bf16.msra.mxu0 %v10976_v58  ;;  %v7414_v51 = vld [vmem:[%s12751_s7 + $0x30] sm:$0xf]  ;;  %v8765_v24 = vld [vmem:[%s12751_s7 + $0x34] sm:$0xf0] }
 0x575   :  { %3232 = vmatpush.bf16.msrb.mxu1 %v7293_v13  ;;  %v8779_v13 = vld [vmem:[%s12751_s7 + $0xa4] sm:$0xf0] }
 0x576   :  { %7194 = vmatmul.msk.bf16.vlgmr.msrb.gmra.mxu2 %vm2860_vm11, %v7169_v63  ;;  %7195 = vmatmul.msk.bf16.vlgmr.msrb.gmra.mxu3 %vm2860_vm11, %v7169_v63  ;;  %v8789_v63 = vld [vmem:[%s12751_s7 + $0xf4] sm:$0xf0] }
 0x577   :  { %2985 = vmatpush.bf16.msra.mxu2 %v10948_v43  ;;  %2999 = vmatpush.bf16.msra.mxu3 %v10938_v57  ;;  %v7511_v30 = vor.u32 %v8789_v63, %v7510_v42  ;;  %v7244_v42 = vld [vmem:[%s12751_s7 + $0x120] sm:$0xf]  ;;  %v8796_v63 = vld [vmem:[%s12751_s7 + $0x124] sm:$0xf0] }
 0x578   :  { %7203 = vmatmul.msk.bf16.vlgmr.msra.gmra.mxu0 %vm2860_vm11, %v7202_v5 }
 0x579   :  { %3245 = vmatpush.bf16.msrb.mxu0 %v7365_v61  ;;  %3233 = vmatpush.bf16.msrb.mxu1 %v7285_v31  ;;  %v7268_v61 = vld [vmem:[%s12751_s7 + $0x150] sm:$0xf]  ;;  %v7260_v31 = vld [vmem:[%s12751_s7 + $0x140] sm:$0xf] }
 0x57a   :  { %v7269_v39 = vor.u32 %v8802_v22, %v7268_v61  ;;  %v7334_v61 = vld [vmem:[%s12751_s7 + $0x1d8] sm:$0xf0] }
 0x57b   :  { %2986 = vmatpush.bf16.msra.mxu2 %v10964_v38  ;;  %3000 = vmatpush.bf16.msra.mxu3 %v10941_v53 }
 0x57d   :  { %3246 = vmatpush.bf16.msrb.mxu0 %v7357_v40  ;;  %3234 = vmatpush.bf16.msrb.mxu1 %v7277_v1  ;;  %v7471_v40 = vor.u32 %v8779_v13, %v7470_v6  ;;  %v8823_v1 = vld [vmem:[%s12751_s7 + $0x204] sm:$0xf]  ;;  %v8769_v13 = vld [vmem:[%s12751_s7 + $0x54] sm:$0xf0] }
 0x57f   :  { %2987 = vmatpush.bf16.msra.mxu2 %v10978_v19  ;;  %3001 = vmatpush.bf16.msra.mxu3 %v10950_v8 }
 0x581   :  { %3247 = vmatpush.bf16.msrb.mxu0 %v7349_v54  ;;  %3235 = vmatpush.bf16.msrb.mxu1 %v7269_v39  ;;  %v7324_v54 = vld [vmem:[%s12751_s7 + $0x1c0] sm:$0xf]  ;;  %v7382_v39 = vld [vmem:[%s12751_s7 + $0x238] sm:$0xf0] }
 0x582   :  { %v7325_v37 = vor.u32 %v8816_v34, %v7324_v54  ;;  %v7385_v6 = vor.u32 %v8829_v33, %v7382_v39  ;;  %v8813_v54 = vld [vmem:[%s12751_s7 + $0x1b4] sm:$0xf] }
 0x583   :  { %3273 = vmatpush.bf16.msrb.mxu3 %v7305_v48  ;;  %3265 = vmatpush.bf16.msrb.mxu2 %v7381_v56  ;;  %v7494_v48 = vld [vmem:[%s12751_s7 + $0xd0] sm:$0xf]  ;;  %v7454_v56 = vld [vmem:[%s12751_s7 + $0x80] sm:$0xf] }
 0x584   :  { %v7495_v62 = vor.u32 %v8785_v12, %v7494_v48 }
 0x585   :  { %3248 = vmatpush.bf16.msrb.mxu0 %v7341_v36  ;;  %v7361_v36 = vor.u32 %v8823_v1, %v7358_v44  ;;  %v7310_v1 = vld [vmem:[%s12751_s7 + $0x1a8] sm:$0xf0] }
 0x586   :  { %7204 = vmatmul.msk.bf16.vlgmr.msra.gmra.mxu2 %vm2860_vm11, %v7202_v5  ;;  %7205 = vmatmul.msk.bf16.vlgmr.msra.gmra.mxu3 %vm2860_vm11, %v7202_v5  ;;  %v7502_v5 = vld [vmem:[%s12751_s7 + $0xe0] sm:$0xf] }
 0x587   :  { %3274 = vmatpush.bf16.msrb.mxu3 %v7297_v45  ;;  %v7503_v4 = vor.u32 %v8787_v16, %v7502_v5  ;;  %v7479_v45 = vor.u32 %v8781_v0, %v7478_v55  ;;  %v8812_v5 = vld [vmem:[%s12751_s7 + $0x1a4] sm:$0xf0]  ;;  %v7446_v16 = vld [vmem:[%s12751_s7 + $0x70] sm:$0xf] }
 0x588   :  { %v8771_v55 = vld [vmem:[%s12751_s7 + $0x64] sm:$0xf0] }
 0x589   :  { %3249 = vmatpush.bf16.msrb.mxu0 %v7333_v59  ;;  %v8815_v59 = vld [vmem:[%s12751_s7 + $0x1c4] sm:$0xf] }
 0x58b   :  { %3275 = vmatpush.bf16.msrb.mxu3 %v7289_v17  ;;  %v7372_v17 = vld [vmem:[%s12751_s7 + $0x220] sm:$0xf] }
 0x58c   :  { %v7373_v11 = vor.u32 %v8828_v3, %v7372_v17  ;;  %v7431_v17 = vor.u32 %v8769_v13, %v7430_v41 }
 0x58d   :  { %3250 = vmatpush.bf16.msrb.mxu0 %v7325_v37  ;;  %v7415_v37 = vor.u32 %v8765_v24, %v7414_v51  ;;  %v8784_v24 = vld [vmem:[%s12751_s7 + $0xd4] sm:$0xf] }
 0x58e   :  { %3266 = vmatpush.bf16.msrb.mxu2 %v7373_v11  ;;  %v7374_v11 = vld [vmem:[%s12751_s7 + $0x228] sm:$0xf0] }
 0x58f   :  { %3276 = vmatpush.bf16.msrb.mxu3 %v7281_v49  ;;  %v7261_v49 = vor.u32 %v8800_v27, %v7260_v31  ;;  %v8767_v31 = vld [vmem:[%s12751_s7 + $0x44] sm:$0xf0] }
 0x590   :  { %v7423_v27 = vor.u32 %v8767_v31, %v7422_v9  ;;  %v8790_v9 = vld [vmem:[%s12751_s7 + $0x104] sm:$0xf] }
 0x591   :  { %3236 = vmatpush.bf16.msrb.mxu1 %v7261_v49  ;;  %3251 = vmatpush.bf16.msrb.mxu0 %v7317_v47  ;;  %v7318_v49 = vld [vmem:[%s12751_s7 + $0x1b8] sm:$0xf0]  ;;  %v7398_v47 = vld [vmem:[%s12751_s7 + $0x10] sm:$0xf] }
 0x592   :  { %3287 = vmatpush.bf16.msra.mxu2 %v7369_v29  ;;  %v7377_v29 = vor.u32 %v8827_v46, %v7374_v11  ;;  %v7321_v34 = vor.u32 %v8813_v54, %v7318_v49  ;;  %v7504_v11 = vld [vmem:[%s12751_s7 + $0xe8] sm:$0xf0]  ;;  %v8768_v49 = vld [vmem:[%s12751_s7 + $0x54] sm:$0xf] }
 0x593   :  { %3277 = vmatpush.bf16.msrb.mxu3 %v7273_v26  ;;  %v7252_v26 = vld [vmem:[%s12751_s7 + $0x130] sm:$0xf] }
 0x594   :  { %v7253_v20 = vor.u32 %v8798_v23, %v7252_v26  ;;  %v7406_v26 = vld [vmem:[%s12751_s7 + $0x20] sm:$0xf]  ;;  %v8763_v23 = vld [vmem:[%s12751_s7 + $0x24] sm:$0xf0] }
 0x595   :  { %v7407_v2 = vor.u32 %v8763_v23, %v7406_v26  ;;  %v8766_v26 = vld [vmem:[%s12751_s7 + $0x44] sm:$0xf]  ;;  %v7424_v23 = vld [vmem:[%s12751_s7 + $0x48] sm:$0xf0] }
 0x596   :  { %3288 = vmatpush.bf16.msra.mxu2 %v7361_v36  ;;  %3237 = vmatpush.bf16.msrb.mxu1 %v7253_v20  ;;  %v7526_v20 = vld [vmem:[%s12751_s7 + $0x110] sm:$0xf] }
 0x597   :  { %3278 = vmatpush.bf16.msrb.mxu3 %v7265_v10  ;;  %v8775_v10 = vld [vmem:[%s12751_s7 + $0x84] sm:$0xf0] }
 0x598   :  { %v7455_v21 = vor.u32 %v8775_v10, %v7454_v56  ;;  %v8793_v10 = vld [vmem:[%s12751_s7 + $0x114] sm:$0xf0] }
 0x59b   :  { %3279 = vmatpush.bf16.msrb.mxu3 %v7257_v14  ;;  %v8821_v14 = vld [vmem:[%s12751_s7 + $0x1f4] sm:$0xf] }
 0x59c   :  { %v7353_v18 = vor.u32 %v8821_v14, %v7350_v32 }
 0x59e   :  { %3289 = vmatpush.bf16.msra.mxu2 %v7353_v18  ;;  %v7527_v18 = vor.u32 %v8793_v10, %v7526_v20  ;;  %v8782_v20 = vld [vmem:[%s12751_s7 + $0xc4] sm:$0xf]  ;;  %v7427_v10 = vor.u32 %v8766_v26, %v7424_v23  ;;  %v7623_v26 = vld [vmem:[%s12751_s7 + $0x298] sm:$0xf0] }
 0x59f   :  { %3280 = vmatpush.bf16.msrb.mxu3 %v7249_v28  ;;  %v7308_v28 = vld [vmem:[%s12751_s7 + $0x1a0] sm:$0xf] }
 0x5a0   :  { %v7309_v48 = vor.u32 %v8812_v5, %v7308_v28  ;;  %v8791_v28 = vld [vmem:[%s12751_s7 + $0x104] sm:$0xf0] }
 0x5a1   :  { %v8759_v5 = vld [vmem:[%s12751_s7 + $0x4] sm:$0xf0] }
 0x5a2   :  { %3252 = vmatpush.bf16.msrb.mxu0 %v7309_v48 }
 0x5a3   :  { %3512 = vmatpush.bf16.msra.mxu3 %v7511_v30  ;;  %v7245_v30 = vor.u32 %v8796_v63, %v7244_v42  ;;  %v7518_v42 = vld [vmem:[%s12751_s7 + $0x100] sm:$0xf] }
 0x5a5   :  { %3238 = vmatpush.bf16.msrb.mxu1 %v7245_v30  ;;  %v7390_v30 = vld [vmem:[%s12751_s7] sm:$0xf] }
 0x5a7   :  { %3513 = vmatpush.bf16.msra.mxu3 %v7503_v4  ;;  %v8773_v4 = vld [vmem:[%s12751_s7 + $0x74] sm:$0xf0] }
 0x5a8   :  { %v7447_v12 = vor.u32 %v8773_v4, %v7446_v16  ;;  %v7391_v16 = vor.u32 %v8759_v5, %v7390_v30  ;;  %v7519_v4 = vor.u32 %v8791_v28, %v7518_v42  ;;  %v7480_v42 = vld [vmem:[%s12751_s7 + $0xb8] sm:$0xf0] }
 0x5a9   :  { %3307 = vmatpush.bf16.msra.mxu1 %v7385_v6 }
 0x5aa   :  { %3498 = vmatpush.bf16.msra.mxu0 %v7447_v12 }
 0x5ab   :  { %3514 = vmatpush.bf16.msra.mxu3 %v7495_v62  ;;  %v8819_v62 = vld [vmem:[%s12751_s7 + $0x1e4] sm:$0xf] }
 0x5ac   :  { %v7345_v15 = vor.u32 %v8819_v62, %v7342_v60 }
 0x5ad   :  { %3308 = vmatpush.bf16.msra.mxu1 %v7377_v29  ;;  %v7520_v29 = vld [vmem:[%s12751_s7 + $0x108] sm:$0xf0] }
 0x5ae   :  { %3290 = vmatpush.bf16.msra.mxu2 %v7345_v15  ;;  %v7523_v51 = vor.u32 %v8790_v9, %v7520_v29  ;;  %v7685_v9 = vld [vmem:[%s12751_s7 + $0x310] sm:$0xf]  ;;  %v8859_v29 = vld [vmem:[%s12751_s7 + $0x314] sm:$0xf0] }
 0x5af   :  { %3515 = vmatpush.bf16.msra.mxu3 %v7487_v50  ;;  %v7438_v50 = vld [vmem:[%s12751_s7 + $0x60] sm:$0xf] }
 0x5b0   :  { %v7439_v0 = vor.u32 %v8771_v55, %v7438_v50  ;;  %v8772_v50 = vld [vmem:[%s12751_s7 + $0x74] sm:$0xf]  ;;  %v7448_v55 = vld [vmem:[%s12751_s7 + $0x78] sm:$0xf0] }
 0x5b1   :  { %v7451_v41 = vor.u32 %v8772_v50, %v7448_v55  ;;  %v7400_v50 = vld [vmem:[%s12751_s7 + $0x18] sm:$0xf0]  ;;  %v8776_v55 = vld [vmem:[%s12751_s7 + $0x94] sm:$0xf] }
 0x5b2   :  { %3499 = vmatpush.bf16.msra.mxu0 %v7439_v0  ;;  %v8788_v0 = vld [vmem:[%s12751_s7 + $0xf4] sm:$0xf] }
 0x5b3   :  { %3516 = vmatpush.bf16.msra.mxu3 %v7479_v45  ;;  %v8817_v45 = vld [vmem:[%s12751_s7 + $0x1d4] sm:$0xf] }
 0x5b4   :  { %v7337_v22 = vor.u32 %v8817_v45, %v7334_v61  ;;  %v7512_v45 = vld [vmem:[%s12751_s7 + $0xf8] sm:$0xf0]  ;;  %v8792_v61 = vld [vmem:[%s12751_s7 + $0x114] sm:$0xf] }
 0x5b6   :  { %3291 = vmatpush.bf16.msra.mxu2 %v7337_v22  ;;  %3500 = vmatpush.bf16.msra.mxu0 %v7431_v17  ;;  %v7528_v22 = vld [vmem:[%s12751_s7 + $0x118] sm:$0xf0]  ;;  %v7440_v17 = vld [vmem:[%s12751_s7 + $0x68] sm:$0xf0] }
 0x5b7   :  { %3517 = vmatpush.bf16.msra.mxu3 %v7471_v40  ;;  %v7326_v40 = vld [vmem:[%s12751_s7 + $0x1c8] sm:$0xf0]  ;;  %v7531_v46 = vor.u32 %v8792_v61, %v7528_v22  ;;  %v8758_v22 = vld [vmem:[%s12751_s7 + $0x4] sm:$0xf] }
 0x5b8   :  { %v7329_v3 = vor.u32 %v8815_v59, %v7326_v40  ;;  %v7515_v59 = vor.u32 %v8788_v0, %v7512_v45  ;;  %v8770_v40 = vld [vmem:[%s12751_s7 + $0x64] sm:$0xf]  ;;  %v7464_v0 = vld [vmem:[%s12751_s7 + $0x98] sm:$0xf0] }
 0x5b9   :  { %v7467_v61 = vor.u32 %v8776_v55, %v7464_v0  ;;  %v8832_v55 = vld [vmem:[%s12751_s7 + $0x244] sm:$0xf]  ;;  %v7583_v0 = vld [vmem:[%s12751_s7 + $0x248] sm:$0xf0] }
 0x5ba   :  { %3292 = vmatpush.bf16.msra.mxu2 %v7329_v3  ;;  %3501 = vmatpush.bf16.msra.mxu0 %v7423_v27  ;;  %v8786_v3 = vld [vmem:[%s12751_s7 + $0xe4] sm:$0xf]  ;;  %v7443_v27 = vor.u32 %v8770_v40, %v7440_v17 }
 0x5bb   :  { %3518 = vmatpush.bf16.msra.mxu3 %v7463_v52  ;;  %v8811_v52 = vld [vmem:[%s12751_s7 + $0x1a4] sm:$0xf]  ;;  %v7507_v54 = vor.u32 %v8786_v3, %v7504_v11  ;;  %v7693_v3 = vld [vmem:[%s12751_s7 + $0x320] sm:$0xf] }
 0x5bc   :  { %v7313_v44 = vor.u32 %v8811_v52, %v7310_v1  ;;  %v7538_v52 = vld [vmem:[%s12752_s8 + $0x10] sm:$0xf]  ;;  %v8831_v1 = vld [vmem:[%s12752_s8 + $0x10] sm:$0x70] }
 0x5be   :  { %3293 = vmatpush.bf16.msra.mxu2 %v7321_v34  ;;  %3502 = vmatpush.bf16.msra.mxu0 %v7415_v37  ;;  %v7432_v34 = vld [vmem:[%s12751_s7 + $0x58] sm:$0xf0] }
 0x5bf   :  { %3519 = vmatpush.bf16.msra.mxu3 %v7455_v21  ;;  %v8761_v21 = vld [vmem:[%s12751_s7 + $0x14] sm:$0xf0]  ;;  %v7496_v37 = vld [vmem:[%s12751_s7 + $0xd8] sm:$0xf0] }
 0x5c0   :  { %v7399_v14 = vor.u32 %v8761_v21, %v7398_v47 }
 0x5c2   :  { %3294 = vmatpush.bf16.msra.mxu2 %v7313_v44  ;;  %3503 = vmatpush.bf16.msra.mxu0 %v7407_v2  ;;  %v7435_v44 = vor.u32 %v8768_v49, %v7432_v34  ;;  %v11390_v2 = vor.u32 %v8831_v1, %v7538_v52  ;;  %v7677_v34 = vld [vmem:[%s12751_s7 + $0x300] sm:$0xf]  ;;  %v7669_v1 = vld [vmem:[%s12751_s7 + $0x2f0] sm:$0xf] }
 0x5c6   :  { %3504 = vmatpush.bf16.msra.mxu0 %v7399_v14  ;;  %v8764_v14 = vld [vmem:[%s12751_s7 + $0x34] sm:$0xf] }
 0x5ca   :  { %3505 = vmatpush.bf16.msra.mxu0 %v7391_v16  ;;  %v8762_v16 = vld [vmem:[%s12751_s7 + $0x24] sm:$0xf] }
 0x5ed   :  { %v2911_v31 = vpop.f32.mrf.mxu1 }
 0x5f5   :  { %v2975_v36 = vpop.f32.mrf.mxu0  ;;  %v2913_v21 = vpop.f32.mrf.mxu1 }
 0x5f9   :  { %v11297_v25 = vpop.f32.mrf.mxu2  ;;  %v2897_v56 = vpop.f32.mrf.mxu3 }
 0x5fd   :  { %v2977_v32 = vpop.f32.mrf.mxu0 }
 0x5fe   :  { %v3008_v63 = vpack.c.bf16 %v2977_v32, %v2975_v36  ;;  %v7499_v36 = vor.u32 %v8784_v24, %v7496_v37  ;;  %v7416_v32 = vld [vmem:[%s12751_s7 + $0x38] sm:$0xf0]  ;;  %v8844_v24 = vld [vmem:[%s12751_s7 + $0x2a4] sm:$0xf] }
 0x5ff   :  { %v7419_v28 = vor.u32 %v8764_v14, %v7416_v32 }
 0x600   :  { %3281 = vmatmul.bf16.vlgmr.msrb.gmra.mxu3 %v3008_v63  ;;  %3239 = vmatmul.bf16.vlgmr.msrb.gmra.mxu1 %v3008_v63  ;;  %v2918_v63 = vpack.c.bf16 %v2913_v21, %v2911_v31  ;;  %v8846_v31 = vld [vmem:[%s12751_s7 + $0x2b4] sm:$0xf]  ;;  %v7615_v21 = vld [vmem:[%s12751_s7 + $0x288] sm:$0xf0] }
 0x601   :  { %3598 = vmatpush.bf16.msrb.mxu3 %v10945_v7  ;;  %3532 = vmatpush.bf16.msrb.mxu1 %v7527_v18  ;;  %v11321_v48 = vpop.f32.mrf.mxu2  ;;  %v2899_v12 = vpop.f32.mrf.mxu3  ;;  %v8780_v18 = vld [vmem:[%s12751_s7 + $0xb4] sm:$0xf] }
 0x602   :  { %v11325_v15 = vpack.c.bf16 %v2899_v12, %v2897_v56  ;;  %v7488_v56 = vld [vmem:[%s12751_s7 + $0xc8] sm:$0xf0]  ;;  %v2916_v30 = vpack.c.bf16 %v11321_v48, %v11297_v25  ;;  %v7483_v5 = vor.u32 %v8780_v18, %v7480_v42  ;;  %v8778_v12 = vld [vmem:[%s12751_s7 + $0xa4] sm:$0xf]  ;;  %v7653_v18 = vld [vmem:[%s12751_s7 + $0x2d0] sm:$0xf] }
 0x603   :  { %v7491_v47 = vor.u32 %v8782_v20, %v7488_v56  ;;  %v7661_v56 = vld [vmem:[%s12751_s7 + $0x2e0] sm:$0xf]  ;;  %v8851_v42 = vld [vmem:[%s12751_s7 + $0x2d4] sm:$0xf0] }
 0x605   :  { %3599 = vmatpush.bf16.msrb.mxu3 %v10962_v35  ;;  %3533 = vmatpush.bf16.msrb.mxu1 %v7519_v4  ;;  %v7408_v4 = vld [vmem:[%s12751_s7 + $0x28] sm:$0xf0] }
 0x606   :  { %v7411_v25 = vor.u32 %v8762_v16, %v7408_v4  ;;  %v8849_v16 = vld [vmem:[%s12751_s7 + $0x2c4] sm:$0xf0]  ;;  %v8836_v4 = vld [vmem:[%s12751_s7 + $0x264] sm:$0xf] }
 0x609   :  { %3600 = vmatpush.bf16.msrb.mxu3 %v10976_v58  ;;  %v2989_v62 = vpop.f32.mrf.mxu2  ;;  %v3003_v60 = vpop.f32.mrf.mxu3 }
 0x610   :  { %3520 = vmatmul.bf16.vlgmr.msra.gmra.mxu3 %v11325_v15 }
 0x611   :  { %v2991_v33 = vpop.f32.mrf.mxu2  ;;  %v3005_v39 = vpop.f32.mrf.mxu3 }
 0x612   :  { %v3009_v6 = vpack.c.bf16 %v2991_v33, %v2989_v62  ;;  %v3010_v13 = vpack.c.bf16 %v3005_v39, %v3003_v60  ;;  %v7472_v62 = vld [vmem:[%s12751_s7 + $0xa8] sm:$0xf0]  ;;  %v8760_v60 = vld [vmem:[%s12751_s7 + $0x14] sm:$0xf]  ;;  %v8774_v39 = vld [vmem:[%s12751_s7 + $0x84] sm:$0xf] }
 0x613   :  { %v7475_v48 = vor.u32 %v8778_v12, %v7472_v62  ;;  %v7403_v45 = vor.u32 %v8760_v60, %v7400_v50  ;;  %v7392_v33 = vld [vmem:[%s12751_s7 + $0x8] sm:$0xf0]  ;;  %v7591_v60 = vld [vmem:[%s12751_s7 + $0x258] sm:$0xf0] }
 0x614   :  { %3253 = vmatmul.bf16.vlgmr.msrb.gmra.mxu0 %v3009_v6  ;;  %7386 = vmatmul.msk.bf16.vlgmr.msrb.gmra.mxu2 %vm534_vm1, %v3010_v13  ;;  %v7599_v12 = vld [vmem:[%s12751_s7 + $0x268] sm:$0xf0] }
 0x615   :  { %7387 = vmatmul.msk.bf16.vlgmr.msra.gmra.mxu1 %vm534_vm1, %v3010_v13  ;;  %3540 = vmatpush.bf16.msrb.mxu2 %v7451_v41  ;;  %v7456_v41 = vld [vmem:[%s12751_s7 + $0x88] sm:$0xf0]  ;;  %v8863_v13 = vld [vmem:[%s12751_s7 + $0x334] sm:$0xf0] }
 0x616   :  { %3554 = vmatpush.bf16.msra.mxu1 %v7515_v59  ;;  %3574 = vmatpush.bf16.msrb.mxu0 %v7531_v46  ;;  %v7395_v59 = vor.u32 %v8758_v22, %v7392_v33  ;;  %v7459_v40 = vor.u32 %v8774_v39, %v7456_v41  ;;  %v8861_v46 = vld [vmem:[%s12751_s7 + $0x324] sm:$0xf0]  ;;  %v8847_v22 = vld [vmem:[%s12751_s7 + $0x2b4] sm:$0xf0]  ;;  %v7629_v39 = vld [vmem:[%s12751_s7 + $0x2a0] sm:$0xf] }
 0x617   :  { %v7694_v11 = vor.u32 %v8861_v46, %v7693_v3  ;;  %v8845_v41 = vld [vmem:[%s12751_s7 + $0x2a4] sm:$0xf0] }
 0x618   :  { %v8841_v3 = vld [vmem:[%s12751_s7 + $0x284] sm:$0xf0] }
 0x619   :  { %3541 = vmatpush.bf16.msrb.mxu2 %v7443_v27  ;;  %v7639_v27 = vld [vmem:[%s12751_s7 + $0x2b8] sm:$0xf0] }
 0x61a   :  { %3555 = vmatpush.bf16.msra.mxu1 %v7507_v54  ;;  %3575 = vmatpush.bf16.msrb.mxu0 %v7523_v51  ;;  %v7686_v54 = vor.u32 %v8859_v29, %v7685_v9  ;;  %v7642_v49 = vor.u32 %v8846_v31, %v7639_v27  ;;  %v8857_v51 = vld [vmem:[%s12751_s7 + $0x304] sm:$0xf0]  ;;  %v8839_v9 = vld [vmem:[%s12751_s7 + $0x274] sm:$0xf0]  ;;  %v7597_v31 = vld [vmem:[%s12751_s7 + $0x260] sm:$0xf] }
 0x61b   :  { %v7678_v37 = vor.u32 %v8857_v51, %v7677_v34  ;;  %v8837_v27 = vld [vmem:[%s12751_s7 + $0x264] sm:$0xf0]  ;;  %v7589_v34 = vld [vmem:[%s12751_s7 + $0x250] sm:$0xf]  ;;  %v8835_v51 = vld [vmem:[%s12751_s7 + $0x254] sm:$0xf0] }
 0x61d   :  { %3542 = vmatpush.bf16.msrb.mxu2 %v7435_v44  ;;  %v8855_v44 = vld [vmem:[%s12751_s7 + $0x2f4] sm:$0xf0] }
 0x61e   :  { %3556 = vmatpush.bf16.msra.mxu1 %v7499_v36  ;;  %v8842_v36 = vld [vmem:[%s12751_s7 + $0x294] sm:$0xf]  ;;  %v7670_v23 = vor.u32 %v8855_v44, %v7669_v1 }
 0x61f   :  { %v7626_v20 = vor.u32 %v8842_v36, %v7623_v26  ;;  %v8866_v44 = vld [vmem:[%s12751_s7 + $0x354] sm:$0xf]  ;;  %v7719_v36 = vld [vmem:[%s12751_s7 + $0x358] sm:$0xf0] }
 0x620   :  { %7540 = vmatmul.msk.bf16.vlgmr.msrb.gmra.mxu3 %vm2860_vm11, %v11390_v2  ;;  %v7722_v26 = vor.u32 %v8866_v44, %v7719_v36 }
 0x621   :  { %3543 = vmatpush.bf16.msrb.mxu2 %v7427_v10  ;;  %v8853_v10 = vld [vmem:[%s12751_s7 + $0x2e4] sm:$0xf0] }
 0x622   :  { %3557 = vmatpush.bf16.msra.mxu1 %v7491_v47  ;;  %v8840_v47 = vld [vmem:[%s12751_s7 + $0x284] sm:$0xf]  ;;  %v7662_v14 = vor.u32 %v8853_v10, %v7661_v56  ;;  %v7711_v10 = vld [vmem:[%s12751_s7 + $0x348] sm:$0xf0] }
 0x623   :  { %v7618_v32 = vor.u32 %v8840_v47, %v7615_v21  ;;  %v8864_v56 = vld [vmem:[%s12751_s7 + $0x344] sm:$0xf]  ;;  %v7717_v21 = vld [vmem:[%s12751_s7 + $0x350] sm:$0xf] }
 0x624   :  { %3295 = vmatmul.bf16.vlgmr.msra.gmra.mxu2 %v3009_v6  ;;  %3506 = vmatmul.bf16.vlgmr.msra.gmra.mxu0 %v2916_v30  ;;  %v7701_v6 = vld [vmem:[%s12751_s7 + $0x330] sm:$0xf]  ;;  %v7714_v47 = vor.u32 %v8864_v56, %v7711_v10  ;;  %v8848_v10 = vld [vmem:[%s12751_s7 + $0x2c4] sm:$0xf] }
 0x625   :  { %7532 = vmatmul.msk.bf16.vlgmr.msrb.gmra.mxu1 %vm534_vm1, %v2918_v63  ;;  %3544 = vmatpush.bf16.msrb.mxu2 %v7419_v28  ;;  %v7702_v17 = vor.u32 %v8863_v13, %v7701_v6  ;;  %v7607_v28 = vld [vmem:[%s12751_s7 + $0x278] sm:$0xf0]  ;;  %v7630_v6 = vor.u32 %v8845_v41, %v7629_v39  ;;  %v7621_v13 = vld [vmem:[%s12751_s7 + $0x290] sm:$0xf]  ;;  %v8856_v41 = vld [vmem:[%s12751_s7 + $0x304] sm:$0xf] }
 0x626   :  { %3558 = vmatpush.bf16.msra.mxu1 %v7483_v5  ;;  %3612 = vmatpush.bf16.msra.mxu0 %v10948_v43 }
 0x629   :  { %3545 = vmatpush.bf16.msrb.mxu2 %v7411_v25  ;;  %v7602_v25 = vor.u32 %v8836_v4, %v7599_v12 }
 0x62a   :  { %3559 = vmatpush.bf16.msra.mxu1 %v7475_v48  ;;  %3613 = vmatpush.bf16.msra.mxu0 %v10964_v38  ;;  %v8834_v48 = vld [vmem:[%s12751_s7 + $0x254] sm:$0xf] }
 0x62b   :  { %v7594_v50 = vor.u32 %v8834_v48, %v7591_v60 }
 0x62d   :  { %3546 = vmatpush.bf16.msrb.mxu2 %v7403_v45  ;;  %v7586_v45 = vor.u32 %v8832_v55, %v7583_v0 }
 0x62e   :  { %3560 = vmatpush.bf16.msra.mxu1 %v7467_v61  ;;  %3614 = vmatpush.bf16.msra.mxu0 %v10978_v19  ;;  %v7637_v61 = vld [vmem:[%s12751_s7 + $0x2b0] sm:$0xf] }
 0x62f   :  { %v7638_v33 = vor.u32 %v8847_v22, %v7637_v61  ;;  %v7687_v61 = vld [vmem:[%s12751_s7 + $0x318] sm:$0xf0] }
 0x631   :  { %3547 = vmatpush.bf16.msrb.mxu2 %v7395_v59  ;;  %3858 = vmatpush.bf16.msra.mxu3 %v7638_v33  ;;  %v8843_v59 = vld [vmem:[%s12751_s7 + $0x294] sm:$0xf0] }
 0x632   :  { %3561 = vmatpush.bf16.msra.mxu1 %v7459_v40  ;;  %v7622_v40 = vor.u32 %v8843_v59, %v7621_v13 }
 0x634   :  { %3548 = vmatmul.bf16.vlgmr.msrb.gmra.mxu2 %v2916_v30  ;;  %7533 = vmatmul.msk.bf16.vlgmr.msrb.gmra.mxu0 %vm534_vm1, %v2918_v63  ;;  %v8838_v63 = vld [vmem:[%s12751_s7 + $0x274] sm:$0xf]  ;;  %v7654_v30 = vor.u32 %v8851_v42, %v7653_v18 }
 0x635   :  { %3626 = vmatpush.bf16.msra.mxu2 %v10938_v57  ;;  %3562 = vmatmul.bf16.vlgmr.msra.gmra.mxu1 %v11325_v15  ;;  %v7631_v15 = vld [vmem:[%s12751_s7 + $0x2a8] sm:$0xf0]  ;;  %v7610_v5 = vor.u32 %v8838_v63, %v7607_v28  ;;  %v7709_v28 = vld [vmem:[%s12751_s7 + $0x340] sm:$0xf] }
 0x636   :  { %3872 = vmatpush.bf16.msrb.mxu1 %v7702_v17  ;;  %v7634_v52 = vor.u32 %v8844_v24, %v7631_v15  ;;  %3859 = vmatpush.bf16.msra.mxu3 %v7630_v6  ;;  %v7613_v17 = vld [vmem:[%s12751_s7 + $0x280] sm:$0xf]  ;;  %v7590_v15 = vor.u32 %v8835_v51, %v7589_v34  ;;  %v7679_v6 = vld [vmem:[%s12751_s7 + $0x308] sm:$0xf0] }
 0x637   :  { %v7614_v46 = vor.u32 %v8841_v3, %v7613_v17  ;;  %v7682_v59 = vor.u32 %v8856_v41, %v7679_v6  ;;  %v8854_v3 = vld [vmem:[%s12751_s7 + $0x2f4] sm:$0xf] }
 0x639   :  { %3627 = vmatpush.bf16.msra.mxu2 %v10941_v53 }
 0x63a   :  { %3873 = vmatpush.bf16.msrb.mxu1 %v7694_v11  ;;  %3860 = vmatpush.bf16.msra.mxu3 %v7622_v40  ;;  %v7605_v11 = vld [vmem:[%s12751_s7 + $0x270] sm:$0xf] }
 0x63b   :  { %v7606_v29 = vor.u32 %v8839_v9, %v7605_v11 }
 0x63d   :  { %3628 = vmatpush.bf16.msra.mxu2 %v10950_v8 }
 0x63e   :  { %3874 = vmatpush.bf16.msrb.mxu1 %v7686_v54  ;;  %3861 = vmatpush.bf16.msra.mxu3 %v7614_v46  ;;  %v7598_v54 = vor.u32 %v8837_v27, %v7597_v31  ;;  %v7671_v46 = vld [vmem:[%s12751_s7 + $0x2f8] sm:$0xf0]  ;;  %v7663_v31 = vld [vmem:[%s12751_s7 + $0x2e8] sm:$0xf0] }
 0x63f   :  { %v7674_v11 = vor.u32 %v8854_v3, %v7671_v46  ;;  %v8898_v46 = vld [vmem:[%s12751_s7 + $0x444] sm:$0xf0] }
 0x641   :  { %3900 = vmatpush.bf16.msrb.mxu2 %v7642_v49 }
 0x642   :  { %3875 = vmatpush.bf16.msrb.mxu1 %v7678_v37  ;;  %3862 = vmatpush.bf16.msra.mxu3 %v7606_v29  ;;  %v7581_v37 = vld [vmem:[%s12751_s7 + $0x240] sm:$0xf]  ;;  %v8852_v29 = vld [vmem:[%s12751_s7 + $0x2e4] sm:$0xf] }
 0x644   :  { %7541 = vmatmul.msk.bf16.vlgmr.msra.gmra.mxu0 %vm2860_vm11, %v11390_v2  ;;  %7542 = vmatmul.msk.bf16.vlgmr.msra.gmra.mxu2 %vm2860_vm11, %v11390_v2  ;;  %v7645_v2 = vld [vmem:[%s12751_s7 + $0x2c0] sm:$0xf] }
 0x645   :  { %3901 = vmatpush.bf16.msrb.mxu2 %v7634_v52  ;;  %v7646_v62 = vor.u32 %v8849_v16, %v7645_v2  ;;  %v8833_v52 = vld [vmem:[%s12751_s7 + $0x244] sm:$0xf0]  ;;  %v8862_v2 = vld [vmem:[%s12751_s7 + $0x334] sm:$0xf]  ;;  %v7703_v16 = vld [vmem:[%s12751_s7 + $0x338] sm:$0xf0] }
 0x646   :  { %3876 = vmatpush.bf16.msrb.mxu1 %v7670_v23  ;;  %3863 = vmatpush.bf16.msra.mxu3 %v7598_v54  ;;  %v7582_v1 = vor.u32 %v8833_v52, %v7581_v37  ;;  %v7706_v4 = vor.u32 %v8862_v2, %v7703_v16  ;;  %v7666_v54 = vor.u32 %v8852_v29, %v7663_v31  ;;  %v8850_v52 = vld [vmem:[%s12751_s7 + $0x2d4] sm:$0xf]  ;;  %v7822_v29 = vld [vmem:[%s12751_s7 + $0x3c8] sm:$0xf0] }
 0x649   :  { %3902 = vmatpush.bf16.msrb.mxu2 %v7626_v20 }
 0x64a   :  { %3877 = vmatpush.bf16.msrb.mxu1 %v7662_v14  ;;  %3864 = vmatpush.bf16.msra.mxu3 %v7590_v15  ;;  %v8867_v14 = vld [vmem:[%s12751_s7 + $0x354] sm:$0xf0] }
 0x64d   :  { %3903 = vmatpush.bf16.msrb.mxu2 %v7618_v32  ;;  %v7718_v32 = vor.u32 %v8867_v14, %v7717_v21 }
 0x64e   :  { %3878 = vmatpush.bf16.msrb.mxu1 %v7654_v30  ;;  %3865 = vmatpush.bf16.msra.mxu3 %v7582_v1  ;;  %v8865_v30 = vld [vmem:[%s12751_s7 + $0x344] sm:$0xf0]  ;;  %v7655_v1 = vld [vmem:[%s12751_s7 + $0x2d8] sm:$0xf0] }
 0x64f   :  { %3892 = vmatpush.bf16.msrb.mxu0 %v7718_v32  ;;  %v7658_v36 = vor.u32 %v8850_v52, %v7655_v1  ;;  %v7868_v1 = vld [vmem:[%s12751_s7 + $0x420] sm:$0xf] }
 0x651   :  { %3904 = vmatpush.bf16.msrb.mxu2 %v7610_v5  ;;  %v7710_v5 = vor.u32 %v8865_v30, %v7709_v28  ;;  %v8868_v28 = vld [vmem:[%s12752_s8 + $0x18] sm:$0x70] }
 0x652   :  { %3879 = vmatpush.bf16.msrb.mxu1 %v7646_v62  ;;  %3934 = vmatpush.bf16.msrb.mxu3 %v7722_v26  ;;  %v8860_v62 = vld [vmem:[%s12751_s7 + $0x324] sm:$0xf] }
 0x653   :  { %3893 = vmatpush.bf16.msrb.mxu0 %v7710_v5 }
 0x655   :  { %3905 = vmatpush.bf16.msrb.mxu2 %v7602_v25  ;;  %v7695_v25 = vld [vmem:[%s12751_s7 + $0x328] sm:$0xf0] }
 0x656   :  { %3962 = vmatpush.bf16.msra.mxu1 %v10945_v7  ;;  %3935 = vmatpush.bf16.msrb.mxu3 %v7714_v47  ;;  %v7698_v60 = vor.u32 %v8860_v62, %v7695_v25  ;;  %v7647_v47 = vld [vmem:[%s12751_s7 + $0x2c8] sm:$0xf0] }
 0x657   :  { %3914 = vmatpush.bf16.msra.mxu0 %v7706_v4  ;;  %v7650_v14 = vor.u32 %v8848_v10, %v7647_v47  ;;  %v7860_v47 = vld [vmem:[%s12751_s7 + $0x410] sm:$0xf] }
 0x659   :  { %3906 = vmatpush.bf16.msrb.mxu2 %v7594_v50 }
 0x65a   :  { %3963 = vmatpush.bf16.msra.mxu1 %v10962_v35 }
 0x65b   :  { %3915 = vmatpush.bf16.msra.mxu0 %v7698_v60 }
 0x65d   :  { %3907 = vmatpush.bf16.msrb.mxu2 %v7586_v45  ;;  %v8858_v45 = vld [vmem:[%s12751_s7 + $0x314] sm:$0xf] }
 0x65e   :  { %3964 = vmatpush.bf16.msra.mxu1 %v10976_v58  ;;  %v7690_v22 = vor.u32 %v8858_v45, %v7687_v61  ;;  %v7892_v61 = vld [vmem:[%s12751_s7 + $0x450] sm:$0xf] }
 0x660   :  { %3916 = vmatpush.bf16.msra.mxu0 %v7690_v22  ;;  %v8900_v22 = vld [vmem:[%s12751_s7 + $0x454] sm:$0xf0] }
 0x661   :  { %3976 = vmatpush.bf16.msra.mxu2 %v10948_v43  ;;  %v7893_v6 = vor.u32 %v8900_v22, %v7892_v61  ;;  %v8888_v61 = vld [vmem:[%s12751_s7 + $0x3f4] sm:$0xf0]  ;;  %v8871_v22 = vld [vmem:[%s12751_s7 + $0x374] sm:$0xf] }
 0x664   :  { %3917 = vmatpush.bf16.msra.mxu0 %v7682_v59 }
 0x665   :  { %3977 = vmatpush.bf16.msra.mxu2 %v10964_v38 }
 0x668   :  { %3918 = vmatpush.bf16.msra.mxu0 %v7674_v11  ;;  %v8881_v11 = vld [vmem:[%s12751_s7 + $0x3c4] sm:$0xf] }
 0x669   :  { %3978 = vmatpush.bf16.msra.mxu2 %v10978_v19 }
 0x66c   :  { %3919 = vmatpush.bf16.msra.mxu0 %v7666_v54  ;;  %v7876_v54 = vld [vmem:[%s12751_s7 + $0x430] sm:$0xf] }
 0x670   :  { %3920 = vmatpush.bf16.msra.mxu0 %v7658_v36  ;;  %v8877_v36 = vld [vmem:[%s12751_s7 + $0x3a4] sm:$0xf] }
 0x674   :  { %3921 = vmatpush.bf16.msra.mxu0 %v7650_v14  ;;  %v8892_v14 = vld [vmem:[%s12751_s7 + $0x414] sm:$0xf0] }
 0x67d   :  { %v11601_v49 = vpop.f32.mrf.mxu1 }
 0x683   :  { %v11609_v24 = vpop.f32.mrf.mxu3 }
 0x685   :  { %v3242_v23 = vpop.f32.mrf.mxu1 }
 0x68b   :  { %v11623_v20 = vpop.f32.mrf.mxu3 }
 0x691   :  { %v11637_v18 = vpop.f32.mrf.mxu0 }
 0x692   :  { %v11639_v42 = vpop.f32.mrf.mxu1 }
 0x693   :  { %v11641_v63 = vpop.f32.mrf.mxu3 }
 0x697   :  { %v11655_v12 = vpop.f32.mrf.mxu2 }
 0x699   :  { %v3256_v48 = vpop.f32.mrf.mxu0 }
 0x69a   :  { %v3257_v50 = vadd.f32 %v3256_v48, %v3242_v23  ;;  %v3312_v55 = vpop.f32.mrf.mxu1 }
 0x69b   :  { %v3523_v0 = vpop.f32.mrf.mxu3 }
 0x69f   :  { %v3270_v33 = vpop.f32.mrf.mxu2 }
 0x6a0   :  { %v3271_v39 = vadd.f32 %v3270_v33, %v3257_v50  ;;  %v8883_v33 = vld [vmem:[%s12751_s7 + $0x3d4] sm:$0xf] }
 0x6a1   :  { %v11675_v13 = vpop.f32.mrf.mxu0 }
 0x6a2   :  { %v11677_v17 = vpop.f32.mrf.mxu1 }
 0x6a3   :  { %v3602_v40 = vpop.f32.mrf.mxu3 }
 0x6a7   :  { %v11685_v9 = vpop.f32.mrf.mxu2 }
 0x6a9   :  { %v3509_v27 = vpop.f32.mrf.mxu0 }
 0x6aa   :  { %v3510_v34 = vadd.f32 %v3509_v27, %v3271_v39  ;;  %v3537_v44 = vpop.f32.mrf.mxu1  ;;  %v7830_v39 = vld [vmem:[%s12751_s7 + $0x3d8] sm:$0xf0]  ;;  %v7825_v27 = vor.u32 %v8881_v11, %v7822_v29  ;;  %v8884_v11 = vld [vmem:[%s12751_s7 + $0x3d4] sm:$0xf0] }
 0x6ab   :  { %v3604_v51 = vpop.f32.mrf.mxu3  ;;  %v7833_v59 = vor.u32 %v8883_v33, %v7830_v39  ;;  %v7836_v39 = vld [vmem:[%s12751_s7 + $0x3e0] sm:$0xf] }
 0x6ac   :  { %v3635_v15 = vpack.c.bf16 %v3604_v51, %v3602_v40  ;;  %v3524_v37 = vadd.f32 %v3523_v0, %v3510_v34  ;;  %v7884_v40 = vld [vmem:[%s12751_s7 + $0x440] sm:$0xf]  ;;  %v8896_v34 = vld [vmem:[%s12751_s7 + $0x434] sm:$0xf0]  ;;  %v8879_v51 = vld [vmem:[%s12751_s7 + $0x3b4] sm:$0xf] }
 0x6ad   :  { %v7885_v31 = vor.u32 %v8898_v46, %v7884_v40  ;;  %v7828_v46 = vld [vmem:[%s12751_s7 + $0x3d0] sm:$0xf] }
 0x6ae   :  { %3866 = vmatmul.bf16.vlgmr.msra.gmra.mxu3 %v3635_v15  ;;  %3908 = vmatmul.bf16.vlgmr.msrb.gmra.mxu2 %v3635_v15  ;;  %v11699_v26 = vadd.f32 %v3537_v44, %v3524_v37  ;;  %v7814_v15 = vld [vmem:[%s12751_s7 + $0x3b8] sm:$0xf0]  ;;  %v7877_v37 = vor.u32 %v8896_v34, %v7876_v54  ;;  %v8894_v44 = vld [vmem:[%s12751_s7 + $0x424] sm:$0xf0] }
 0x6af   :  { %3990 = vmatpush.bf16.msra.mxu3 %v10938_v57  ;;  %v3298_v23 = vpop.f32.mrf.mxu2  ;;  %v7817_v52 = vor.u32 %v8879_v51, %v7814_v15  ;;  %v7796_v51 = vld [vmem:[%s12751_s7 + $0x390] sm:$0xf]  ;;  %v8876_v15 = vld [vmem:[%s12751_s7 + $0x394] sm:$0xf0] }
 0x6b0   :  { %v3299_v56 = vadd.f32 %v3298_v23, %v11623_v20  ;;  %v7729_v20 = vld [vmem:[%s12752_s8 + $0x18] sm:$0xf]  ;;  %v7806_v23 = vld [vmem:[%s12751_s7 + $0x3a8] sm:$0xf0] }
 0x6b1   :  { %v11709_v21 = vpop.f32.mrf.mxu0  ;;  %v7730_v16 = vor.u32 %v8868_v28, %v7729_v20  ;;  %v7809_v10 = vor.u32 %v8877_v36, %v7806_v23  ;;  %v7798_v20 = vld [vmem:[%s12751_s7 + $0x398] sm:$0xf0]  ;;  %v7861_v28 = vor.u32 %v8892_v14, %v7860_v47  ;;  %v7780_v23 = vld [vmem:[%s12751_s7 + $0x370] sm:$0xf]  ;;  %v8904_v14 = vld [vmem:[%s12751_s7 + $0x474] sm:$0xf0] }
 0x6b2   :  { %v3313_v32 = vadd.f32 %v3312_v55, %v3299_v56  ;;  %v11719_v30 = vpop.f32.mrf.mxu1  ;;  %v7869_v56 = vor.u32 %v8894_v44, %v7868_v1  ;;  %v8874_v1 = vld [vmem:[%s12751_s7 + $0x384] sm:$0xf0]  ;;  %v7908_v47 = vld [vmem:[%s12751_s7 + $0x470] sm:$0xf] }
 0x6b3   :  { %3991 = vmatpush.bf16.msra.mxu3 %v10941_v53 }
 0x6b7   :  { %3992 = vmatpush.bf16.msra.mxu3 %v10950_v8  ;;  %v11721_v5 = vpop.f32.mrf.mxu2 }
 0x6b9   :  { %v3579_v2 = vpop.f32.mrf.mxu0 }
 0x6ba   :  { %v3565_v25 = vpop.f32.mrf.mxu1 }
 0x6be   :  { %7732 = vmatmul.msk.bf16.vlgmr.msra.gmra.mxu2 %vm2860_vm11, %v7730_v16 }
 0x6bf   :  { %v3551_v4 = vpop.f32.mrf.mxu2 }
 0x6c0   :  { %v3552_v62 = vadd.f32 %v3551_v4, %v3313_v32  ;;  %v8875_v32 = vld [vmem:[%s12751_s7 + $0x394] sm:$0xf]  ;;  %v7852_v4 = vld [vmem:[%s12751_s7 + $0x400] sm:$0xf] }
 0x6c1   :  { %v3616_v48 = vpop.f32.mrf.mxu0 }
 0x6c2   :  { %v3566_v60 = vadd.f32 %v3565_v25, %v3552_v62  ;;  %v8890_v62 = vld [vmem:[%s12751_s7 + $0x404] sm:$0xf0]  ;;  %v8873_v25 = vld [vmem:[%s12751_s7 + $0x384] sm:$0xf] }
 0x6c4   :  { %v11724_v50 = vadd.f32 %v3579_v2, %v3566_v60  ;;  %v7801_v2 = vor.u32 %v8875_v32, %v7798_v20  ;;  %v7853_v60 = vor.u32 %v8890_v62, %v7852_v4  ;;  %v7909_v32 = vor.u32 %v8904_v14, %v7908_v47  ;;  %v7772_v20 = vld [vmem:[%s12751_s7 + $0x360] sm:$0xf]  ;;  %v8903_v4 = vld [vmem:[%s12751_s7 + $0x474] sm:$0xf]  ;;  %v7910_v62 = vld [vmem:[%s12751_s7 + $0x478] sm:$0xf0] }
 0x6c5   :  { %v7846_v14 = vld [vmem:[%s12751_s7 + $0x3f8] sm:$0xf0] }
 0x6c6   :  { %4256 = vmatpush.bf16.msrb.mxu2 %v7909_v32 }
 0x6c7   :  { %v3630_v55 = vpop.f32.mrf.mxu2 }
 0x6c9   :  { %v3618_v0 = vpop.f32.mrf.mxu0 }
 0x6ca   :  { %v3636_v45 = vpack.c.bf16 %v3618_v0, %v3616_v48  ;;  %v7790_v48 = vld [vmem:[%s12751_s7 + $0x388] sm:$0xf0]  ;;  %v7844_v0 = vld [vmem:[%s12751_s7 + $0x3f0] sm:$0xf] }
 0x6cc   :  { %3880 = vmatmul.bf16.vlgmr.msrb.gmra.mxu1 %v3636_v45 }
 0x6cf   :  { %v3632_v41 = vpop.f32.mrf.mxu2 }
 0x6d0   :  { %v3637_v3 = vpack.c.bf16 %v3632_v41, %v3630_v55  ;;  %v7793_v55 = vor.u32 %v8873_v25, %v7790_v48  ;;  %v8886_v41 = vld [vmem:[%s12751_s7 + $0x3e4] sm:$0xf0]  ;;  %v7913_v25 = vor.u32 %v8903_v4, %v7910_v62  ;;  %v7900_v48 = vld [vmem:[%s12751_s7 + $0x460] sm:$0xf]  ;;  %v8885_v4 = vld [vmem:[%s12751_s7 + $0x3e4] sm:$0xf] }
 0x6d1   :  { %v7837_v40 = vor.u32 %v8886_v41, %v7836_v39  ;;  %v7838_v62 = vld [vmem:[%s12751_s7 + $0x3e8] sm:$0xf0] }
 0x6d2   :  { %7723 = vmatmul.msk.bf16.vlgmr.msrb.gmra.mxu0 %vm534_vm1, %v3637_v3  ;;  %7724 = vmatmul.msk.bf16.vlgmr.msrb.gmra.mxu3 %vm534_vm1, %v3637_v3 }
 0x6d3   :  { %4236 = vmatpush.bf16.msrb.mxu0 %v7893_v6  ;;  %4264 = vmatpush.bf16.msrb.mxu3 %v7833_v59  ;;  %v8869_v6 = vld [vmem:[%s12751_s7 + $0x364] sm:$0xf]  ;;  %v7774_v59 = vld [vmem:[%s12751_s7 + $0x368] sm:$0xf0] }
 0x6d4   :  { %v7777_v3 = vor.u32 %v8869_v6, %v7774_v59  ;;  %v8897_v6 = vld [vmem:[%s12751_s7 + $0x444] sm:$0xf]  ;;  %v7886_v59 = vld [vmem:[%s12751_s7 + $0x448] sm:$0xf0] }
 0x6d7   :  { %4237 = vmatpush.bf16.msrb.mxu0 %v7885_v31  ;;  %4265 = vmatpush.bf16.msrb.mxu3 %v7825_v27  ;;  %v7804_v31 = vld [vmem:[%s12751_s7 + $0x3a0] sm:$0xf]  ;;  %v8878_v27 = vld [vmem:[%s12751_s7 + $0x3a4] sm:$0xf0] }
 0x6d8   :  { %v7805_v54 = vor.u32 %v8878_v27, %v7804_v31  ;;  %v8891_v27 = vld [vmem:[%s12751_s7 + $0x414] sm:$0xf] }
 0x6db   :  { %4238 = vmatpush.bf16.msrb.mxu0 %v7877_v37  ;;  %4266 = vmatpush.bf16.msrb.mxu3 %v7817_v52  ;;  %v7797_v37 = vor.u32 %v8876_v15, %v7796_v51  ;;  %v7788_v52 = vld [vmem:[%s12751_s7 + $0x380] sm:$0xf] }
 0x6dc   :  { %7731 = vmatmul.msk.bf16.vlgmr.msra.gmra.mxu1 %vm2860_vm11, %v7730_v16  ;;  %v7789_v44 = vor.u32 %v8874_v1, %v7788_v52  ;;  %v7920_v52 = vld [vmem:[%s12752_s8 + $0x20] sm:$0xf]  ;;  %v8905_v1 = vld [vmem:[%s12752_s8 + $0x20] sm:$0x70] }
 0x6df   :  { %4239 = vmatpush.bf16.msrb.mxu0 %v7869_v56  ;;  %4267 = vmatpush.bf16.msrb.mxu3 %v7809_v10  ;;  %v8872_v56 = vld [vmem:[%s12751_s7 + $0x374] sm:$0xf0] }
 0x6e0   :  { %v7781_v10 = vor.u32 %v8872_v56, %v7780_v23  ;;  %v7854_v23 = vld [vmem:[%s12751_s7 + $0x408] sm:$0xf0]  ;;  %v8887_v56 = vld [vmem:[%s12751_s7 + $0x3f4] sm:$0xf] }
 0x6e2   :  { %3922 = vmatmul.bf16.vlgmr.msra.gmra.mxu0 %v3636_v45  ;;  %7733 = vmatmul.msk.bf16.vlgmr.msra.gmra.mxu3 %vm2860_vm11, %v7730_v16  ;;  %v7782_v16 = vld [vmem:[%s12751_s7 + $0x378] sm:$0xf0]  ;;  %v7845_v45 = vor.u32 %v8888_v61, %v7844_v0  ;;  %v8899_v61 = vld [vmem:[%s12751_s7 + $0x454] sm:$0xf] }
 0x6e3   :  { %4240 = vmatpush.bf16.msrb.mxu0 %v7861_v28  ;;  %4268 = vmatpush.bf16.msrb.mxu3 %v7801_v2  ;;  %v7785_v33 = vor.u32 %v8871_v22, %v7782_v16  ;;  %v8870_v28 = vld [vmem:[%s12751_s7 + $0x364] sm:$0xf0]  ;;  %v7894_v22 = vld [vmem:[%s12751_s7 + $0x458] sm:$0xf0] }
 0x6e4   :  { %v7773_v2 = vor.u32 %v8870_v28, %v7772_v20  ;;  %v7897_v16 = vor.u32 %v8899_v61, %v7894_v22  ;;  %v7921_v20 = vor.u32 %v8905_v1, %v7920_v52  ;;  %v7849_v28 = vor.u32 %v8887_v56, %v7846_v14  ;;  %v8915_v52 = vld [vmem:[%s12751_s7 + $0x4c4] sm:$0xf0]  ;;  %v8918_v1 = vld [vmem:[%s12751_s7 + $0x4e4] sm:$0xf]  ;;  %v8933_v14 = vld [vmem:[%s12751_s7 + $0x554] sm:$0xf0] }
 0x6e7   :  { %4241 = vmatpush.bf16.msrb.mxu0 %v7853_v60  ;;  %4269 = vmatpush.bf16.msrb.mxu3 %v7793_v55  ;;  %v8902_v60 = vld [vmem:[%s12751_s7 + $0x464] sm:$0xf0] }
 0x6e8   :  { %v7901_v0 = vor.u32 %v8902_v60, %v7900_v48  ;;  %v7841_v60 = vor.u32 %v8885_v4, %v7838_v62  ;;  %v8005_v4 = vld [vmem:[%s12751_s7 + $0x4d8] sm:$0xf0] }
 0x6ea   :  { %4257 = vmatpush.bf16.msrb.mxu2 %v7901_v0 }
 0x6eb   :  { %4242 = vmatpush.bf16.msrb.mxu0 %v7845_v45  ;;  %4270 = vmatpush.bf16.msrb.mxu3 %v7785_v33  ;;  %v8901_v45 = vld [vmem:[%s12751_s7 + $0x464] sm:$0xf]  ;;  %v7902_v33 = vld [vmem:[%s12751_s7 + $0x468] sm:$0xf0] }
 0x6ec   :  { %v7905_v41 = vor.u32 %v8901_v45, %v7902_v33 }
 0x6ee   :  { %4278 = vmatpush.bf16.msra.mxu2 %v7897_v16  ;;  %v8019_v16 = vld [vmem:[%s12751_s7 + $0x4f0] sm:$0xf] }
 0x6ef   :  { %4243 = vmatpush.bf16.msrb.mxu0 %v7837_v40  ;;  %4271 = vmatpush.bf16.msrb.mxu3 %v7777_v3  ;;  %v7889_v40 = vor.u32 %v8897_v6, %v7886_v59 }
 0x6f2   :  { %4279 = vmatpush.bf16.msra.mxu2 %v7889_v40 }
 0x6f3   :  { %4326 = vmatpush.bf16.msra.mxu0 %v10945_v7  ;;  %4340 = vmatpush.bf16.msra.mxu3 %v10948_v43  ;;  %v7820_v7 = vld [vmem:[%s12751_s7 + $0x3c0] sm:$0xf]  ;;  %v7829_v43 = vor.u32 %v8884_v11, %v7828_v46  ;;  %v8895_v46 = vld [vmem:[%s12751_s7 + $0x434] sm:$0xf]  ;;  %v7878_v11 = vld [vmem:[%s12751_s7 + $0x438] sm:$0xf0] }
 0x6f5   :  { %4222 = vmatpush.bf16.msrb.mxu1 %v7829_v43 }
 0x6f7   :  { %4327 = vmatpush.bf16.msra.mxu0 %v10962_v35  ;;  %4341 = vmatpush.bf16.msra.mxu3 %v10964_v38  ;;  %v8882_v35 = vld [vmem:[%s12751_s7 + $0x3c4] sm:$0xf0] }
 0x6f8   :  { %v7821_v38 = vor.u32 %v8882_v35, %v7820_v7  ;;  %v7881_v35 = vor.u32 %v8895_v46, %v7878_v11  ;;  %v8003_v11 = vld [vmem:[%s12751_s7 + $0x4d0] sm:$0xf] }
 0x6fa   :  { %4223 = vmatpush.bf16.msrb.mxu1 %v7821_v38  ;;  %4280 = vmatpush.bf16.msra.mxu2 %v7881_v35  ;;  %v8893_v38 = vld [vmem:[%s12751_s7 + $0x424] sm:$0xf]  ;;  %v8917_v35 = vld [vmem:[%s12751_s7 + $0x4d4] sm:$0xf0] }
 0x6fb   :  { %4328 = vmatpush.bf16.msra.mxu0 %v10976_v58  ;;  %4342 = vmatpush.bf16.msra.mxu3 %v10978_v19  ;;  %v7812_v58 = vld [vmem:[%s12751_s7 + $0x3b0] sm:$0xf]  ;;  %v8880_v19 = vld [vmem:[%s12751_s7 + $0x3b4] sm:$0xf0] }
 0x6fc   :  { %v7813_v29 = vor.u32 %v8880_v19, %v7812_v58  ;;  %v7870_v58 = vld [vmem:[%s12751_s7 + $0x428] sm:$0xf0] }
 0x6fe   :  { %4224 = vmatpush.bf16.msrb.mxu1 %v7813_v29  ;;  %v7873_v29 = vor.u32 %v8893_v38, %v7870_v58  ;;  %v8920_v38 = vld [vmem:[%s12751_s7 + $0x4f4] sm:$0xf]  ;;  %v8021_v58 = vld [vmem:[%s12751_s7 + $0x4f8] sm:$0xf0] }
 0x700   :  { %4281 = vmatpush.bf16.msra.mxu2 %v7873_v29  ;;  %v8024_v29 = vor.u32 %v8920_v38, %v8021_v58  ;;  %v8099_v58 = vld [vmem:[%s12751_s7 + $0x590] sm:$0xf] }
 0x702   :  { %4225 = vmatpush.bf16.msrb.mxu1 %v7805_v54  ;;  %v7862_v54 = vld [vmem:[%s12751_s7 + $0x418] sm:$0xf0] }
 0x703   :  { %v7865_v15 = vor.u32 %v8891_v27, %v7862_v54  ;;  %v8075_v27 = vld [vmem:[%s12751_s7 + $0x560] sm:$0xf]  ;;  %v8935_v54 = vld [vmem:[%s12751_s7 + $0x564] sm:$0xf0] }
 0x705   :  { %4282 = vmatpush.bf16.msra.mxu2 %v7865_v15 }
 0x706   :  { %4226 = vmatpush.bf16.msrb.mxu1 %v7797_v37 }
 0x70a   :  { %4227 = vmatpush.bf16.msrb.mxu1 %v7789_v44  ;;  %v8889_v44 = vld [vmem:[%s12751_s7 + $0x404] sm:$0xf] }
 0x70b   :  { %v7857_v47 = vor.u32 %v8889_v44, %v7854_v23  ;;  %v8013_v23 = vld [vmem:[%s12751_s7 + $0x4e8] sm:$0xf0] }
 0x70c   :  { %v8016_v56 = vor.u32 %v8918_v1, %v8013_v23  ;;  %v7981_v1 = vld [vmem:[%s12751_s7 + $0x4a8] sm:$0xf0]  ;;  %v8035_v23 = vld [vmem:[%s12751_s7 + $0x510] sm:$0xf] }
 0x70d   :  { %4283 = vmatpush.bf16.msra.mxu2 %v7857_v47  ;;  %v8067_v47 = vld [vmem:[%s12751_s7 + $0x550] sm:$0xf] }
 0x70e   :  { %4228 = vmatpush.bf16.msrb.mxu1 %v7781_v10 }
 0x711   :  { %4284 = vmatpush.bf16.msra.mxu2 %v7849_v28  ;;  %v8913_v28 = vld [vmem:[%s12751_s7 + $0x4b4] sm:$0xf0] }
 0x712   :  { %4229 = vmatpush.bf16.msrb.mxu1 %v7773_v2 }
 0x715   :  { %4285 = vmatpush.bf16.msra.mxu2 %v7841_v60  ;;  %v8059_v60 = vld [vmem:[%s12751_s7 + $0x540] sm:$0xf] }
 0x716   :  { %4298 = vmatpush.bf16.msra.mxu1 %v7913_v25 }
 0x71a   :  { %4299 = vmatpush.bf16.msra.mxu1 %v7905_v41 }
 0x731   :  { %v11856_v34 = vpop.f32.mrf.mxu2  ;;  %v11914_v39 = vpop.f32.mrf.mxu3 }
 0x739   :  { %v11870_v36 = vpop.f32.mrf.mxu2  ;;  %v3869_v19 = vpop.f32.mrf.mxu3 }
 0x741   :  { %v3980_v55 = vpop.f32.mrf.mxu2 }
 0x749   :  { %v3982_v3 = vpop.f32.mrf.mxu2  ;;  %v11928_v7 = vpop.f32.mrf.mxu1 }
 0x74a   :  { %v4000_v43 = vpack.c.bf16 %v3982_v3, %v3980_v55 }
 0x74c   :  { %4244 = vmatmul.bf16.vlgmr.msrb.gmra.mxu0 %v4000_v43 }
 0x74f   :  { %v11936_v31 = vpop.f32.mrf.mxu0 }
 0x751   :  { %v3883_v51 = vpop.f32.mrf.mxu1 }
 0x752   :  { %v3884_v37 = vadd.f32 %v3883_v51, %v3869_v19  ;;  %v8004_v19 = vor.u32 %v8917_v35, %v8003_v11  ;;  %v8076_v51 = vor.u32 %v8935_v54, %v8075_v27  ;;  %v8927_v35 = vld [vmem:[%s12751_s7 + $0x524] sm:$0xf0]  ;;  %v7963_v54 = vld [vmem:[%s12751_s7 + $0x480] sm:$0xf] }
 0x755   :  { %v11959_v10 = vpop.f32.mrf.mxu3 }
 0x757   :  { %v3897_v32 = vpop.f32.mrf.mxu0 }
 0x758   :  { %v3898_v2 = vadd.f32 %v3897_v32, %v3884_v37  ;;  %v7995_v37 = vld [vmem:[%s12751_s7 + $0x4c0] sm:$0xf]  ;;  %v7987_v32 = vld [vmem:[%s12751_s7 + $0x4b0] sm:$0xf] }
 0x759   :  { %v3966_v25 = vpop.f32.mrf.mxu1  ;;  %v7996_v44 = vor.u32 %v8915_v52, %v7995_v37  ;;  %v7988_v62 = vor.u32 %v8913_v28, %v7987_v32  ;;  %v8910_v37 = vld [vmem:[%s12751_s7 + $0x4a4] sm:$0xf]  ;;  %v8939_v32 = vld [vmem:[%s12751_s7 + $0x584] sm:$0xf0]  ;;  %v8908_v28 = vld [vmem:[%s12751_s7 + $0x494] sm:$0xf] }
 0x75a   :  { %v11971_v48 = vadd.f32 %v3898_v2, %v11699_v26  ;;  %v8921_v26 = vld [vmem:[%s12751_s7 + $0x4f4] sm:$0xf0]  ;;  %v8916_v2 = vld [vmem:[%s12751_s7 + $0x4d4] sm:$0xf] }
 0x75b   :  { %v8020_v33 = vor.u32 %v8921_v26, %v8019_v16  ;;  %v7979_v16 = vld [vmem:[%s12751_s7 + $0x4a0] sm:$0xf]  ;;  %v8911_v26 = vld [vmem:[%s12751_s7 + $0x4a4] sm:$0xf0] }
 0x75c   :  { %7922 = vmatmul.msk.bf16.vlgmr.msra.gmra.mxu0 %vm2860_vm11, %v7921_v20 }
 0x75d   :  { %v3939_v55 = vpop.f32.mrf.mxu3  ;;  %4586 = vmatpush.bf16.msrb.mxu0 %v8020_v33  ;;  %v7980_v33 = vor.u32 %v8911_v26, %v7979_v16 }
 0x75f   :  { %v11974_v0 = vpop.f32.mrf.mxu0 }
 0x761   :  { %v3968_v61 = vpop.f32.mrf.mxu1 }
 0x762   :  { %v3999_v22 = vpack.c.bf16 %v3968_v61, %v3966_v25  ;;  %v8008_v25 = vor.u32 %v8916_v2, %v8005_v4  ;;  %v7973_v2 = vld [vmem:[%s12751_s7 + $0x498] sm:$0xf0]  ;;  %v8936_v4 = vld [vmem:[%s12751_s7 + $0x574] sm:$0xf] }
 0x764   :  { %4230 = vmatmul.bf16.vlgmr.msrb.gmra.mxu1 %v3999_v22  ;;  %4272 = vmatmul.bf16.vlgmr.msrb.gmra.mxu3 %v3999_v22 }
 0x765   :  { %4354 = vmatpush.bf16.msrb.mxu1 %v10938_v57  ;;  %v3994_v45 = vpop.f32.mrf.mxu3  ;;  %v8011_v57 = vld [vmem:[%s12751_s7 + $0x4e0] sm:$0xf] }
 0x767   :  { %v3925_v41 = vpop.f32.mrf.mxu0 }
 0x768   :  { %v3926_v6 = vadd.f32 %v3925_v41, %v11870_v36  ;;  %v8937_v36 = vld [vmem:[%s12751_s7 + $0x574] sm:$0xf0]  ;;  %v7997_v41 = vld [vmem:[%s12751_s7 + $0x4c8] sm:$0xf0] }
 0x769   :  { %4355 = vmatpush.bf16.msrb.mxu1 %v10941_v53  ;;  %v8919_v53 = vld [vmem:[%s12751_s7 + $0x4e4] sm:$0xf0] }
 0x76a   :  { %v3940_v59 = vadd.f32 %v3939_v55, %v3926_v6  ;;  %v8931_v55 = vld [vmem:[%s12751_s7 + $0x544] sm:$0xf0] }
 0x76b   :  { %v8060_v61 = vor.u32 %v8931_v55, %v8059_v60  ;;  %v8027_v55 = vld [vmem:[%s12751_s7 + $0x500] sm:$0xf] }
 0x76c   :  { %v11986_v40 = vadd.f32 %v3940_v59, %v11724_v50  ;;  %v8083_v50 = vld [vmem:[%s12751_s7 + $0x570] sm:$0xf] }
 0x76d   :  { %4356 = vmatpush.bf16.msrb.mxu1 %v10950_v8  ;;  %v3996_v3 = vpop.f32.mrf.mxu3  ;;  %v8012_v8 = vor.u32 %v8919_v53, %v8011_v57  ;;  %v8051_v59 = vld [vmem:[%s12751_s7 + $0x530] sm:$0xf]  ;;  %v8909_v53 = vld [vmem:[%s12751_s7 + $0x494] sm:$0xf0] }
 0x76e   :  { %v4001_v46 = vpack.c.bf16 %v3996_v3, %v3994_v45  ;;  %v8914_v45 = vld [vmem:[%s12751_s7 + $0x4c4] sm:$0xf]  ;;  %v8929_v3 = vld [vmem:[%s12751_s7 + $0x534] sm:$0xf0]  ;;  %v7971_v57 = vld [vmem:[%s12751_s7 + $0x490] sm:$0xf] }
 0x76f   :  { %4587 = vmatpush.bf16.msrb.mxu0 %v8012_v8  ;;  %v8000_v6 = vor.u32 %v8914_v45, %v7997_v41  ;;  %v8912_v8 = vld [vmem:[%s12751_s7 + $0x4b4] sm:$0xf]  ;;  %v8906_v45 = vld [vmem:[%s12751_s7 + $0x484] sm:$0xf] }
 0x770   :  { %7914 = vmatmul.msk.bf16.vlgmr.msrb.gmra.mxu2 %vm534_vm1, %v4001_v46  ;;  %v8934_v41 = vld [vmem:[%s12751_s7 + $0x564] sm:$0xf] }
 0x773   :  { %4588 = vmatpush.bf16.msrb.mxu0 %v8004_v19  ;;  %v8941_v19 = vld [vmem:[%s12751_s7 + $0x594] sm:$0xf0] }
 0x774   :  { %7915 = vmatmul.msk.bf16.vlgmr.msra.gmra.mxu1 %vm534_vm1, %v4001_v46  ;;  %7923 = vmatmul.msk.bf16.vlgmr.msra.gmra.mxu3 %vm2860_vm11, %v7921_v20  ;;  %v8052_v46 = vor.u32 %v8929_v3, %v8051_v59  ;;  %v8100_v27 = vor.u32 %v8941_v19, %v8099_v58  ;;  %v8061_v58 = vld [vmem:[%s12751_s7 + $0x548] sm:$0xf0]  ;;  %v8938_v19 = vld [vmem:[%s12751_s7 + $0x584] sm:$0xf] }
 0x775   :  { %4628 = vmatpush.bf16.msra.mxu1 %v8024_v29 }
 0x776   :  { %4620 = vmatpush.bf16.msrb.mxu3 %v8100_v27 }
 0x777   :  { %4589 = vmatpush.bf16.msrb.mxu0 %v7996_v44  ;;  %v7984_v44 = vor.u32 %v8910_v37, %v7981_v1  ;;  %v8053_v1 = vld [vmem:[%s12751_s7 + $0x538] sm:$0xf0] }
 0x779   :  { %4629 = vmatpush.bf16.msra.mxu1 %v8016_v56  ;;  %v8925_v56 = vld [vmem:[%s12751_s7 + $0x514] sm:$0xf0] }
 0x77b   :  { %4590 = vmatpush.bf16.msrb.mxu0 %v7988_v62  ;;  %v7976_v62 = vor.u32 %v8908_v28, %v7973_v2 }
 0x77d   :  { %4630 = vmatpush.bf16.msra.mxu1 %v8008_v25  ;;  %v8085_v25 = vld [vmem:[%s12751_s7 + $0x578] sm:$0xf0] }
 0x77e   :  { %v8088_v60 = vor.u32 %v8936_v4, %v8085_v25  ;;  %v8922_v4 = vld [vmem:[%s12751_s7 + $0x504] sm:$0xf] }
 0x77f   :  { %4591 = vmatpush.bf16.msrb.mxu0 %v7980_v33  ;;  %v7965_v33 = vld [vmem:[%s12751_s7 + $0x488] sm:$0xf0] }
 0x780   :  { %4286 = vmatmul.bf16.vlgmr.msra.gmra.mxu2 %v4000_v43  ;;  %v8084_v43 = vor.u32 %v8937_v36, %v8083_v50  ;;  %v7972_v50 = vor.u32 %v8909_v53, %v7971_v57  ;;  %v7989_v36 = vld [vmem:[%s12751_s7 + $0x4b8] sm:$0xf0]  ;;  %v7968_v3 = vor.u32 %v8906_v45, %v7965_v33 }
 0x781   :  { %4631 = vmatpush.bf16.msra.mxu1 %v8000_v6  ;;  %v7992_v11 = vor.u32 %v8912_v8, %v7989_v36  ;;  %v8932_v8 = vld [vmem:[%s12751_s7 + $0x554] sm:$0xf] }
 0x782   :  { %4600 = vmatpush.bf16.msrb.mxu2 %v8084_v43  ;;  %v8043_v43 = vld [vmem:[%s12751_s7 + $0x520] sm:$0xf]  ;;  %v8940_v36 = vld [vmem:[%s12751_s7 + $0x594] sm:$0xf] }
 0x783   :  { %4592 = vmatpush.bf16.msrb.mxu0 %v7972_v50  ;;  %v8044_v38 = vor.u32 %v8927_v35, %v8043_v43  ;;  %v8069_v50 = vld [vmem:[%s12751_s7 + $0x558] sm:$0xf0] }
 0x784   :  { %7924 = vmatmul.msk.bf16.vlgmr.msrb.gmra.mxu1 %vm2860_vm11, %v7921_v20  ;;  %v8068_v20 = vor.u32 %v8933_v14, %v8067_v47  ;;  %v8036_v47 = vor.u32 %v8925_v56, %v8035_v23  ;;  %v8091_v14 = vld [vmem:[%s12751_s7 + $0x580] sm:$0xf]  ;;  %v8926_v56 = vld [vmem:[%s12751_s7 + $0x524] sm:$0xf]  ;;  %vm4990_vm11 = vcmask 1046528  }
 0x785   :  { %4632 = vmatpush.bf16.msra.mxu1 %v7992_v11  ;;  %v8072_v11 = vor.u32 %v8932_v8, %v8069_v50 }
 0x786   :  { %4601 = vmatpush.bf16.msrb.mxu2 %v8076_v51  ;;  %v8907_v51 = vld [vmem:[%s12751_s7 + $0x484] sm:$0xf0] }
 0x787   :  { %v7964_v52 = vor.u32 %v8907_v51, %v7963_v54  ;;  %v8093_v54 = vld [vmem:[%s12751_s7 + $0x588] sm:$0xf0] }
 0x788   :  { %v8096_v37 = vor.u32 %v8938_v19, %v8093_v54  ;;  %v4723_v19 = vld [vmem:[%s12755_s11 + $0x40] sm:$0xff]  ;;  %v4720_v54 = vld [vmem:[%s12755_s11 + $0x28] sm:$0xff] }
 0x789   :  { %4593 = vmatpush.bf16.msrb.mxu0 %v7964_v52  ;;  %4633 = vmatpush.bf16.msra.mxu1 %v7984_v44  ;;  %v8928_v52 = vld [vmem:[%s12751_s7 + $0x534] sm:$0xf] }
 0x78a   :  { %4602 = vmatpush.bf16.msrb.mxu2 %v8068_v20  ;;  %v8092_v20 = vor.u32 %v8939_v32, %v8091_v14  ;;  %v8056_v44 = vor.u32 %v8928_v52, %v8053_v1  ;;  %v8924_v32 = vld [vmem:[%s12751_s7 + $0x514] sm:$0xf]  ;;  %v3255_v52 = vadd.f32 %v11637_v18, %v11601_v49 }
 0x78b   :  { %v4717_v1 = vld [vmem:[%s12755_s11 + $0x10] sm:$0xff] }
 0x78c   :  { %4621 = vmatpush.bf16.msrb.mxu3 %v8092_v20  ;;  %v8037_v20 = vld [vmem:[%s12751_s7 + $0x518] sm:$0xf0]  ;;  %v4741_v49 = vld [vmem:[%s12755_s11 + $0xd0] sm:$0xff] }
 0x78d   :  { %4634 = vmatpush.bf16.msra.mxu1 %v7976_v62  ;;  %v8040_v2 = vor.u32 %v8924_v32, %v8037_v20  ;;  %v8029_v62 = vld [vmem:[%s12751_s7 + $0x508] sm:$0xf0]  ;;  %v4739_v32 = vld [vmem:[%s12755_s11 + $0xc0] sm:$0xff]  ;;  %v3882_v20 = vadd.f32 %v11928_v7, %v11914_v39 }
 0x78e   :  { %4603 = vmatpush.bf16.msrb.mxu2 %v8060_v61  ;;  %v8923_v61 = vld [vmem:[%s12751_s7 + $0x504] sm:$0xf0] }
 0x78f   :  { %v8028_v16 = vor.u32 %v8923_v61, %v8027_v55 }
 0x790   :  { %4642 = vmatpush.bf16.msra.mxu3 %v8088_v60  ;;  %v8032_v60 = vor.u32 %v8922_v4, %v8029_v62  ;;  %v4738_v4 = vld [vmem:[%s12755_s11 + $0xb8] sm:$0xff]  ;;  %v3896_v62 = vadd.f32 %v11936_v31, %v3882_v20  ;;  %v3297_v31 = vadd.f32 %v11685_v9, %v11609_v24 }
 0x791   :  { %4635 = vmatpush.bf16.msra.mxu1 %v7968_v3 }
 0x792   :  { %4604 = vmatpush.bf16.msrb.mxu2 %v8052_v46  ;;  %v8077_v46 = vld [vmem:[%s12751_s7 + $0x568] sm:$0xf0]  ;;  %v3311_v24 = vadd.f32 %v11639_v42, %v3297_v31 }
 0x793   :  { %v8080_v53 = vor.u32 %v8934_v41, %v8077_v46  ;;  %v4732_v42 = vld [vmem:[%s12755_s11 + $0x88] sm:$0xff] }
 0x795   :  { %4643 = vmatpush.bf16.msra.mxu3 %v8080_v53 }
 0x796   :  { %4605 = vmatpush.bf16.msrb.mxu2 %v8044_v38  ;;  %v8930_v38 = vld [vmem:[%s12751_s7 + $0x544] sm:$0xf] }
 0x797   :  { %v8064_v27 = vor.u32 %v8930_v38, %v8061_v58  ;;  %v4725_v38 = vld [vmem:[%s12755_s11 + $0x50] sm:$0xff]  ;;  %v4724_v58 = vld [vmem:[%s12755_s11 + $0x48] sm:$0xff] }
 0x799   :  { %4644 = vmatpush.bf16.msra.mxu3 %v8072_v11  ;;  %v4730_v11 = vld [vmem:[%s12755_s11 + $0x78] sm:$0xff] }
 0x79a   :  { %4606 = vmatpush.bf16.msrb.mxu2 %v8036_v47 }
 0x79d   :  { %4645 = vmatpush.bf16.msra.mxu3 %v8064_v27  ;;  %v4721_v27 = vld [vmem:[%s12755_s11 + $0x30] sm:$0xff] }
 0x79e   :  { %4607 = vmatpush.bf16.msrb.mxu2 %v8028_v16 }
 0x7a1   :  { %4646 = vmatpush.bf16.msra.mxu3 %v8056_v44  ;;  %v4742_v44 = vld [vmem:[%s12755_s11 + $0xd8] sm:$0xff] }
 0x7a2   :  { %4746 = vmatpush.msra.mxu2 %v4730_v11  ;;  %4770 = vmatpush.msrb.mxu1 %v4742_v44 }
 0x7a4   :  { %4771 = vmatpush.msrb.mxu1 %v4741_v49 }
 0x7c9   :  { %v12023_v15 = vpop.f32.mrf.mxu0 }
 0x7d1   :  { %v12061_v22 = vpop.f32.mrf.mxu0 }
 0x7d9   :  { %v4330_v29 = vpop.f32.mrf.mxu0 }
 0x7e1   :  { %v4332_v26 = vpop.f32.mrf.mxu0  ;;  %v4231_v6 = vpop.f32.mrf.mxu1 }
 0x7e2   :  { %v4363_v59 = vpack.c.bf16 %v4332_v26, %v4330_v29  ;;  %v12160_v57 = vadd.f32 %v12023_v15, %v4231_v6  ;;  %v8101_v15 = vld [vmem:[%s12751_s7 + $0x598] sm:$0xf0] }
 0x7e3   :  { %v8104_v43 = vor.u32 %v8940_v36, %v8101_v15  ;;  %v4729_v15 = vld [vmem:[%s12755_s11 + $0x70] sm:$0xff] }
 0x7e4   :  { %4594 = vmatmul.bf16.vlgmr.msrb.gmra.mxu0 %v4363_v59  ;;  %4636 = vmatmul.bf16.vlgmr.msra.gmra.mxu1 %v4363_v59 }
 0x7e5   :  { %4662 = vmatpush.bf16.msra.mxu0 %v8104_v43  ;;  %4747 = vmatpush.msra.mxu2 %v4729_v15  ;;  %v4728_v43 = vld [vmem:[%s12755_s11 + $0x68] sm:$0xff] }
 0x7e7   :  { %v4273_v35 = vpop.f32.mrf.mxu3  ;;  %4748 = vmatpush.msra.mxu2 %v4728_v43 }
 0x7e9   :  { %v4233_v29 = vpop.f32.mrf.mxu1  ;;  %4663 = vmatpush.bf16.msra.mxu0 %v8096_v37  ;;  %v4718_v37 = vld [vmem:[%s12755_s11 + $0x18] sm:$0xff] }
 0x7ea   :  { %v4248_v51 = vadd.f32 %v12061_v22, %v4233_v29  ;;  %v8045_v22 = vld [vmem:[%s12751_s7 + $0x528] sm:$0xf0]  ;;  %v4722_v29 = vld [vmem:[%s12755_s11 + $0x38] sm:$0xff] }
 0x7eb   :  { %v8048_v14 = vor.u32 %v8926_v56, %v8045_v22  ;;  %v4716_v22 = vld [vmem:[%s12755_s11 + $0x8] sm:$0xff] }
 0x7ed   :  { %4647 = vmatpush.bf16.msra.mxu3 %v8048_v14  ;;  %4789 = vmatpush.msrb.mxu0 %v4730_v11  ;;  %v4740_v14 = vld [vmem:[%s12755_s11 + $0xc8] sm:$0xff] }
 0x7ee   :  { %4772 = vmatpush.msrb.mxu1 %v4740_v14 }
 0x7ef   :  { %v4275_v23 = vpop.f32.mrf.mxu3  ;;  %4790 = vmatpush.msrb.mxu0 %v4729_v15 }
 0x7f0   :  { %4773 = vmatpush.msrb.mxu1 %v4739_v32 }
 0x7f1   :  { %v4301_v47 = vpop.f32.mrf.mxu1  ;;  %4648 = vmatpush.bf16.msra.mxu3 %v8040_v2  ;;  %4791 = vmatpush.msrb.mxu0 %v4728_v43 }
 0x7f2   :  { %4774 = vmatpush.msrb.mxu1 %v4738_v4 }
 0x7f3   :  { %v12205_v28 = vpop.f32.mrf.mxu2 }
 0x7f4   :  { %v4260_v39 = vadd.f32 %v12205_v28, %v12160_v57 }
 0x7f5   :  { %4649 = vmatpush.bf16.msra.mxu3 %v8032_v60 }
 0x7f7   :  { %v4344_v25 = vpop.f32.mrf.mxu3 }
 0x7f9   :  { %v4303_v55 = vpop.f32.mrf.mxu1 }
 0x7fb   :  { %v4261_v61 = vpop.f32.mrf.mxu2 }
 0x7fc   :  { %v4262_v16 = vadd.f32 %v4261_v61, %v4248_v51  ;;  %v4719_v51 = vld [vmem:[%s12755_s11 + $0x20] sm:$0xff] }
 0x7fe   :  { %v12214_v26 = vadd.f32 %v4262_v16, %v11971_v48 }
 0x7ff   :  { %v4346_v45 = vpop.f32.mrf.mxu3 }
 0x800   :  { %v4364_v33 = vpack.c.bf16 %v4346_v45, %v4344_v25  ;;  %v4737_v25 = vld [vmem:[%s12755_s11 + $0xb0] sm:$0xff] }
 0x801   :  { %v4358_v41 = vpop.f32.mrf.mxu1  ;;  %4775 = vmatpush.msrb.mxu1 %v4737_v25 }
 0x802   :  { %4608 = vmatmul.bf16.vlgmr.msrb.gmra.mxu2 %v4364_v33 }
 0x803   :  { %v4287_v6 = vpop.f32.mrf.mxu2 }
 0x804   :  { %v4288_v59 = vadd.f32 %v4287_v6, %v4273_v35  ;;  %v4726_v35 = vld [vmem:[%s12755_s11 + $0x58] sm:$0xff] }
 0x806   :  { %v12216_v3 = vadd.f32 %v4301_v47, %v4288_v59  ;;  %v4733_v59 = vld [vmem:[%s12755_s11 + $0x90] sm:$0xff] }
 0x809   :  { %v4360_v46 = vpop.f32.mrf.mxu1 }
 0x80a   :  { %v4365_v53 = vpack.c.bf16 %v4360_v46, %v4358_v41  ;;  %v4734_v41 = vld [vmem:[%s12755_s11 + $0x98] sm:$0xff]  ;;  %v3550_v46 = vadd.f32 %v11721_v5, %v3311_v24  ;;  %v9077_v24 = vmov 98.0  }
 0x80b   :  { %v4289_v8 = vpop.f32.mrf.mxu2  ;;  %9040 = vrcp.f32 %v9077_v24 }
 0x80c   :  { %v4290_v50 = vadd.f32 %v4289_v8, %v4275_v23  ;;  %8105 = vmatmul.msk.bf16.vlgmr.msrb.gmra.mxu3 %vm534_vm1, %v4365_v53  ;;  %8106 = vmatmul.msk.bf16.vlgmr.msra.gmra.mxu0 %vm534_vm1, %v4365_v53  ;;  %v3269_v23 = vadd.f32 %v11655_v12, %v3255_v52  ;;  %v4715_v12 = vld [vmem:[%s12755_s11] sm:$0xff]  ;;  %v3564_v43 = vadd.f32 %v11719_v30, %v3550_v46 }
 0x80d   :  { %4813 = vmatpush.msrb.mxu3 %v4742_v44  ;;  %v4731_v8 = vld [vmem:[%s12755_s11 + $0x80] sm:$0xff] }
 0x80e   :  { %v4304_v36 = vadd.f32 %v4303_v55, %v4290_v50  ;;  %v3508_v18 = vadd.f32 %v11675_v13, %v3269_v23  ;;  %v4736_v55 = vld [vmem:[%s12755_s11 + $0xa8] sm:$0xff]  ;;  %v3924_v50 = vadd.f32 %v11974_v0, %v11856_v34 }
 0x80f   :  { %4814 = vmatpush.msrb.mxu3 %v4741_v49  ;;  %4776 = vmatpush.msrb.mxu1 %v4736_v55 }
 0x810   :  { %v12221_v48 = vadd.f32 %v4304_v36, %v11986_v40  ;;  %v4727_v40 = vld [vmem:[%s12755_s11 + $0x60] sm:$0xff]  ;;  %v3522_v13 = vadd.f32 %v11641_v63, %v3508_v18 }
 0x811   :  { %4749 = vmatpush.msra.mxu2 %v4727_v40  ;;  %4792 = vmatpush.msrb.mxu0 %v4727_v40 }
 0x812   :  { %4815 = vmatpush.msrb.mxu3 %v4740_v14  ;;  %v3536_v63 = vadd.f32 %v11677_v17, %v3522_v13  ;;  %v4735_v17 = vld [vmem:[%s12755_s11 + $0xa0] sm:$0xff] }
 0x813   :  { %4750 = vmatpush.msra.mxu2 %v4726_v35  ;;  %4793 = vmatpush.msrb.mxu0 %v4726_v35 }
 0x814   :  { %4816 = vmatpush.msrb.mxu3 %v4739_v32  ;;  %v3942_v61 = vadd.f32 %v3896_v62, %v3536_v63  ;;  %4777 = vmatpush.msrb.mxu1 %v4735_v17 }
 0x815   :  { %4751 = vmatpush.msra.mxu2 %v4725_v38  ;;  %4794 = vmatpush.msrb.mxu0 %v4725_v38 }
 0x816   :  { %4817 = vmatpush.msrb.mxu3 %v4738_v4  ;;  %v4306_v28 = vadd.f32 %v4260_v39, %v3942_v61  ;;  %4778 = vmatpush.msrb.mxu1 %v4734_v41 }
 0x817   :  { %4752 = vmatpush.msra.mxu2 %v4724_v58  ;;  %4795 = vmatpush.msrb.mxu0 %v4724_v58  ;;  %v3938_v58 = vadd.f32 %v11959_v10, %v3924_v50  ;;  %v4863_v50 = vld [vmem:[%s12756_s12 + $0x38] sm:$0xff] }
 0x818   :  { %4818 = vmatpush.msrb.mxu3 %v4737_v25  ;;  %4779 = vmatpush.msrb.mxu1 %v4733_v59 }
 0x819   :  { %4753 = vmatpush.msra.mxu2 %v4723_v19  ;;  %4796 = vmatpush.msrb.mxu0 %v4723_v19 }
 0x81a   :  { %4819 = vmatpush.msrb.mxu3 %v4736_v55  ;;  %4780 = vmatpush.msrb.mxu1 %v4732_v42 }
 0x81b   :  { %4754 = vmatpush.msra.mxu2 %v4722_v29  ;;  %4797 = vmatpush.msrb.mxu0 %v4722_v29 }
 0x81c   :  { %4650 = vmatmul.bf16.vlgmr.msra.gmra.mxu3 %v4364_v33  ;;  %4781 = vmatpush.msrb.mxu1 %v4731_v8 }
 0x81d   :  { %4755 = vmatpush.msra.mxu2 %v4721_v27  ;;  %4798 = vmatpush.msrb.mxu0 %v4721_v27 }
 0x81e   :  { %4820 = vmatpush.msrb.mxu3 %v4735_v17 }
 0x81f   :  { %4756 = vmatpush.msra.mxu2 %v4720_v54  ;;  %4799 = vmatpush.msrb.mxu0 %v4720_v54  ;;  %v3578_v54 = vadd.f32 %v11709_v21, %v3564_v43 }
 0x820   :  { %4821 = vmatpush.msrb.mxu3 %v4734_v41 }
 0x821   :  { %4757 = vmatpush.msra.mxu2 %v4719_v51  ;;  %4800 = vmatpush.msrb.mxu0 %v4719_v51  ;;  %v3943_v52 = vadd.f32 %v3938_v58, %v3578_v54 }
 0x822   :  { %4822 = vmatpush.msrb.mxu3 %v4733_v59 }
 0x823   :  { %4758 = vmatpush.msra.mxu2 %v4718_v37  ;;  %4801 = vmatpush.msrb.mxu0 %v4718_v37  ;;  %v4307_v23 = vadd.f32 %v12216_v3, %v3943_v52 }
 0x824   :  { %4823 = vmatpush.msrb.mxu3 %v4732_v42 }
 0x825   :  { %4759 = vmatpush.msra.mxu2 %v4717_v1  ;;  %4802 = vmatpush.msrb.mxu0 %v4717_v1 }
 0x826   :  { %4824 = vmatpush.msrb.mxu3 %v4731_v8  ;;  %v4862_v8 = vld [vmem:[%s12756_s12 + $0x30] sm:$0xff] }
 0x827   :  { %4760 = vmatpush.msra.mxu2 %v4716_v22  ;;  %4803 = vmatpush.msrb.mxu0 %v4716_v22 }
 0x828   :  { %4879 = vmatpush.msra.mxu1 %v4862_v8 }
 0x829   :  { %4761 = vmatpush.msra.mxu2 %v4715_v12  ;;  %4804 = vmatpush.msrb.mxu0 %v4715_v12 }
 0x82b   :  { %4899 = vmatpush.msrb.mxu2 %v4863_v50 }
 0x861   :  { %v4595_v47 = vpop.f32.mrf.mxu0 }
 0x869   :  { %v4597_v16 = vpop.f32.mrf.mxu0 }
 0x885   :  { %v4609_v56 = vpop.f32.mrf.mxu2 }
 0x886   :  { %v4610_v7 = vadd.f32 %v4609_v56, %v4595_v47 }
 0x889   :  { %v4665_v34 = vpop.f32.mrf.mxu0 }
 0x88d   :  { %v4611_v60 = vpop.f32.mrf.mxu2 }
 0x88e   :  { %v4612_v57 = vadd.f32 %v4611_v60, %v4597_v16 }
 0x88f   :  { %v4623_v2 = vpop.f32.mrf.mxu3 }
 0x890   :  { %v4624_v45 = vadd.f32 %v4623_v2, %v4610_v7 }
 0x891   :  { %v4667_v12 = vpop.f32.mrf.mxu0 }
 0x892   :  { %v12312_v6 = vadd.f32 %v4624_v45, %v4306_v28 }
 0x894   :  { %v4694_v11 = vmul.f32 %v12312_v6, %v12312_v6 }
 0x897   :  { %v4625_v33 = vpop.f32.mrf.mxu3 }
 0x898   :  { %v4626_v9 = vadd.f32 %v4625_v33, %v4612_v57 }
 0x89a   :  { %v12319_v53 = vadd.f32 %v4626_v9, %v12214_v26  ;;  %v4637_v26 = vpop.f32.mrf.mxu1  ;;  %v9041_v9 = vpop.eup %9040 }
 0x89b   :  { %v4830_v59 = vmul.f32 98.0, %v9041_v9  ;;  %vm4834_vm15 = vweird.f32 %v9041_v9 }
 0x89c   :  { %v4675_v36 = vsel %vm4674_vm12, %v12319_v53, 0.0  ;;  %v4696_v5 = vmul.f32 %v12319_v53, %v12319_v53 }
 0x89d   :  { %v4676_v15 = vadd.f32 %v4675_v36, %v12312_v6  ;;  %v4831_v46 = vsub.f32 1.0, %v4830_v59  ;;  %v8971_v59 = vld [vmem:[%s12757_s13 + $0xd8] sm:$0xff] }
 0x89e   :  { %v4698_v40 = vsel %vm4674_vm12, %v4696_v5, 0.0  ;;  %vm5869_vm12 = vcmask 519168  }
 0x89f   :  { %v4677_v0 = vrot.slane %v4676_v15, 4  ;;  %v4699_v35 = vadd.f32 %v4698_v40, %v4694_v11  ;;  %v4651_v38 = vpop.f32.mrf.mxu3  ;;  %v4832_v42 = vmul.f32 %v9041_v9, %v4831_v46  ;;  %v4861_v11 = vld [vmem:[%s12756_s12 + $0x28] sm:$0xff]  ;;  %v4858_v40 = vld [vmem:[%s12756_s12 + $0x10] sm:$0xff] }
 0x8a0   :  { %v4652_v19 = vadd.f32 %v4651_v38, %v4637_v26  ;;  %v4860_v26 = vld [vmem:[%s12756_s12 + $0x20] sm:$0xff]  ;;  %4900 = vmatpush.msrb.mxu2 %v4861_v11  ;;  %v4857_v38 = vld [vmem:[%s12756_s12 + $0x8] sm:$0xff] }
 0x8a1   :  { %v4678_v29 = vadd.f32 %v4677_v0, %v4676_v15  ;;  %v4700_v27 = vrot.slane %v4699_v35, 4  ;;  %v4833_v5 = vadd.f32 %v9041_v9, %v4832_v42  ;;  %4880 = vmatpush.msra.mxu1 %v4860_v26  ;;  %v8957_v46 = vld [vmem:[%s12757_s13 + $0x68] sm:$0xff] }
 0x8a2   :  { %v4666_v1 = vadd.f32 %v4665_v34, %v4652_v19  ;;  %v4639_v56 = vpop.f32.mrf.mxu1  ;;  %v4859_v34 = vld [vmem:[%s12756_s12 + $0x18] sm:$0xff] }
 0x8a3   :  { %v4679_v51 = vrot.slane %v4678_v29, 2  ;;  %v4701_v37 = vadd.f32 %v4700_v27, %v4699_v35  ;;  %v4835_v0 = vsel %vm4834_vm15, %v9041_v9, %v4833_v5  ;;  %4881 = vmatpush.msra.mxu1 %v4858_v40  ;;  %4901 = vmatpush.msrb.mxu2 %v4859_v34  ;;  %v4856_v35 = vld [vmem:[%s12756_s12] sm:$0xff]  ;;  %v8965_v5 = vld [vmem:[%s12757_s13 + $0xa8] sm:$0xff] }
 0x8a4   :  { %v12341_v47 = vadd.f32 %v4666_v1, %v4307_v23 }
 0x8a5   :  { %v4680_v30 = vadd.f32 %v4679_v51, %v4678_v29  ;;  %v4702_v44 = vrot.slane %v4701_v37, 2  ;;  %4882 = vmatpush.msra.mxu1 %v4856_v35  ;;  %4902 = vmatpush.msrb.mxu2 %v4857_v38 }
 0x8a6   :  { %v4695_v20 = vmul.f32 %v12341_v47, %v12341_v47  ;;  %v4684_v2 = vsel %vm4683_vm13, %v12341_v47, 0.0 }
 0x8a7   :  { %v4653_v22 = vpop.f32.mrf.mxu3  ;;  %v4681_v49 = vrot.slane %v4680_v30, 1  ;;  %v4703_v18 = vadd.f32 %v4702_v44, %v4701_v37 }
 0x8a8   :  { %v4654_v10 = vadd.f32 %v4653_v22, %v4639_v56  ;;  %v4706_v63 = vsel %vm4683_vm13, %v4695_v20, 0.0 }
 0x8a9   :  { %v4682_v14 = vadd.f32 %v4681_v49, %v4680_v30  ;;  %v4704_v32 = vrot.slane %v4703_v18, 1  ;;  %v4851_v49 = vld [vmem:[%s12753_s9] sm:$0x1] }
 0x8aa   :  { %v4668_v13 = vadd.f32 %v4667_v12, %v4654_v10 }
 0x8ab   :  { %4762 = vmatmul.f32.vlgmr.msra.gmra.mxu2 %v4682_v14  ;;  %v4705_v21 = vadd.f32 %v4704_v32, %v4703_v18  ;;  %v4853_v14 = vld [vmem:[%s12754_s10] sm:$0x1] }
 0x8ac   :  { %v12346_v3 = vadd.f32 %v4668_v13, %v12221_v48  ;;  %4942 = vmatpush.msra.mxu2 %v4863_v50  ;;  %v4977_v50 = vld [vmem:[%s12758_s14] sm:$0x3] }
 0x8ad   :  { %4805 = vmatmul.f32.vlgmr.msrb.gmra.mxu0 %v4705_v21 }
 0x8ae   :  { %v4686_v4 = vsel %vm4685_vm14, %v12346_v3, 0.0  ;;  %v4697_v62 = vmul.f32 %v12346_v3, %v12346_v3  ;;  %4943 = vmatpush.msra.mxu2 %v4861_v11  ;;  %v8956_v11 = vld [vmem:[%s12757_s13 + $0x60] sm:$0xff] }
 0x8af   :  { %v4687_v25 = vadd.f32 %v4686_v4, %v4684_v2 }
 0x8b0   :  { %v4707_v39 = vsel %vm4685_vm14, %v4697_v62, 0.0  ;;  %4944 = vmatpush.msra.mxu2 %v4859_v34  ;;  %v8951_v34 = vld [vmem:[%s12757_s13 + $0x38] sm:$0xff] }
 0x8b1   :  { %v4688_v7 = vrot.slane %v4687_v25, 4  ;;  %v4708_v60 = vadd.f32 %v4707_v39, %v4706_v63 }
 0x8b2   :  { %4945 = vmatpush.msra.mxu2 %v4857_v38  ;;  %v8954_v38 = vld [vmem:[%s12757_s13 + $0x50] sm:$0xff] }
 0x8b3   :  { %v4689_v55 = vadd.f32 %v4688_v7, %v4687_v25  ;;  %v4709_v31 = vrot.slane %v4708_v60, 4 }
 0x8b5   :  { %v4690_v61 = vrot.slane %v4689_v55, 2  ;;  %v4710_v48 = vadd.f32 %v4709_v31, %v4708_v60 }
 0x8b7   :  { %v4691_v16 = vadd.f32 %v4690_v61, %v4689_v55  ;;  %v4711_v45 = vrot.slane %v4710_v48, 2 }
 0x8b9   :  { %v4692_v17 = vrot.slane %v4691_v16, 1  ;;  %v4712_v57 = vadd.f32 %v4711_v45, %v4710_v48 }
 0x8bb   :  { %v4693_v28 = vadd.f32 %v4692_v17, %v4691_v16  ;;  %v4713_v33 = vrot.slane %v4712_v57, 1 }
 0x8bd   :  { %8107 = vmatmul.msk.f32.vlgmr.msrb.gmra.mxu1 %vm4683_vm13, %v4693_v28  ;;  %v4714_v41 = vadd.f32 %v4713_v33, %v4712_v57 }
 0x8be   :  { %4922 = vmatpush.msrb.mxu1 %v4862_v8 }
 0x8bf   :  { %8108 = vmatmul.msk.f32.vlgmr.msrb.gmra.mxu3 %vm4683_vm13, %v4714_v41 }
 0x8c0   :  { %4923 = vmatpush.msrb.mxu1 %v4860_v26  ;;  %v8970_v26 = vld [vmem:[%s12757_s13 + $0xd0] sm:$0xff] }
 0x8c2   :  { %4924 = vmatpush.msrb.mxu1 %v4858_v40  ;;  %v8955_v40 = vld [vmem:[%s12757_s13 + $0x58] sm:$0xff] }
 0x8c4   :  { %4925 = vmatpush.msrb.mxu1 %v4856_v35  ;;  %v8968_v35 = vld [vmem:[%s12757_s13 + $0xc0] sm:$0xff] }
 0x92a   :  { %v4806_v19 = vpop.f32.mrf.mxu0 }
 0x92e   :  { %v4763_v15 = vpop.f32.mrf.mxu2 }
 0x93a   :  { %v4783_v36 = vpop.f32.mrf.mxu1 }
 0x93b   :  { %v4784_v43 = vadd.f32 %v4783_v36, %v4763_v15  ;;  %v8123_v36 = vld [vmem:[%s12758_s14 + $0x2] sm:$0x3] }
 0x93c   :  { %v8964_v15 = vld [vmem:[%s12757_s13 + $0xa0] sm:$0xff] }
 0x93d   :  { %v4836_v58 = vmul.f32 %v4835_v0, %v4784_v43  ;;  %v8969_v43 = vld [vmem:[%s12757_s13 + $0xc8] sm:$0xff] }
 0x93f   :  { %v4838_v54 = vmul.f32 %v4836_v58, %v4836_v58 }
 0x942   :  { %v4826_v29 = vpop.f32.mrf.mxu3 }
 0x943   :  { %v4827_v27 = vadd.f32 %v4826_v29, %v4806_v19  ;;  %v8962_v19 = vld [vmem:[%s12757_s13 + $0x90] sm:$0xff]  ;;  %v8967_v29 = vld [vmem:[%s12757_s13 + $0xb8] sm:$0xff] }
 0x945   :  { %v4837_v51 = vmul.f32 %v4835_v0, %v4827_v27  ;;  %v8963_v0 = vld [vmem:[%s12757_s13 + $0x98] sm:$0xff]  ;;  %v8953_v27 = vld [vmem:[%s12757_s13 + $0x48] sm:$0xff] }
 0x947   :  { %v4839_v37 = vsub.f32 %v4837_v51, %v4838_v54  ;;  %v8949_v54 = vld [vmem:[%s12757_s13 + $0x28] sm:$0xff] }
 0x948   :  { %v8961_v51 = vld [vmem:[%s12757_s13 + $0x88] sm:$0xff] }
 0x949   :  { %v4840_v52 = vadd.f32 1e-05, %v4839_v37  ;;  %v8966_v37 = vld [vmem:[%s12757_s13 + $0xb0] sm:$0xff] }
 0x94b   :  { %9042 = vrsqrt.f32 %v4840_v52  ;;  %vm4847_vm3 = vweird.f32 %v4840_v52 }
 0x951   :  { %v9043_v1 = vpop.eup %9042 }
 0x952   :  { %v4842_v30 = vmul.f32 %v9043_v1, %v4840_v52  ;;  %vm4848_vm0 = vweird.f32 %v9043_v1  ;;  %v8952_v52 = vld [vmem:[%s12757_s13 + $0x40] sm:$0xff] }
 0x953   :  { %vm4849_vm4 = vmor %vm4847_vm3, %vm4848_vm0 }
 0x954   :  { %v4843_v44 = vmul.f32 %v9043_v1, %v4842_v30  ;;  %v8960_v30 = vld [vmem:[%s12757_s13 + $0x80] sm:$0xff] }
 0x956   :  { %v4844_v23 = vmul.f32 0.5, %v4843_v44  ;;  %v8947_v44 = vld [vmem:[%s12757_s13 + $0x18] sm:$0xff] }
 0x958   :  { %v4845_v56 = vsub.f32 1.5, %v4844_v23  ;;  %v8959_v23 = vld [vmem:[%s12757_s13 + $0x78] sm:$0xff] }
 0x95a   :  { %v4846_v22 = vmul.f32 %v9043_v1, %v4845_v56  ;;  %v8958_v56 = vld [vmem:[%s12757_s13 + $0x70] sm:$0xff] }
 0x95c   :  { %v4850_v18 = vsel %vm4849_vm4, %v9043_v1, %v4846_v22  ;;  %v8948_v1 = vld [vmem:[%s12757_s13 + $0x20] sm:$0xff]  ;;  %v8979_v22 = vld [vmem:[%s12757_s13 + $0x118] sm:$0xff]  ;;  %vm6032_vm4 = vcmask 31744  }
 0x95d   :  { %v4852_v10 = vmul.f32 %v4851_v49, %v4850_v18  ;;  %v8978_v49 = vld [vmem:[%s12757_s13 + $0x110] sm:$0xff]  ;;  %v8977_v18 = vld [vmem:[%s12757_s13 + $0x108] sm:$0xff] }
 0x95f   :  { %8109 = vmatmul.msk.f32.vlgmr.msra.gmra.mxu1 %vm534_vm1, %v4852_v10  ;;  %8110 = vmatmul.msk.f32.vlgmr.msrb.gmra.mxu2 %vm534_vm1, %v4852_v10  ;;  %v4854_v12 = vmul.f32 %v4852_v10, %v4836_v58  ;;  %v8950_v58 = vld [vmem:[%s12757_s13 + $0x30] sm:$0xff]  ;;  %v8976_v10 = vld [vmem:[%s12757_s13 + $0x100] sm:$0xff] }
 0x961   :  { %v4855_v32 = vsub.f32 %v4853_v14, %v4854_v12  ;;  %v8975_v12 = vld [vmem:[%s12757_s13 + $0xf8] sm:$0xff]  ;;  %v8974_v14 = vld [vmem:[%s12757_s13 + $0xf0] sm:$0xff] }
 0x967   :  { %8111 = vmatmul.msk.f32.vlgmr.msrb.gmra.mxu1 %vm534_vm1, %v4855_v32  ;;  %8112 = vmatmul.msk.f32.vlgmr.msra.gmra.mxu2 %vm534_vm1, %v4855_v32  ;;  %v8973_v32 = vld [vmem:[%s12757_s13 + $0xe8] sm:$0xff] }
 0x9dc   :  { %v4884_v13 = vpop.f32.mrf.mxu1 }
 0x9dd   :  { %v4950_v2 = vperm.slane %v4884_v13, 0  ;;  %v8946_v13 = vld [vmem:[%s12757_s13 + $0x10] sm:$0xff] }
 0x9df   :  { %v4952_v25 = vmul.f32 %v4950_v2, %v12312_v6  ;;  %v4954_v63 = vmul.f32 %v4950_v2, %v12319_v53  ;;  %v8944_v2 = vld [vmem:[%s12757_s13] sm:$0xff] }
 0x9e2   :  { %v4904_v21 = vpop.f32.mrf.mxu2 }
 0x9e3   :  { %v4951_v4 = vperm.slane %v4904_v21, 0  ;;  %v8972_v21 = vld [vmem:[%s12757_s13 + $0xe0] sm:$0xff] }
 0x9e4   :  { %v4927_v20 = vpop.f32.mrf.mxu1 }
 0x9e5   :  { %v4956_v62 = vperm.slane %v4927_v20, 0  ;;  %v4953_v39 = vmul.f32 %v4951_v4, %v12341_v47  ;;  %v4955_v60 = vmul.f32 %v4951_v4, %v12346_v3  ;;  %v8945_v20 = vld [vmem:[%s12757_s13 + $0x8] sm:$0xff] }
 0x9e7   :  { %v4958_v55 = vadd.f32 %v4956_v62, %v4952_v25  ;;  %v4960_v31 = vadd.f32 %v4956_v62, %v4954_v63 }
 0x9e9   :  { %v4962_v45 = vmax.f32 %v4958_v55, 0.0  ;;  %v4964_v17 = vmax.f32 %v4960_v31, 0.0 }
 0x9ea   :  { %v4947_v7 = vpop.f32.mrf.mxu2 }
 0x9eb   :  { %v4957_v61 = vperm.slane %v4947_v7, 0 }
 0x9ed   :  { %v4959_v48 = vadd.f32 %v4957_v61, %v4953_v39  ;;  %v4961_v16 = vadd.f32 %v4957_v61, %v4955_v60 }
 0x9ef   :  { %v4963_v57 = vmax.f32 %v4959_v48, 0.0  ;;  %v4965_v28 = vmax.f32 %v4961_v16, 0.0  ;;  %v8985_v48 = vld [vmem:[%s12757_s13 + $0x148] sm:$0xff]  ;;  %v8984_v16 = vld [vmem:[%s12757_s13 + $0x140] sm:$0xff] }
 0x9f1   :  { %v4966_v6 = vpack.c.bf16 %v4963_v57, %v4962_v45  ;;  %v4967_v53 = vpack.c.bf16 %v4965_v28, %v4964_v17  ;;  %v8268_v57 = vld [vmem:[%s12758_s14 + $0x4] sm:$0x3]  ;;  %v8983_v28 = vld [vmem:[%s12757_s13 + $0x138] sm:$0xff] }
 0x9f3   :  { %4970 = vst.msk [vmem:[#allocation3] sm:$0xff] %vm4969_vm8, %v4966_v6  ;;  %v8356_v6 = vld [vmem:[%s12758_s14 + $0x6] sm:$0x3] }
 0x9f4   :  { %4974 = vst.msk [vmem:[#allocation3 + $0x8] sm:$0x77] %vm4973_vm9, %v4967_v53  ;;  %v8982_v53 = vld [vmem:[%s12757_s13 + $0x130] sm:$0xff] }
 0x9fa   :  { %v8115_v47 = vld [vmem:[#allocation3] sm:$0xf]  ;;  %v8942_v3 = vld [vmem:[#allocation3 + $0x4] sm:$0xf] }
 0x9fb   :  { %v8943_v33 = vld [vmem:[#allocation3 + $0x4] sm:$0x70]  ;;  %v8117_v41 = vld [vmem:[#allocation3 + $0x8] sm:$0x70] }
 0x9fc   :  { %v8116_v24 = vor.u32 %v8943_v33, %v8115_v47  ;;  %v8120_v9 = vor.u32 %v8942_v3, %v8117_v41  ;;  %v8993_v47 = vld [vmem:[%s12757_s13 + $0x188] sm:$0xff]  ;;  %v8992_v33 = vld [vmem:[%s12757_s13 + $0x180] sm:$0xff] }
 0x9fd   :  { %v8981_v3 = vld [vmem:[%s12757_s13 + $0x128] sm:$0xff]  ;;  %v8980_v41 = vld [vmem:[%s12757_s13 + $0x120] sm:$0xff] }
 0x9fe   :  { %v12401_v42 = vsel %vm4990_vm11, %v8116_v24, 0  ;;  %v12403_v8 = vsel %vm4990_vm11, %v8120_v9, 0  ;;  %v8991_v24 = vld [vmem:[%s12757_s13 + $0x178] sm:$0xff] }
 0x9ff   :  { %5004 = vmatpush.bf16.msra.mxu3 %v12401_v42  ;;  %5017 = vmatpush.bf16.msra.mxu0 %v12403_v8  ;;  %v8999_v9 = vld [vmem:[%s12757_s13 + $0x1b8] sm:$0xff] }
 0xa00   :  { %5065 = vmatpush.bf16.msra.mxu1 %v12401_v42  ;;  %5078 = vmatpush.bf16.msrb.mxu2 %v12403_v8 }
 0xa02   :  { %8122 = vmatmul.msk.bf16.vlgmr.msra.gmra.mxu0 %vm4986_vm2, %v4977_v50  ;;  %8121 = vmatmul.msk.bf16.vlgmr.msra.gmra.mxu3 %vm4986_vm2, %v4977_v50  ;;  %v8988_v50 = vld [vmem:[%s12757_s13 + $0x160] sm:$0xff] }
 0xa03   :  { %5217 = vmatpush.bf16.msrb.mxu0 %v8971_v59  ;;  %8124 = vmatmul.msk.bf16.vlgmr.msra.gmra.mxu1 %vm4986_vm2, %v8123_v36  ;;  %v8990_v59 = vld [vmem:[%s12757_s13 + $0x170] sm:$0xff] }
 0xa04   :  { %5330 = vmatpush.bf16.msra.mxu2 %v8957_v46  ;;  %5202 = vmatpush.bf16.msrb.mxu3 %v8965_v5  ;;  %v8998_v46 = vld [vmem:[%s12757_s13 + $0x1b0] sm:$0xff]  ;;  %v8444_v5 = vld [vmem:[%s12758_s14 + $0x8] sm:$0x3] }
 0xa05   :  { %8125 = vmatmul.msk.bf16.vlgmr.msrb.gmra.mxu2 %vm4986_vm2, %v8123_v36  ;;  %5315 = vmatpush.bf16.msrb.mxu1 %v8951_v34  ;;  %v8996_v36 = vld [vmem:[%s12757_s13 + $0x1a0] sm:$0xff]  ;;  %v8994_v34 = vld [vmem:[%s12757_s13 + $0x190] sm:$0xff] }
 0xa07   :  { %5218 = vmatpush.bf16.msrb.mxu0 %v8970_v26  ;;  %v8987_v26 = vld [vmem:[%s12757_s13 + $0x158] sm:$0xff] }
 0xa08   :  { %5331 = vmatpush.bf16.msra.mxu2 %v8956_v11  ;;  %5203 = vmatpush.bf16.msrb.mxu3 %v8964_v15  ;;  %v8995_v11 = vld [vmem:[%s12757_s13 + $0x198] sm:$0xff] }
 0xa09   :  { %5316 = vmatpush.bf16.msrb.mxu1 %v8950_v58 }
 0xa0b   :  { %5219 = vmatpush.bf16.msrb.mxu0 %v8969_v43 }
 0xa0c   :  { %5332 = vmatpush.bf16.msra.mxu2 %v8955_v40  ;;  %5204 = vmatpush.bf16.msrb.mxu3 %v8963_v0  ;;  %v8986_v40 = vld [vmem:[%s12757_s13 + $0x150] sm:$0xff] }
 0xa0d   :  { %5317 = vmatpush.bf16.msrb.mxu1 %v8949_v54 }
 0xa0f   :  { %5220 = vmatpush.bf16.msrb.mxu0 %v8968_v35 }
 0xa10   :  { %5333 = vmatpush.bf16.msra.mxu2 %v8954_v38  ;;  %5205 = vmatpush.bf16.msrb.mxu3 %v8962_v19  ;;  %v9007_v19 = vld [vmem:[%s12757_s13 + $0x1f8] sm:$0xff] }
 0xa11   :  { %5318 = vmatpush.bf16.msrb.mxu1 %v8948_v1  ;;  %v9005_v1 = vld [vmem:[%s12757_s13 + $0x1e8] sm:$0xff] }
 0xa13   :  { %5221 = vmatpush.bf16.msrb.mxu0 %v8967_v29 }
 0xa14   :  { %5334 = vmatpush.bf16.msra.mxu2 %v8953_v27  ;;  %5206 = vmatpush.bf16.msrb.mxu3 %v8961_v51  ;;  %v9006_v27 = vld [vmem:[%s12757_s13 + $0x1f0] sm:$0xff] }
 0xa15   :  { %5319 = vmatpush.bf16.msrb.mxu1 %v8947_v44 }
 0xa17   :  { %5222 = vmatpush.bf16.msrb.mxu0 %v8966_v37 }
 0xa18   :  { %5335 = vmatpush.bf16.msra.mxu2 %v8952_v52  ;;  %5207 = vmatpush.bf16.msrb.mxu3 %v8960_v30  ;;  %v9004_v30 = vld [vmem:[%s12757_s13 + $0x1e0] sm:$0xff] }
 0xa19   :  { %5320 = vmatpush.bf16.msrb.mxu1 %v8946_v13 }
 0xa1b   :  { %5353 = vmatpush.bf16.msra.mxu0 %v12401_v42 }
 0xa1c   :  { %5366 = vmatpush.bf16.msrb.mxu2 %v12403_v8  ;;  %5208 = vmatpush.bf16.msrb.mxu3 %v8959_v23 }
 0xa1d   :  { %5321 = vmatpush.bf16.msrb.mxu1 %v8945_v20  ;;  %v9003_v20 = vld [vmem:[%s12757_s13 + $0x1d8] sm:$0xff] }
 0xa20   :  { %5209 = vmatpush.bf16.msrb.mxu3 %v8958_v56 }
 0xa21   :  { %5322 = vmatpush.bf16.msrb.mxu1 %v8944_v2  ;;  %v9013_v2 = vld [vmem:[%s12757_s13 + $0x228] sm:$0xff] }
 0xa24   :  { %5490 = vmatpush.bf16.msra.mxu3 %v8979_v22 }
 0xa25   :  { %5505 = vmatpush.bf16.msra.mxu1 %v8985_v48 }
 0xa28   :  { %5491 = vmatpush.bf16.msra.mxu3 %v8978_v49 }
 0xa29   :  { %5506 = vmatpush.bf16.msra.mxu1 %v8984_v16 }
 0xa2c   :  { %5492 = vmatpush.bf16.msra.mxu3 %v8977_v18 }
 0xa2d   :  { %5507 = vmatpush.bf16.msra.mxu1 %v8983_v28 }
 0xa30   :  { %5493 = vmatpush.bf16.msra.mxu3 %v8976_v10 }
 0xa31   :  { %5508 = vmatpush.bf16.msra.mxu1 %v8982_v53 }
 0xa34   :  { %5494 = vmatpush.bf16.msra.mxu3 %v8975_v12 }
 0xa35   :  { %5509 = vmatpush.bf16.msra.mxu1 %v8981_v3 }
 0xa38   :  { %5495 = vmatpush.bf16.msra.mxu3 %v8974_v14 }
 0xa39   :  { %5510 = vmatpush.bf16.msra.mxu1 %v8980_v41 }
 0xa3c   :  { %5496 = vmatpush.bf16.msra.mxu3 %v8973_v32 }
 0xa40   :  { %5497 = vmatpush.bf16.msra.mxu3 %v8972_v21 }
 0xa7f   :  { %v5019_v4 = vpop.f32.mrf.mxu0 }
 0xa80   :  { %v5024_v62 = vpack.c.bf16 %v5019_v4, %v5019_v4  ;;  %v5067_v25 = vpop.f32.mrf.mxu1  ;;  %v9002_v4 = vld [vmem:[%s12757_s13 + $0x1d0] sm:$0xff] }
 0xa81   :  { %v5084_v63 = vpack.c.bf16 %v5067_v25, %v5067_v25  ;;  %v9001_v25 = vld [vmem:[%s12757_s13 + $0x1c8] sm:$0xff] }
 0xa82   :  { %8267 = vmatmul.msk.bf16.vlgmr.msra.gmra.mxu2 %vm4683_vm13, %v5024_v62  ;;  %v9012_v62 = vld [vmem:[%s12757_s13 + $0x220] sm:$0xff] }
 0xa83   :  { %5210 = vmatmul.bf16.vlgmr.msrb.gmra.mxu3 %v5084_v63  ;;  %5542 = vmatpush.bf16.msra.mxu2 %v12403_v8  ;;  %v9011_v63 = vld [vmem:[%s12757_s13 + $0x218] sm:$0xff] }
 0xa84   :  { %5718 = vmatpush.bf16.msrb.mxu3 %v12403_v8  ;;  %v8997_v8 = vld [vmem:[%s12757_s13 + $0x1a8] sm:$0xff] }
 0xa85   :  { %v5006_v39 = vpop.f32.mrf.mxu3 }
 0xa86   :  { %v5023_v60 = vpack.c.bf16 %v5006_v39, %v5006_v39  ;;  %v9000_v39 = vld [vmem:[%s12757_s13 + $0x1c0] sm:$0xff] }
 0xa87   :  { %v5021_v31 = vpop.f32.mrf.mxu0 }
 0xa88   :  { %v5080_v7 = vpop.f32.mrf.mxu2  ;;  %5323 = vmatmul.bf16.vlgmr.msrb.gmra.mxu1 %v5023_v60  ;;  %v5069_v61 = vpop.f32.mrf.mxu1  ;;  %v9009_v31 = vld [vmem:[%s12757_s13 + $0x208] sm:$0xff] }
 0xa89   :  { %v5085_v55 = vpack.c.bf16 %v5080_v7, %v5080_v7  ;;  %5681 = vmatpush.bf16.msrb.mxu1 %v8999_v9  ;;  %v9010_v7 = vld [vmem:[%s12757_s13 + $0x210] sm:$0xff]  ;;  %v9008_v61 = vld [vmem:[%s12757_s13 + $0x200] sm:$0xff] }
 0xa8b   :  { %8210 = vmatmul.msk.bf16.vlgmr.msrb.gmra.mxu0 %vm4683_vm13, %v5085_v55 }
 0xa8c   :  { %5529 = vmatpush.bf16.msrb.mxu0 %v12401_v42 }
 0xa8d   :  { %v5008_v45 = vpop.f32.mrf.mxu3  ;;  %5682 = vmatpush.bf16.msrb.mxu1 %v8998_v46 }
 0xa90   :  { %v5082_v17 = vpop.f32.mrf.mxu2 }
 0xa91   :  { %5683 = vmatpush.bf16.msrb.mxu1 %v8997_v8 }
 0xa92   :  { %8270 = vmatmul.msk.bf16.vlgmr.msrb.gmra.mxu2 %vm4986_vm2, %v8268_v57 }
 0xa93   :  { %5705 = vmatpush.bf16.msrb.mxu2 %v12401_v42  ;;  %v8989_v42 = vld [vmem:[%s12757_s13 + $0x168] sm:$0xff] }
 0xa95   :  { %5684 = vmatpush.bf16.msrb.mxu1 %v8996_v36  ;;  %v5891_v36 = vld [vmem:[%s12761_s17 + $0x30] sm:$0xff] }
 0xa99   :  { %5685 = vmatpush.bf16.msrb.mxu1 %v8995_v11  ;;  %v5888_v11 = vld [vmem:[%s12761_s17 + $0x18] sm:$0xff] }
 0xa9b   :  { %8269 = vmatmul.msk.bf16.vlgmr.msra.gmra.mxu0 %vm4986_vm2, %v8268_v57 }
 0xa9c   :  { %5666 = vmatpush.bf16.msra.mxu0 %v8993_v47 }
 0xa9d   :  { %5686 = vmatpush.bf16.msrb.mxu1 %v8994_v34 }
 0xaa0   :  { %5667 = vmatpush.bf16.msra.mxu0 %v8992_v33 }
 0xaa2   :  { %8358 = vmatmul.msk.bf16.vlgmr.msra.gmra.mxu2 %vm4986_vm2, %v8356_v6 }
 0xaa3   :  { %5842 = vmatpush.bf16.msra.mxu2 %v9007_v19 }
 0xaa4   :  { %5668 = vmatpush.bf16.msra.mxu0 %v8991_v24 }
 0xaa7   :  { %5843 = vmatpush.bf16.msra.mxu2 %v9006_v27 }
 0xaa8   :  { %5669 = vmatpush.bf16.msra.mxu0 %v8990_v59 }
 0xaab   :  { %8357 = vmatmul.msk.bf16.vlgmr.msrb.gmra.mxu0 %vm4986_vm2, %v8356_v6  ;;  %5844 = vmatpush.bf16.msra.mxu2 %v9005_v1 }
 0xaac   :  { %5670 = vmatpush.bf16.msra.mxu0 %v8989_v42 }
 0xaaf   :  { %5845 = vmatpush.bf16.msra.mxu2 %v9004_v30 }
 0xab0   :  { %5671 = vmatpush.bf16.msra.mxu0 %v8988_v50  ;;  %v5892_v50 = vld [vmem:[%s12761_s17 + $0x38] sm:$0xff] }
 0xab2   :  { %8445 = vmatmul.msk.bf16.vlgmr.msrb.gmra.mxu2 %vm4986_vm2, %v8444_v5 }
 0xab3   :  { %5846 = vmatpush.bf16.msra.mxu2 %v9003_v20 }
 0xab4   :  { %5672 = vmatpush.bf16.msra.mxu0 %v8987_v26  ;;  %v5889_v26 = vld [vmem:[%s12761_s17 + $0x20] sm:$0xff] }
 0xab7   :  { %5847 = vmatpush.bf16.msra.mxu2 %v9002_v4  ;;  %v5967_v4 = vld [vmem:[%s12762_s18] sm:$0xff] }
 0xab8   :  { %5673 = vmatpush.bf16.msra.mxu0 %v8986_v40  ;;  %v5885_v40 = vld [vmem:[%s12761_s17] sm:$0xff] }
 0xabb   :  { %5848 = vmatpush.bf16.msra.mxu2 %v9001_v25 }
 0xabc   :  { %5928 = vmatpush.msrb.mxu0 %v5892_v50 }
 0xabe   :  { %5929 = vmatpush.msrb.mxu0 %v5891_v36 }
 0xabf   :  { %5849 = vmatpush.bf16.msra.mxu2 %v9000_v39 }
 0xb05   :  { %v5337_v15 = vpop.f32.mrf.mxu2  ;;  %v5324_v43 = vpop.f32.mrf.mxu1 }
 0xb06   :  { %v5211_v0 = vpop.f32.mrf.mxu3 }
 0xb08   :  { %v5224_v35 = vpop.f32.mrf.mxu0 }
 0xb09   :  { %v5225_v38 = vadd.f32 %v5224_v35, %v5211_v0 }
 0xb0b   :  { %v5325_v58 = vadd.f32 %v5324_v43, %v5225_v38  ;;  %v5886_v43 = vld [vmem:[%s12761_s17 + $0x8] sm:$0xff] }
 0xb0d   :  { %v5338_v29 = vadd.f32 %v5337_v15, %v5325_v58  ;;  %v5339_v54 = vpop.f32.mrf.mxu2  ;;  %v5326_v51 = vpop.f32.mrf.mxu1  ;;  %v5887_v15 = vld [vmem:[%s12761_s17 + $0x10] sm:$0xff] }
 0xb0e   :  { %v5213_v52 = vpop.f32.mrf.mxu3 }
 0xb10   :  { %v5226_v37 = vpop.f32.mrf.mxu0 }
 0xb15   :  { %v5368_v44 = vpop.f32.mrf.mxu2 }
 0xb16   :  { %v5373_v56 = vpack.c.bf16 %v5368_v44, %v5368_v44 }
 0xb18   :  { %v5355_v23 = vpop.f32.mrf.mxu0  ;;  %8355 = vmatmul.msk.bf16.vlgmr.msra.gmra.mxu1 %vm4683_vm13, %v5373_v56 }
 0xb19   :  { %v5372_v22 = vpack.c.bf16 %v5355_v23, %v5355_v23  ;;  %5905 = vmatpush.msra.mxu1 %v5892_v50 }
 0xb1b   :  { %5498 = vmatmul.bf16.vlgmr.msra.gmra.mxu3 %v5372_v22  ;;  %5906 = vmatpush.msra.mxu1 %v5891_v36 }
 0xb1c   :  { %5857 = vmatpush.bf16.msra.mxu3 %v9013_v2  ;;  %v5968_v2 = vld [vmem:[%s12762_s18 + $0x8] sm:$0xff] }
 0xb1d   :  { %v5370_v49 = vpop.f32.mrf.mxu2 }
 0xb20   :  { %v5357_v18 = vpop.f32.mrf.mxu0  ;;  %5858 = vmatpush.bf16.msra.mxu3 %v9012_v62 }
 0xb21   :  { %v9078_v18 = vmov 8.0  }
 0xb22   :  { %9044 = vrcp.f32 %v9078_v18 }
 0xb24   :  { %5859 = vmatpush.bf16.msra.mxu3 %v9011_v63 }
 0xb25   :  { %v5544_v10 = vpop.f32.mrf.mxu2 }
 0xb26   :  { %v5549_v14 = vpack.c.bf16 %v5544_v10, %v5544_v10 }
 0xb28   :  { %v5531_v12 = vpop.f32.mrf.mxu0  ;;  %8443 = vmatmul.msk.bf16.vlgmr.msrb.gmra.mxu1 %vm4683_vm13, %v5549_v14  ;;  %5860 = vmatpush.bf16.msra.mxu3 %v9010_v7  ;;  %v9045_v10 = vpop.eup %9044 }
 0xb29   :  { %v5548_v32 = vpack.c.bf16 %v5531_v12, %v5531_v12  ;;  %v5941_v12 = vmul.f32 8.0, %v9045_v10  ;;  %vm5945_vm14 = vweird.f32 %v9045_v10 }
 0xb2b   :  { %5674 = vmatmul.bf16.vlgmr.msra.gmra.mxu0 %v5548_v32  ;;  %8446 = vmatmul.msk.bf16.vlgmr.msrb.gmra.mxu3 %vm4986_vm2, %v8444_v5  ;;  %v5890_v5 = vld [vmem:[%s12761_s17 + $0x28] sm:$0xff]  ;;  %v5942_v14 = vsub.f32 1.0, %v5941_v12  ;;  %v9081_v12 = vmov 16.0  }
 0xb2c   :  { %5861 = vmatpush.bf16.msra.mxu3 %v9009_v31  ;;  %5907 = vmatpush.msra.mxu1 %v5890_v5 }
 0xb2d   :  { %v5546_v13 = vpop.f32.mrf.mxu2  ;;  %5930 = vmatpush.msrb.mxu0 %v5890_v5  ;;  %v5943_v32 = vmul.f32 %v9045_v10, %v5942_v14 }
 0xb2e   :  { %5908 = vmatpush.msra.mxu1 %v5889_v26  ;;  %v5970_v13 = vld [vmem:[%s12762_s18 + $0x18] sm:$0xff] }
 0xb2f   :  { %5931 = vmatpush.msrb.mxu0 %v5889_v26  ;;  %v5944_v20 = vadd.f32 %v9045_v10, %v5943_v32 }
 0xb30   :  { %v5533_v21 = vpop.f32.mrf.mxu0  ;;  %5862 = vmatpush.bf16.msra.mxu3 %v9008_v61  ;;  %5909 = vmatpush.msra.mxu1 %v5888_v11 }
 0xb31   :  { %5932 = vmatpush.msrb.mxu0 %v5888_v11  ;;  %v5969_v21 = vld [vmem:[%s12762_s18 + $0x10] sm:$0xff]  ;;  %v5946_v62 = vsel %vm5945_vm14, %v9045_v10, %v5944_v20  ;;  %s9082_s18 = smov [#allocation5]  }
 0xb32   :  { %5910 = vmatpush.msra.mxu1 %v5887_v15  ;;  %s6212_s13 = sshll.u32 %s9082_s18, 4  ;;  %s6213_s13 = int_to_ptr.vmem [resolvable:$true] %s6212_s13 }
 0xb33   :  { %5933 = vmatpush.msrb.mxu0 %v5887_v15 }
 0xb34   :  { %5911 = vmatpush.msra.mxu1 %v5886_v43 }
 0xb35   :  { %v5707_v60 = vpop.f32.mrf.mxu2  ;;  %5934 = vmatpush.msrb.mxu0 %v5886_v43 }
 0xb36   :  { %v5724_v55 = vpack.c.bf16 %v5707_v60, %v5707_v60  ;;  %5912 = vmatpush.msra.mxu1 %v5885_v40 }
 0xb37   :  { %5935 = vmatpush.msrb.mxu0 %v5885_v40 }
 0xb38   :  { %5850 = vmatmul.bf16.vlgmr.msra.gmra.mxu2 %v5724_v55  ;;  %5986 = vmatpush.msrb.mxu1 %v5970_v13 }
 0xb39   :  { %6009 = vmatpush.msra.mxu0 %v5970_v13 }
 0xb3a   :  { %5987 = vmatpush.msrb.mxu1 %v5969_v21 }
 0xb3b   :  { %6010 = vmatpush.msra.mxu0 %v5969_v21 }
 0xb3c   :  { %5988 = vmatpush.msrb.mxu1 %v5968_v2 }
 0xb3d   :  { %v5709_v48 = vpop.f32.mrf.mxu2  ;;  %6011 = vmatpush.msra.mxu0 %v5968_v2 }
 0xb3e   :  { %5989 = vmatpush.msrb.mxu1 %v5967_v4 }
 0xb3f   :  { %6012 = vmatpush.msra.mxu0 %v5967_v4 }
 0xb95   :  { %v5512_v16 = vpop.f32.mrf.mxu1 }
 0xb9d   :  { %v5514_v57 = vpop.f32.mrf.mxu1 }
 0xb9e   :  { %v5499_v45 = vpop.f32.mrf.mxu3 }
 0xb9f   :  { %v5513_v17 = vadd.f32 %v5512_v16, %v5499_v45 }
 0xba1   :  { %v5516_v28 = vadd.f32 %v5513_v17, %v5338_v29 }
 0xba5   :  { %v5688_v53 = vpop.f32.mrf.mxu1 }
 0xba6   :  { %v5501_v6 = vpop.f32.mrf.mxu3 }
 0xba8   :  { %v5675_v47 = vpop.f32.mrf.mxu0 }
 0xba9   :  { %v5689_v3 = vadd.f32 %v5688_v53, %v5675_v47  ;;  %v5964_v47 = vld [vmem:[%s12760_s16] sm:$0x1] }
 0xbab   :  { %v5692_v33 = vadd.f32 %v5689_v3, %v5516_v28  ;;  %v5962_v28 = vld [vmem:[%s12759_s15] sm:$0x1] }
 0xbad   :  { %v5690_v9 = vpop.f32.mrf.mxu1 }
 0xbae   :  { %v5720_v41 = vpop.f32.mrf.mxu3  ;;  %v9016_v9 = vld [vmem:[%s12763_s19 + $0x10] sm:$0xff] }
 0xbaf   :  { %v5725_v24 = vpack.c.bf16 %v5720_v41, %v5720_v41  ;;  %v9017_v41 = vld [vmem:[%s12763_s19 + $0x18] sm:$0xff] }
 0xbb0   :  { %v5677_v59 = vpop.f32.mrf.mxu0  ;;  %6092 = vmatpush.bf16.msrb.mxu3 %v9017_v41 }
 0xbb1   :  { %8531 = vmatmul.msk.bf16.vlgmr.msra.gmra.mxu3 %vm4683_vm13, %v5725_v24  ;;  %vm5893_vm13 = vcmask 523264   ;;  %v9021_v24 = vld [vmem:[%s12763_s19 + $0x38] sm:$0xff]  ;;  %v9020_v59 = vld [vmem:[%s12763_s19 + $0x30] sm:$0xff] }
 0xbb2   :  { %6161 = vmatpush.bf16.msrb.mxu2 %v9021_v24 }
 0xbb4   :  { %6093 = vmatpush.bf16.msrb.mxu3 %v9016_v9 }
 0xbb6   :  { %v5722_v46 = vpop.f32.mrf.mxu3  ;;  %6162 = vmatpush.bf16.msrb.mxu2 %v9020_v59 }
 0xbb7   :  { %v9015_v46 = vld [vmem:[%s12763_s19 + $0x8] sm:$0xff] }
 0xbb8   :  { %6094 = vmatpush.bf16.msrb.mxu3 %v9015_v46 }
 0xbbb   :  { %v5851_v42 = vpop.f32.mrf.mxu2 }
 0xbc3   :  { %v5853_v8 = vpop.f32.mrf.mxu2 }
 0xc34   :  { %v5864_v34 = vpop.f32.mrf.mxu3 }
 0xc35   :  { %v5865_v0 = vadd.f32 %v5864_v34, %v5851_v42  ;;  %v9019_v42 = vld [vmem:[%s12763_s19 + $0x28] sm:$0xff] }
 0xc36   :  { %6163 = vmatpush.bf16.msrb.mxu2 %v9019_v42 }
 0xc37   :  { %v12673_v35 = vadd.f32 %v5865_v0, %v5692_v33  ;;  %v6031_v0 = vld [vmem:[%s12765_s21] sm:$0x1] }
 0xc39   :  { %v5870_v38 = vsel %vm5869_vm12, %v12673_v35, 0.0  ;;  %v5877_v58 = vmul.f32 %v12673_v35, %v12673_v35 }
 0xc3a   :  { %v5871_v19 = vrot.slane %v5870_v38, 4 }
 0xc3b   :  { %v5878_v29 = vsel %vm5869_vm12, %v5877_v58, 0.0  ;;  %v9018_v58 = vld [vmem:[%s12763_s19 + $0x20] sm:$0xff] }
 0xc3c   :  { %v5872_v27 = vadd.f32 %v5871_v19, %v5870_v38  ;;  %v5879_v54 = vrot.slane %v5878_v29, 4  ;;  %v5866_v51 = vpop.f32.mrf.mxu3  ;;  %v9014_v38 = vld [vmem:[%s12763_s19] sm:$0xff]  ;;  %6164 = vmatpush.bf16.msrb.mxu2 %v9018_v58  ;;  %s9080_s19 = smov 127  }
 0xc3d   :  { %6095 = vmatpush.bf16.msrb.mxu3 %v9014_v38 }
 0xc3e   :  { %v5873_v37 = vrot.slane %v5872_v27, 2  ;;  %v5880_v52 = vadd.f32 %v5879_v54, %v5878_v29 }
 0xc40   :  { %v5874_v1 = vadd.f32 %v5873_v37, %v5872_v27  ;;  %v5881_v30 = vrot.slane %v5880_v52, 2 }
 0xc42   :  { %v5875_v44 = vrot.slane %v5874_v1, 1  ;;  %v5882_v23 = vadd.f32 %v5881_v30, %v5880_v52  ;;  %v9079_v52 = vmov 0  }
 0xc43   :  { %9033 = vset.pattern.permute.xlu1 %v9079_v52  ;;  %9034 = vset.pattern.permute.xlu0 %v9079_v52 }
 0xc44   :  { %v5876_v56 = vadd.f32 %v5875_v44, %v5874_v1  ;;  %v5883_v22 = vrot.slane %v5882_v23, 1  ;;  %v9035_v1 = vld [vmem:[%s12764_s20] ss:$0 sm:$0xff] }
 0xc46   :  { %v5884_v49 = vadd.f32 %v5883_v22, %v5882_v23  ;;  %8532 = vmatmul.msk.f32.vlgmr.msra.gmra.mxu1 %vm5893_vm13, %v5876_v56 }
 0xc48   :  { %8533 = vmatmul.msk.f32.vlgmr.msrb.gmra.mxu0 %vm5893_vm13, %v5884_v49 }
 0xcc3   :  { %v5914_v25 = vpop.f32.mrf.mxu1 }
 0xcc4   :  { %v5947_v63 = vmul.f32 %v5946_v62, %v5914_v25 }
 0xcc5   :  { %v5937_v39 = vpop.f32.mrf.mxu0 }
 0xcc6   :  { %v5949_v7 = vmul.f32 %v5947_v63, %v5947_v63  ;;  %v5948_v60 = vmul.f32 %v5946_v62, %v5937_v39 }
 0xcc8   :  { %v5950_v55 = vsub.f32 %v5948_v60, %v5949_v7 }
 0xcca   :  { %v5951_v31 = vadd.f32 1e-05, %v5950_v55 }
 0xccc   :  { %9046 = vrsqrt.f32 %v5951_v31  ;;  %vm5958_vm0 = vweird.f32 %v5951_v31 }
 0xccd   :  { %9048 = vrcp.f32 %v9081_v12 }
 0xcd2   :  { %v9047_v61 = vpop.eup %9046 }
 0xcd3   :  { %v5953_v48 = vmul.f32 %v9047_v61, %v5951_v31  ;;  %vm5959_vm15 = vweird.f32 %v9047_v61  ;;  %v9049_v14 = vpop.eup %9048 }
 0xcd4   :  { %vm5960_vm3 = vmor %vm5958_vm0, %vm5959_vm15  ;;  %v6187_v32 = vmul.f32 16.0, %v9049_v14  ;;  %vm6191_vm5 = vweird.f32 %v9049_v14 }
 0xcd5   :  { %v5954_v16 = vmul.f32 %v9047_v61, %v5953_v48 }
 0xcd6   :  { %v6188_v13 = vsub.f32 1.0, %v6187_v32 }
 0xcd7   :  { %v5955_v45 = vmul.f32 0.5, %v5954_v16 }
 0xcd8   :  { %v6189_v4 = vmul.f32 %v9049_v14, %v6188_v13 }
 0xcd9   :  { %v5956_v17 = vsub.f32 1.5, %v5955_v45 }
 0xcdb   :  { %v5957_v57 = vmul.f32 %v9047_v61, %v5956_v17 }
 0xcdd   :  { %v5961_v6 = vsel %vm5960_vm3, %v9047_v61, %v5957_v57 }
 0xcde   :  { %v5963_v53 = vmul.f32 %v5962_v28, %v5961_v6 }
 0xce0   :  { %v5965_v3 = vmul.f32 %v5963_v53, %v5947_v63  ;;  %8534 = vmatmul.msk.f32.vlgmr.msrb.gmra.mxu1 %vm534_vm1, %v5963_v53  ;;  %v6190_v63 = vadd.f32 %v9049_v14, %v6189_v4 }
 0xce2   :  { %v5966_v33 = vsub.f32 %v5964_v47, %v5965_v3  ;;  %v6192_v60 = vsel %vm6191_vm5, %v9049_v14, %v6190_v63 }
 0xce4   :  { %8535 = vmatmul.msk.f32.vlgmr.msra.gmra.mxu0 %vm534_vm1, %v5966_v33  ;;  %vm6023_vm1 = vcmask 517120  }
 0xd5d   :  { %v5991_v8 = vpop.f32.mrf.mxu1 }
 0xd5e   :  { %v6017_v50 = vperm.slane %v5991_v8, 0 }
 0xd60   :  { %v6018_v5 = vmul.f32 %v6017_v50, %v12673_v35  ;;  %v8554_v35 = vld [vmem:[%s12765_s21 + $0x1] sm:$0x1] }
 0xd61   :  { %v6014_v36 = vpop.f32.mrf.mxu0 }
 0xd62   :  { %v6019_v26 = vperm.slane %v6014_v36, 0 }
 0xd64   :  { %v6020_v11 = vadd.f32 %v6019_v26, %v6018_v5 }
 0xd66   :  { %v6021_v15 = vmax.f32 %v6020_v11, 0.0 }
 0xd68   :  { %v6022_v43 = vpack.c.bf16 %v6021_v15, %v6021_v15 }
 0xd6a   :  { %6024 = vst.msk [vmem:[#allocation4] sm:$0x3] %vm6023_vm1, %v6022_v43 }
 0xd71   :  { %v6025_v40 = vld [vmem:[#allocation4] sm:$0x3] }
 0xd72   :  { %v6037_v34 = vsel %vm2864_vm10, %v6025_v40, 0  ;;  %vm6175_vm10 = vcmask 58368  }
 0xd73   :  { %6046 = vmatpush.bf16.msra.mxu1 %v6037_v34  ;;  %6114 = vmatpush.bf16.msrb.mxu0 %v6037_v34 }
 0xd76   :  { %8536 = vmatmul.msk.bf16.vlgmr.msra.gmra.mxu1 %vm6032_vm4, %v6031_v0  ;;  %8555 = vmatmul.msk.bf16.vlgmr.msrb.gmra.mxu0 %vm6032_vm4, %v8554_v35 }
 0xdf3   :  { %v6048_v19 = vpop.f32.mrf.mxu1  ;;  %v6116_v29 = vpop.f32.mrf.mxu0 }
 0xdf4   :  { %v6052_v27 = vpack.c.bf16 %v6048_v19, %v6048_v19  ;;  %v6120_v54 = vpack.c.bf16 %v6116_v29, %v6116_v29 }
 0xdf6   :  { %8553 = vmatmul.msk.bf16.vlgmr.msrb.gmra.mxu3 %vm5893_vm13, %v6052_v27  ;;  %8580 = vmatmul.msk.bf16.vlgmr.msrb.gmra.mxu2 %vm5893_vm13, %v6120_v54 }
 0xdfb   :  { %v6050_v51 = vpop.f32.mrf.mxu1  ;;  %v6118_v37 = vpop.f32.mrf.mxu0 }
 0xe79   :  { %v6097_v30 = vpop.f32.mrf.mxu3  ;;  %v6166_v44 = vpop.f32.mrf.mxu2 }
 0xe7a   :  { %v6101_v23 = vadd.f32 %v9035_v1, %v6097_v30 }
 0xe7c   :  { %v6170_v56 = vadd.f32 %v6166_v44, %v6101_v23 }
 0xe7e   :  { %6196 = vperm.xlu1 %9033, %v6170_v56   ;;  %6172 = vrot.lane.b32.xlu0 %v6170_v56, %s9080_s19 }
 0xe81   :  { %v6099_v22 = vpop.f32.mrf.mxu3  ;;  %v6168_v49 = vpop.f32.mrf.mxu2 }
 0xef0   :  { %v6173_v18 = vpop.permute.xlu0 %6172  ;;  %v6197_v55 = vpop.permute.xlu1 %6196 }
 0xef1   :  { %v6176_v10 = vsel %vm6175_vm10, %v6173_v18, 0.0  ;;  %v6199_v31 = vadd.f32 %v6197_v55, %v6170_v56 }
 0xef2   :  { %6177 = vadd.xlane.f32.xlu0 %v6176_v10 }
 0xf65   :  { %v6178_v21 = vpop.xlane.xlu0 %6177 }
 0xf66   :  { %v6179_v20 = vrot.slane %v6178_v21, 4 }
 0xf68   :  { %v6180_v2 = vadd.f32 %v6179_v20, %v6178_v21 }
 0xf6a   :  { %v6181_v62 = vrot.slane %v6180_v2, 2 }
 0xf6c   :  { %v6182_v25 = vadd.f32 %v6181_v62, %v6180_v2 }
 0xf6e   :  { %v6183_v39 = vrot.slane %v6182_v25, 1 }
 0xf70   :  { %v6184_v7 = vadd.f32 %v6183_v39, %v6182_v25 }
 0xf72   :  { %9022 = vpush %v6184_v7 }
 0xf73   :  { %9024 = vpush %v6192_v60 }
 0xfa3   :  { %s9023_s20 = spop %9022 }
 0xfa4   :  { %s9025_s11 = spop %9024 }
 0xfa5   :  { %s6194_s9 = smul.f32 %s9025_s11, %s9023_s20 }
 0xfa7   :  { %v6200_v61 = vstv %s6194_s9 }
 0xfa8   :  { %v6201_v48 = vsub.f32 %v6199_v31, %v6200_v61 }
 0xfaa   :  { %6203 = vrot.lane.b32.xlu1 %v6201_v48, %s9080_s19 }
0x101c   :  { %v6204_v16 = vpop.permute.xlu1 %6203 }
0x101d   :  { %6206 = vst.msk [vmem:[#allocation5] sm:$0x3] %vm6175_vm10, %v6204_v16 }
0x101e   :  { %6217 = dma.vmem_to_hbm [thread:$0]  %s6213_s13, 32, %s6215_s29, [#allocation6]  }
0x101f   :  { %9074 = dma.done.wait [#allocation6], 32  }
0x1020   :  { %9075 = vsyncadd [#allocation6], 4294967264 }
0x1021   :  { %6222 = vsyncpa [#allocation6], 1 }

</bundles_post_ra>
